<compile_context>
chip_gen: v7x
topology: tpu7x:2x2x1
jax: 0.10.0
libtpu: 0.0.40
codegen_flags: <defaults>
</compile_context>

<pallas_src>
import functools

import jax
import jax.numpy as jnp
from jax import lax
from jax.experimental import pallas as pl
from jax.experimental.pallas import tpu as pltpu

_HI = jax.lax.Precision.HIGHEST


# ----------------------------------------------------------------------------
# Padding helpers (parameter-prep time only).
# ----------------------------------------------------------------------------
def _round_up(n, m):
    return ((n + m - 1) // m) * m


def _pad2(a, rows, cols):
    return jnp.zeros((rows, cols), a.dtype).at[: a.shape[0], : a.shape[1]].set(a)


def _pad_row(v, cols):
    return jnp.zeros((1, cols), v.dtype).at[0, : v.shape[0]].set(v)


# ----------------------------------------------------------------------------
# Fused GRU-rollout kernel (single invocation, everything resident in VMEM,
# recurrent state and per-step projections carried in vregs).
# ----------------------------------------------------------------------------
def _gru_rollout_kernel(x_ref, h0_ref, wx_ref, bx_ref, wh_ur_ref, wh_c_ref,
                        why_ref, by_ref, y_ref, hT_ref, *, T, H, Hp):
    # x_ref:     (T, Xp)     zero-padded time-major inputs
    # h0_ref:    (1, Hp)     zero-padded initial hidden state
    # wx_ref:    (Xp, 3*Hp)  [Wu_x | Wr_x | Wc_x], each slab 128-lane aligned
    # bx_ref:    (1, 3*Hp)   [bu   | br   | bc  ]
    # wh_ur_ref: (Hp, 2*Hp)  [Wu_h | Wr_h]
    # wh_c_ref:  (Hp, Hp)    Wc_h
    # why_ref:   (Hp, O)     decoder weight (output dim NOT padded)
    # by_ref:    (1, O)      decoder bias
    # y_ref:     (T, O)      per-step outputs
    # hT_ref:    (1, H)      final hidden state
    dot = functools.partial(jnp.dot, preferred_element_type=jnp.float32,
                            precision=_HI)

    # Pre-pass: input projections for ALL timesteps in one MXU matmul, kept
    # in registers ((T, 3*Hp) f32 = 3 vregs at T=8, Hp=128).  No scratch.
    gi = dot(x_ref[...], wx_ref[...]) + bx_ref[...]
    gi_u = gi[:, 0:Hp]            # 128-lane-aligned slab slices
    gi_r = gi[:, Hp:2 * Hp]
    gi_c = gi[:, 2 * Hp:3 * Hp]

    row_ids = lax.broadcasted_iota(jnp.int32, (T, Hp), 0)

    h = h0_ref[...]               # (1, Hp); padded lanes are exactly zero
    hseq = jnp.zeros((T, Hp), jnp.float32)   # one vreg, lives in registers

    for t in range(T):            # fully unrolled static loop (T is small)
        gh = dot(h, wh_ur_ref[...])                        # (1, 2*Hp)
        Lu = jax.nn.sigmoid(gi_u[t:t + 1, :] + gh[:, 0:Hp])
        Lr = jax.nn.sigmoid(gi_r[t:t + 1, :] + gh[:, Hp:2 * Hp])
        hc = dot(h * Lr, wh_c_ref[...])                    # (1, Hp)
        c_tilda = jnp.tanh(gi_c[t:t + 1, :] + hc)
        h = h + Lu * (c_tilda - h)                         # == Lu*c + (1-Lu)*h
        # Keep the hidden-state sequence in registers: select the new row in
        # (off the serial critical path) instead of a masked sublane VMEM
        # store + reload.
        hseq = jnp.where(row_ids == t, h, hseq)

    hT_ref[...] = h[:, :H]

    # Fused decoder: one (T, Hp) x (Hp, O) matmul fed straight from vregs.
    y_ref[...] = dot(hseq, why_ref[...]) + by_ref[...]


# ----------------------------------------------------------------------------
# Parameter preparation (once): split [x; h]-concatenated weights, pad the
# contracted dims / gate slabs to 128 lanes; decoder output dim left natural.
# ----------------------------------------------------------------------------
def prepare_params(params, input_size, hidden_size, output_size):
    X, H, O = input_size, hidden_size, output_size
    Xp, Hp = _round_up(X, 128), _round_up(H, 128)
    Wc, Wu, Wr = params["Wc"], params["Wu"], params["Wr"]
    return {
        "wx": jnp.concatenate([_pad2(Wu[:X], Xp, Hp),
                               _pad2(Wr[:X], Xp, Hp),
                               _pad2(Wc[:X], Xp, Hp)], axis=1),       # (Xp,3Hp)
        "bx": jnp.concatenate([_pad_row(params["bu"], Hp),
                               _pad_row(params["br"], Hp),
                               _pad_row(params["bc"], Hp)], axis=1),  # (1,3Hp)
        "wh_ur": jnp.concatenate([_pad2(Wu[X:], Hp, Hp),
                                  _pad2(Wr[X:], Hp, Hp)], axis=1),    # (Hp,2Hp)
        "wh_c": _pad2(Wc[X:], Hp, Hp),                                # (Hp,Hp)
        "why": _pad2(params["Wh_y"], Hp, O),                          # (Hp,O)
        "by": params["by"].reshape(1, O).astype(jnp.float32),         # (1,O)
    }


# ----------------------------------------------------------------------------
# Forward wrapper: x (1, T, X), h (H,) -> (Y (T, O), hT (H,))
# ----------------------------------------------------------------------------
@jax.jit
def low_level_gru_forward(prepped, x, h):
    T, X = x.shape[1], x.shape[2]
    H = h.shape[0]
    Xp = prepped["wx"].shape[0]
    Hp = prepped["wh_c"].shape[0]
    O = prepped["why"].shape[1]

    # Contracted dims stay explicitly zero-padded (tile-aligned, exact MXU
    # behaviour); these pads are a few KiB and the only wrapper-side ops left.
    xp = jnp.zeros((T, Xp), jnp.float32).at[:, :X].set(x[0].astype(jnp.float32))
    h0p = jnp.zeros((1, Hp), jnp.float32).at[0, :H].set(h.astype(jnp.float32))

    flops = 2 * T * (Xp * 3 * Hp + Hp * 2 * Hp + Hp * Hp + Hp * O)
    transcendentals = 3 * T * Hp
    nbytes = 4 * (xp.size + h0p.size
                  + sum(int(v.size) for v in prepped.values()) + T * O + H)

    kernel = functools.partial(_gru_rollout_kernel, T=T, H=H, Hp=Hp)
    # TODO(synk): for multi-rollout / repeated-call workloads, wrap this in a
    # grid over rollouts with constant-index weight BlockSpecs so the weights
    # stay VMEM-resident across calls (and a 'parallel' axis for v7x's 2 TCs).
    y, hT = pl.pallas_call(
        kernel,
        out_shape=(jax.ShapeDtypeStruct((T, O), jnp.float32),
                   jax.ShapeDtypeStruct((1, H), jnp.float32)),
        in_specs=[pl.BlockSpec(memory_space=pltpu.MemorySpace.VMEM)] * 8,
        out_specs=(pl.BlockSpec(memory_space=pltpu.MemorySpace.VMEM),
                   pl.BlockSpec(memory_space=pltpu.MemorySpace.VMEM)),
        cost_estimate=pl.CostEstimate(flops=flops,
                                      transcendentals=transcendentals,
                                      bytes_accessed=nbytes),
    )(xp, h0p, prepped["wx"], prepped["bx"], prepped["wh_ur"],
      prepped["wh_c"], prepped["why"], prepped["by"])

    return y, hT[0]


# ----------------------------------------------------------------------------
# Pure-JAX reference mirroring the PyTorch module exactly (f32, HIGHEST).
# ----------------------------------------------------------------------------
def reference_forward(params, x, h):
    dot = functools.partial(jnp.dot, precision=_HI)
    Wc, Wu, Wr = params["Wc"], params["Wu"], params["Wr"]
    bc, bu, br = params["bc"], params["bu"], params["br"]
    Wh_y, by = params["Wh_y"], params["by"]
    T = x.shape[1]
    outs = []
    for t in range(T):
        xt = x[0, t]
        xc = jnp.concatenate([xt, h], axis=0)
        Lu = jax.nn.sigmoid(dot(xc, Wu) + bu)
        Lr = jax.nn.sigmoid(dot(xc, Wr) + br)
        c_prev = h
        xr = jnp.concatenate([xt, c_prev * Lr], axis=0)
        c_tilda = jnp.tanh(dot(xr, Wc) + bc)
        h = c_tilda * Lu + c_prev * (1.0 - Lu)
        outs.append(dot(h, Wh_y) + by)
    return jnp.stack(outs, axis=0), h


# ----------------------------------------------------------------------------
# Deterministic init matching the module: M(n,m,r)=randn*r, V(n)=zeros.
# ----------------------------------------------------------------------------
def init_params(key, input_size, hidden_size, output_size, r=0.01):
    k1, k2, k3, k4 = jax.random.split(key, 4)
    return {
        "Wc": jax.random.normal(k1, (input_size + hidden_size, hidden_size),
                                jnp.float32) * r,
        "Wu": jax.random.normal(k2, (input_size + hidden_size, hidden_size),
                                jnp.float32) * r,
        "Wr": jax.random.normal(k3, (input_size + hidden_size, hidden_size),
                                jnp.float32) * r,
        "bc": jnp.zeros((hidden_size,), jnp.float32),
        "bu": jnp.zeros((hidden_size,), jnp.float32),
        "br": jnp.zeros((hidden_size,), jnp.float32),
        "Wh_y": jax.random.normal(k4, (hidden_size, output_size),
                                  jnp.float32) * r,
        "by": jnp.zeros((output_size,), jnp.float32),
    }


if __name__ == "__main__":
    input_size = 16
    hidden_size = 32
    output_size = 8
    rollout = 8

    key = jax.random.PRNGKey(0)
    k_params, k_x, k_h = jax.random.split(key, 3)
    params = init_params(k_params, input_size, hidden_size, output_size)
    prepped = prepare_params(params, input_size, hidden_size, output_size)

    x = jax.random.normal(k_x, (1, rollout, input_size), jnp.float32)
    h = jax.random.normal(k_h, (hidden_size,), jnp.float32) * 0.1

    out, hT = low_level_gru_forward(prepped, x, h)
    out = jax.block_until_ready(out)
    hT = jax.block_until_ready(hT)

    ref_out, ref_hT = reference_forward(params, x, h)
    assert out.shape == (rollout, output_size)
    assert hT.shape == (hidden_size,)
    assert jnp.allclose(out, ref_out, atol=1e-5, rtol=1e-4), \
        float(jnp.max(jnp.abs(out - ref_out)))
    assert jnp.allclose(hT, ref_hT, atol=1e-5, rtol=1e-4), \
        float(jnp.max(jnp.abs(hT - ref_hT)))

    print("KERNEL_OK")
</pallas_src>

<mosaic_0001>
module attributes {stable_mosaic.version = 11 : i64} {
  func.func @_gru_rollout_kernel(%arg0: memref<8x128xf32, #tpu.memory_space<vmem>>, %arg1: memref<1x128xf32, #tpu.memory_space<vmem>>, %arg2: memref<128x384xf32, #tpu.memory_space<vmem>>, %arg3: memref<1x384xf32, #tpu.memory_space<vmem>>, %arg4: memref<128x256xf32, #tpu.memory_space<vmem>>, %arg5: memref<128x128xf32, #tpu.memory_space<vmem>>, %arg6: memref<128x8xf32, #tpu.memory_space<vmem>>, %arg7: memref<1x8xf32, #tpu.memory_space<vmem>>, %arg8: memref<8x8xf32, #tpu.memory_space<vmem>>, %arg9: memref<1x32xf32, #tpu.memory_space<vmem>>) attributes {dimension_semantics = [], scalar_prefetch = 0 : i64, scratch_operands = 0 : i64, tpu.core_type = #tpu.core_type<tc>} {
    %c0 = arith.constant 0 : index
    %c0_0 = arith.constant 0 : index
    %0 = vector.load %arg0[%c0, %c0_0] : memref<8x128xf32, #tpu.memory_space<vmem>>, vector<8x128xf32>
    %c0_1 = arith.constant 0 : index
    %c0_2 = arith.constant 0 : index
    %1 = vector.load %arg2[%c0_1, %c0_2] : memref<128x384xf32, #tpu.memory_space<vmem>>, vector<128x384xf32>
    %cst = arith.constant dense<0.000000e+00> : vector<8x384xf32>
    %2 = tpu.matmul %0, %1, %cst {dimension_numbers = #tpu.dot_dimension_numbers<[1], [0], [0], [1], [0, 0, 1, 1], [], []>, precision = #tpu.contract_precision<fp32>} : vector<8x128xf32>, vector<128x384xf32>, vector<8x384xf32> -> vector<8x384xf32>
    %c0_3 = arith.constant 0 : index
    %c0_4 = arith.constant 0 : index
    %3 = vector.load %arg3[%c0_3, %c0_4] : memref<1x384xf32, #tpu.memory_space<vmem>>, vector<1x384xf32>
    %4 = vector.broadcast %3 : vector<1x384xf32> to vector<8x384xf32>
    %5 = arith.addf %2, %4 : vector<8x384xf32>
    %6 = vector.extract_strided_slice %5 {offsets = [0, 0], sizes = [8, 128], strides = [1, 1]} : vector<8x384xf32> to vector<8x128xf32>
    %7 = vector.extract_strided_slice %5 {offsets = [0, 128], sizes = [8, 128], strides = [1, 1]} : vector<8x384xf32> to vector<8x128xf32>
    %8 = vector.extract_strided_slice %5 {offsets = [0, 256], sizes = [8, 128], strides = [1, 1]} : vector<8x384xf32> to vector<8x128xf32>
    %9 = tpu.iota {dimensions = array<i32: 0>} : vector<8x128xi32>
    %c0_5 = arith.constant 0 : index
    %c0_6 = arith.constant 0 : index
    %10 = vector.load %arg1[%c0_5, %c0_6] : memref<1x128xf32, #tpu.memory_space<vmem>>, vector<1x128xf32>
    %cst_7 = arith.constant 0.000000e+00 : f32
    %11 = vector.broadcast %cst_7 : f32 to vector<8x128xf32>
    %c0_8 = arith.constant 0 : index
    %c0_9 = arith.constant 0 : index
    %12 = vector.load %arg4[%c0_8, %c0_9] : memref<128x256xf32, #tpu.memory_space<vmem>>, vector<128x256xf32>
    %cst_10 = arith.constant dense<0.000000e+00> : vector<1x256xf32>
    %13 = tpu.matmul %10, %12, %cst_10 {dimension_numbers = #tpu.dot_dimension_numbers<[1], [0], [0], [1], [0, 0, 1, 1], [], []>, precision = #tpu.contract_precision<fp32>} : vector<1x128xf32>, vector<128x256xf32>, vector<1x256xf32> -> vector<1x256xf32>
    %14 = vector.extract_strided_slice %6 {offsets = [0, 0], sizes = [1, 128], strides = [1, 1]} : vector<8x128xf32> to vector<1x128xf32>
    %15 = vector.extract_strided_slice %13 {offsets = [0, 0], sizes = [1, 128], strides = [1, 1]} : vector<1x256xf32> to vector<1x128xf32>
    %16 = arith.addf %14, %15 : vector<1x128xf32>
    %17 = arith.negf %16 : vector<1x128xf32>
    %18 = math.exp %17 : vector<1x128xf32>
    %cst_11 = arith.constant 1.000000e+00 : f32
    %19 = vector.broadcast %cst_11 : f32 to vector<1x128xf32>
    %20 = arith.addf %19, %18 : vector<1x128xf32>
    %21 = arith.divf %19, %20 : vector<1x128xf32>
    %22 = vector.extract_strided_slice %7 {offsets = [0, 0], sizes = [1, 128], strides = [1, 1]} : vector<8x128xf32> to vector<1x128xf32>
    %23 = vector.extract_strided_slice %13 {offsets = [0, 128], sizes = [1, 128], strides = [1, 1]} : vector<1x256xf32> to vector<1x128xf32>
    %24 = arith.addf %22, %23 : vector<1x128xf32>
    %25 = arith.negf %24 : vector<1x128xf32>
    %26 = math.exp %25 : vector<1x128xf32>
    %cst_12 = arith.constant 1.000000e+00 : f32
    %27 = vector.broadcast %cst_12 : f32 to vector<1x128xf32>
    %28 = arith.addf %27, %26 : vector<1x128xf32>
    %29 = arith.divf %27, %28 : vector<1x128xf32>
    %30 = arith.mulf %10, %29 : vector<1x128xf32>
    %c0_13 = arith.constant 0 : index
    %c0_14 = arith.constant 0 : index
    %31 = vector.load %arg5[%c0_13, %c0_14] : memref<128x128xf32, #tpu.memory_space<vmem>>, vector<128x128xf32>
    %cst_15 = arith.constant dense<0.000000e+00> : vector<1x128xf32>
    %32 = tpu.matmul %30, %31, %cst_15 {dimension_numbers = #tpu.dot_dimension_numbers<[1], [0], [0], [1], [0, 0, 1, 1], [], []>, precision = #tpu.contract_precision<fp32>} : vector<1x128xf32>, vector<128x128xf32>, vector<1x128xf32> -> vector<1x128xf32>
    %33 = vector.extract_strided_slice %8 {offsets = [0, 0], sizes = [1, 128], strides = [1, 1]} : vector<8x128xf32> to vector<1x128xf32>
    %34 = arith.addf %33, %32 : vector<1x128xf32>
    %35 = math.tanh %34 : vector<1x128xf32>
    %36 = arith.subf %35, %10 : vector<1x128xf32>
    %37 = arith.mulf %21, %36 : vector<1x128xf32>
    %38 = arith.addf %10, %37 : vector<1x128xf32>
    %c0_i32 = arith.constant 0 : i32
    %39 = vector.broadcast %c0_i32 : i32 to vector<8x128xi32>
    %40 = arith.cmpi eq, %9, %39 : vector<8x128xi32>
    %41 = vector.shape_cast %38 : vector<1x128xf32> to vector<1x128xf32>
    %42 = vector.broadcast %41 : vector<1x128xf32> to vector<8x128xf32>
    %43 = arith.select %40, %42, %11 : vector<8x128xi1>, vector<8x128xf32>
    %c0_16 = arith.constant 0 : index
    %c0_17 = arith.constant 0 : index
    %44 = vector.load %arg4[%c0_16, %c0_17] : memref<128x256xf32, #tpu.memory_space<vmem>>, vector<128x256xf32>
    %cst_18 = arith.constant dense<0.000000e+00> : vector<1x256xf32>
    %45 = tpu.matmul %38, %44, %cst_18 {dimension_numbers = #tpu.dot_dimension_numbers<[1], [0], [0], [1], [0, 0, 1, 1], [], []>, precision = #tpu.contract_precision<fp32>} : vector<1x128xf32>, vector<128x256xf32>, vector<1x256xf32> -> vector<1x256xf32>
    %46 = vector.extract_strided_slice %6 {offsets = [1, 0], sizes = [1, 128], strides = [1, 1]} : vector<8x128xf32> to vector<1x128xf32>
    %47 = vector.extract_strided_slice %45 {offsets = [0, 0], sizes = [1, 128], strides = [1, 1]} : vector<1x256xf32> to vector<1x128xf32>
    %48 = arith.addf %46, %47 : vector<1x128xf32>
    %49 = arith.negf %48 : vector<1x128xf32>
    %50 = math.exp %49 : vector<1x128xf32>
    %cst_19 = arith.constant 1.000000e+00 : f32
    %51 = vector.broadcast %cst_19 : f32 to vector<1x128xf32>
    %52 = arith.addf %51, %50 : vector<1x128xf32>
    %53 = arith.divf %51, %52 : vector<1x128xf32>
    %54 = vector.extract_strided_slice %7 {offsets = [1, 0], sizes = [1, 128], strides = [1, 1]} : vector<8x128xf32> to vector<1x128xf32>
    %55 = vector.extract_strided_slice %45 {offsets = [0, 128], sizes = [1, 128], strides = [1, 1]} : vector<1x256xf32> to vector<1x128xf32>
    %56 = arith.addf %54, %55 : vector<1x128xf32>
    %57 = arith.negf %56 : vector<1x128xf32>
    %58 = math.exp %57 : vector<1x128xf32>
    %cst_20 = arith.constant 1.000000e+00 : f32
    %59 = vector.broadcast %cst_20 : f32 to vector<1x128xf32>
    %60 = arith.addf %59, %58 : vector<1x128xf32>
    %61 = arith.divf %59, %60 : vector<1x128xf32>
    %62 = arith.mulf %38, %61 : vector<1x128xf32>
    %c0_21 = arith.constant 0 : index
    %c0_22 = arith.constant 0 : index
    %63 = vector.load %arg5[%c0_21, %c0_22] : memref<128x128xf32, #tpu.memory_space<vmem>>, vector<128x128xf32>
    %cst_23 = arith.constant dense<0.000000e+00> : vector<1x128xf32>
    %64 = tpu.matmul %62, %63, %cst_23 {dimension_numbers = #tpu.dot_dimension_numbers<[1], [0], [0], [1], [0, 0, 1, 1], [], []>, precision = #tpu.contract_precision<fp32>} : vector<1x128xf32>, vector<128x128xf32>, vector<1x128xf32> -> vector<1x128xf32>
    %65 = vector.extract_strided_slice %8 {offsets = [1, 0], sizes = [1, 128], strides = [1, 1]} : vector<8x128xf32> to vector<1x128xf32>
    %66 = arith.addf %65, %64 : vector<1x128xf32>
    %67 = math.tanh %66 : vector<1x128xf32>
    %68 = arith.subf %67, %38 : vector<1x128xf32>
    %69 = arith.mulf %53, %68 : vector<1x128xf32>
    %70 = arith.addf %38, %69 : vector<1x128xf32>
    %c1_i32 = arith.constant 1 : i32
    %71 = vector.broadcast %c1_i32 : i32 to vector<8x128xi32>
    %72 = arith.cmpi eq, %9, %71 : vector<8x128xi32>
    %73 = vector.shape_cast %70 : vector<1x128xf32> to vector<1x128xf32>
    %74 = vector.broadcast %73 : vector<1x128xf32> to vector<8x128xf32>
    %75 = arith.select %72, %74, %43 : vector<8x128xi1>, vector<8x128xf32>
    %c0_24 = arith.constant 0 : index
    %c0_25 = arith.constant 0 : index
    %76 = vector.load %arg4[%c0_24, %c0_25] : memref<128x256xf32, #tpu.memory_space<vmem>>, vector<128x256xf32>
    %cst_26 = arith.constant dense<0.000000e+00> : vector<1x256xf32>
    %77 = tpu.matmul %70, %76, %cst_26 {dimension_numbers = #tpu.dot_dimension_numbers<[1], [0], [0], [1], [0, 0, 1, 1], [], []>, precision = #tpu.contract_precision<fp32>} : vector<1x128xf32>, vector<128x256xf32>, vector<1x256xf32> -> vector<1x256xf32>
    %78 = vector.extract_strided_slice %6 {offsets = [2, 0], sizes = [1, 128], strides = [1, 1]} : vector<8x128xf32> to vector<1x128xf32>
    %79 = vector.extract_strided_slice %77 {offsets = [0, 0], sizes = [1, 128], strides = [1, 1]} : vector<1x256xf32> to vector<1x128xf32>
    %80 = arith.addf %78, %79 : vector<1x128xf32>
    %81 = arith.negf %80 : vector<1x128xf32>
    %82 = math.exp %81 : vector<1x128xf32>
    %cst_27 = arith.constant 1.000000e+00 : f32
    %83 = vector.broadcast %cst_27 : f32 to vector<1x128xf32>
    %84 = arith.addf %83, %82 : vector<1x128xf32>
    %85 = arith.divf %83, %84 : vector<1x128xf32>
    %86 = vector.extract_strided_slice %7 {offsets = [2, 0], sizes = [1, 128], strides = [1, 1]} : vector<8x128xf32> to vector<1x128xf32>
    %87 = vector.extract_strided_slice %77 {offsets = [0, 128], sizes = [1, 128], strides = [1, 1]} : vector<1x256xf32> to vector<1x128xf32>
    %88 = arith.addf %86, %87 : vector<1x128xf32>
    %89 = arith.negf %88 : vector<1x128xf32>
    %90 = math.exp %89 : vector<1x128xf32>
    %cst_28 = arith.constant 1.000000e+00 : f32
    %91 = vector.broadcast %cst_28 : f32 to vector<1x128xf32>
    %92 = arith.addf %91, %90 : vector<1x128xf32>
    %93 = arith.divf %91, %92 : vector<1x128xf32>
    %94 = arith.mulf %70, %93 : vector<1x128xf32>
    %c0_29 = arith.constant 0 : index
    %c0_30 = arith.constant 0 : index
    %95 = vector.load %arg5[%c0_29, %c0_30] : memref<128x128xf32, #tpu.memory_space<vmem>>, vector<128x128xf32>
    %cst_31 = arith.constant dense<0.000000e+00> : vector<1x128xf32>
    %96 = tpu.matmul %94, %95, %cst_31 {dimension_numbers = #tpu.dot_dimension_numbers<[1], [0], [0], [1], [0, 0, 1, 1], [], []>, precision = #tpu.contract_precision<fp32>} : vector<1x128xf32>, vector<128x128xf32>, vector<1x128xf32> -> vector<1x128xf32>
    %97 = vector.extract_strided_slice %8 {offsets = [2, 0], sizes = [1, 128], strides = [1, 1]} : vector<8x128xf32> to vector<1x128xf32>
    %98 = arith.addf %97, %96 : vector<1x128xf32>
    %99 = math.tanh %98 : vector<1x128xf32>
    %100 = arith.subf %99, %70 : vector<1x128xf32>
    %101 = arith.mulf %85, %100 : vector<1x128xf32>
    %102 = arith.addf %70, %101 : vector<1x128xf32>
    %c2_i32 = arith.constant 2 : i32
    %103 = vector.broadcast %c2_i32 : i32 to vector<8x128xi32>
    %104 = arith.cmpi eq, %9, %103 : vector<8x128xi32>
    %105 = vector.shape_cast %102 : vector<1x128xf32> to vector<1x128xf32>
    %106 = vector.broadcast %105 : vector<1x128xf32> to vector<8x128xf32>
    %107 = arith.select %104, %106, %75 : vector<8x128xi1>, vector<8x128xf32>
    %c0_32 = arith.constant 0 : index
    %c0_33 = arith.constant 0 : index
    %108 = vector.load %arg4[%c0_32, %c0_33] : memref<128x256xf32, #tpu.memory_space<vmem>>, vector<128x256xf32>
    %cst_34 = arith.constant dense<0.000000e+00> : vector<1x256xf32>
    %109 = tpu.matmul %102, %108, %cst_34 {dimension_numbers = #tpu.dot_dimension_numbers<[1], [0], [0], [1], [0, 0, 1, 1], [], []>, precision = #tpu.contract_precision<fp32>} : vector<1x128xf32>, vector<128x256xf32>, vector<1x256xf32> -> vector<1x256xf32>
    %110 = vector.extract_strided_slice %6 {offsets = [3, 0], sizes = [1, 128], strides = [1, 1]} : vector<8x128xf32> to vector<1x128xf32>
    %111 = vector.extract_strided_slice %109 {offsets = [0, 0], sizes = [1, 128], strides = [1, 1]} : vector<1x256xf32> to vector<1x128xf32>
    %112 = arith.addf %110, %111 : vector<1x128xf32>
    %113 = arith.negf %112 : vector<1x128xf32>
    %114 = math.exp %113 : vector<1x128xf32>
    %cst_35 = arith.constant 1.000000e+00 : f32
    %115 = vector.broadcast %cst_35 : f32 to vector<1x128xf32>
    %116 = arith.addf %115, %114 : vector<1x128xf32>
    %117 = arith.divf %115, %116 : vector<1x128xf32>
    %118 = vector.extract_strided_slice %7 {offsets = [3, 0], sizes = [1, 128], strides = [1, 1]} : vector<8x128xf32> to vector<1x128xf32>
    %119 = vector.extract_strided_slice %109 {offsets = [0, 128], sizes = [1, 128], strides = [1, 1]} : vector<1x256xf32> to vector<1x128xf32>
    %120 = arith.addf %118, %119 : vector<1x128xf32>
    %121 = arith.negf %120 : vector<1x128xf32>
    %122 = math.exp %121 : vector<1x128xf32>
    %cst_36 = arith.constant 1.000000e+00 : f32
    %123 = vector.broadcast %cst_36 : f32 to vector<1x128xf32>
    %124 = arith.addf %123, %122 : vector<1x128xf32>
    %125 = arith.divf %123, %124 : vector<1x128xf32>
    %126 = arith.mulf %102, %125 : vector<1x128xf32>
    %c0_37 = arith.constant 0 : index
    %c0_38 = arith.constant 0 : index
    %127 = vector.load %arg5[%c0_37, %c0_38] : memref<128x128xf32, #tpu.memory_space<vmem>>, vector<128x128xf32>
    %cst_39 = arith.constant dense<0.000000e+00> : vector<1x128xf32>
    %128 = tpu.matmul %126, %127, %cst_39 {dimension_numbers = #tpu.dot_dimension_numbers<[1], [0], [0], [1], [0, 0, 1, 1], [], []>, precision = #tpu.contract_precision<fp32>} : vector<1x128xf32>, vector<128x128xf32>, vector<1x128xf32> -> vector<1x128xf32>
    %129 = vector.extract_strided_slice %8 {offsets = [3, 0], sizes = [1, 128], strides = [1, 1]} : vector<8x128xf32> to vector<1x128xf32>
    %130 = arith.addf %129, %128 : vector<1x128xf32>
    %131 = math.tanh %130 : vector<1x128xf32>
    %132 = arith.subf %131, %102 : vector<1x128xf32>
    %133 = arith.mulf %117, %132 : vector<1x128xf32>
    %134 = arith.addf %102, %133 : vector<1x128xf32>
    %c3_i32 = arith.constant 3 : i32
    %135 = vector.broadcast %c3_i32 : i32 to vector<8x128xi32>
    %136 = arith.cmpi eq, %9, %135 : vector<8x128xi32>
    %137 = vector.shape_cast %134 : vector<1x128xf32> to vector<1x128xf32>
    %138 = vector.broadcast %137 : vector<1x128xf32> to vector<8x128xf32>
    %139 = arith.select %136, %138, %107 : vector<8x128xi1>, vector<8x128xf32>
    %c0_40 = arith.constant 0 : index
    %c0_41 = arith.constant 0 : index
    %140 = vector.load %arg4[%c0_40, %c0_41] : memref<128x256xf32, #tpu.memory_space<vmem>>, vector<128x256xf32>
    %cst_42 = arith.constant dense<0.000000e+00> : vector<1x256xf32>
    %141 = tpu.matmul %134, %140, %cst_42 {dimension_numbers = #tpu.dot_dimension_numbers<[1], [0], [0], [1], [0, 0, 1, 1], [], []>, precision = #tpu.contract_precision<fp32>} : vector<1x128xf32>, vector<128x256xf32>, vector<1x256xf32> -> vector<1x256xf32>
    %142 = vector.extract_strided_slice %6 {offsets = [4, 0], sizes = [1, 128], strides = [1, 1]} : vector<8x128xf32> to vector<1x128xf32>
    %143 = vector.extract_strided_slice %141 {offsets = [0, 0], sizes = [1, 128], strides = [1, 1]} : vector<1x256xf32> to vector<1x128xf32>
    %144 = arith.addf %142, %143 : vector<1x128xf32>
    %145 = arith.negf %144 : vector<1x128xf32>
    %146 = math.exp %145 : vector<1x128xf32>
    %cst_43 = arith.constant 1.000000e+00 : f32
    %147 = vector.broadcast %cst_43 : f32 to vector<1x128xf32>
    %148 = arith.addf %147, %146 : vector<1x128xf32>
    %149 = arith.divf %147, %148 : vector<1x128xf32>
    %150 = vector.extract_strided_slice %7 {offsets = [4, 0], sizes = [1, 128], strides = [1, 1]} : vector<8x128xf32> to vector<1x128xf32>
    %151 = vector.extract_strided_slice %141 {offsets = [0, 128], sizes = [1, 128], strides = [1, 1]} : vector<1x256xf32> to vector<1x128xf32>
    %152 = arith.addf %150, %151 : vector<1x128xf32>
    %153 = arith.negf %152 : vector<1x128xf32>
    %154 = math.exp %153 : vector<1x128xf32>
    %cst_44 = arith.constant 1.000000e+00 : f32
    %155 = vector.broadcast %cst_44 : f32 to vector<1x128xf32>
    %156 = arith.addf %155, %154 : vector<1x128xf32>
    %157 = arith.divf %155, %156 : vector<1x128xf32>
    %158 = arith.mulf %134, %157 : vector<1x128xf32>
    %c0_45 = arith.constant 0 : index
    %c0_46 = arith.constant 0 : index
    %159 = vector.load %arg5[%c0_45, %c0_46] : memref<128x128xf32, #tpu.memory_space<vmem>>, vector<128x128xf32>
    %cst_47 = arith.constant dense<0.000000e+00> : vector<1x128xf32>
    %160 = tpu.matmul %158, %159, %cst_47 {dimension_numbers = #tpu.dot_dimension_numbers<[1], [0], [0], [1], [0, 0, 1, 1], [], []>, precision = #tpu.contract_precision<fp32>} : vector<1x128xf32>, vector<128x128xf32>, vector<1x128xf32> -> vector<1x128xf32>
    %161 = vector.extract_strided_slice %8 {offsets = [4, 0], sizes = [1, 128], strides = [1, 1]} : vector<8x128xf32> to vector<1x128xf32>
    %162 = arith.addf %161, %160 : vector<1x128xf32>
    %163 = math.tanh %162 : vector<1x128xf32>
    %164 = arith.subf %163, %134 : vector<1x128xf32>
    %165 = arith.mulf %149, %164 : vector<1x128xf32>
    %166 = arith.addf %134, %165 : vector<1x128xf32>
    %c4_i32 = arith.constant 4 : i32
    %167 = vector.broadcast %c4_i32 : i32 to vector<8x128xi32>
    %168 = arith.cmpi eq, %9, %167 : vector<8x128xi32>
    %169 = vector.shape_cast %166 : vector<1x128xf32> to vector<1x128xf32>
    %170 = vector.broadcast %169 : vector<1x128xf32> to vector<8x128xf32>
    %171 = arith.select %168, %170, %139 : vector<8x128xi1>, vector<8x128xf32>
    %c0_48 = arith.constant 0 : index
    %c0_49 = arith.constant 0 : index
    %172 = vector.load %arg4[%c0_48, %c0_49] : memref<128x256xf32, #tpu.memory_space<vmem>>, vector<128x256xf32>
    %cst_50 = arith.constant dense<0.000000e+00> : vector<1x256xf32>
    %173 = tpu.matmul %166, %172, %cst_50 {dimension_numbers = #tpu.dot_dimension_numbers<[1], [0], [0], [1], [0, 0, 1, 1], [], []>, precision = #tpu.contract_precision<fp32>} : vector<1x128xf32>, vector<128x256xf32>, vector<1x256xf32> -> vector<1x256xf32>
    %174 = vector.extract_strided_slice %6 {offsets = [5, 0], sizes = [1, 128], strides = [1, 1]} : vector<8x128xf32> to vector<1x128xf32>
    %175 = vector.extract_strided_slice %173 {offsets = [0, 0], sizes = [1, 128], strides = [1, 1]} : vector<1x256xf32> to vector<1x128xf32>
    %176 = arith.addf %174, %175 : vector<1x128xf32>
    %177 = arith.negf %176 : vector<1x128xf32>
    %178 = math.exp %177 : vector<1x128xf32>
    %cst_51 = arith.constant 1.000000e+00 : f32
    %179 = vector.broadcast %cst_51 : f32 to vector<1x128xf32>
    %180 = arith.addf %179, %178 : vector<1x128xf32>
    %181 = arith.divf %179, %180 : vector<1x128xf32>
    %182 = vector.extract_strided_slice %7 {offsets = [5, 0], sizes = [1, 128], strides = [1, 1]} : vector<8x128xf32> to vector<1x128xf32>
    %183 = vector.extract_strided_slice %173 {offsets = [0, 128], sizes = [1, 128], strides = [1, 1]} : vector<1x256xf32> to vector<1x128xf32>
    %184 = arith.addf %182, %183 : vector<1x128xf32>
    %185 = arith.negf %184 : vector<1x128xf32>
    %186 = math.exp %185 : vector<1x128xf32>
    %cst_52 = arith.constant 1.000000e+00 : f32
    %187 = vector.broadcast %cst_52 : f32 to vector<1x128xf32>
    %188 = arith.addf %187, %186 : vector<1x128xf32>
    %189 = arith.divf %187, %188 : vector<1x128xf32>
    %190 = arith.mulf %166, %189 : vector<1x128xf32>
    %c0_53 = arith.constant 0 : index
    %c0_54 = arith.constant 0 : index
    %191 = vector.load %arg5[%c0_53, %c0_54] : memref<128x128xf32, #tpu.memory_space<vmem>>, vector<128x128xf32>
    %cst_55 = arith.constant dense<0.000000e+00> : vector<1x128xf32>
    %192 = tpu.matmul %190, %191, %cst_55 {dimension_numbers = #tpu.dot_dimension_numbers<[1], [0], [0], [1], [0, 0, 1, 1], [], []>, precision = #tpu.contract_precision<fp32>} : vector<1x128xf32>, vector<128x128xf32>, vector<1x128xf32> -> vector<1x128xf32>
    %193 = vector.extract_strided_slice %8 {offsets = [5, 0], sizes = [1, 128], strides = [1, 1]} : vector<8x128xf32> to vector<1x128xf32>
    %194 = arith.addf %193, %192 : vector<1x128xf32>
    %195 = math.tanh %194 : vector<1x128xf32>
    %196 = arith.subf %195, %166 : vector<1x128xf32>
    %197 = arith.mulf %181, %196 : vector<1x128xf32>
    %198 = arith.addf %166, %197 : vector<1x128xf32>
    %c5_i32 = arith.constant 5 : i32
    %199 = vector.broadcast %c5_i32 : i32 to vector<8x128xi32>
    %200 = arith.cmpi eq, %9, %199 : vector<8x128xi32>
    %201 = vector.shape_cast %198 : vector<1x128xf32> to vector<1x128xf32>
    %202 = vector.broadcast %201 : vector<1x128xf32> to vector<8x128xf32>
    %203 = arith.select %200, %202, %171 : vector<8x128xi1>, vector<8x128xf32>
    %c0_56 = arith.constant 0 : index
    %c0_57 = arith.constant 0 : index
    %204 = vector.load %arg4[%c0_56, %c0_57] : memref<128x256xf32, #tpu.memory_space<vmem>>, vector<128x256xf32>
    %cst_58 = arith.constant dense<0.000000e+00> : vector<1x256xf32>
    %205 = tpu.matmul %198, %204, %cst_58 {dimension_numbers = #tpu.dot_dimension_numbers<[1], [0], [0], [1], [0, 0, 1, 1], [], []>, precision = #tpu.contract_precision<fp32>} : vector<1x128xf32>, vector<128x256xf32>, vector<1x256xf32> -> vector<1x256xf32>
    %206 = vector.extract_strided_slice %6 {offsets = [6, 0], sizes = [1, 128], strides = [1, 1]} : vector<8x128xf32> to vector<1x128xf32>
    %207 = vector.extract_strided_slice %205 {offsets = [0, 0], sizes = [1, 128], strides = [1, 1]} : vector<1x256xf32> to vector<1x128xf32>
    %208 = arith.addf %206, %207 : vector<1x128xf32>
    %209 = arith.negf %208 : vector<1x128xf32>
    %210 = math.exp %209 : vector<1x128xf32>
    %cst_59 = arith.constant 1.000000e+00 : f32
    %211 = vector.broadcast %cst_59 : f32 to vector<1x128xf32>
    %212 = arith.addf %211, %210 : vector<1x128xf32>
    %213 = arith.divf %211, %212 : vector<1x128xf32>
    %214 = vector.extract_strided_slice %7 {offsets = [6, 0], sizes = [1, 128], strides = [1, 1]} : vector<8x128xf32> to vector<1x128xf32>
    %215 = vector.extract_strided_slice %205 {offsets = [0, 128], sizes = [1, 128], strides = [1, 1]} : vector<1x256xf32> to vector<1x128xf32>
    %216 = arith.addf %214, %215 : vector<1x128xf32>
    %217 = arith.negf %216 : vector<1x128xf32>
    %218 = math.exp %217 : vector<1x128xf32>
    %cst_60 = arith.constant 1.000000e+00 : f32
    %219 = vector.broadcast %cst_60 : f32 to vector<1x128xf32>
    %220 = arith.addf %219, %218 : vector<1x128xf32>
    %221 = arith.divf %219, %220 : vector<1x128xf32>
    %222 = arith.mulf %198, %221 : vector<1x128xf32>
    %c0_61 = arith.constant 0 : index
    %c0_62 = arith.constant 0 : index
    %223 = vector.load %arg5[%c0_61, %c0_62] : memref<128x128xf32, #tpu.memory_space<vmem>>, vector<128x128xf32>
    %cst_63 = arith.constant dense<0.000000e+00> : vector<1x128xf32>
    %224 = tpu.matmul %222, %223, %cst_63 {dimension_numbers = #tpu.dot_dimension_numbers<[1], [0], [0], [1], [0, 0, 1, 1], [], []>, precision = #tpu.contract_precision<fp32>} : vector<1x128xf32>, vector<128x128xf32>, vector<1x128xf32> -> vector<1x128xf32>
    %225 = vector.extract_strided_slice %8 {offsets = [6, 0], sizes = [1, 128], strides = [1, 1]} : vector<8x128xf32> to vector<1x128xf32>
    %226 = arith.addf %225, %224 : vector<1x128xf32>
    %227 = math.tanh %226 : vector<1x128xf32>
    %228 = arith.subf %227, %198 : vector<1x128xf32>
    %229 = arith.mulf %213, %228 : vector<1x128xf32>
    %230 = arith.addf %198, %229 : vector<1x128xf32>
    %c6_i32 = arith.constant 6 : i32
    %231 = vector.broadcast %c6_i32 : i32 to vector<8x128xi32>
    %232 = arith.cmpi eq, %9, %231 : vector<8x128xi32>
    %233 = vector.shape_cast %230 : vector<1x128xf32> to vector<1x128xf32>
    %234 = vector.broadcast %233 : vector<1x128xf32> to vector<8x128xf32>
    %235 = arith.select %232, %234, %203 : vector<8x128xi1>, vector<8x128xf32>
    %c0_64 = arith.constant 0 : index
    %c0_65 = arith.constant 0 : index
    %236 = vector.load %arg4[%c0_64, %c0_65] : memref<128x256xf32, #tpu.memory_space<vmem>>, vector<128x256xf32>
    %cst_66 = arith.constant dense<0.000000e+00> : vector<1x256xf32>
    %237 = tpu.matmul %230, %236, %cst_66 {dimension_numbers = #tpu.dot_dimension_numbers<[1], [0], [0], [1], [0, 0, 1, 1], [], []>, precision = #tpu.contract_precision<fp32>} : vector<1x128xf32>, vector<128x256xf32>, vector<1x256xf32> -> vector<1x256xf32>
    %238 = vector.extract_strided_slice %6 {offsets = [7, 0], sizes = [1, 128], strides = [1, 1]} : vector<8x128xf32> to vector<1x128xf32>
    %239 = vector.extract_strided_slice %237 {offsets = [0, 0], sizes = [1, 128], strides = [1, 1]} : vector<1x256xf32> to vector<1x128xf32>
    %240 = arith.addf %238, %239 : vector<1x128xf32>
    %241 = arith.negf %240 : vector<1x128xf32>
    %242 = math.exp %241 : vector<1x128xf32>
    %cst_67 = arith.constant 1.000000e+00 : f32
    %243 = vector.broadcast %cst_67 : f32 to vector<1x128xf32>
    %244 = arith.addf %243, %242 : vector<1x128xf32>
    %245 = arith.divf %243, %244 : vector<1x128xf32>
    %246 = vector.extract_strided_slice %7 {offsets = [7, 0], sizes = [1, 128], strides = [1, 1]} : vector<8x128xf32> to vector<1x128xf32>
    %247 = vector.extract_strided_slice %237 {offsets = [0, 128], sizes = [1, 128], strides = [1, 1]} : vector<1x256xf32> to vector<1x128xf32>
    %248 = arith.addf %246, %247 : vector<1x128xf32>
    %249 = arith.negf %248 : vector<1x128xf32>
    %250 = math.exp %249 : vector<1x128xf32>
    %cst_68 = arith.constant 1.000000e+00 : f32
    %251 = vector.broadcast %cst_68 : f32 to vector<1x128xf32>
    %252 = arith.addf %251, %250 : vector<1x128xf32>
    %253 = arith.divf %251, %252 : vector<1x128xf32>
    %254 = arith.mulf %230, %253 : vector<1x128xf32>
    %c0_69 = arith.constant 0 : index
    %c0_70 = arith.constant 0 : index
    %255 = vector.load %arg5[%c0_69, %c0_70] : memref<128x128xf32, #tpu.memory_space<vmem>>, vector<128x128xf32>
    %cst_71 = arith.constant dense<0.000000e+00> : vector<1x128xf32>
    %256 = tpu.matmul %254, %255, %cst_71 {dimension_numbers = #tpu.dot_dimension_numbers<[1], [0], [0], [1], [0, 0, 1, 1], [], []>, precision = #tpu.contract_precision<fp32>} : vector<1x128xf32>, vector<128x128xf32>, vector<1x128xf32> -> vector<1x128xf32>
    %257 = vector.extract_strided_slice %8 {offsets = [7, 0], sizes = [1, 128], strides = [1, 1]} : vector<8x128xf32> to vector<1x128xf32>
    %258 = arith.addf %257, %256 : vector<1x128xf32>
    %259 = math.tanh %258 : vector<1x128xf32>
    %260 = arith.subf %259, %230 : vector<1x128xf32>
    %261 = arith.mulf %245, %260 : vector<1x128xf32>
    %262 = arith.addf %230, %261 : vector<1x128xf32>
    %c7_i32 = arith.constant 7 : i32
    %263 = vector.broadcast %c7_i32 : i32 to vector<8x128xi32>
    %264 = arith.cmpi eq, %9, %263 : vector<8x128xi32>
    %265 = vector.shape_cast %262 : vector<1x128xf32> to vector<1x128xf32>
    %266 = vector.broadcast %265 : vector<1x128xf32> to vector<8x128xf32>
    %267 = arith.select %264, %266, %235 : vector<8x128xi1>, vector<8x128xf32>
    %268 = vector.extract_strided_slice %262 {offsets = [0, 0], sizes = [1, 32], strides = [1, 1]} : vector<1x128xf32> to vector<1x32xf32>
    %c0_72 = arith.constant 0 : index
    %c0_73 = arith.constant 0 : index
    %269 = vector.load %arg9[%c0_72, %c0_73] : memref<1x32xf32, #tpu.memory_space<vmem>>, vector<1x32xf32>
    tpu.vector_store %arg9[%c0_72, %c0_73], %268 {strides = array<i32>} : memref<1x32xf32, #tpu.memory_space<vmem>>, vector<1x32xf32>,
    %c0_74 = arith.constant 0 : index
    %c0_75 = arith.constant 0 : index
    %270 = vector.load %arg6[%c0_74, %c0_75] : memref<128x8xf32, #tpu.memory_space<vmem>>, vector<128x8xf32>
    %cst_76 = arith.constant dense<0.000000e+00> : vector<8x8xf32>
    %271 = tpu.matmul %267, %270, %cst_76 {dimension_numbers = #tpu.dot_dimension_numbers<[1], [0], [0], [1], [0, 0, 1, 1], [], []>, precision = #tpu.contract_precision<fp32>} : vector<8x128xf32>, vector<128x8xf32>, vector<8x8xf32> -> vector<8x8xf32>
    %c0_77 = arith.constant 0 : index
    %c0_78 = arith.constant 0 : index
    %272 = vector.load %arg7[%c0_77, %c0_78] : memref<1x8xf32, #tpu.memory_space<vmem>>, vector<1x8xf32>
    %273 = vector.broadcast %272 : vector<1x8xf32> to vector<8x8xf32>
    %274 = arith.addf %271, %273 : vector<8x8xf32>
    %c0_79 = arith.constant 0 : index
    %c0_80 = arith.constant 0 : index
    %275 = vector.load %arg8[%c0_79, %c0_80] : memref<8x8xf32, #tpu.memory_space<vmem>>, vector<8x8xf32>
    tpu.vector_store %arg8[%c0_79, %c0_80], %274 {strides = array<i32>} : memref<8x8xf32, #tpu.memory_space<vmem>>, vector<8x8xf32>,
    return
  }
}

</mosaic_0001>

<bundles_post_ra>
// kernel: low_level_gru_forward.1
= control target key start
LH: loop header
LB: loop body
LE: loop exit
PB: predicated region body
PF: predicated region fallthrough
CT: control target
= control target key end

     0   :  { %15 = vsyncpa [#allocation3], 0  ;;  %s25688_s0 = inlined_call_operand.vmem [shape: f32[8,128], index: 0, kind: input, shape index: {}]   ;;  %s25689_s1 = inlined_call_operand.vmem [shape: f32[1,128], index: 1, kind: input, shape index: {}]   ;;  %s25690_s2 = inlined_call_operand.hbm [shape: f32[128,384], index: 2, kind: input, shape index: {}]   ;;  %s25691_s3 = inlined_call_operand.vmem [shape: f32[1,384], index: 3, kind: input, shape index: {}]   ;;  %s25692_s4 = inlined_call_operand.hbm [shape: f32[128,256], index: 4, kind: input, shape index: {}]   ;;  %s25693_s5 = inlined_call_operand.vmem [shape: f32[128,128], index: 5, kind: input, shape index: {}]   ;;  %s25694_s6 = inlined_call_operand.vmem [shape: f32[128,8], index: 6, kind: input, shape index: {}]   ;;  %s25695_s7 = inlined_call_operand.vmem [shape: f32[1,8], index: 7, kind: input, shape index: {}]   ;;  %s25696_s8 = inlined_call_operand.hbm [shape: f32[8,8], index: 8, kind: output, shape index: {0}]   ;;  %s25697_s9 = inlined_call_operand.hbm [shape: f32[1,32], index: 9, kind: output, shape index: {1}]  }
   0x1   :  { %16 = vsyncpa [#allocation6], 0 }
   0x2   :  { %17 = vsyncpa [#allocation4], 0 }
   0x3   :  { %18 = vsyncpa [#allocation9], 0  ;;  %s21553_s30 = smov [#allocation2]   ;;  %s21457_s13 = scalar_lea.hbm %s25690_s2, 6144 }
   0x4   :  { %s28_s10 = sshll.u32 %s21553_s30, 4  ;;  %p21458_p0 = scmp.ne.s32.totalorder %s25690_s2, %s21457_s13  ;;  %s29_s10 = int_to_ptr.vmem [resolvable:$true] %s28_s10 }
   0x5   :  { %p21461_p1 = scmp.lt.u32.totalorder %s21457_s13, %s25690_s2 }
   0x7   :  { %p21463_p2 = pnand %p21461_p1, %p21458_p0 }
   0x9   :  { %21466 = shalt.err (!%p21463_p2)
}
   0xa   :  { %s21467_s18 = scalar_lea.vmem %s29_s10, 6144  ;;  %p21472_p4 = scmp.lt.s32.totalorder %s29_s10, %s29_s10 }
   0xb   :  { %p21468_p3 = scmp.ne.s32.totalorder %s29_s10, %s21467_s18  ;;  %p21473_p5 = scmp.lt.s32.totalorder %s21467_s18, %s21467_s18 }
   0xd   :  { %p21474_p6 = por %p21473_p5, %p21472_p4 }
   0xf   :  { %p21475_p7 = pnand %p21474_p6, %p21468_p3 }
  0x11   :  { %21478 = shalt.err (!%p21475_p7)
}
  0x12   :  { %s21554_s19 = smov 384   ;;  %s21555_s20 = smov 24  }
  0x13   :  { %34 = dma.hbm_to_vmem [thread:$0]  %s25690_s2, 6144, %s29_s10, [#allocation3], %s21554_s19, %s21554_s19, %s21555_s20  }
  0x14   :  { %s21556_s23 = smov [#allocation5]   ;;  %s21479_s27 = scalar_lea.hbm %s25692_s4, 4096 }
  0x15   :  { %s42_s24 = sshll.u32 %s21556_s23, 4  ;;  %p21480_p8 = scmp.ne.s32.totalorder %s25692_s4, %s21479_s27  ;;  %s43_s24 = int_to_ptr.vmem [resolvable:$true] %s42_s24 }
  0x16   :  { %p21483_p9 = scmp.lt.u32.totalorder %s21479_s27, %s25692_s4 }
  0x18   :  { %p21485_p10 = pnand %p21483_p9, %p21480_p8 }
  0x1a   :  { %21488 = shalt.err (!%p21485_p10)
}
  0x1b   :  { %s21489_s12 = scalar_lea.vmem %s43_s24, 4096  ;;  %p21494_p12 = scmp.lt.s32.totalorder %s43_s24, %s43_s24 }
  0x1c   :  { %p21490_p11 = scmp.ne.s32.totalorder %s43_s24, %s21489_s12  ;;  %p21495_p13 = scmp.lt.s32.totalorder %s21489_s12, %s21489_s12 }
  0x1e   :  { %p21496_p0 = por %p21495_p13, %p21494_p12 }
  0x20   :  { %p21497_p1 = pnand %p21496_p0, %p21490_p11 }
  0x22   :  { %21500 = shalt.err (!%p21497_p1)
}
  0x23   :  { %s21557_s2 = smov 256   ;;  %s21558_s10 = smov 16  }
  0x24   :  { %48 = dma.hbm_to_vmem [thread:$0]  %s25692_s4, 4096, %s43_s24, [#allocation6], %s21557_s2, %s21557_s2, %s21558_s10  }
  0x25   :  { %21545 = dma.done.wait [#allocation3], 6144  }
  0x26   :  { %21546 = vsyncadd [#allocation3], 4294961152 }
  0x27   :  { %21547 = dma.done.wait [#allocation6], 4096  }
  0x28   :  { %21548 = vsyncadd [#allocation6], 4294963200  ;;  %v25698_v0 = vmov 0.0   ;;  %v63_v1 = vld [vmem:[#allocation2 + $0x8] sm:$0xff]  ;;  %v66_v2 = vld [vmem:[#allocation2 + $0x20] sm:$0xff]  ;;  %vm21561_vm0 = vmmov 0  }
  0x29   :  { %223 = vmatprep.mubr.f32.mxu1 %v25698_v0  ;;  %700 = vmatprep.mubr.f32.mxu0 %v25698_v0  ;;  %v62_v3 = vld [vmem:[#allocation2] sm:$0xff]  ;;  %v127_v4 = vand.u32 4294901760, %v63_v1  ;;  %v131_v5 = vand.u32 4294901760, %v66_v2  ;;  %v65_v6 = vld [vmem:[#allocation2 + $0x18] sm:$0xff]  ;;  %v72_v9 = vld [vmem:[#allocation2 + $0x50] sm:$0xff]  ;;  %vm14177_vm7 = vcmask 253952  }
  0x2a   :  { %v129_v7 = vand.u32 4294901760, %v62_v3  ;;  %v69_v8 = vld [vmem:[#allocation2 + $0x38] sm:$0xff]  ;;  %v133_v10 = vand.u32 4294901760, %v65_v6  ;;  %v139_v12 = vand.u32 4294901760, %v72_v9  ;;  %v68_v13 = vld [vmem:[#allocation2 + $0x30] sm:$0xff]  ;;  %v71_v14 = vld [vmem:[#allocation2 + $0x48] sm:$0xff] }
  0x2b   :  { %v135_v11 = vand.u32 4294901760, %v69_v8  ;;  %v75_v15 = vld [vmem:[#allocation2 + $0x68] sm:$0xff]  ;;  %v21641_v16 = vpack.c.bf16 %v131_v5, %v127_v4  ;;  %v78_v17 = vld [vmem:[#allocation2 + $0x80] sm:$0xff]  ;;  %v77_v19 = vld [vmem:[#allocation2 + $0x78] sm:$0xff]  ;;  %v21643_v20 = vsub.f32 %v63_v1, %v127_v4  ;;  %v21650_v25 = vsub.f32 %v66_v2, %v131_v5 }
  0x2c   :  { %v74_v18 = vld [vmem:[#allocation2 + $0x60] sm:$0xff]  ;;  %v21645_v21 = vpack.c.bf16 %v133_v10, %v129_v7  ;;  %v81_v23 = vld [vmem:[#allocation2 + $0x98] sm:$0xff]  ;;  %v84_v24 = vld [vmem:[#allocation2 + $0xb0] sm:$0xff]  ;;  %v137_v26 = vand.u32 4294901760, %v68_v13  ;;  %v141_v27 = vand.u32 4294901760, %v71_v14  ;;  %v143_v28 = vand.u32 4294901760, %v75_v15 }
  0x2d   :  { %v21647_v22 = vpack.c.bf16 %v139_v12, %v135_v11  ;;  %18013 = vmatprep.subr.bf16.mxu1 %v21641_v16  ;;  %18109 = vmatprep.subr.bf16.mxu0 %v21641_v16  ;;  %v21654_v29 = vsub.f32 %v62_v3, %v129_v7  ;;  %v147_v30 = vand.u32 4294901760, %v78_v17  ;;  %v145_v31 = vand.u32 4294901760, %v74_v18  ;;  %v80_v37 = vld [vmem:[#allocation2 + $0x90] sm:$0xff]  ;;  %v83_v38 = vld [vmem:[#allocation2 + $0xa8] sm:$0xff]  ;;  %v90_v44 = vld [vmem:[#allocation2 + $0xe0] sm:$0xff] }
  0x2e   :  { %26013 = vst [vmem:[#allocation14_spill] sm:$0xff] %v21645_v21  ;;  %18015 = vmatpush1.bf16.msra.mxu1 %v21645_v21  ;;  %18111 = vmatpush1.bf16.msra.mxu0 %v21645_v21  ;;  %v149_v32 = vand.u32 4294901760, %v77_v19  ;;  %v21657_v33 = vsub.f32 %v65_v6, %v133_v10  ;;  %v21661_v34 = vpack.c.bf16 %v141_v27, %v137_v26  ;;  %v151_v35 = vand.u32 4294901760, %v81_v23  ;;  %v87_v39 = vld [vmem:[#allocation2 + $0xc8] sm:$0xff]  ;;  %v86_v45 = vld [vmem:[#allocation2 + $0xc0] sm:$0xff]  ;;  %v89_v46 = vld [vmem:[#allocation2 + $0xd8] sm:$0xff] }
  0x2f   :  { %26014 = vst [vmem:[#allocation15_spill] sm:$0xff] %v21647_v22  ;;  %18017 = vmatprep.subr.bf16.mxu1 %v21647_v22  ;;  %18113 = vmatprep.subr.bf16.mxu0 %v21647_v22  ;;  %v155_v36 = vand.u32 4294901760, %v84_v24  ;;  %v21663_v40 = vsub.f32 %v69_v8, %v135_v11  ;;  %v21665_v41 = vsub.f32 %v72_v9, %v139_v12  ;;  %v93_v51 = vld [vmem:[#allocation2 + $0xf8] sm:$0xff]  ;;  %v153_v53 = vand.u32 4294901760, %v80_v37  ;;  %v96_v60 = vld [vmem:[#allocation2 + $0x110] sm:$0xff]  ;;  %v95_v3 = vld [vmem:[#allocation2 + $0x108] sm:$0xff] }
  0x30   :  { %26015 = vst [vmem:[#allocation16_spill] sm:$0xff] %v21661_v34  ;;  %v21667_v42 = vsub.f32 %v68_v13, %v137_v26  ;;  %v21669_v43 = vpack.c.bf16 %v147_v30, %v143_v28  ;;  %v21671_v47 = vsub.f32 %v71_v14, %v141_v27  ;;  %v21673_v48 = vsub.f32 %v75_v15, %v143_v28  ;;  %v92_v61 = vld [vmem:[#allocation2 + $0xf0] sm:$0xff]  ;;  %v99_v4 = vld [vmem:[#allocation2 + $0x128] sm:$0xff]  ;;  %v102_v5 = vld [vmem:[#allocation2 + $0x140] sm:$0xff] }
  0x31   :  { %v21675_v49 = vsub.f32 %v78_v17, %v147_v30  ;;  %v21677_v50 = vpack.c.bf16 %v149_v32, %v145_v31  ;;  %v21681_v52 = vsub.f32 %v74_v18, %v145_v31  ;;  %v157_v54 = vand.u32 4294901760, %v83_v38  ;;  %v98_v10 = vld [vmem:[#allocation2 + $0x120] sm:$0xff]  ;;  %v101_v15 = vld [vmem:[#allocation2 + $0x138] sm:$0xff]  ;;  %v108_v31 = vld [vmem:[#allocation2 + $0x170] sm:$0xff] }
  0x32   :  { %26016 = vst [vmem:[#allocation17_spill] sm:$0xff] %v21667_v42  ;;  %26017 = vst [vmem:[#allocation18_spill] sm:$0xff] %v21669_v43  ;;  %18019 = vmatpush1.bf16.msra.mxu1 %v21661_v34  ;;  %18115 = vmatpush1.bf16.msra.mxu0 %v21661_v34  ;;  %v159_v55 = vand.u32 4294901760, %v87_v39  ;;  %v21685_v56 = vpack.c.bf16 %v155_v36, %v151_v35  ;;  %v163_v57 = vand.u32 4294901760, %v90_v44  ;;  %v161_v58 = vand.u32 4294901760, %v86_v45  ;;  %v105_v30 = vld [vmem:[#allocation2 + $0x158] sm:$0xff] }
  0x33   :  { %26018 = vst [vmem:[#allocation19_spill] sm:$0xff] %v21671_v47  ;;  %26019 = vst [vmem:[#allocation20_spill] sm:$0xff] %v21677_v50  ;;  %18021 = vmatprep.subr.bf16.mxu1 %v21669_v43  ;;  %18117 = vmatprep.subr.bf16.mxu0 %v21669_v43  ;;  %v165_v59 = vand.u32 4294901760, %v89_v46  ;;  %v21687_v62 = vsub.f32 %v77_v19, %v149_v32  ;;  %v21689_v63 = vsub.f32 %v81_v23, %v151_v35  ;;  %v104_v32 = vld [vmem:[#allocation2 + $0x150] sm:$0xff] }
  0x34   :  { %26020 = vst [vmem:[#allocation21_spill] sm:$0xff] %v21681_v52  ;;  %26021 = vst [vmem:[#allocation22_spill] sm:$0xff] %v21685_v56  ;;  %v21691_v1 = vsub.f32 %v84_v24, %v155_v36  ;;  %v167_v2 = vand.u32 4294901760, %v93_v51  ;;  %v21693_v6 = vpack.c.bf16 %v157_v54, %v153_v53  ;;  %v21695_v7 = vsub.f32 %v80_v37, %v153_v53 }
  0x35   :  { %26022 = vst [vmem:[#allocation23_spill] sm:$0xff] %v21687_v62  ;;  %v21697_v8 = vsub.f32 %v83_v38, %v157_v54  ;;  %v21699_v9 = vsub.f32 %v87_v39, %v159_v55  ;;  %v21703_v11 = vpack.c.bf16 %v163_v57, %v159_v55  ;;  %v21705_v12 = vsub.f32 %v90_v44, %v163_v57  ;;  %v107_v39 = vld [vmem:[#allocation2 + $0x168] sm:$0xff]  ;;  %v61_v44 = vld [vmem:[%s25688_s0] sm:$0xff] }
  0x36   :  { %26023 = vst [vmem:[#allocation24_spill] sm:$0xff] %v21693_v6  ;;  %18023 = vmatpush1.bf16.msra.mxu1 %v21677_v50  ;;  %18119 = vmatpush1.bf16.msra.mxu0 %v21677_v50  ;;  %v171_v13 = vand.u32 4294901760, %v96_v60  ;;  %v169_v14 = vand.u32 4294901760, %v92_v61  ;;  %v21709_v17 = vpack.c.bf16 %v165_v59, %v161_v58  ;;  %v173_v18 = vand.u32 4294901760, %v95_v3 }
  0x37   :  { %26024 = vst [vmem:[#allocation25_spill] sm:$0xff] %v21703_v11  ;;  %18025 = vmatprep.subr.bf16.mxu1 %v21685_v56  ;;  %18121 = vmatprep.subr.bf16.mxu0 %v21685_v56  ;;  %v175_v19 = vand.u32 4294901760, %v99_v4  ;;  %v179_v23 = vand.u32 4294901760, %v102_v5  ;;  %v21711_v24 = vsub.f32 %v86_v45, %v161_v58  ;;  %v21713_v26 = vsub.f32 %v89_v46, %v165_v59 }
  0x38   :  { %26025 = vst [vmem:[#allocation26_spill] sm:$0xff] %v21709_v17  ;;  %v21715_v27 = vsub.f32 %v93_v51, %v167_v2  ;;  %v177_v28 = vand.u32 4294901760, %v98_v10  ;;  %v21717_v35 = vpack.c.bf16 %v171_v13, %v167_v2  ;;  %v21719_v36 = vsub.f32 %v96_v60, %v171_v13 }
  0x39   :  { %v21721_v37 = vsub.f32 %v92_v61, %v169_v14  ;;  %v181_v38 = vand.u32 4294901760, %v101_v15  ;;  %v21728_v45 = vpack.c.bf16 %v173_v18, %v169_v14  ;;  %v21730_v46 = vsub.f32 %v95_v3, %v173_v18 }
  0x3a   :  { %26026 = vst [vmem:[#allocation27_spill] sm:$0xff] %v21715_v27  ;;  %26027 = vst [vmem:[#allocation28_spill] sm:$0xff] %v21717_v35  ;;  %18027 = vmatpush1.bf16.msra.mxu1 %v21693_v6  ;;  %18123 = vmatpush1.bf16.msra.mxu0 %v21693_v6  ;;  %v21732_v51 = vpack.c.bf16 %v179_v23, %v175_v19  ;;  %v21736_v53 = vsub.f32 %v99_v4, %v175_v19  ;;  %v183_v54 = vand.u32 4294901760, %v105_v30 }
  0x3b   :  { %26028 = vst [vmem:[#allocation29_spill] sm:$0xff] %v21728_v45  ;;  %18029 = vmatprep.subr.bf16.mxu1 %v21703_v11  ;;  %18125 = vmatprep.subr.bf16.mxu0 %v21703_v11  ;;  %v187_v55 = vand.u32 4294901760, %v108_v31  ;;  %v185_v57 = vand.u32 4294901760, %v104_v32  ;;  %v189_v58 = vand.u32 4294901760, %v107_v39  ;;  %v237_v59 = vand.u32 4294901760, %v21643_v20 }
  0x3c   :  { %26029 = vst [vmem:[#allocation30_spill] sm:$0xff] %v21732_v51  ;;  %26030 = vst [vmem:[#allocation31_spill] sm:$0xff] %v21736_v53  ;;  %v249_v60 = vand.u32 4294901760, %v21650_v25  ;;  %v21740_v61 = vand.u32 4294901760, %v61_v44  ;;  %v21742_v2 = vsub.f32 %v102_v5, %v179_v23  ;;  %v21744_v3 = vpack.c.bf16 %v181_v38, %v177_v28 }
  0x3d   :  { %v21746_v13 = vsub.f32 %v98_v10, %v177_v28  ;;  %v21748_v14 = vsub.f32 %v101_v15, %v181_v38  ;;  %v21752_v4 = vsub.f32 %v105_v30, %v183_v54  ;;  %v238_v18 = vsub.f32 %v21643_v20, %v237_v59 }
  0x3e   :  { %26031 = vst [vmem:[#allocation32_spill] sm:$0xff] %v21740_v61  ;;  %26032 = vst [vmem:[#allocation33_spill] sm:$0xff] %v21744_v3  ;;  %18031 = vmatpush1.bf16.msra.mxu1 %v21709_v17  ;;  %18127 = vmatpush1.bf16.msra.mxu0 %v21709_v17  ;;  %v250_v19 = vsub.f32 %v21650_v25, %v249_v60  ;;  %v243_v0 = vand.u32 4294901760, %v21654_v29  ;;  %v21759_v5 = vpack.c.bf16 %v187_v55, %v183_v54 }
  0x3f   :  { %18033 = vmatprep.subr.bf16.mxu1 %v21717_v35  ;;  %18129 = vmatprep.subr.bf16.mxu0 %v21717_v35  ;;  %v21762_v10 = vsub.f32 %v61_v44, %v21740_v61  ;;  %v255_v15 = vand.u32 4294901760, %v21657_v33  ;;  %v261_v23 = vand.u32 4294901760, %v21663_v40  ;;  %v21766_v28 = vsub.f32 %v108_v31, %v187_v55 }
  0x40   :  { %26033 = vst [vmem:[#allocation34_spill] sm:$0xff] %v21759_v5  ;;  %v21768_v30 = vpack.c.bf16 %v189_v58, %v185_v57  ;;  %v244_v38 = vsub.f32 %v21654_v29, %v243_v0  ;;  %v273_v17 = vand.u32 4294901760, %v21665_v41  ;;  %v21772_v11 = vsub.f32 %v104_v32, %v185_v57 }
  0x41   :  { %26034 = vst [vmem:[#allocation35_spill] sm:$0xff] %v21762_v10  ;;  %v21775_v54 = vand.u32 4294901760, %v21762_v10  ;;  %v256_v44 = vsub.f32 %v21657_v33, %v255_v15  ;;  %v262_v35 = vsub.f32 %v21663_v40, %v261_v23  ;;  %v21781_v31 = vsub.f32 %v107_v39, %v189_v58 }
  0x42   :  { %26035 = vst [vmem:[#allocation36_spill] sm:$0xff] %v21768_v30  ;;  %18035 = vmatpush1.bf16.msra.mxu1 %v21728_v45  ;;  %18131 = vmatpush1.bf16.msra.mxu0 %v21728_v45  ;;  %v239_v55 = vand.u32 4294901760, %v238_v18  ;;  %v251_v6 = vand.u32 4294901760, %v250_v19  ;;  %v274_v56 = vsub.f32 %v21665_v41, %v273_v17  ;;  %v18140_v32 = vpack.c.bf16 %v249_v60, %v237_v59 }
  0x43   :  { %26036 = vst [vmem:[#allocation37_spill] sm:$0xff] %v21775_v54  ;;  %18037 = vmatprep.subr.bf16.mxu1 %v21732_v51  ;;  %18133 = vmatprep.subr.bf16.mxu0 %v21732_v51  ;;  %v227_v57 = vsub.f32 %v21762_v10, %v21775_v54  ;;  %v245_v50 = vand.u32 4294901760, %v244_v38  ;;  %v267_v43 = vand.u32 4294901760, %v21667_v42  ;;  %v257_v34 = vand.u32 4294901760, %v256_v44 }
  0x44   :  { %v279_v45 = vand.u32 4294901760, %v21671_v47  ;;  %v285_v39 = vand.u32 4294901760, %v21673_v48  ;;  %v297_v58 = vand.u32 4294901760, %v21675_v49  ;;  %v18142_v18 = vpack.c.bf16 %v255_v15, %v243_v0 }
  0x45   :  { %v263_v19 = vand.u32 4294901760, %v262_v35  ;;  %v275_v22 = vand.u32 4294901760, %v274_v56  ;;  %v291_v21 = vand.u32 4294901760, %v21681_v52  ;;  %v18044_v59 = vpack.c.bf16 %v251_v6, %v239_v55 }
  0x46   :  { %18039 = vmatpush1.bf16.msra.mxu1 %v21744_v3  ;;  %18135 = vmatpush1.bf16.msra.mxu0 %v21744_v3  ;;  %v268_v60 = vsub.f32 %v21667_v42, %v267_v43  ;;  %v280_v38 = vsub.f32 %v21671_v47, %v279_v45  ;;  %v303_v44 = vand.u32 4294901760, %v21687_v62  ;;  %v18144_v0 = vpack.c.bf16 %v273_v17, %v261_v23 }
  0x47   :  { %18041 = vmatprep.subr.bf16.mxu1 %v21759_v5  ;;  %18137 = vmatprep.subr.bf16.mxu0 %v21759_v5  ;;  %v286_v56 = vsub.f32 %v21673_v48, %v285_v39  ;;  %v298_v35 = vsub.f32 %v21675_v49, %v297_v58  ;;  %v21802_v15 = vand.u32 4294901760, %v227_v57  ;;  %v18046_v10 = vpack.c.bf16 %v257_v34, %v245_v50 }
  0x48   :  { %v292_v6 = vsub.f32 %v21681_v52, %v291_v21  ;;  %v304_v55 = vsub.f32 %v21687_v62, %v303_v44  ;;  %v18048_v3 = vpack.c.bf16 %v275_v22, %v263_v19  ;;  %v18146_v51 = vpack.c.bf16 %v279_v45, %v267_v43 }
  0x49   :  { %26037 = vst [vmem:[#allocation38_spill] sm:$0xff] %v21802_v15  ;;  %v309_v47 = vand.u32 4294901760, %v21689_v63  ;;  %v321_v42 = vand.u32 4294901760, %v21691_v1  ;;  %v269_v17 = vand.u32 4294901760, %v268_v60  ;;  %v281_v23 = vand.u32 4294901760, %v280_v38 }
  0x4a   :  { %18043 = vmatpush1.bf16.msra.mxu1 %v21768_v30  ;;  %18139 = vmatpush1.bf16.msra.mxu0 %v21768_v30  ;;  %v287_v5 = vand.u32 4294901760, %v286_v56  ;;  %v315_v57 = vand.u32 4294901760, %v21695_v7  ;;  %v299_v34 = vand.u32 4294901760, %v298_v35  ;;  %v327_v43 = vand.u32 4294901760, %v21697_v8 }
  0x4b   :  { %18045 = vmatprep.subr.bf16.mxu1 %v18044_v59  ;;  %18141 = vmatprep.subr.bf16.mxu0 %v18140_v32  ;;  %v310_v50 = vsub.f32 %v21689_v63, %v309_v47  ;;  %v322_v22 = vsub.f32 %v21691_v1, %v321_v42  ;;  %v18148_v45 = vpack.c.bf16 %v297_v58, %v285_v39  ;;  %v293_v19 = vand.u32 4294901760, %v292_v6 }
  0x4c   :  { %v305_v62 = vand.u32 4294901760, %v304_v55  ;;  %v333_v52 = vand.u32 4294901760, %v21699_v9  ;;  %v18150_v60 = vpack.c.bf16 %v303_v44, %v291_v21  ;;  %v316_v32 = vsub.f32 %v21695_v7, %v315_v57 }
  0x4d   :  { %229 = vmatmul.mubr.f32.vlgmr.msra.gmra.mrb[0].mxu1 %v21802_v15  ;;  %704 = vmatmul.mubr.f32.vlgmr.msra.gmra.mrb[0].mxu0 %v21775_v54  ;;  %v311_v38 = vand.u32 4294901760, %v310_v50  ;;  %v323_v59 = vand.u32 4294901760, %v322_v22  ;;  %v18050_v56 = vpack.c.bf16 %v281_v23, %v269_v17  ;;  %v328_v35 = vsub.f32 %v21697_v8, %v327_v43 }
  0x4e   :  { %18047 = vmatpush1.bf16.msra.mxu1 %v18046_v10  ;;  %18143 = vmatpush1.bf16.msra.mxu0 %v18142_v18  ;;  %v345_v39 = vand.u32 4294901760, %v21705_v12  ;;  %v339_v58 = vand.u32 4294901760, %v21711_v24  ;;  %v18052_v6 = vpack.c.bf16 %v299_v34, %v287_v5  ;;  %v334_v55 = vsub.f32 %v21699_v9, %v333_v52 }
  0x4f   :  { %18049 = vmatprep.subr.bf16.mxu1 %v18048_v3  ;;  %18145 = vmatprep.subr.bf16.mxu0 %v18144_v0  ;;  %v351_v21 = vand.u32 4294901760, %v21713_v26  ;;  %v357_v44 = vand.u32 4294901760, %v21715_v27  ;;  %v18054_v50 = vpack.c.bf16 %v305_v62, %v293_v19  ;;  %v26038_v17 = vmov 0.0  }
  0x50   :  { %v346_v10 = vsub.f32 %v21705_v12, %v345_v39  ;;  %v340_v18 = vsub.f32 %v21711_v24, %v339_v58  ;;  %459 = vmatprep.mubr.f32.mxu1 %v26038_v17  ;;  %870 = vmatprep.mubr.f32.mxu0 %v26038_v17  ;;  %v18056_v23 = vpack.c.bf16 %v323_v59, %v311_v38  ;;  %v317_v3 = vand.u32 4294901760, %v316_v32 }
  0x51   :  { %v18152_v22 = vpack.c.bf16 %v321_v42, %v309_v47  ;;  %v352_v5 = vsub.f32 %v21713_v26, %v351_v21  ;;  %v329_v0 = vand.u32 4294901760, %v328_v35  ;;  %v358_v34 = vsub.f32 %v21715_v27, %v357_v44 }
  0x52   :  { %18051 = vmatpush1.bf16.msra.mxu1 %v18050_v56  ;;  %18147 = vmatpush1.bf16.msra.mxu0 %v18146_v51  ;;  %v369_v62 = vand.u32 4294901760, %v21719_v36  ;;  %v363_v19 = vand.u32 4294901760, %v21721_v37  ;;  %v335_v54 = vand.u32 4294901760, %v334_v55  ;;  %v347_v15 = vand.u32 4294901760, %v346_v10 }
  0x53   :  { %18053 = vmatprep.subr.bf16.mxu1 %v18052_v6  ;;  %18149 = vmatprep.subr.bf16.mxu0 %v18148_v45  ;;  %v375_v30 = vand.u32 4294901760, %v21730_v46  ;;  %v381_v42 = vand.u32 4294901760, %v21736_v53  ;;  %v18154_v47 = vpack.c.bf16 %v327_v43, %v315_v57  ;;  %v18156_v38 = vpack.c.bf16 %v345_v39, %v333_v52 }
  0x54   :  { %v341_v59 = vand.u32 4294901760, %v340_v18  ;;  %v370_v51 = vsub.f32 %v21719_v36, %v369_v62  ;;  %v353_v32 = vand.u32 4294901760, %v352_v5  ;;  %v364_v56 = vsub.f32 %v21721_v37, %v363_v19 }
  0x55   :  { %v376_v35 = vsub.f32 %v21730_v46, %v375_v30  ;;  %v382_v27 = vsub.f32 %v21736_v53, %v381_v42  ;;  %v18058_v45 = vpack.c.bf16 %v329_v0, %v317_v3  ;;  %v359_v6 = vand.u32 4294901760, %v358_v34 }
  0x56   :  { %18055 = vmatpush1.bf16.msra.mxu1 %v18054_v50  ;;  %18151 = vmatpush1.bf16.msra.mxu0 %v18150_v60  ;;  %v393_v55 = vand.u32 4294901760, %v21742_v2  ;;  %v387_v10 = vand.u32 4294901760, %v21746_v13  ;;  %v18060_v52 = vpack.c.bf16 %v347_v15, %v335_v54  ;;  %v371_v57 = vand.u32 4294901760, %v370_v51 }
  0x57   :  { %18057 = vmatprep.subr.bf16.mxu1 %v18056_v23  ;;  %18153 = vmatprep.subr.bf16.mxu0 %v18152_v22  ;;  %v399_v43 = vand.u32 4294901760, %v21748_v14  ;;  %v405_v39 = vand.u32 4294901760, %v21752_v4  ;;  %v18158_v18 = vpack.c.bf16 %v351_v21, %v339_v58  ;;  %v18160_v5 = vpack.c.bf16 %v369_v62, %v357_v44 }
  0x58   :  { %v394_v53 = vsub.f32 %v21742_v2, %v393_v55  ;;  %v18062_v50 = vpack.c.bf16 %v353_v32, %v341_v59  ;;  %v365_v60 = vand.u32 4294901760, %v364_v56  ;;  %v377_v3 = vand.u32 4294901760, %v376_v35 }
  0x59   :  { %v383_v0 = vand.u32 4294901760, %v382_v27  ;;  %v388_v34 = vsub.f32 %v21746_v13, %v387_v10  ;;  %v400_v23 = vsub.f32 %v21748_v14, %v399_v43  ;;  %v417_v54 = vand.u32 4294901760, %v21766_v28 }
  0x5a   :  { %18059 = vmatpush1.bf16.msra.mxu1 %v18058_v45  ;;  %18155 = vmatpush1.bf16.msra.mxu0 %v18154_v47  ;;  %v411_v15 = vand.u32 4294901760, %v21772_v11  ;;  %v18064_v58 = vpack.c.bf16 %v371_v57, %v359_v6  ;;  %v395_v21 = vand.u32 4294901760, %v394_v53  ;;  %v406_v44 = vsub.f32 %v21752_v4, %v405_v39 }
  0x5b   :  { %18061 = vmatprep.subr.bf16.mxu1 %v18060_v52  ;;  %18157 = vmatprep.subr.bf16.mxu0 %v18156_v38  ;;  %v423_v22 = vand.u32 4294901760, %v21781_v31  ;;  %v418_v27 = vsub.f32 %v21766_v28, %v417_v54  ;;  %v18066_v62 = vpack.c.bf16 %v377_v3, %v365_v60  ;;  %v18162_v47 = vpack.c.bf16 %v375_v30, %v363_v19  ;;  %v21877_v3 = vld [vmem:[#allocation5 + $0x28] sm:$0xff] }
  0x5c   :  { %v389_v59 = vand.u32 4294901760, %v388_v34  ;;  %v401_v51 = vand.u32 4294901760, %v400_v23  ;;  %v412_v32 = vsub.f32 %v21772_v11, %v411_v15  ;;  %v18068_v38 = vpack.c.bf16 %v395_v21, %v383_v0  ;;  %v26043_v0 = vld [vmem:[#allocation16_spill] sm:$0xff]  ;;  %v26044_v34 = vld [vmem:[#allocation21_spill] sm:$0xff]  ;;  %v26045_v23 = vld [vmem:[#allocation23_spill] sm:$0xff] }
  0x5d   :  { %v424_v56 = vsub.f32 %v21781_v31, %v423_v22  ;;  %v18164_v53 = vpack.c.bf16 %v393_v55, %v381_v42  ;;  %v407_v35 = vand.u32 4294901760, %v406_v44  ;;  %v419_v45 = vand.u32 4294901760, %v418_v27  ;;  %v21895_v27 = vld [vmem:[#allocation5 + $0x58] sm:$0xff] }
  0x5e   :  { %18063 = vmatpush1.bf16.msra.mxu1 %v18062_v50  ;;  %18159 = vmatpush1.bf16.msra.mxu0 %v18158_v18  ;;  %v18070_v6 = vpack.c.bf16 %v401_v51, %v389_v59  ;;  %v18166_v52 = vpack.c.bf16 %v399_v43, %v387_v10  ;;  %v413_v57 = vand.u32 4294901760, %v412_v32  ;;  %v18168_v18 = vpack.c.bf16 %v417_v54, %v405_v39  ;;  %v26039_v43 = vld [vmem:[#allocation14_spill] sm:$0xff]  ;;  %v26040_v39 = vld [vmem:[#allocation17_spill] sm:$0xff]  ;;  %v26047_v51 = vld [vmem:[#allocation27_spill] sm:$0xff] }
  0x5f   :  { %18065 = vmatprep.subr.bf16.mxu1 %v18064_v58  ;;  %18161 = vmatprep.subr.bf16.mxu0 %v18160_v5  ;;  %v425_v30 = vand.u32 4294901760, %v424_v56  ;;  %v18072_v19 = vpack.c.bf16 %v419_v45, %v407_v35  ;;  %v18170_v60 = vpack.c.bf16 %v423_v22, %v411_v15  ;;  %v18076_v42 = vpack.c.bf16 %v21650_v25, %v21643_v20  ;;  %v26041_v20 = vld [vmem:[#allocation19_spill] sm:$0xff]  ;;  %v21884_v54 = vld [vmem:[#allocation5 + $0x20] sm:$0xff]  ;;  %v26046_v58 = vld [vmem:[#allocation18_spill] sm:$0xff] }
  0x60   :  { %v18078_v55 = vpack.c.bf16 %v21657_v33, %v21654_v29  ;;  %v18080_v10 = vpack.c.bf16 %v21665_v41, %v21663_v40  ;;  %v18082_v25 = vpack.c.bf16 %v26041_v20, %v26040_v39  ;;  %v26042_v5 = vld [vmem:[#allocation15_spill] sm:$0xff]  ;;  %v18084_v29 = vpack.c.bf16 %v21675_v49, %v21673_v48  ;;  %v21873_v40 = vld [vmem:[#allocation5] sm:$0xff]  ;;  %v21893_v22 = vld [vmem:[#allocation5 + $0x48] sm:$0xff] }
  0x61   :  { %v18074_v50 = vpack.c.bf16 %v425_v30, %v413_v57  ;;  %v21871_v33 = vld [vmem:[#allocation5 + $0x18] sm:$0xff]  ;;  %v21875_v41 = vld [vmem:[#allocation5 + $0x10] sm:$0xff]  ;;  %v18086_v48 = vpack.c.bf16 %v26045_v23, %v26044_v34  ;;  %v18088_v21 = vpack.c.bf16 %v21691_v1, %v21689_v63  ;;  %v18090_v44 = vpack.c.bf16 %v21697_v8, %v21695_v7  ;;  %v21909_v7 = vld [vmem:[#allocation5 + $0x68] sm:$0xff] }
  0x62   :  { %18067 = vmatpush1.bf16.msra.mxu1 %v18066_v62  ;;  %18163 = vmatpush1.bf16.msra.mxu0 %v18162_v47  ;;  %v21882_v49 = vld [vmem:[#allocation5 + $0x38] sm:$0xff]  ;;  %v21886_v15 = vld [vmem:[#allocation5 + $0x30] sm:$0xff]  ;;  %v21897_v62 = vld [vmem:[#allocation5 + $0x40] sm:$0xff]  ;;  %v18092_v47 = vpack.c.bf16 %v21705_v12, %v21699_v9  ;;  %v18094_v59 = vpack.c.bf16 %v21713_v26, %v21711_v24  ;;  %v18096_v32 = vpack.c.bf16 %v21719_v36, %v26047_v51  ;;  %v1660_v9 = vand.u32 4294901760, %v21873_v40 }
  0x63   :  { %18069 = vmatprep.subr.bf16.mxu1 %v18068_v38  ;;  %18165 = vmatprep.subr.bf16.mxu0 %v18164_v53  ;;  %v21907_v1 = vld [vmem:[#allocation5 + $0x50] sm:$0xff]  ;;  %v21911_v8 = vld [vmem:[#allocation5 + $0x78] sm:$0xff]  ;;  %v1662_v38 = vand.u32 4294901760, %v21871_v33  ;;  %v1664_v12 = vand.u32 4294901760, %v21875_v41  ;;  %v21917_v24 = vld [vmem:[#allocation5 + $0x60] sm:$0xff]  ;;  %v1666_v35 = vand.u32 4294901760, %v21877_v3 }
  0x64   :  { %v21919_v26 = vld [vmem:[#allocation5 + $0x70] sm:$0xff]  ;;  %v26048_v53 = vld [vmem:[#allocation20_spill] sm:$0xff]  ;;  %v25733_v45 = vand.u32 4294901760, %v21882_v49  ;;  %v25731_v30 = vand.u32 4294901760, %v21893_v22 }
  0x65   :  { %v26049_v57 = vld [vmem:[#allocation22_spill] sm:$0xff]  ;;  %v26050_v39 = vld [vmem:[#allocation31_spill] sm:$0xff]  ;;  %v21947_v34 = vld [vmem:[#allocation5 + $0x80] sm:$0xff]  ;;  %v22025_v63 = vsub.f32 %v21871_v33, %v1662_v38  ;;  %v22043_v33 = vsub.f32 %v21875_v41, %v1664_v12 }
  0x66   :  { %18071 = vmatpush1.bf16.msra.mxu1 %v18070_v6  ;;  %18167 = vmatpush1.bf16.msra.mxu0 %v18166_v52  ;;  %v25732_v6 = vand.u32 4294901760, %v21884_v54  ;;  %v25727_v52 = vand.u32 4294901760, %v21886_v15  ;;  %v26051_v23 = vld [vmem:[#allocation24_spill] sm:$0xff]  ;;  %v21990_v20 = vld [vmem:[#allocation5 + $0xb0] sm:$0xff]  ;;  %v26072_v41 = vand.u32 4294901760, %v21947_v34 }
  0x67   :  { %18073 = vmatprep.subr.bf16.mxu1 %v18072_v19  ;;  %18169 = vmatprep.subr.bf16.mxu0 %v18168_v18  ;;  %v25728_v19 = vand.u32 4294901760, %v21895_v27  ;;  %v25730_v18 = vand.u32 4294901760, %v21897_v62  ;;  %26065 = vst [vmem:[#allocation22_spill] sm:$0xff] %v22043_v33 }
  0x6a   :  { %18075 = vmatpush1.bf16.msra.mxu1 %v18074_v50  ;;  %18171 = vmatpush1.bf16.msra.mxu0 %v18170_v60  ;;  %v25729_v50 = vand.u32 4294901760, %v21907_v1  ;;  %v25735_v60 = vand.u32 4294901760, %v21909_v7 }
  0x6b   :  { %18077 = vmatprep.subr.bf16.mxu1 %v18076_v42  ;;  %18173 = vmatprep.subr.bf16.mxu0 %v21641_v16  ;;  %v21869_v16 = vld [vmem:[#allocation5 + $0x8] sm:$0xff]  ;;  %v25734_v42 = vand.u32 4294901760, %v21911_v8 }
  0x6c   :  { %v1658_v56 = vand.u32 4294901760, %v21869_v16 }
  0x6d   :  { %461 = vmatmul.mubr.f32.vlgmr.msra.gmra.mrb[0].mxu1 %v21740_v61  ;;  %872 = vmatmul.mubr.f32.vlgmr.msra.gmra.mrb[0].mxu0 %v21740_v61 }
  0x6e   :  { %18079 = vmatpush1.bf16.msra.mxu1 %v18078_v55  ;;  %18175 = vmatpush1.bf16.msra.mxu0 %v26039_v43  ;;  %v25737_v55 = vand.u32 4294901760, %v21917_v24  ;;  %v21935_v43 = vld [vmem:[#allocation5 + $0x88] sm:$0xff] }
  0x6f   :  { %18081 = vmatprep.subr.bf16.mxu1 %v18080_v10  ;;  %18177 = vmatprep.subr.bf16.mxu0 %v26042_v5  ;;  %v25736_v10 = vand.u32 4294901760, %v21919_v26  ;;  %v21979_v5 = vpack.c.bf16 %v25728_v19, %v25731_v30  ;;  %v21999_v19 = vpack.c.bf16 %v25734_v42, %v25735_v60  ;;  %v22014_v42 = vld [vmem:[#allocation5 + $0xd8] sm:$0xff]  ;;  %v22017_v60 = vsub.f32 %v21869_v16, %v1658_v56 }
  0x70   :  { %595 = vmatprep.mubr.f32.mxu1 %v26038_v17  ;;  %974 = vmatprep.mubr.f32.mxu0 %v26038_v17  ;;  %v25739_v30 = vand.u32 4294901760, %v21990_v20  ;;  %v26064_v16 = vld [vmem:[#allocation28_spill] sm:$0xff]  ;;  %v26067_v36 = vand.u32 4294901760, %v21935_v43 }
  0x71   :  { %26057 = vst [vmem:[#allocation16_spill] sm:$0xff] %v21979_v5  ;;  %26059 = vst [vmem:[#allocation23_spill] sm:$0xff] %v21999_v19 }
  0x72   :  { %18083 = vmatpush1.bf16.msra.mxu1 %v18082_v25  ;;  %18179 = vmatpush1.bf16.msra.mxu0 %v26043_v0  ;;  %v21945_v0 = vld [vmem:[#allocation5 + $0x98] sm:$0xff]  ;;  %v21985_v25 = vpack.c.bf16 %v25729_v50, %v25730_v18  ;;  %v22005_v50 = vpack.c.bf16 %v25736_v10, %v25737_v55  ;;  %26061 = vst [vmem:[#allocation27_spill] sm:$0xff] %v22017_v60  ;;  %v26062_v10 = vld [vmem:[#allocation26_spill] sm:$0xff]  ;;  %v22022_v18 = vld [vmem:[#allocation5 + $0xc0] sm:$0xff] }
  0x73   :  { %18085 = vmatprep.subr.bf16.mxu1 %v18084_v29  ;;  %18181 = vmatprep.subr.bf16.mxu0 %v26046_v58  ;;  %v21956_v58 = vpack.c.bf16 %v1664_v12, %v1660_v9  ;;  %v21966_v29 = vld [vmem:[#allocation5 + $0xb8] sm:$0xff]  ;;  %v26068_v51 = vand.u32 4294901760, %v21945_v0 }
  0x74   :  { %26058 = vst [vmem:[#allocation21_spill] sm:$0xff] %v21985_v25  ;;  %26060 = vst [vmem:[#allocation18_spill] sm:$0xff] %v22005_v50 }
  0x75   :  { %26053 = vst [vmem:[#allocation17_spill] sm:$0xff] %v21956_v58 }
  0x76   :  { %18087 = vmatpush1.bf16.msra.mxu1 %v18086_v48  ;;  %18183 = vmatpush1.bf16.msra.mxu0 %v26048_v53  ;;  %v21950_v48 = vpack.c.bf16 %v1662_v38, %v1658_v56  ;;  %v21962_v53 = vld [vmem:[#allocation5 + $0x90] sm:$0xff]  ;;  %v22038_v56 = vsub.f32 %v21873_v40, %v1660_v9  ;;  %v22046_v38 = vsub.f32 %v21877_v3, %v1666_v35  ;;  %v26070_v40 = vand.u32 4294901760, %v21882_v49 }
  0x77   :  { %18089 = vmatprep.subr.bf16.mxu1 %v18088_v21  ;;  %18185 = vmatprep.subr.bf16.mxu0 %v26049_v57  ;;  %v21960_v21 = vpack.c.bf16 %v25733_v45, %v1666_v35  ;;  %v21964_v57 = vld [vmem:[#allocation5 + $0xa8] sm:$0xff]  ;;  %v26075_v35 = vand.u32 4294901760, %v21966_v29 }
  0x78   :  { %26052 = vst [vmem:[#allocation14_spill] sm:$0xff] %v21950_v48  ;;  %26066 = vst [vmem:[#allocation31_spill] sm:$0xff] %v22046_v38  ;;  %v22059_v9 = vsub.f32 %v21882_v49, %v26070_v40  ;;  %v26074_v12 = vand.u32 4294901760, %v21964_v57  ;;  %v26077_v40 = vpack.c.bf16 %v21730_v46, %v21721_v37  ;;  %v26081_v37 = vpack.c.bf16 %v21742_v2, %v26050_v39  ;;  %v26082_v46 = vld [vmem:[#allocation30_spill] sm:$0xff] }
  0x79   :  { %26054 = vst [vmem:[#allocation19_spill] sm:$0xff] %v21960_v21  ;;  %v26086_v2 = vand.u32 4294901760, %v22014_v42 }
  0x7a   :  { %18091 = vmatpush1.bf16.msra.mxu1 %v18090_v44  ;;  %18187 = vmatpush1.bf16.msra.mxu0 %v26051_v23  ;;  %v26055_v44 = vld [vmem:[#allocation25_spill] sm:$0xff]  ;;  %v21973_v23 = vpack.c.bf16 %v25727_v52, %v25732_v6  ;;  %v1625_v52 = vld [vmem:[%s25689_s1] sm:$0x1]  ;;  %v25738_v6 = vand.u32 4294901760, %v21962_v53 }
  0x7b   :  { %18093 = vmatprep.subr.bf16.mxu1 %v18092_v47  ;;  %18189 = vmatprep.subr.bf16.mxu0 %v26055_v44  ;;  %v21988_v44 = vld [vmem:[#allocation5 + $0xa0] sm:$0xff]  ;;  %v22012_v47 = vld [vmem:[#allocation5 + $0xc8] sm:$0xff]  ;;  %v22027_v45 = vand.u32 4294901760, %v1625_v52  ;;  %26071 = vst [vmem:[#allocation25_spill] sm:$0xff] %v22059_v9 }
  0x7c   :  { %26056 = vst [vmem:[#allocation15_spill] sm:$0xff] %v21973_v23  ;;  %v25740_v55 = vand.u32 4294901760, %v21988_v44  ;;  %v22065_v3 = vpack.c.bf16 %v25738_v6, %v26072_v41  ;;  %v26078_v41 = vld [vmem:[#allocation29_spill] sm:$0xff] }
  0x7d   :  { %26063 = vst [vmem:[#allocation20_spill] sm:$0xff] %v22027_v45  ;;  %v22090_v6 = vld [vmem:[#allocation5 + $0xe0] sm:$0xff]  ;;  %v22094_v49 = vsub.f32 %v1625_v52, %v22027_v45  ;;  %v26085_v52 = vand.u32 4294901760, %v22012_v47 }
  0x7e   :  { %18095 = vmatpush1.bf16.msra.mxu1 %v18094_v59  ;;  %18191 = vmatpush1.bf16.msra.mxu0 %v26062_v10  ;;  %v22033_v59 = vld [vmem:[#allocation5 + $0xd0] sm:$0xff]  ;;  %26073 = vst [vmem:[#allocation26_spill] sm:$0xff] %v22065_v3  ;;  %v22076_v10 = vld [vmem:[#allocation5 + $0xf8] sm:$0xff] }
  0x7f   :  { %18097 = vmatprep.subr.bf16.mxu1 %v18096_v32  ;;  %18193 = vmatprep.subr.bf16.mxu0 %v26064_v16  ;;  %v22052_v32 = vpack.c.bf16 %v26068_v51, %v26067_v36  ;;  %v22071_v36 = vpack.c.bf16 %v26075_v35, %v26074_v12  ;;  %v22074_v16 = vld [vmem:[#allocation5 + $0xe8] sm:$0xff]  ;;  %v22087_v12 = vpack.c.bf16 %v25739_v30, %v25740_v55  ;;  %v26083_v35 = vand.u32 4294901760, %v21884_v54 }
  0x80   :  { %26080 = vst [vmem:[#allocation39_spill] sm:$0xff] %v22094_v49  ;;  %v22114_v39 = vpack.c.bf16 %v26086_v2, %v26085_v52  ;;  %v26088_v55 = vand.u32 4294901760, %v22017_v60  ;;  %v26091_v52 = vand.u32 4294901760, %v21893_v22  ;;  %v26095_v30 = vand.u32 4294901760, %v22022_v18 }
  0x81   :  { %26069 = vst [vmem:[#allocation24_spill] sm:$0xff] %v22052_v32  ;;  %26076 = vst [vmem:[#allocation28_spill] sm:$0xff] %v22071_v36  ;;  %v22108_v51 = vsub.f32 %v21884_v54, %v26083_v35  ;;  %v26089_v54 = vand.u32 4294901760, %v21886_v15 }
  0x82   :  { %18099 = vmatpush1.bf16.msra.mxu1 %v26077_v40  ;;  %18195 = vmatpush1.bf16.msra.mxu0 %v26078_v41  ;;  %26079 = vst [vmem:[#allocation29_spill] sm:$0xff] %v22087_v12  ;;  %v22100_v40 = vld [vmem:[#allocation5 + $0xf0] sm:$0xff]  ;;  %26087 = vst [vmem:[#allocation40_spill] sm:$0xff] %v22114_v39  ;;  %v1769_v45 = vsub.f32 %v22017_v60, %v26088_v55  ;;  %v22131_v2 = vsub.f32 %v21893_v22, %v26091_v52  ;;  %v26096_v55 = vand.u32 4294901760, %v22033_v59 }
  0x83   :  { %18101 = vmatprep.subr.bf16.mxu1 %v26081_v37  ;;  %18197 = vmatprep.subr.bf16.mxu0 %v26082_v46  ;;  %26084 = vst [vmem:[#allocation30_spill] sm:$0xff] %v22108_v51  ;;  %v22126_v35 = vsub.f32 %v21886_v15, %v26089_v54  ;;  %v26093_v46 = vpack.c.bf16 %v21748_v14, %v21746_v13  ;;  %v26094_v37 = vld [vmem:[#allocation33_spill] sm:$0xff]  ;;  %v26098_v54 = vand.u32 4294901760, %v22025_v63  ;;  %v26100_v14 = vld [vmem:[#allocation34_spill] sm:$0xff]  ;;  %v26104_v22 = vand.u32 4294901760, %v22059_v9 }
  0x84   :  { %26092 = vst [vmem:[#allocation42_spill] sm:$0xff] %v22131_v2  ;;  %v22141_v41 = vpack.c.bf16 %v26096_v55, %v26095_v30  ;;  %v26099_v13 = vpack.c.bf16 %v21766_v28, %v21752_v4  ;;  %v26102_v30 = vand.u32 4294901760, %v22043_v33  ;;  %v26103_v55 = vand.u32 4294901760, %v22046_v38 }
  0x85   :  { %26090 = vst [vmem:[#allocation41_spill] sm:$0xff] %v22126_v35  ;;  %v1781_v60 = vsub.f32 %v22025_v63, %v26098_v54  ;;  %v1805_v4 = vsub.f32 %v22059_v9, %v26104_v22  ;;  %v26105_v28 = vand.u32 4294901760, %v21895_v27  ;;  %v1770_v15 = vand.u32 4294901760, %v1769_v45 }
  0x86   :  { %18103 = vmatpush1.bf16.msra.mxu1 %v26093_v46  ;;  %18199 = vmatpush1.bf16.msra.mxu0 %v26094_v37  ;;  %26097 = vst [vmem:[#allocation33_spill] sm:$0xff] %v22141_v41  ;;  %v26101_v37 = vand.u32 4294901760, %v22038_v56  ;;  %v1787_v52 = vsub.f32 %v22043_v33, %v26102_v30  ;;  %v1793_v54 = vsub.f32 %v22046_v38, %v26103_v55  ;;  %v26109_v30 = vand.u32 4294901760, %v22074_v16 }
  0x87   :  { %18105 = vmatprep.subr.bf16.mxu1 %v26099_v13  ;;  %18201 = vmatprep.subr.bf16.mxu0 %v26100_v14  ;;  %v22168_v13 = vsub.f32 %v21895_v27, %v26105_v28  ;;  %v26107_v14 = vand.u32 4294901760, %v21897_v62  ;;  %v26110_v55 = vand.u32 4294901760, %v22076_v10  ;;  %v26112_v27 = vpack.c.bf16 %v21781_v31, %v21772_v11  ;;  %v26113_v28 = vld [vmem:[#allocation36_spill] sm:$0xff]  ;;  %v22202_v11 = vld [vmem:[#allocation2 + $0x10] sm:$0xff] }
  0x88   :  { %v1775_v46 = vsub.f32 %v22038_v56, %v26101_v37  ;;  %v1782_v9 = vand.u32 4294901760, %v1781_v60  ;;  %v1788_v60 = vand.u32 4294901760, %v1787_v52  ;;  %v25753_v33 = vmov 0.0|0.0   ;;  %v26122_v52 = vld [vmem:[#allocation35_spill] sm:$0xff] }
  0x89   :  { %26106 = vst [vmem:[#allocation34_spill] sm:$0xff] %v22168_v13  ;;  %v22173_v37 = vsub.f32 %v21897_v62, %v26107_v14  ;;  %v22179_v38 = vpack.c.bf16 %v26110_v55, %v26109_v30  ;;  %v26114_v62 = vand.u32 4294901760, %v22094_v49  ;;  %v26115_v30 = vand.u32 4294901760, %v21907_v1 }
  0x8a   :  { %18107 = vmatpush1.bf16.msra.mxu1 %v26112_v27  ;;  %18203 = vmatpush1.bf16.msra.mxu0 %v26113_v28  ;;  %v26117_v55 = vand.u32 4294901760, %v21909_v7  ;;  %v1776_v31 = vand.u32 4294901760, %v1775_v46  ;;  %v1794_v27 = vand.u32 4294901760, %v1793_v54  ;;  %v26119_v28 = vand.u32 4294901760, %v22108_v51  ;;  %v22218_v46 = vld [vmem:[#allocation2 + $0x28] sm:$0xff] }
  0x8b   :  { %26108 = vst [vmem:[#allocation43_spill] sm:$0xff] %v22173_v37  ;;  %26111 = vst [vmem:[#allocation44_spill] sm:$0xff] %v22179_v38  ;;  %v22190_v14 = vsub.f32 %v22094_v49, %v26114_v62  ;;  %v22195_v45 = vsub.f32 %v21907_v1, %v26115_v30  ;;  %18349 = vmatprep.subr.bf16.mxu0 %v21950_v48  ;;  %18204 = vmatprep.subr.bf16.mxu1 %v25753_v33  ;;  %v1806_v1 = vand.u32 4294901760, %v1805_v4 }
  0x8c   :  { %v22200_v22 = vsub.f32 %v21909_v7, %v26117_v55  ;;  %v22208_v62 = vsub.f32 %v22108_v51, %v26119_v28  ;;  %v26120_v55 = vand.u32 4294901760, %v21911_v8  ;;  %v26123_v54 = vand.u32 4294901760, %v22090_v6 }
  0x8d   :  { %26116 = vst [vmem:[#allocation36_spill] sm:$0xff] %v22195_v45  ;;  %598 = vmatmul.mubr.f32.vlgmr.msra.gmra.mrb[0].mxu1 %v26122_v52  ;;  %976 = vmatmul.mubr.f32.vlgmr.msra.gmra.mrb[0].mxu0 %v21740_v61  ;;  %v26124_v28 = vand.u32 4294901760, %v22100_v40  ;;  %v26126_v33 = vand.u32 4294901760, %v22126_v35  ;;  %v22241_v52 = vpack.c.bf16 %v1782_v9, %v1770_v15  ;;  %v22247_v48 = vpack.c.bf16 %v1788_v60, %v1776_v31 }
  0x8e   :  { %26118 = vst [vmem:[#allocation45_spill] sm:$0xff] %v22200_v22  ;;  %v22216_v49 = vsub.f32 %v21911_v8, %v26120_v55  ;;  %v26127_v8 = vand.u32 4294901760, %v22131_v2  ;;  %18351 = vmatpush1.bf16.msra.mxu0 %v21956_v58  ;;  %1754 = vmatprep.mubr.f32.mxu0 %v26038_v17  ;;  %v26130_v30 = vand.u32 4294901760, %v21917_v24  ;;  %v25763_v9 = vand.u32 4294901760, %v22218_v46 }
  0x8f   :  { %v22226_v4 = vpack.c.bf16 %v26124_v28, %v26123_v54  ;;  %v22231_v7 = vsub.f32 %v22126_v35, %v26126_v33  ;;  %26128 = vst [vmem:[#allocation48_spill] sm:$0xff] %v22241_v52  ;;  %18353 = vmatprep.subr.bf16.mxu0 %v21960_v21  ;;  %26129 = vst [vmem:[#allocation49_spill] sm:$0xff] %v22247_v48  ;;  %v22256_v15 = vpack.c.bf16 %v1806_v1, %v1794_v27 }
  0x90   :  { %26121 = vst [vmem:[#allocation46_spill] sm:$0xff] %v22216_v49  ;;  %v22236_v55 = vsub.f32 %v22131_v2, %v26127_v8  ;;  %v1800_v8 = vand.u32 4294901760, %v22208_v62  ;;  %v22253_v58 = vsub.f32 %v21917_v24, %v26130_v30  ;;  %v26133_v54 = vand.u32 4294901760, %v22168_v13  ;;  %v22267_v62 = vld [vmem:[#allocation2 + $0x40] sm:$0xff]  ;;  %15944 = vmatprep.mubr.msk.f32.mxu1 %vm21561_vm0, %v26038_v17 }
  0x91   :  { %26125 = vst [vmem:[#allocation47_spill] sm:$0xff] %v22226_v4  ;;  %26132 = vst [vmem:[#allocation51_spill] sm:$0xff] %v22256_v15  ;;  %v26134_v33 = vand.u32 4294901760, %v22173_v37  ;;  %v1812_v24 = vand.u32 4294901760, %v22231_v7  ;;  %v26135_v27 = vand.u32 4294901760, %v21919_v26  ;;  %v26139_v60 = vand.u32 4294901760, %v22195_v45 }
  0x92   :  { %26131 = vst [vmem:[#allocation50_spill] sm:$0xff] %v22253_v58  ;;  %v1829_v28 = vsub.f32 %v22168_v13, %v26133_v54  ;;  %v1818_v30 = vand.u32 4294901760, %v22236_v55  ;;  %v26137_v54 = vand.u32 4294901760, %v22202_v11  ;;  %18355 = vmatpush1.bf16.msra.mxu0 %v21973_v23  ;;  %v26140_v55 = vand.u32 4294901760, %v22200_v22  ;;  %v22337_v13 = vld [vmem:[#allocation2 + $0xa0] sm:$0xff] }
  0x93   :  { %v22264_v31 = vsub.f32 %v22173_v37, %v26134_v33  ;;  %v22274_v1 = vsub.f32 %v21919_v26, %v26135_v27  ;;  %v22282_v33 = vld [vmem:[#allocation2 + $0x58] sm:$0xff]  ;;  %v1835_v7 = vsub.f32 %v22195_v45, %v26139_v60  ;;  %v26141_v26 = vand.u32 4294901760, %v21935_v43  ;;  %v22301_v37 = vld [vmem:[#allocation2 + $0x70] sm:$0xff]  ;;  %18357 = vmatprep.subr.bf16.mxu0 %v21979_v5 }
  0x94   :  { %v22280_v21 = vpack.c.bf16 %v25763_v9, %v26137_v54  ;;  %v1841_v61 = vsub.f32 %v22200_v22, %v26140_v55  ;;  %v26142_v54 = vand.u32 4294901760, %v21945_v0  ;;  %v26143_v23 = vand.u32 4294901760, %v21947_v34 }
  0x95   :  { %26136 = vst [vmem:[#allocation52_spill] sm:$0xff] %v22274_v1  ;;  %v22294_v27 = vsub.f32 %v21935_v43, %v26141_v26  ;;  %v26145_v22 = vand.u32 4294901760, %v21962_v53  ;;  %v22317_v26 = vld [vmem:[#allocation2 + $0x88] sm:$0xff]  ;;  %v1824_v5 = vand.u32 4294901760, %v22264_v31  ;;  %v26146_v60 = vand.u32 4294901760, %v22216_v49 }
  0x96   :  { %26138 = vst [vmem:[#allocation53_spill] sm:$0xff] %v22280_v21  ;;  %v22299_v9 = vsub.f32 %v21945_v0, %v26142_v54  ;;  %v22308_v55 = vsub.f32 %v21947_v34, %v26143_v23  ;;  %18206 = vmatpush3.bf16.msra.mxu1 %v22280_v21  ;;  %v1830_v54 = vand.u32 4294901760, %v1829_v28  ;;  %v26147_v34 = vmov 0.0|0.0   ;;  %18359 = vmatpush1.bf16.msra.mxu0 %v21985_v25 }
  0x97   :  { %v22313_v43 = vsub.f32 %v21962_v53, %v26145_v22  ;;  %v1853_v45 = vsub.f32 %v22216_v49, %v26146_v60  ;;  %18207 = vmatprep.subr.bf16.mxu1 %v26147_v34  ;;  %v26148_v22 = vand.u32 4294901760, %v21964_v57  ;;  %v26149_v0 = vand.u32 4294901760, %v21966_v29  ;;  %18361 = vmatprep.subr.bf16.mxu0 %v21999_v19 }
  0x98   :  { %26144 = vst [vmem:[#allocation54_spill] sm:$0xff] %v22308_v55  ;;  %v26150_v23 = vand.u32 4294901760, %v22267_v62  ;;  %v26153_v60 = vand.u32 4294901760, %v21988_v44  ;;  %v1842_v2 = vand.u32 4294901760, %v1841_v61  ;;  %v26155_v49 = vand.u32 4294901760, %v22301_v37 }
  0x99   :  { %v22329_v21 = vsub.f32 %v21964_v57, %v26148_v22  ;;  %v22334_v28 = vsub.f32 %v21966_v29, %v26149_v0  ;;  %v26151_v57 = vand.u32 4294901760, %v22282_v33  ;;  %v22349_v29 = vld [vmem:[#allocation2 + $0xb8] sm:$0xff]  ;;  %v1836_v0 = vand.u32 4294901760, %v1835_v7 }
  0x9a   :  { %v22357_v53 = vsub.f32 %v21988_v44, %v26153_v60  ;;  %v26156_v7 = vand.u32 4294901760, %v22317_v26  ;;  %v1854_v31 = vand.u32 4294901760, %v1853_v45  ;;  %v22374_v60 = vld [vmem:[#allocation2 + $0xd0] sm:$0xff]  ;;  %18363 = vmatpush1.bf16.msra.mxu0 %v22005_v50  ;;  %v26161_v35 = vand.u32 4294901760, %v22299_v9 }
  0x9b   :  { %v22346_v22 = vpack.c.bf16 %v26151_v57, %v26150_v23  ;;  %v26154_v23 = vand.u32 4294901760, %v22253_v58  ;;  %18365 = vmatprep.subr.bf16.mxu0 %v22052_v32  ;;  %v22391_v25 = vpack.c.bf16 %v1830_v54, %v1818_v30  ;;  %v26163_v50 = vand.u32 4294901760, %v22308_v55 }
  0x9c   :  { %v22367_v19 = vpack.c.bf16 %v26156_v7, %v26155_v49  ;;  %v26159_v49 = vand.u32 4294901760, %v22274_v1  ;;  %v26160_v7 = vand.u32 4294901760, %v22294_v27  ;;  %v1877_v61 = vsub.f32 %v22299_v9, %v26161_v35 }
  0x9d   :  { %26152 = vst [vmem:[#allocation55_spill] sm:$0xff] %v22346_v22  ;;  %v1847_v57 = vsub.f32 %v22253_v58, %v26154_v23  ;;  %18209 = vmatpush3.bf16.msra.mxu1 %v22346_v22  ;;  %v22376_v23 = vld [vmem:[#allocation2 + $0xe8] sm:$0xff]  ;;  %v22379_v22 = vpack.c.bf16 %v1812_v24, %v1800_v8  ;;  %26162 = vst [vmem:[#allocation58_spill] sm:$0xff] %v22391_v25  ;;  %v1871_v8 = vsub.f32 %v22308_v55, %v26163_v50 }
  0x9e   :  { %26157 = vst [vmem:[#allocation56_spill] sm:$0xff] %v22367_v19  ;;  %18210 = vmatprep.subr.bf16.mxu1 %v26147_v34  ;;  %v1859_v45 = vsub.f32 %v22274_v1, %v26159_v49  ;;  %v1865_v44 = vsub.f32 %v22294_v27, %v26160_v7  ;;  %v26164_v24 = vand.u32 4294901760, %v22313_v43  ;;  %v22400_v58 = vpack.c.bf16 %v1836_v0, %v1824_v5 }
  0x9f   :  { %26158 = vst [vmem:[#allocation57_spill] sm:$0xff] %v22379_v22  ;;  %v26166_v35 = vand.u32 4294901760, %v22337_v13  ;;  %v26167_v7 = vand.u32 4294901760, %v22349_v29  ;;  %v22411_v32 = vpack.c.bf16 %v1854_v31, %v1842_v2  ;;  %v1848_v55 = vand.u32 4294901760, %v1847_v57  ;;  %18367 = vmatpush1.bf16.msra.mxu0 %v22065_v3 }
  0xa0   :  { %v1883_v49 = vsub.f32 %v22313_v43, %v26164_v24  ;;  %26165 = vst [vmem:[#allocation59_spill] sm:$0xff] %v22400_v58  ;;  %v26170_v24 = vand.u32 4294901760, %v22329_v21  ;;  %v26171_v0 = vand.u32 4294901760, %v22334_v28  ;;  %v1866_v2 = vand.u32 4294901760, %v1865_v44  ;;  %18369 = vmatprep.subr.bf16.mxu0 %v22071_v36  ;;  %v22455_v36 = vld [vmem:[#allocation2 + $0x130] sm:$0xff] }
  0xa1   :  { %18212 = vmatpush3.bf16.msra.mxu1 %v22367_v19  ;;  %v22407_v30 = vpack.c.bf16 %v26167_v7, %v26166_v35  ;;  %26169 = vst [vmem:[#allocation61_spill] sm:$0xff] %v22411_v32  ;;  %v22420_v19 = vld [vmem:[#allocation2 + $0x100] sm:$0xff]  ;;  %v22422_v35 = vld [vmem:[#allocation2 + $0x118] sm:$0xff]  ;;  %v1860_v7 = vand.u32 4294901760, %v1859_v45  ;;  %v1878_v31 = vand.u32 4294901760, %v1877_v61  ;;  %v26172_v57 = vand.u32 4294901760, %v21990_v20 }
  0xa2   :  { %v1889_v5 = vsub.f32 %v22329_v21, %v26170_v24  ;;  %v1901_v1 = vsub.f32 %v22334_v28, %v26171_v0  ;;  %18213 = vmatprep.subr.bf16.mxu1 %v26147_v34  ;;  %v1872_v24 = vand.u32 4294901760, %v1871_v8  ;;  %v1884_v0 = vand.u32 4294901760, %v1883_v49 }
  0xa3   :  { %26168 = vst [vmem:[#allocation60_spill] sm:$0xff] %v22407_v30  ;;  %v22428_v50 = vsub.f32 %v21990_v20, %v26172_v57  ;;  %v26173_v54 = vand.u32 4294901760, %v22357_v53  ;;  %v26174_v58 = vand.u32 4294901760, %v22202_v11  ;;  %v26175_v44 = vand.u32 4294901760, %v22218_v46  ;;  %18371 = vmatpush1.bf16.msra.mxu0 %v22087_v12 }
  0xa4   :  { %v26176_v20 = vand.u32 4294901760, %v22374_v60  ;;  %v26177_v8 = vand.u32 4294901760, %v22376_v23  ;;  %v1902_v3 = vand.u32 4294901760, %v1901_v1  ;;  %18373 = vmatprep.subr.bf16.mxu0 %v22114_v39  ;;  %v26184_v1 = vand.u32 4294901760, %v22267_v62 }
  0xa5   :  { %v22434_v32 = vsub.f32 %v22357_v53, %v26173_v54  ;;  %v22439_v45 = vsub.f32 %v22202_v11, %v26174_v58  ;;  %v22444_v61 = vsub.f32 %v22218_v46, %v26175_v44  ;;  %18215 = vmatpush3.bf16.msra.mxu1 %v22407_v30  ;;  %v22457_v58 = vld [vmem:[#allocation2 + $0x148] sm:$0xff]  ;;  %v1890_v11 = vand.u32 4294901760, %v1889_v5 }
  0xa6   :  { %v22451_v49 = vpack.c.bf16 %v26177_v8, %v26176_v20  ;;  %v26179_v46 = vand.u32 4294901760, %v22012_v47  ;;  %18216 = vmatprep.subr.bf16.mxu1 %v26147_v34  ;;  %v22466_v20 = vpack.c.bf16 %v1860_v7, %v1848_v55  ;;  %v22468_v8 = vpack.c.bf16 %v1878_v31, %v1866_v2  ;;  %v26229_v30 = vld [vmem:[#allocation22_spill] sm:$0xff] }
  0xa7   :  { %v26182_v54 = vand.u32 4294901760, %v22014_v42  ;;  %v22484_v55 = vsub.f32 %v22267_v62, %v26184_v1  ;;  %v22502_v62 = vld [vmem:[#allocation2 + $0x178] sm:$0xff]  ;;  %v22506_v7 = vpack.c.bf16 %v1902_v3, %v1890_v11  ;;  %v26192_v57 = vand.u32 4294901760, %v22022_v18  ;;  %18375 = vmatpush1.bf16.msra.mxu0 %v22141_v41 }
  0xa8   :  { %26178 = vst [vmem:[#allocation62_spill] sm:$0xff] %v22451_v49  ;;  %v22462_v44 = vsub.f32 %v22012_v47, %v26179_v46  ;;  %26180 = vst [vmem:[#allocation63_spill] sm:$0xff] %v22466_v20  ;;  %v22479_v47 = vpack.c.bf16 %v1884_v0, %v1872_v24  ;;  %v26189_v24 = vand.u32 4294901760, %v22422_v35  ;;  %v22500_v46 = vld [vmem:[#allocation2 + $0x160] sm:$0xff]  ;;  %v26194_v11 = vand.u32 4294901760, %v22033_v59  ;;  %18377 = vmatprep.subr.bf16.mxu0 %v22179_v38 }
  0xa9   :  { %26181 = vst [vmem:[#allocation64_spill] sm:$0xff] %v22468_v8  ;;  %v22474_v5 = vsub.f32 %v22014_v42, %v26182_v54  ;;  %26185 = vst [vmem:[#allocation66_spill] sm:$0xff] %v22484_v55  ;;  %v26186_v42 = vand.u32 4294901760, %v22282_v33  ;;  %18218 = vmatpush3.bf16.msra.mxu1 %v22451_v49  ;;  %v26188_v54 = vand.u32 4294901760, %v22420_v19  ;;  %v22513_v49 = vsub.f32 %v22022_v18, %v26192_v57 }
  0xaa   :  { %26183 = vst [vmem:[#allocation65_spill] sm:$0xff] %v22479_v47  ;;  %26191 = vst [vmem:[#allocation69_spill] sm:$0xff] %v22506_v7  ;;  %18219 = vmatprep.subr.bf16.mxu1 %v26147_v34  ;;  %v26197_v57 = vand.u32 4294901760, %v22317_v26  ;;  %v26200_v3 = vand.u32 4294901760, %v22457_v58  ;;  %v26203_v38 = vand.u32 4294901760, %v22444_v61  ;;  %v26213_v41 = vand.u32 4294901760, %v22500_v46 }
  0xab   :  { %v22491_v31 = vsub.f32 %v22282_v33, %v26186_v42  ;;  %v22498_v0 = vpack.c.bf16 %v26189_v24, %v26188_v54  ;;  %v26193_v54 = vand.u32 4294901760, %v22428_v50  ;;  %v22526_v33 = vsub.f32 %v22033_v59, %v26194_v11  ;;  %18379 = vmatpush1.bf16.msra.mxu0 %v22226_v4 }
  0xac   :  { %v26195_v42 = vand.u32 4294901760, %v22301_v37  ;;  %v22537_v2 = vsub.f32 %v22317_v26, %v26197_v57  ;;  %v1084_v26 = vsub.f32 %v22444_v61, %v26203_v38  ;;  %v26205_v11 = vand.u32 4294901760, %v22076_v10  ;;  %18381 = vmatprep.subr.bf16.mxu0 %v22241_v52 }
  0xad   :  { %26187 = vst [vmem:[#allocation67_spill] sm:$0xff] %v22491_v31  ;;  %26190 = vst [vmem:[#allocation68_spill] sm:$0xff] %v22498_v0  ;;  %v22520_v24 = vsub.f32 %v22428_v50, %v26193_v54  ;;  %v26199_v54 = vand.u32 4294901760, %v22455_v36  ;;  %18221 = vmatpush3.bf16.msra.mxu1 %v22498_v0  ;;  %v26208_v38 = vand.u32 4294901760, %v22337_v13  ;;  %v26216_v52 = vand.u32 4294901760, %v22484_v55 }
  0xae   :  { %v22531_v18 = vsub.f32 %v22301_v37, %v26195_v42  ;;  %26198 = vst [vmem:[#allocation71_spill] sm:$0xff] %v22537_v2  ;;  %v26202_v37 = vand.u32 4294901760, %v22439_v45  ;;  %v22564_v59 = vsub.f32 %v22076_v10, %v26205_v11  ;;  %18222 = vmatprep.subr.bf16.mxu1 %v26147_v34  ;;  %v26211_v11 = vand.u32 4294901760, %v22349_v29 }
  0xaf   :  { %v22543_v1 = vpack.c.bf16 %v26200_v3, %v26199_v54  ;;  %v26204_v3 = vand.u32 4294901760, %v22074_v16  ;;  %v22574_v57 = vsub.f32 %v22337_v13, %v26208_v38  ;;  %v26212_v13 = vand.u32 4294901760, %v22462_v44 }
  0xb0   :  { %26196 = vst [vmem:[#allocation70_spill] sm:$0xff] %v22531_v18  ;;  %v1077_v42 = vsub.f32 %v22439_v45, %v26202_v37  ;;  %26206 = vst [vmem:[#allocation73_spill] sm:$0xff] %v22564_v59  ;;  %v26207_v37 = vand.u32 4294901760, %v22090_v6  ;;  %v1091_v4 = vsub.f32 %v22484_v55, %v26216_v52  ;;  %v26218_v39 = vand.u32 4294901760, %v22190_v14 }
  0xb1   :  { %26201 = vst [vmem:[#allocation72_spill] sm:$0xff] %v22543_v1  ;;  %v22559_v54 = vsub.f32 %v22074_v16, %v26204_v3  ;;  %26209 = vst [vmem:[#allocation74_spill] sm:$0xff] %v22574_v57  ;;  %v26210_v3 = vand.u32 4294901760, %v22100_v40  ;;  %v22594_v38 = vsub.f32 %v22462_v44, %v26212_v13  ;;  %18224 = vmatpush3.bf16.msra.mxu1 %v22543_v1  ;;  %v26217_v13 = vand.u32 4294901760, %v22491_v31 }
  0xb2   :  { %v22569_v0 = vsub.f32 %v22090_v6, %v26207_v37  ;;  %v22587_v6 = vsub.f32 %v22349_v29, %v26211_v11  ;;  %v1078_v11 = vand.u32 4294901760, %v1077_v42  ;;  %v1085_v37 = vand.u32 4294901760, %v1084_v26  ;;  %1760 = vmatmul.mubr.f32.vlgmr.msra.gmra.mrb[2].mxu0 %v26218_v39  ;;  %18225 = vmatprep.subr.bf16.mxu1 %v26147_v34 }
  0xb3   :  { %v22582_v10 = vsub.f32 %v22100_v40, %v26210_v3  ;;  %v26214_v40 = vand.u32 4294901760, %v22502_v62  ;;  %v1098_v16 = vsub.f32 %v22491_v31, %v26217_v13  ;;  %18383 = vmatpush1.bf16.msra.mxu0 %v22247_v48  ;;  %1990 = vmatprep.mubr.f32.mxu0 %v26038_v17  ;;  %v26219_v26 = vand.u32 4294901760, %v22374_v60  ;;  %v26224_v48 = vld [vmem:[#allocation27_spill] sm:$0xff]  ;;  %v26246_v31 = vld [vmem:[#allocation34_spill] sm:$0xff] }
  0xb4   :  { %v26220_v14 = vand.u32 4294901760, %v22531_v18  ;;  %18385 = vmatprep.subr.bf16.mxu0 %v22256_v15  ;;  %v26222_v52 = vand.u32 4294901760, %v22420_v19  ;;  %v26226_v29 = vand.u32 4294901760, %v22025_v63  ;;  %v18229_v15 = vpack.c.bf16 %v1085_v37, %v1078_v11  ;;  %v26234_v37 = vld [vmem:[#allocation31_spill] sm:$0xff] }
  0xb5   :  { %v22601_v3 = vpack.c.bf16 %v26214_v40, %v26213_v41  ;;  %v22624_v39 = vsub.f32 %v22374_v60, %v26219_v26  ;;  %v26221_v40 = vand.u32 4294901760, %v22376_v23  ;;  %v26223_v60 = vand.u32 4294901760, %v22537_v2 }
  0xb6   :  { %v1105_v13 = vsub.f32 %v22531_v18, %v26220_v14  ;;  %v22639_v42 = vsub.f32 %v22420_v19, %v26222_v52  ;;  %v26225_v14 = vand.u32 4294901760, %v26224_v48  ;;  %v26228_v12 = vand.u32 4294901760, %v22038_v56 }
  0xb7   :  { %26215 = vst [vmem:[#allocation75_spill] sm:$0xff] %v22601_v3  ;;  %v22634_v41 = vsub.f32 %v22376_v23, %v26221_v40  ;;  %v1112_v26 = vsub.f32 %v22537_v2, %v26223_v60  ;;  %18227 = vmatpush3.bf16.msra.mxu1 %v22601_v3  ;;  %v1092_v23 = vand.u32 4294901760, %v1091_v4  ;;  %v1099_v40 = vand.u32 4294901760, %v1098_v16  ;;  %v26236_v16 = vld [vmem:[#allocation25_spill] sm:$0xff]  ;;  %18387 = vmatpush1.bf16.msra.mxu0 %v22379_v22 }
  0xb8   :  { %v22648_v1 = vpack.c.bf16 %v26226_v29, %v26225_v14  ;;  %v26230_v19 = vand.u32 4294901760, %v26229_v30  ;;  %v26232_v18 = vand.u32 4294901760, %v22422_v35  ;;  %18228 = vmatprep.subr.bf16.mxu1 %v26147_v34  ;;  %v26233_v29 = vand.u32 4294901760, %v22574_v57  ;;  %18389 = vmatprep.subr.bf16.mxu0 %v22391_v25 }
  0xb9   :  { %v26235_v4 = vand.u32 4294901760, %v26234_v37  ;;  %v26237_v11 = vand.u32 4294901760, %v26236_v16  ;;  %v26247_v55 = vand.u32 4294901760, %v26246_v31  ;;  %v26270_v25 = vand.u32 4294901760, %v22313_v43 }
  0xba   :  { %26227 = vst [vmem:[#allocation27_spill] sm:$0xff] %v22648_v1  ;;  %v22655_v52 = vpack.c.bf16 %v26230_v19, %v26228_v12  ;;  %v22660_v60 = vsub.f32 %v22422_v35, %v26232_v18  ;;  %v1119_v14 = vsub.f32 %v22574_v57, %v26233_v29  ;;  %v26239_v12 = vand.u32 4294901760, %v22108_v51  ;;  %v26240_v19 = vld [vmem:[#allocation41_spill] sm:$0xff]  ;;  %v26244_v29 = vld [vmem:[#allocation42_spill] sm:$0xff] }
  0xbb   :  { %v22670_v3 = vpack.c.bf16 %v26237_v11, %v26235_v4  ;;  %v1106_v35 = vand.u32 4294901760, %v1105_v13  ;;  %v26243_v18 = vand.u32 4294901760, %v22587_v6  ;;  %v26245_v57 = vand.u32 4294901760, %v26244_v29  ;;  %v26249_v4 = vld [vmem:[#allocation43_spill] sm:$0xff] }
  0xbc   :  { %26231 = vst [vmem:[#allocation22_spill] sm:$0xff] %v22655_v52  ;;  %v26241_v52 = vand.u32 4294901760, %v26240_v19  ;;  %v26250_v11 = vand.u32 4294901760, %v26249_v4  ;;  %v1113_v13 = vand.u32 4294901760, %v1112_v26  ;;  %v26265_v26 = vand.u32 4294901760, %v22294_v27 }
  0xbd   :  { %26238 = vst [vmem:[#allocation31_spill] sm:$0xff] %v22670_v3  ;;  %v1126_v2 = vsub.f32 %v22587_v6, %v26243_v18  ;;  %v22686_v16 = vpack.c.bf16 %v26247_v55, %v26245_v57  ;;  %v26251_v3 = vld [vmem:[#allocation36_spill] sm:$0xff]  ;;  %v26255_v18 = vld [vmem:[#allocation45_spill] sm:$0xff]  ;;  %v26260_v55 = vld [vmem:[#allocation50_spill] sm:$0xff] }
  0xbe   :  { %v22676_v1 = vpack.c.bf16 %v26241_v52, %v26239_v12  ;;  %v26252_v51 = vand.u32 4294901760, %v26251_v3  ;;  %v26254_v52 = vld [vmem:[#allocation38_spill] sm:$0xff]  ;;  %v26256_v22 = vand.u32 4294901760, %v26255_v18  ;;  %v26261_v57 = vand.u32 4294901760, %v26260_v55 }
  0xbf   :  { %26248 = vst [vmem:[#allocation77_spill] sm:$0xff] %v22686_v16  ;;  %15945 = vmatmul.mubr.f32.vlgmr.msra.gmra.mrb[2].mxu1 %v26254_v52  ;;  %v26262_v16 = vld [vmem:[#allocation52_spill] sm:$0xff]  ;;  %v26266_v52 = vand.u32 4294901760, %v22299_v9 }
  0xc0   :  { %26242 = vst [vmem:[#allocation76_spill] sm:$0xff] %v22676_v1  ;;  %v22692_v19 = vpack.c.bf16 %v26252_v51, %v26250_v11  ;;  %v26257_v1 = vld [vmem:[#allocation46_spill] sm:$0xff]  ;;  %v26263_v4 = vand.u32 4294901760, %v26262_v16  ;;  %18230 = vmatpush3.bf16.msra.mxu1 %v18229_v15  ;;  %v18232_v51 = vpack.c.bf16 %v1099_v40, %v1092_v23  ;;  %15979 = vmatprep.mubr.msk.f32.mxu1 %vm21561_vm0, %v26038_v17  ;;  %v26272_v15 = vand.u32 4294901760, %v22474_v5 }
  0xc1   :  { %v26258_v29 = vand.u32 4294901760, %v26257_v1  ;;  %v22716_v12 = vpack.c.bf16 %v26266_v52, %v26265_v26  ;;  %18231 = vmatprep.subr.bf16.mxu1 %v26147_v34  ;;  %v26273_v40 = vand.u32 4294901760, %v22329_v21  ;;  %v26276_v26 = vand.u32 4294901760, %v22357_v53 }
  0xc2   :  { %26253 = vst [vmem:[#allocation78_spill] sm:$0xff] %v22692_v19  ;;  %v22707_v3 = vpack.c.bf16 %v26263_v4, %v26261_v57  ;;  %v1925_v23 = vsub.f32 %v22474_v5, %v26272_v15  ;;  %v26274_v4 = vand.u32 4294901760, %v22334_v28  ;;  %v26277_v52 = vand.u32 4294901760, %v22428_v50 }
  0xc3   :  { %v22701_v31 = vpack.c.bf16 %v26258_v29, %v26256_v22  ;;  %26267 = vst [vmem:[#allocation46_spill] sm:$0xff] %v22716_v12  ;;  %v26268_v22 = vld [vmem:[#allocation54_spill] sm:$0xff]  ;;  %v26283_v12 = vand.u32 4294901760, %v22455_v36 }
  0xc4   :  { %26264 = vst [vmem:[#allocation45_spill] sm:$0xff] %v22707_v3  ;;  %v26269_v29 = vand.u32 4294901760, %v26268_v22  ;;  %v22732_v57 = vpack.c.bf16 %v26274_v4, %v26273_v40  ;;  %v22738_v11 = vpack.c.bf16 %v26277_v52, %v26276_v26  ;;  %v26284_v40 = vand.u32 4294901760, %v22513_v49  ;;  %18233 = vmatpush3.bf16.msra.mxu1 %v18232_v51 }
  0xc5   :  { %26259 = vst [vmem:[#allocation38_spill] sm:$0xff] %v22701_v31  ;;  %v22750_v3 = vsub.f32 %v22455_v36, %v26283_v12  ;;  %v26285_v4 = vand.u32 4294901760, %v22526_v33  ;;  %v26287_v26 = vand.u32 4294901760, %v22559_v54  ;;  %v26288_v52 = vand.u32 4294901760, %v22564_v59  ;;  %v26293_v36 = vld [vmem:[#allocation61_spill] sm:$0xff]  ;;  %18234 = vmatprep.subr.bf16.mxu1 %v26147_v34 }
  0xc6   :  { %v22722_v31 = vpack.c.bf16 %v26270_v25, %v26269_v29  ;;  %26275 = vst [vmem:[#allocation52_spill] sm:$0xff] %v22732_v57  ;;  %26278 = vst [vmem:[#allocation54_spill] sm:$0xff] %v22738_v11  ;;  %v26279_v25 = vand.u32 4294901760, %v22462_v44  ;;  %v26280_v29 = vmov %v26272_v15  ;;  %v26282_v15 = vld [vmem:[#allocation59_spill] sm:$0xff]  ;;  %v26294_v12 = vand.u32 4294901760, %v22457_v58 }
  0xc7   :  { %18391 = vmatpush1.bf16.msra.mxu0 %v26282_v15  ;;  %v22756_v57 = vpack.c.bf16 %v26285_v4, %v26284_v40  ;;  %v22762_v11 = vpack.c.bf16 %v26288_v52, %v26287_v26  ;;  %v1120_v40 = vand.u32 4294901760, %v1119_v14  ;;  %v1127_v4 = vand.u32 4294901760, %v1126_v2 }
  0xc8   :  { %26271 = vst [vmem:[#allocation50_spill] sm:$0xff] %v22722_v31  ;;  %v22744_v31 = vpack.c.bf16 %v26280_v29, %v26279_v25  ;;  %v26290_v25 = vand.u32 4294901760, %v22569_v0  ;;  %v26291_v29 = vand.u32 4294901760, %v22582_v10  ;;  %18393 = vmatprep.subr.bf16.mxu0 %v26293_v36  ;;  %v18235_v52 = vpack.c.bf16 %v1113_v13, %v1106_v35 }
  0xc9   :  { %26286 = vst [vmem:[#allocation80_spill] sm:$0xff] %v22756_v57  ;;  %26289 = vst [vmem:[#allocation81_spill] sm:$0xff] %v22762_v11  ;;  %v26295_v57 = vand.u32 4294901760, %v22624_v39  ;;  %v26296_v11 = vand.u32 4294901760, %v22634_v41  ;;  %v1926_v14 = vand.u32 4294901760, %v1925_v23  ;;  %v26297_v2 = vand.u32 4294901760, %v22513_v49 }
  0xca   :  { %26281 = vst [vmem:[#allocation79_spill] sm:$0xff] %v22744_v31  ;;  %v22768_v15 = vpack.c.bf16 %v26291_v29, %v26290_v25  ;;  %v22774_v31 = vsub.f32 %v22457_v58, %v26294_v12  ;;  %v1914_v58 = vand.u32 4294901760, %v22594_v38  ;;  %v26298_v35 = vand.u32 4294901760, %v22526_v33  ;;  %18236 = vmatpush3.bf16.msra.mxu1 %v18235_v52 }
  0xcb   :  { %v1133_v26 = vsub.f32 %v22624_v39, %v26295_v57  ;;  %v1140_v25 = vsub.f32 %v22634_v41, %v26296_v11  ;;  %v1919_v12 = vsub.f32 %v22513_v49, %v26297_v2  ;;  %18395 = vmatpush1.bf16.msra.mxu0 %v22466_v20  ;;  %v26299_v51 = vand.u32 4294901760, %v22559_v54  ;;  %18237 = vmatprep.subr.bf16.mxu1 %v26147_v34 }
  0xcc   :  { %26292 = vst [vmem:[#allocation82_spill] sm:$0xff] %v22768_v15  ;;  %v1908_v15 = vand.u32 4294901760, %v22520_v24  ;;  %v1931_v13 = vsub.f32 %v22526_v33, %v26298_v35  ;;  %v26300_v24 = vand.u32 4294901760, %v22564_v59  ;;  %v26301_v23 = vand.u32 4294901760, %v22500_v46  ;;  %18397 = vmatprep.subr.bf16.mxu0 %v22468_v8 }
  0xcd   :  { %v1937_v11 = vsub.f32 %v22559_v54, %v26299_v51  ;;  %v26302_v2 = vand.u32 4294901760, %v22502_v62  ;;  %v18238_v35 = vpack.c.bf16 %v1127_v4, %v1120_v40  ;;  %v1134_v29 = vand.u32 4294901760, %v1133_v26 }
  0xce   :  { %v1949_v38 = vsub.f32 %v22564_v59, %v26300_v24  ;;  %v22803_v57 = vsub.f32 %v22500_v46, %v26301_v23  ;;  %v25870_v51 = vand.u32 4294901760, %v22750_v3  ;;  %v1141_v20 = vand.u32 4294901760, %v1140_v25 }
  0xcf   :  { %v22809_v36 = vsub.f32 %v22502_v62, %v26302_v2  ;;  %v26303_v24 = vand.u32 4294901760, %v22639_v42  ;;  %v26304_v46 = vand.u32 4294901760, %v22660_v60  ;;  %v25873_v8 = vand.u32 4294901760, %v22774_v31  ;;  %18399 = vmatpush1.bf16.msra.mxu0 %v22479_v47  ;;  %18239 = vmatpush3.bf16.msra.mxu1 %v18238_v35 }
  0xd0   :  { %v26305_v59 = vand.u32 4294901760, %v22434_v32  ;;  %v22823_v40 = vpack.c.bf16 %v1926_v14, %v1914_v58  ;;  %v1920_v4 = vand.u32 4294901760, %v1919_v12  ;;  %v1932_v26 = vand.u32 4294901760, %v1931_v13  ;;  %18401 = vmatprep.subr.bf16.mxu0 %v22506_v7  ;;  %18240 = vmatprep.subr.bf16.mxu1 %v26147_v34 }
  0xd1   :  { %v1147_v19 = vsub.f32 %v22639_v42, %v26303_v24  ;;  %v1154_v23 = vsub.f32 %v22660_v60, %v26304_v46  ;;  %v1938_v52 = vand.u32 4294901760, %v1937_v11  ;;  %v26308_v25 = vand.u32 4294901760, %v22569_v0 }
  0xd2   :  { %v22821_v62 = vpack.c.bf16 %v1908_v15, %v26305_v59  ;;  %26307 = vst [vmem:[#allocation84_spill] sm:$0xff] %v22823_v40  ;;  %v26309_v24 = vand.u32 4294901760, %v22582_v10  ;;  %v1950_v32 = vand.u32 4294901760, %v1949_v38  ;;  %v1161_v59 = vsub.f32 %v22750_v3, %v25870_v51 }
  0xd3   :  { %v1943_v2 = vsub.f32 %v22569_v0, %v26308_v25  ;;  %v25872_v15 = vand.u32 4294901760, %v22803_v57  ;;  %v25871_v58 = vand.u32 4294901760, %v22809_v36  ;;  %v18241_v14 = vpack.c.bf16 %v1141_v20, %v1134_v29 }
  0xd4   :  { %26306 = vst [vmem:[#allocation83_spill] sm:$0xff] %v22821_v62  ;;  %v1955_v46 = vsub.f32 %v22582_v10, %v26309_v24  ;;  %v1148_v12 = vand.u32 4294901760, %v1147_v19  ;;  %v1155_v13 = vand.u32 4294901760, %v1154_v23  ;;  %v1168_v11 = vsub.f32 %v22774_v31, %v25873_v8  ;;  %18403 = vmatpush1.bf16.msra.mxu0 %v22821_v62  ;;  %v26339_v8 = vld [vmem:[#allocation34_spill] sm:$0xff] }
  0xd5   :  { %v22844_v38 = vpack.c.bf16 %v1932_v26, %v1920_v4  ;;  %v1944_v25 = vand.u32 4294901760, %v1943_v2  ;;  %18405 = vmatprep.subr.bf16.mxu0 %v22823_v40  ;;  %v22847_v51 = vpack.c.bf16 %v1950_v32, %v1938_v52  ;;  %v1162_v35 = vand.u32 4294901760, %v1161_v59  ;;  %18242 = vmatpush3.bf16.msra.mxu1 %v18241_v14 }
  0xd6   :  { %v1956_v24 = vand.u32 4294901760, %v1955_v46  ;;  %v18244_v20 = vpack.c.bf16 %v1155_v13, %v1148_v12  ;;  %v1169_v19 = vand.u32 4294901760, %v1168_v11  ;;  %v1175_v29 = vsub.f32 %v22803_v57, %v25872_v15  ;;  %18243 = vmatprep.subr.bf16.mxu1 %v26147_v34  ;;  %v26319_v11 = vld [vmem:[#allocation66_spill] sm:$0xff] }
  0xd7   :  { %26310 = vst [vmem:[#allocation85_spill] sm:$0xff] %v22844_v38  ;;  %26311 = vst [vmem:[#allocation86_spill] sm:$0xff] %v22847_v51  ;;  %v1182_v23 = vsub.f32 %v22809_v36, %v25871_v58  ;;  %v22862_v26 = vpack.c.bf16 %v22025_v63, %v26224_v48  ;;  %v26314_v52 = vand.u32 4294901760, %v22439_v45  ;;  %v26315_v2 = vand.u32 4294901760, %v22444_v61  ;;  %v26317_v63 = vld [vmem:[#allocation25_spill] sm:$0xff] }
  0xd8   :  { %18407 = vmatpush1.bf16.msra.mxu0 %v22844_v38  ;;  %v22857_v4 = vpack.c.bf16 %v1956_v24, %v1944_v25  ;;  %v18247_v32 = vpack.c.bf16 %v1169_v19, %v1162_v35  ;;  %v1176_v59 = vand.u32 4294901760, %v1175_v29  ;;  %v22874_v12 = vpack.c.bf16 %v26229_v30, %v22038_v56  ;;  %v26321_v24 = vld [vmem:[#allocation67_spill] sm:$0xff]  ;;  %v26323_v19 = vld [vmem:[#allocation20_spill] sm:$0xff]  ;;  %v26324_v56 = vld [vmem:[#allocation70_spill] sm:$0xff] }
  0xd9   :  { %18409 = vmatprep.subr.bf16.mxu0 %v22847_v51  ;;  %26313 = vst [vmem:[#allocation88_spill] sm:$0xff] %v22862_v26  ;;  %v22868_v46 = vpack.c.bf16 %v26315_v2, %v26314_v52  ;;  %18245 = vmatpush3.bf16.msra.mxu1 %v18244_v20  ;;  %v1183_v14 = vand.u32 4294901760, %v1182_v23  ;;  %v22879_v48 = vpack.c.bf16 %v26317_v63, %v26234_v37  ;;  %v26320_v25 = vand.u32 4294901760, %v26319_v11  ;;  %v26326_v29 = vld [vmem:[#allocation71_spill] sm:$0xff]  ;;  %v26328_v37 = vld [vmem:[#allocation74_spill] sm:$0xff]  ;;  %v26334_v58 = vld [vmem:[#allocation41_spill] sm:$0xff] }
  0xda   :  { %26312 = vst [vmem:[#allocation87_spill] sm:$0xff] %v22857_v4  ;;  %18246 = vmatprep.subr.bf16.mxu1 %v26147_v34  ;;  %26316 = vst [vmem:[#allocation89_spill] sm:$0xff] %v22874_v12  ;;  %v26322_v35 = vand.u32 4294901760, %v26321_v24  ;;  %v26325_v30 = vand.u32 4294901760, %v26324_v56  ;;  %v26327_v23 = vand.u32 4294901760, %v26326_v29  ;;  %v26329_v2 = vand.u32 4294901760, %v26328_v37 }
  0xdb   :  { %26318 = vst [vmem:[#allocation25_spill] sm:$0xff] %v22879_v48  ;;  %v18250_v13 = vpack.c.bf16 %v1183_v14, %v1176_v59  ;;  %v26331_v14 = vand.u32 4294901760, %v22624_v39  ;;  %v26332_v63 = vand.u32 4294901760, %v22634_v41 }
  0xdc   :  { %18411 = vmatpush1.bf16.msra.mxu0 %v22857_v4  ;;  %v22885_v20 = vpack.c.bf16 %v26322_v35, %v26320_v25  ;;  %v22893_v52 = vpack.c.bf16 %v26327_v23, %v26325_v30  ;;  %v26333_v35 = vld [vmem:[#allocation30_spill] sm:$0xff]  ;;  %v26336_v30 = vand.u32 4294901760, %v22639_v42  ;;  %v26337_v23 = vand.u32 4294901760, %v22660_v60 }
  0xdd   :  { %18413 = vmatprep.subr.bf16.mxu0 %v22862_v26  ;;  %18248 = vmatpush3.bf16.msra.mxu1 %v18247_v32  ;;  %v26330_v32 = vand.u32 4294901760, %v22587_v6  ;;  %v22905_v25 = vpack.c.bf16 %v26332_v63, %v26331_v14  ;;  %v22910_v15 = vpack.c.bf16 %v26334_v58, %v26333_v35  ;;  %v18253_v63 = vpack.c.bf16 %v22444_v61, %v22439_v45  ;;  %v26341_v58 = vld [vmem:[#allocation43_spill] sm:$0xff]  ;;  %v26342_v35 = vld [vmem:[#allocation36_spill] sm:$0xff] }
  0xde   :  { %18249 = vmatprep.subr.bf16.mxu1 %v26147_v34  ;;  %v18256_v45 = vpack.c.bf16 %v26321_v24, %v26319_v11  ;;  %v22946_v61 = vpack.c.bf16 %v26262_v16, %v26260_v55  ;;  %v22964_v16 = vpack.c.bf16 %v22334_v28, %v22329_v21  ;;  %v18265_v21 = vpack.c.bf16 %v22634_v41, %v22624_v39  ;;  %v26366_v11 = vld [vmem:[#allocation35_spill] sm:$0xff] }
  0xdf   :  { %1992 = vmatmul.mubr.f32.vlgmr.msra.gmra.mrb[2].mxu0 %v26323_v19  ;;  %v22899_v59 = vpack.c.bf16 %v26330_v32, %v26329_v2  ;;  %26335 = vst [vmem:[#allocation66_spill] sm:$0xff] %v22910_v15  ;;  %v22917_v2 = vpack.c.bf16 %v26337_v23, %v26336_v30  ;;  %v26338_v32 = vld [vmem:[#allocation42_spill] sm:$0xff]  ;;  %v22935_v30 = vpack.c.bf16 %v26257_v1, %v26255_v18  ;;  %v26352_v28 = vand.u32 4294901760, %v22750_v3  ;;  %v26369_v24 = vld [vmem:[#allocation23_spill] sm:$0xff]  ;;  %v26373_v23 = vld [vmem:[#allocation56_spill] sm:$0xff] }
  0xe0   :  { %18415 = vmatpush1.bf16.msra.mxu0 %v22874_v12  ;;  %2126 = vmatprep.mubr.f32.mxu0 %v26038_v17  ;;  %v22922_v14 = vpack.c.bf16 %v26339_v8, %v26338_v32  ;;  %v22930_v12 = vpack.c.bf16 %v26342_v35, %v26341_v58  ;;  %v26345_v8 = vld [vmem:[#allocation32_spill] sm:$0xff]  ;;  %26346 = vst [vmem:[#allocation71_spill] sm:$0xff] %v22946_v61  ;;  %26349 = vst [vmem:[#allocation41_spill] sm:$0xff] %v22964_v16  ;;  %v26357_v41 = vand.u32 4294901760, %v22803_v57  ;;  %v26374_v32 = vld [vmem:[#allocation26_spill] sm:$0xff] }
  0xe1   :  { %18417 = vmatprep.subr.bf16.mxu0 %v22879_v48  ;;  %18251 = vmatpush3.bf16.msra.mxu1 %v18250_v13  ;;  %26344 = vst [vmem:[#allocation70_spill] sm:$0xff] %v22935_v30  ;;  %v22951_v1 = vpack.c.bf16 %v22299_v9, %v22294_v27  ;;  %v18259_v18 = vpack.c.bf16 %v26326_v29, %v26324_v56  ;;  %v26358_v39 = vand.u32 4294901760, %v22809_v36  ;;  %v26370_v56 = vld [vmem:[#allocation55_spill] sm:$0xff]  ;;  %v26371_v29 = vld [vmem:[#allocation18_spill] sm:$0xff]  ;;  %v26376_v58 = vld [vmem:[#allocation60_spill] sm:$0xff] }
  0xe2   :  { %26340 = vst [vmem:[#allocation67_spill] sm:$0xff] %v22922_v14  ;;  %18252 = vmatprep.subr.bf16.mxu1 %v26147_v34  ;;  %26343 = vst [vmem:[#allocation20_spill] sm:$0xff] %v22930_v12  ;;  %v22959_v13 = vpack.c.bf16 %v22313_v43, %v26268_v22  ;;  %v18262_v9 = vpack.c.bf16 %v22587_v6, %v26328_v37  ;;  %v22972_v27 = vpack.c.bf16 %v22428_v50, %v22357_v53  ;;  %v26355_v50 = vld [vmem:[#allocation73_spill] sm:$0xff]  ;;  %v26372_v37 = vld [vmem:[#allocation24_spill] sm:$0xff] }
  0xe3   :  { %26347 = vst [vmem:[#allocation74_spill] sm:$0xff] %v22951_v1  ;;  %v22977_v43 = vpack.c.bf16 %v22474_v5, %v22462_v44  ;;  %v26353_v6 = vand.u32 4294901760, %v22774_v31  ;;  %v22991_v53 = vpack.c.bf16 %v22526_v33, %v22513_v49  ;;  %v22996_v44 = vpack.c.bf16 %v26355_v50, %v22559_v54  ;;  %v26360_v54 = vld [vmem:[#allocation14_spill] sm:$0xff]  ;;  %v26377_v35 = vld [vmem:[#allocation29_spill] sm:$0xff]  ;;  %v26384_v50 = vld [vmem:[#allocation27_spill] sm:$0xff] }
  0xe4   :  { %18419 = vmatpush1.bf16.msra.mxu0 %v22910_v15  ;;  %15980 = vmatmul.mubr.f32.vlgmr.msra.gmra.mrb[2].mxu1 %v26345_v8  ;;  %26348 = vst [vmem:[#allocation30_spill] sm:$0xff] %v22959_v13  ;;  %26350 = vst [vmem:[#allocation42_spill] sm:$0xff] %v22972_v27  ;;  %v18268_v5 = vpack.c.bf16 %v22660_v60, %v22639_v42  ;;  %v23004_v22 = vpack.c.bf16 %v26358_v39, %v26357_v41  ;;  %v26361_v60 = vld [vmem:[#allocation39_spill] sm:$0xff]  ;;  %v26387_v39 = vld [vmem:[#allocation22_spill] sm:$0xff] }
  0xe5   :  { %18421 = vmatprep.subr.bf16.mxu0 %v22922_v14  ;;  %18254 = vmatpush3.bf16.msra.mxu1 %v18253_v63  ;;  %26351 = vst [vmem:[#allocation34_spill] sm:$0xff] %v22977_v43  ;;  %v22985_v55 = vpack.c.bf16 %v26353_v6, %v26352_v28  ;;  %26354 = vst [vmem:[#allocation43_spill] sm:$0xff] %v22991_v53  ;;  %v23010_v49 = vpack.c.bf16 %v22582_v10, %v22569_v0  ;;  %v26362_v0 = vld [vmem:[#allocation17_spill] sm:$0xff]  ;;  %v26363_v10 = vld [vmem:[#allocation19_spill] sm:$0xff]  ;;  %v26386_v41 = vand.u32 4294901760, %v26361_v60 }
  0xe6   :  { %16014 = vmatprep.mubr.msk.f32.mxu1 %vm21561_vm0, %v26038_v17  ;;  %18255 = vmatprep.subr.bf16.mxu1 %v26147_v34  ;;  %26356 = vst [vmem:[#allocation36_spill] sm:$0xff] %v22996_v44  ;;  %v18271_v33 = vpack.c.bf16 %v22774_v31, %v22750_v3  ;;  %v18274_v42 = vpack.c.bf16 %v22809_v36, %v22803_v57  ;;  %v26364_v31 = vld [vmem:[#allocation15_spill] sm:$0xff]  ;;  %v26365_v3 = vld [vmem:[#allocation16_spill] sm:$0xff]  ;;  %v26367_v36 = vld [vmem:[#allocation53_spill] sm:$0xff] }
  0xe7   :  { %26359 = vst [vmem:[#allocation32_spill] sm:$0xff] %v23010_v49  ;;  %v26368_v57 = vld [vmem:[#allocation21_spill] sm:$0xff]  ;;  %v26375_v63 = vld [vmem:[#allocation28_spill] sm:$0xff]  ;;  %v26383_v6 = vld [vmem:[#allocation47_spill] sm:$0xff] }
  0xe8   :  { %18423 = vmatpush1.bf16.msra.mxu0 %v22930_v12  ;;  %v26382_v28 = vld [vmem:[#allocation68_spill] sm:$0xff] }
  0xe9   :  { %18425 = vmatprep.subr.bf16.mxu0 %v22935_v30  ;;  %18257 = vmatpush3.bf16.msra.mxu1 %v18256_v45  ;;  %v26378_v45 = vld [vmem:[#allocation40_spill] sm:$0xff] }
  0xea   :  { %18258 = vmatprep.subr.bf16.mxu1 %v26147_v34  ;;  %v23461_v48 = vld [vmem:[%s25689_s1] sm:$0x1] }
  0xec   :  { %18427 = vmatpush1.bf16.msra.mxu0 %v22946_v61 }
  0xed   :  { %18429 = vmatprep.subr.bf16.mxu0 %v22951_v1  ;;  %18260 = vmatpush3.bf16.msra.mxu1 %v18259_v18  ;;  %v26379_v18 = vld [vmem:[#allocation62_spill] sm:$0xff] }
  0xee   :  { %18261 = vmatprep.subr.bf16.mxu1 %v26147_v34 }
  0xf0   :  { %18431 = vmatpush1.bf16.msra.mxu0 %v22959_v13 }
  0xf1   :  { %18433 = vmatprep.subr.bf16.mxu0 %v22964_v16  ;;  %18263 = vmatpush3.bf16.msra.mxu1 %v18262_v9  ;;  %v26380_v9 = vld [vmem:[#allocation33_spill] sm:$0xff] }
  0xf2   :  { %18264 = vmatprep.subr.bf16.mxu1 %v26147_v34 }
  0xf4   :  { %18435 = vmatpush1.bf16.msra.mxu0 %v22972_v27 }
  0xf5   :  { %18437 = vmatprep.subr.bf16.mxu0 %v22977_v43  ;;  %18266 = vmatpush3.bf16.msra.mxu1 %v18265_v21  ;;  %v26381_v21 = vld [vmem:[#allocation44_spill] sm:$0xff] }
  0xf6   :  { %18267 = vmatprep.subr.bf16.mxu1 %v26147_v34 }
  0xf8   :  { %18439 = vmatpush1.bf16.msra.mxu0 %v22991_v53 }
  0xf9   :  { %18441 = vmatprep.subr.bf16.mxu0 %v22996_v44  ;;  %18269 = vmatpush3.bf16.msra.mxu1 %v18268_v5  ;;  %v26385_v5 = vld [vmem:[#allocation72_spill] sm:$0xff] }
  0xfa   :  { %18270 = vmatprep.subr.bf16.mxu1 %v26147_v34 }
  0xfc   :  { %18443 = vmatpush1.bf16.msra.mxu0 %v23010_v49  ;;  %v26392_v49 = vld [vmem:[#allocation37_spill] sm:$0xff] }
  0xfd   :  { %18445 = vmatprep.subr.bf16.mxu0 %v26360_v54  ;;  %18272 = vmatpush3.bf16.msra.mxu1 %v18271_v33  ;;  %v26388_v33 = vld [vmem:[#allocation31_spill] sm:$0xff] }
  0xfe   :  { %18273 = vmatprep.subr.bf16.mxu1 %v26147_v34 }
  0xff   :  { %2129 = vmatmul.mubr.f32.vlgmr.msra.gmra.mrb[2].mxu0 %v26361_v60  ;;  %v26393_v60 = vld [vmem:[#allocation78_spill] sm:$0xff] }
 0x100   :  { %18447 = vmatpush1.bf16.msra.mxu0 %v26362_v0  ;;  %2231 = vmatprep.mubr.f32.mxu0 %v26038_v17 }
 0x101   :  { %18449 = vmatprep.subr.bf16.mxu0 %v26363_v10  ;;  %18275 = vmatpush3.bf16.msra.mxu1 %v18274_v42  ;;  %v26389_v42 = vld [vmem:[#allocation75_spill] sm:$0xff] }
 0x102   :  { %18276 = vmatprep.subr.bf16.mxu1 %v26147_v34 }
 0x104   :  { %18451 = vmatpush1.bf16.msra.mxu0 %v26364_v31  ;;  %16015 = vmatmul.mubr.f32.vlgmr.msra.gmra.mrb[2].mxu1 %v26366_v11  ;;  %v26390_v11 = vld [vmem:[#allocation76_spill] sm:$0xff] }
 0x105   :  { %18453 = vmatprep.subr.bf16.mxu0 %v26365_v3  ;;  %18278 = vmatpush3.bf16.msra.mxu1 %v26367_v36 }
 0x106   :  { %16049 = vmatprep.mubr.msk.f32.mxu1 %vm21561_vm0, %v26038_v17  ;;  %18279 = vmatprep.subr.bf16.mxu1 %v26147_v34 }
 0x108   :  { %18455 = vmatpush1.bf16.msra.mxu0 %v26368_v57 }
 0x109   :  { %18457 = vmatprep.subr.bf16.mxu0 %v26369_v24  ;;  %18281 = vmatpush3.bf16.msra.mxu1 %v26370_v56 }
 0x10a   :  { %18282 = vmatprep.subr.bf16.mxu1 %v26147_v34 }
 0x10c   :  { %18459 = vmatpush1.bf16.msra.mxu0 %v26371_v29 }
 0x10d   :  { %18461 = vmatprep.subr.bf16.mxu0 %v26372_v37  ;;  %18284 = vmatpush3.bf16.msra.mxu1 %v26373_v23 }
 0x10e   :  { %18285 = vmatprep.subr.bf16.mxu1 %v26147_v34 }
 0x110   :  { %18463 = vmatpush1.bf16.msra.mxu0 %v26374_v32 }
 0x111   :  { %18465 = vmatprep.subr.bf16.mxu0 %v26375_v63  ;;  %18287 = vmatpush3.bf16.msra.mxu1 %v26376_v58 }
 0x112   :  { %18288 = vmatprep.subr.bf16.mxu1 %v26147_v34 }
 0x114   :  { %18467 = vmatpush1.bf16.msra.mxu0 %v26377_v35 }
 0x115   :  { %18469 = vmatprep.subr.bf16.mxu0 %v26378_v45  ;;  %18290 = vmatpush3.bf16.msra.mxu1 %v26379_v18 }
 0x116   :  { %18291 = vmatprep.subr.bf16.mxu1 %v26147_v34 }
 0x118   :  { %18471 = vmatpush1.bf16.msra.mxu0 %v26380_v9 }
 0x119   :  { %18473 = vmatprep.subr.bf16.mxu0 %v26381_v21  ;;  %18293 = vmatpush3.bf16.msra.mxu1 %v26382_v28 }
 0x11a   :  { %18294 = vmatprep.subr.bf16.mxu1 %v26147_v34 }
 0x11c   :  { %18475 = vmatpush1.bf16.msra.mxu0 %v26383_v6 }
 0x11d   :  { %18477 = vmatprep.subr.bf16.mxu0 %v26384_v50  ;;  %18296 = vmatpush3.bf16.msra.mxu1 %v26385_v5  ;;  %v26391_v50 = vld [vmem:[#allocation77_spill] sm:$0xff] }
 0x11e   :  { %18297 = vmatprep.subr.bf16.mxu1 %v26147_v34 }
 0x11f   :  { %2235 = vmatmul.mubr.f32.vlgmr.msra.gmra.mrb[2].mxu0 %v26386_v41  ;;  %v26394_v41 = vld [vmem:[#allocation38_spill] sm:$0xff] }
 0x120   :  { %18479 = vmatpush1.bf16.msra.mxu0 %v26387_v39  ;;  %2401 = vmatprep.mubr.f32.mxu0 %v26038_v17  ;;  %v23217_v39 = vld [vmem:[%s25693_s5 + $0x48] sm:$0xff] }
 0x121   :  { %18481 = vmatprep.subr.bf16.mxu0 %v26388_v33  ;;  %18299 = vmatpush3.bf16.msra.mxu1 %v26389_v42  ;;  %v23212_v33 = vld [vmem:[%s25693_s5 + $0x40] sm:$0xff] }
 0x122   :  { %18300 = vmatprep.subr.bf16.mxu1 %v26147_v34 }
 0x124   :  { %18483 = vmatpush1.bf16.msra.mxu0 %v26390_v11  ;;  %16050 = vmatmul.mubr.f32.vlgmr.msra.gmra.mrb[2].mxu1 %v26392_v49  ;;  %v26395_v11 = vld [vmem:[#allocation45_spill] sm:$0xff]  ;;  %v26398_v49 = vld [vmem:[#allocation52_spill] sm:$0xff] }
 0x125   :  { %18485 = vmatprep.subr.bf16.mxu0 %v26391_v50  ;;  %18302 = vmatpush3.bf16.msra.mxu1 %v22868_v46  ;;  %v26396_v50 = vld [vmem:[#allocation46_spill] sm:$0xff] }
 0x126   :  { %16084 = vmatprep.mubr.msk.f32.mxu1 %vm21561_vm0, %v26038_v17  ;;  %18303 = vmatprep.subr.bf16.mxu1 %v26147_v34  ;;  %v26397_v46 = vld [vmem:[#allocation50_spill] sm:$0xff] }
 0x128   :  { %18487 = vmatpush1.bf16.msra.mxu0 %v26393_v60 }
 0x129   :  { %18489 = vmatprep.subr.bf16.mxu0 %v26394_v41  ;;  %18305 = vmatpush3.bf16.msra.mxu1 %v22885_v20  ;;  %v26399_v41 = vld [vmem:[#allocation54_spill] sm:$0xff]  ;;  %v26400_v20 = vld [vmem:[#allocation79_spill] sm:$0xff] }
 0x12a   :  { %18306 = vmatprep.subr.bf16.mxu1 %v26147_v34 }
 0x12c   :  { %18491 = vmatpush1.bf16.msra.mxu0 %v26395_v11 }
 0x12d   :  { %18493 = vmatprep.subr.bf16.mxu0 %v26396_v50  ;;  %18308 = vmatpush3.bf16.msra.mxu1 %v22893_v52  ;;  %v26401_v50 = vld [vmem:[#allocation80_spill] sm:$0xff]  ;;  %v26402_v52 = vld [vmem:[#allocation81_spill] sm:$0xff] }
 0x12e   :  { %18309 = vmatprep.subr.bf16.mxu1 %v26147_v34 }
 0x130   :  { %18495 = vmatpush1.bf16.msra.mxu0 %v26397_v46  ;;  %v2535_v46 = vld [vmem:[%s25693_s5 + $0x38] sm:$0xff] }
 0x131   :  { %18497 = vmatprep.subr.bf16.mxu0 %v26398_v49  ;;  %18311 = vmatpush3.bf16.msra.mxu1 %v22899_v59  ;;  %v26403_v49 = vld [vmem:[#allocation82_spill] sm:$0xff]  ;;  %v112_v59 = vlaneseq  ;;  %v2566_v60 = vand.u32 4294901760, %v2535_v46 }
 0x132   :  { %18312 = vmatprep.subr.bf16.mxu1 %v26147_v34 }
 0x134   :  { %18499 = vmatpush1.bf16.msra.mxu0 %v26399_v41  ;;  %v2534_v41 = vld [vmem:[%s25693_s5 + $0x30] sm:$0xff] }
 0x135   :  { %18501 = vmatprep.subr.bf16.mxu0 %v26400_v20  ;;  %18314 = vmatpush3.bf16.msra.mxu1 %v22905_v25  ;;  %v2563_v11 = vand.u32 4294901760, %v2534_v41 }
 0x136   :  { %18315 = vmatprep.subr.bf16.mxu1 %v26147_v34 }
 0x138   :  { %18503 = vmatpush1.bf16.msra.mxu0 %v26401_v50 }
 0x139   :  { %18505 = vmatprep.subr.bf16.mxu0 %v26402_v52  ;;  %18317 = vmatpush3.bf16.msra.mxu1 %v22917_v2  ;;  %v23153_v2 = vld [vmem:[%s25691_s3] sm:$0x7] }
 0x13a   :  { %18318 = vmatprep.subr.bf16.mxu1 %v26147_v34 }
 0x13c   :  { %18507 = vmatpush1.bf16.msra.mxu0 %v26403_v49  ;;  %v2533_v49 = vld [vmem:[%s25693_s5 + $0x28] sm:$0xff] }
 0x13d   :  { %18509 = vmatprep.subr.bf16.mxu0 %v26360_v54  ;;  %18320 = vmatpush3.bf16.msra.mxu1 %v22985_v55  ;;  %v2560_v50 = vand.u32 4294901760, %v2533_v49 }
 0x13e   :  { %18321 = vmatprep.subr.bf16.mxu1 %v26147_v34 }
 0x13f   :  { %2403 = vmatmul.mubr.f32.vlgmr.msra.gmra.mrb[2].mxu0 %v26323_v19 }
 0x140   :  { %18511 = vmatpush1.bf16.msra.mxu0 %v26362_v0  ;;  %2505 = vmatprep.mubr.f32.mxu0 %v26038_v17 }
 0x141   :  { %18513 = vmatprep.subr.bf16.mxu0 %v26363_v10  ;;  %18323 = vmatpush3.bf16.msra.mxu1 %v23004_v22 }
 0x142   :  { %18324 = vmatprep.subr.bf16.mxu1 %v26147_v34 }
 0x144   :  { %18515 = vmatpush1.bf16.msra.mxu0 %v26364_v31  ;;  %16085 = vmatmul.mubr.f32.vlgmr.msra.gmra.mrb[2].mxu1 %v26345_v8 }
 0x145   :  { %18517 = vmatprep.subr.bf16.mxu0 %v26365_v3  ;;  %18326 = vmatpush3.bf16.msra.mxu1 %v26367_v36 }
 0x146   :  { %16119 = vmatprep.mubr.msk.f32.mxu1 %vm21561_vm0, %v26038_v17  ;;  %18327 = vmatprep.subr.bf16.mxu1 %v26147_v34 }
 0x148   :  { %18519 = vmatpush1.bf16.msra.mxu0 %v26368_v57 }
 0x149   :  { %18521 = vmatprep.subr.bf16.mxu0 %v26369_v24  ;;  %18329 = vmatpush3.bf16.msra.mxu1 %v26370_v56 }
 0x14a   :  { %18330 = vmatprep.subr.bf16.mxu1 %v26147_v34 }
 0x14c   :  { %18523 = vmatpush1.bf16.msra.mxu0 %v26371_v29 }
 0x14d   :  { %18525 = vmatprep.subr.bf16.mxu0 %v26372_v37  ;;  %18332 = vmatpush3.bf16.msra.mxu1 %v26373_v23 }
 0x14e   :  { %18333 = vmatprep.subr.bf16.mxu1 %v26147_v34 }
 0x150   :  { %18527 = vmatpush1.bf16.msra.mxu0 %v26374_v32 }
 0x151   :  { %18529 = vmatprep.subr.bf16.mxu0 %v26375_v63  ;;  %18335 = vmatpush3.bf16.msra.mxu1 %v26376_v58 }
 0x152   :  { %18336 = vmatprep.subr.bf16.mxu1 %v26147_v34 }
 0x154   :  { %18531 = vmatpush1.bf16.msra.mxu0 %v26377_v35 }
 0x155   :  { %18533 = vmatprep.subr.bf16.mxu0 %v26378_v45  ;;  %18338 = vmatpush3.bf16.msra.mxu1 %v26379_v18 }
 0x156   :  { %18339 = vmatprep.subr.bf16.mxu1 %v26147_v34 }
 0x158   :  { %18535 = vmatpush1.bf16.msra.mxu0 %v26380_v9 }
 0x159   :  { %18537 = vmatprep.subr.bf16.mxu0 %v26381_v21  ;;  %18341 = vmatpush3.bf16.msra.mxu1 %v26382_v28 }
 0x15a   :  { %18342 = vmatprep.subr.bf16.mxu1 %v26147_v34 }
 0x15c   :  { %18539 = vmatpush1.bf16.msra.mxu0 %v26383_v6 }
 0x15d   :  { %18685 = vmatprep.subr.bf16.mxu0 %v26360_v54  ;;  %18344 = vmatpush3.bf16.msra.mxu1 %v26385_v5 }
 0x15e   :  { %18345 = vmatprep.subr.bf16.mxu1 %v26147_v34 }
 0x15f   :  { %2507 = vmatmul.mubr.f32.vlgmr.msra.gmra.mrb[2].mxu0 %v26323_v19  ;;  %v23143_v19 = vshrl.u32 %v112_v59, 7  ;;  %v26408_v59 = vld [vmem:[#allocation48_spill] sm:$0xff] }
 0x160   :  { %18687 = vmatpush1.bf16.msra.mxu0 %v26362_v0  ;;  %3294 = vmatprep.mubr.f32.mxu0 %v26038_v17  ;;  %v599_v36 = vpop.f32.mrb[0].mxu1  ;;  %v977_v56 = vpop.f32.mrb[0].mxu0  ;;  %v23267_v0 = vld [vmem:[%s25693_s5 + $0x78] sm:$0xff] }
 0x161   :  { %18689 = vmatprep.subr.bf16.mxu0 %v26363_v10  ;;  %18347 = vmatpush3.bf16.msra.mxu1 %v26389_v42  ;;  %26404 = vst [vmem:[#allocation73_spill] sm:$0xff] %v23143_v19  ;;  %v23148_v25 = vsub.s32 0, %v23143_v19  ;;  %v601_v58 = vpop.f32.mrb[1].mxu1  ;;  %v979_v18 = vpop.f32.mrb[1].mxu0  ;;  %v23262_v10 = vld [vmem:[%s25693_s5 + $0x70] sm:$0xff]  ;;  %v25906_v54 = vand.u32 4294901760, %v23267_v0 }
 0x162   :  { %18540 = vmatprep.subr.bf16.mxu1 %v26147_v34 }
 0x163   :  { %26405 = vst [vmem:[#allocation39_spill] sm:$0xff] %v23148_v25  ;;  %v115_v55 = vrot.slane %v23153_v2, %v23148_v25 }
 0x164   :  { %18691 = vmatpush1.bf16.msra.mxu0 %v26364_v31  ;;  %16120 = vmatmul.mubr.f32.vlgmr.msra.gmra.mrb[2].mxu1 %v26345_v8  ;;  %v118_v8 = vsub.s32 1, %v23143_v19 }
 0x165   :  { %18693 = vmatprep.subr.bf16.mxu0 %v26365_v3  ;;  %16154 = vmatprep.mubr.msk.f32.mxu1 %vm21561_vm0, %v26038_v17  ;;  %v21180_v23 = vadd.f32 %v599_v36, %v115_v55  ;;  %v2529_v55 = vld [vmem:[%s25693_s5 + $0x8] sm:$0xff] }
 0x166   :  { %v119_v22 = vrot.slane %v23153_v2, %v118_v8  ;;  %v2528_v8 = vld [vmem:[%s25693_s5] sm:$0xff]  ;;  %v2548_v36 = vand.u32 4294901760, %v2529_v55 }
 0x167   :  { %v23164_v5 = vadd.f32 %v21180_v23, %v977_v56  ;;  %v2530_v23 = vld [vmem:[%s25693_s5 + $0x10] sm:$0xff] }
 0x168   :  { %18695 = vmatpush1.bf16.msra.mxu0 %v26368_v57  ;;  %v21182_v28 = vadd.f32 %v601_v58, %v119_v22  ;;  %v2545_v22 = vand.u32 4294901760, %v2528_v8  ;;  %v2531_v58 = vld [vmem:[%s25693_s5 + $0x18] sm:$0xff]  ;;  %v23281_v53 = vsub.f32 %v2529_v55, %v2548_v36 }
 0x169   :  { %18697 = vmatprep.subr.bf16.mxu0 %v26369_v24  ;;  %26406 = vst [vmem:[#allocation35_spill] sm:$0xff] %v23164_v5  ;;  %v23247_v24 = vld [vmem:[%s25693_s5 + $0x68] sm:$0xff] }
 0x16a   :  { %v23167_v42 = vadd.f32 %v21182_v28, %v979_v18  ;;  %v23179_v56 = vpack.c.bf16 %v2548_v36, %v2545_v22  ;;  %v2551_v18 = vand.u32 4294901760, %v2530_v23  ;;  %v2554_v28 = vand.u32 4294901760, %v2531_v58 }
 0x16b   :  { %v25904_v31 = vand.u32 4294901760, %v23247_v24  ;;  %v23279_v44 = vsub.f32 %v2528_v8, %v2545_v22 }
 0x16c   :  { %18699 = vmatpush1.bf16.msra.mxu0 %v26371_v29  ;;  %26407 = vst [vmem:[#allocation53_spill] sm:$0xff] %v23167_v42  ;;  %18542 = vmatpush3.bf16.msra.mxu1 %v23179_v56  ;;  %v23189_v25 = vpack.c.bf16 %v2554_v28, %v2551_v18  ;;  %v23242_v29 = vld [vmem:[%s25693_s5 + $0x60] sm:$0xff]  ;;  %v23299_v22 = vsub.f32 %v2530_v23, %v2551_v18 }
 0x16d   :  { %18701 = vmatprep.subr.bf16.mxu0 %v26372_v37  ;;  %18543 = vmatprep.subr.bf16.mxu1 %v26147_v34  ;;  %v25905_v3 = vand.u32 4294901760, %v23242_v29  ;;  %v23301_v36 = vsub.f32 %v2531_v58, %v2554_v28  ;;  %v23317_v18 = vsub.f32 %v2533_v49, %v2560_v50 }
 0x16e   :  { %v25927_v27 = vand.u32 4294901760, %v23299_v22 }
 0x16f   :  { %v25916_v16 = vand.u32 4294901760, %v23301_v36 }
 0x170   :  { %18703 = vmatpush1.bf16.msra.mxu0 %v26374_v32  ;;  %18545 = vmatpush3.bf16.msra.mxu1 %v23189_v25 }
 0x171   :  { %18705 = vmatprep.subr.bf16.mxu0 %v26375_v63  ;;  %18546 = vmatprep.subr.bf16.mxu1 %v26147_v34  ;;  %v2660_v23 = vsub.f32 %v23301_v36, %v25916_v16 }
 0x174   :  { %18707 = vmatpush1.bf16.msra.mxu0 %v26377_v35  ;;  %v23231_v35 = vld [vmem:[%s25693_s5 + $0x58] sm:$0xff] }
 0x175   :  { %18709 = vmatprep.subr.bf16.mxu0 %v26378_v45  ;;  %v2572_v45 = vand.u32 4294901760, %v23217_v39  ;;  %v25895_v37 = vand.u32 4294901760, %v23231_v35 }
 0x178   :  { %18711 = vmatpush1.bf16.msra.mxu0 %v26380_v9  ;;  %v2569_v9 = vand.u32 4294901760, %v23212_v33 }
 0x179   :  { %18713 = vmatprep.subr.bf16.mxu0 %v26381_v21  ;;  %v23224_v21 = vpack.c.bf16 %v2566_v60, %v2563_v11 }
 0x17a   :  { %v23234_v63 = vpack.c.bf16 %v2572_v45, %v2569_v9 }
 0x17c   :  { %18715 = vmatpush1.bf16.msra.mxu0 %v26383_v6  ;;  %v23222_v6 = vld [vmem:[%s25693_s5 + $0x50] sm:$0xff] }
 0x17d   :  { %18717 = vmatprep.subr.bf16.mxu0 %v26408_v59  ;;  %v2532_v59 = vld [vmem:[%s25693_s5 + $0x20] sm:$0xff]  ;;  %v25896_v32 = vand.u32 4294901760, %v23222_v6 }
 0x17e   :  { %v2557_v52 = vand.u32 4294901760, %v2532_v59 }
 0x17f   :  { %v23254_v57 = vpack.c.bf16 %v25895_v37, %v25896_v32  ;;  %v23274_v37 = vpack.c.bf16 %v25904_v31, %v25905_v3  ;;  %v25907_v32 = vand.u32 4294901760, %v23262_v10  ;;  %v25915_v31 = vand.u32 4294901760, %v23279_v44 }
 0x180   :  { %v23199_v20 = vpack.c.bf16 %v2560_v50, %v2557_v52  ;;  %v25914_v3 = vand.u32 4294901760, %v23281_v53  ;;  %v23315_v58 = vsub.f32 %v2532_v59, %v2557_v52  ;;  %v23329_v52 = vsub.f32 %v2534_v41, %v2563_v11 }
 0x181   :  { %v23288_v43 = vpack.c.bf16 %v25906_v54, %v25907_v32  ;;  %v2639_v8 = vsub.f32 %v23279_v44, %v25915_v31  ;;  %v25921_v31 = vand.u32 4294901760, %v23317_v18  ;;  %v23331_v50 = vsub.f32 %v2535_v46, %v2566_v60 }
 0x182   :  { %18548 = vmatpush3.bf16.msra.mxu1 %v23199_v20  ;;  %v2646_v55 = vsub.f32 %v23281_v53, %v25914_v3  ;;  %v2653_v3 = vsub.f32 %v23299_v22, %v25927_v27  ;;  %v25920_v59 = vand.u32 4294901760, %v23329_v52  ;;  %v23344_v11 = vsub.f32 %v23217_v39, %v2572_v45 }
 0x183   :  { %18549 = vmatprep.subr.bf16.mxu1 %v26147_v34  ;;  %v2640_v54 = vand.u32 4294901760, %v2639_v8  ;;  %v2661_v8 = vand.u32 4294901760, %v2660_v23  ;;  %v2674_v16 = vsub.f32 %v23317_v18, %v25921_v31  ;;  %v25918_v23 = vand.u32 4294901760, %v23331_v50 }
 0x184   :  { %v2647_v32 = vand.u32 4294901760, %v2646_v55  ;;  %v2654_v28 = vand.u32 4294901760, %v2653_v3  ;;  %v25917_v55 = vand.u32 4294901760, %v23315_v58  ;;  %v25926_v46 = vand.u32 4294901760, %v23344_v11 }
 0x185   :  { %v2675_v49 = vand.u32 4294901760, %v2674_v16  ;;  %v2688_v16 = vsub.f32 %v23331_v50, %v25918_v23  ;;  %v26409_v45 = vand.u32 4294901760, %v23222_v6 }
 0x186   :  { %18551 = vmatpush3.bf16.msra.mxu1 %v23224_v21  ;;  %v23307_v13 = vpack.c.bf16 %v2647_v32, %v2640_v54  ;;  %v23321_v54 = vpack.c.bf16 %v2661_v8, %v2654_v28  ;;  %v2667_v32 = vsub.f32 %v23315_v58, %v25917_v55  ;;  %v2681_v8 = vsub.f32 %v23329_v52, %v25920_v59 }
 0x187   :  { %18552 = vmatprep.subr.bf16.mxu1 %v26147_v34  ;;  %v23341_v55 = vsub.f32 %v23212_v33, %v2569_v9  ;;  %v2702_v9 = vsub.f32 %v23344_v11, %v25926_v46  ;;  %v23360_v39 = vsub.f32 %v23222_v6, %v26409_v45  ;;  %v26410_v33 = vand.u32 4294901760, %v23231_v35 }
 0x188   :  { %v2668_v3 = vand.u32 4294901760, %v2667_v32  ;;  %v2682_v60 = vand.u32 4294901760, %v2681_v8  ;;  %v2689_v32 = vand.u32 4294901760, %v2688_v16 }
 0x189   :  { %v25919_v41 = vand.u32 4294901760, %v23341_v55  ;;  %v2703_v23 = vand.u32 4294901760, %v2702_v9 }
 0x18a   :  { %18554 = vmatpush3.bf16.msra.mxu1 %v23234_v63  ;;  %v23335_v28 = vpack.c.bf16 %v2675_v49, %v2668_v3  ;;  %v23365_v49 = vsub.f32 %v23231_v35, %v26410_v33  ;;  %v23367_v8 = vpack.c.bf16 %v2689_v32, %v2682_v60  ;;  %v26411_v35 = vand.u32 4294901760, %v23242_v29 }
 0x18b   :  { %18555 = vmatprep.subr.bf16.mxu1 %v26147_v34  ;;  %v2695_v3 = vsub.f32 %v23341_v55, %v25919_v41  ;;  %v25922_v41 = vand.u32 4294901760, %v23360_v39  ;;  %v26412_v32 = vand.u32 4294901760, %v23247_v24 }
 0x18c   :  { %v25923_v59 = vand.u32 4294901760, %v23365_v49  ;;  %v23382_v60 = vsub.f32 %v23242_v29, %v26411_v35  ;;  %v26413_v29 = vand.u32 4294901760, %v23262_v10 }
 0x18d   :  { %v2696_v16 = vand.u32 4294901760, %v2695_v3  ;;  %v2709_v6 = vsub.f32 %v23360_v39, %v25922_v41  ;;  %v23387_v3 = vsub.f32 %v23247_v24, %v26412_v32 }
 0x18e   :  { %18557 = vmatpush3.bf16.msra.mxu1 %v23254_v57  ;;  %v2716_v45 = vsub.f32 %v23365_v49, %v25923_v59  ;;  %v25924_v33 = vand.u32 4294901760, %v23382_v60  ;;  %v23399_v35 = vsub.f32 %v23262_v10, %v26413_v29 }
 0x18f   :  { %18558 = vmatprep.subr.bf16.mxu1 %v26147_v34  ;;  %v23371_v31 = vpack.c.bf16 %v2703_v23, %v2696_v16  ;;  %v2710_v23 = vand.u32 4294901760, %v2709_v6  ;;  %v25925_v16 = vand.u32 4294901760, %v23387_v3  ;;  %v26414_v6 = vand.u32 4294901760, %v23267_v0 }
 0x190   :  { %v2717_v9 = vand.u32 4294901760, %v2716_v45  ;;  %v2723_v59 = vsub.f32 %v23382_v60, %v25924_v33 }
 0x191   :  { %v2730_v24 = vsub.f32 %v23387_v3, %v25925_v16  ;;  %v23407_v45 = vsub.f32 %v23267_v0, %v26414_v6  ;;  %v23431_v6 = vpack.c.bf16 %v23317_v18, %v23315_v58 }
 0x192   :  { %18560 = vmatpush3.bf16.msra.mxu1 %v23274_v37  ;;  %v23391_v41 = vpack.c.bf16 %v2717_v9, %v2710_v23  ;;  %v2724_v32 = vand.u32 4294901760, %v2723_v59  ;;  %v25929_v23 = vand.u32 4294901760, %v23399_v35  ;;  %v23423_v59 = vpack.c.bf16 %v23281_v53, %v23279_v44 }
 0x193   :  { %18561 = vmatprep.subr.bf16.mxu1 %v26147_v34  ;;  %v2731_v9 = vand.u32 4294901760, %v2730_v24  ;;  %v25928_v33 = vand.u32 4294901760, %v23407_v45  ;;  %v23427_v24 = vpack.c.bf16 %v23301_v36, %v23299_v22 }
 0x194   :  { %v2737_v10 = vsub.f32 %v23399_v35, %v25929_v23 }
 0x195   :  { %v23414_v29 = vpack.c.bf16 %v2731_v9, %v2724_v32  ;;  %v2744_v16 = vsub.f32 %v23407_v45, %v25928_v33  ;;  %v23435_v32 = vpack.c.bf16 %v23331_v50, %v23329_v52  ;;  %v23451_v9 = vpack.c.bf16 %v23407_v45, %v23399_v35 }
 0x196   :  { %18563 = vmatpush3.bf16.msra.mxu1 %v23288_v43  ;;  %v2738_v46 = vand.u32 4294901760, %v2737_v10 }
 0x197   :  { %18564 = vmatprep.subr.bf16.mxu1 %v26147_v34  ;;  %v2745_v27 = vand.u32 4294901760, %v2744_v16  ;;  %v23447_v16 = vpack.c.bf16 %v23387_v3, %v23382_v60 }
 0x199   :  { %v23419_v0 = vpack.c.bf16 %v2745_v27, %v2738_v46  ;;  %v23439_v27 = vpack.c.bf16 %v23344_v11, %v23341_v55  ;;  %v23443_v46 = vpack.c.bf16 %v23365_v49, %v23360_v39 }
 0x232   :  { %v23453_v10 = vpop.f32.mrb[2].mxu0 }
 0x233   :  { %v2510_v33 = vpop.f32.mrb[3].mxu0 }
 0x234   :  { %v2520_v23 = vadd.f32 %v23167_v42, %v2510_v33 }
 0x236   :  { %v14876_v1 = vmul.f32 -1.442695, %v2520_v23 }
 0x237   :  { %v23456_v61 = vpop.f32.mrb[2].mxu1 }
 0x238   :  { %21376 = vpow2.f32 %v14876_v1  ;;  %v16121_v30 = vpop.f32.mrb[3].mxu1 }
 0x239   :  { %v26418_v30 = vand.u32 4294901760, %v23301_v36  ;;  %v26422_v36 = vand.u32 4294901760, %v23331_v50  ;;  %v26426_v50 = vand.u32 4294901760, %v23365_v49  ;;  %v26431_v49 = vand.u32 4294901760, %v23407_v45 }
 0x242   :  { %v21377_v12 = vpop.eup %21376 }
 0x243   :  { %v2524_v14 = vadd.f32 1.0, %v21377_v12 }
 0x245   :  { %21378 = vrcp.f32 %v2524_v14  ;;  %v26417_v14 = vand.u32 4294901760, %v23299_v22  ;;  %v26421_v22 = vand.u32 4294901760, %v23329_v52  ;;  %v26425_v52 = vand.u32 4294901760, %v23360_v39 }
 0x246   :  { %v26430_v39 = vand.u32 4294901760, %v23399_v35 }
 0x24f   :  { %v21379_v15 = vpop.eup %21378 }
 0x250   :  { %v2527_v26 = vmul.f32 %v23461_v48, %v21379_v15  ;;  %v26415_v15 = vand.u32 4294901760, %v23279_v44  ;;  %v26420_v44 = vand.u32 4294901760, %v23317_v18  ;;  %v26424_v18 = vand.u32 4294901760, %v23344_v11 }
 0x251   :  { %v26428_v11 = vand.u32 4294901760, %v23387_v3 }
 0x252   :  { %v23464_v4 = vand.u32 4294901760, %v2527_v26 }
 0x254   :  { %v2626_v33 = vsub.f32 %v2527_v26, %v23464_v4  ;;  %v26416_v26 = vand.u32 4294901760, %v23281_v53  ;;  %v26419_v53 = vand.u32 4294901760, %v23315_v58  ;;  %v26423_v58 = vand.u32 4294901760, %v23341_v55 }
 0x255   :  { %v26427_v55 = vand.u32 4294901760, %v23382_v60 }
 0x256   :  { %v2627_v23 = vand.u32 4294901760, %v2626_v33  ;;  %v23525_v12 = vpack.c.bf16 %v26416_v26, %v26415_v15  ;;  %v23567_v15 = vpack.c.bf16 %v26426_v50, %v26425_v52 }
 0x257   :  { %v23575_v26 = vpack.c.bf16 %v26428_v11, %v26427_v55  ;;  %v2513_v55 = vadd.f32 %v23164_v5, %v23453_v10  ;;  %v26487_v5 = vld [vmem:[#allocation79_spill] sm:$0xff] }
 0x258   :  { %v2628_v1 = vsub.f32 %v2626_v33, %v2627_v23 }
 0x259   :  { %26429 = vst [vmem:[#allocation55_spill] sm:$0xff] %v23575_v26  ;;  %v14875_v11 = vmul.f32 -1.442695, %v2513_v55  ;;  %v26434_v55 = vld [vmem:[#allocation49_spill] sm:$0xff] }
 0x25a   :  { %v2629_v42 = vand.u32 4294901760, %v2628_v1  ;;  %v23559_v1 = vpack.c.bf16 %v26424_v18, %v26423_v58 }
 0x25b   :  { %21380 = vpow2.f32 %v14875_v11  ;;  %v26435_v11 = vld [vmem:[#allocation51_spill] sm:$0xff] }
 0x25c   :  { %16155 = vmatmul.mubr.f32.vlgmr.msra.gmra.mrb[4].mxu1 %v2629_v42  ;;  %v23533_v42 = vpack.c.bf16 %v26418_v30, %v26417_v14  ;;  %v23583_v14 = vpack.c.bf16 %v26431_v49, %v26430_v39  ;;  %v122_v39 = vsub.s32 2, %v23143_v19 }
 0x25d   :  { %18566 = vmatpush3.bf16.msra.mxu1 %v23307_v13  ;;  %16189 = vmatprep.mubr.msk.f32.mxu1 %vm21561_vm0, %v26038_v17 }
 0x25e   :  { %18567 = vmatprep.subr.bf16.mxu1 %v26147_v34  ;;  %26432 = vst [vmem:[#allocation56_spill] sm:$0xff] %v23583_v14  ;;  %v123_v49 = vrot.slane %v23153_v2, %v122_v39  ;;  %v26436_v39 = vld [vmem:[#allocation57_spill] sm:$0xff] }
 0x261   :  { %18569 = vmatpush3.bf16.msra.mxu1 %v23321_v54 }
 0x262   :  { %18570 = vmatprep.subr.bf16.mxu1 %v26147_v34 }
 0x265   :  { %18572 = vmatpush3.bf16.msra.mxu1 %v23335_v28 }
 0x266   :  { %18573 = vmatprep.subr.bf16.mxu1 %v26147_v34 }
 0x269   :  { %18575 = vmatpush3.bf16.msra.mxu1 %v23367_v8 }
 0x26a   :  { %18576 = vmatprep.subr.bf16.mxu1 %v26147_v34 }
 0x26d   :  { %18578 = vmatpush3.bf16.msra.mxu1 %v23371_v31 }
 0x26e   :  { %18579 = vmatprep.subr.bf16.mxu1 %v26147_v34 }
 0x271   :  { %18581 = vmatpush3.bf16.msra.mxu1 %v23391_v41 }
 0x272   :  { %18582 = vmatprep.subr.bf16.mxu1 %v26147_v34 }
 0x275   :  { %18584 = vmatpush3.bf16.msra.mxu1 %v23414_v29 }
 0x276   :  { %18585 = vmatprep.subr.bf16.mxu1 %v26147_v34 }
 0x279   :  { %18587 = vmatpush3.bf16.msra.mxu1 %v23419_v0 }
 0x27a   :  { %18588 = vmatprep.subr.bf16.mxu1 %v26147_v34 }
 0x27c   :  { %16190 = vmatmul.mubr.f32.vlgmr.msra.gmra.mrb[6].mxu1 %v23464_v4 }
 0x27d   :  { %18590 = vmatpush3.bf16.msra.mxu1 %v23423_v59  ;;  %16224 = vmatprep.mubr.msk.f32.mxu1 %vm21561_vm0, %v26038_v17 }
 0x27e   :  { %18591 = vmatprep.subr.bf16.mxu1 %v26147_v34 }
 0x281   :  { %18593 = vmatpush3.bf16.msra.mxu1 %v23427_v24 }
 0x282   :  { %18594 = vmatprep.subr.bf16.mxu1 %v26147_v34 }
 0x285   :  { %18596 = vmatpush3.bf16.msra.mxu1 %v23431_v6 }
 0x286   :  { %18597 = vmatprep.subr.bf16.mxu1 %v26147_v34 }
 0x289   :  { %18599 = vmatpush3.bf16.msra.mxu1 %v23435_v32 }
 0x28a   :  { %18600 = vmatprep.subr.bf16.mxu1 %v26147_v34 }
 0x28d   :  { %18602 = vmatpush3.bf16.msra.mxu1 %v23439_v27 }
 0x28e   :  { %18603 = vmatprep.subr.bf16.mxu1 %v26147_v34 }
 0x291   :  { %18605 = vmatpush3.bf16.msra.mxu1 %v23443_v46 }
 0x292   :  { %18606 = vmatprep.subr.bf16.mxu1 %v26147_v34 }
 0x295   :  { %18608 = vmatpush3.bf16.msra.mxu1 %v23447_v16 }
 0x296   :  { %18609 = vmatprep.subr.bf16.mxu1 %v26147_v34 }
 0x299   :  { %18611 = vmatpush3.bf16.msra.mxu1 %v23451_v9 }
 0x29a   :  { %18612 = vmatprep.subr.bf16.mxu1 %v26147_v34 }
 0x29c   :  { %16225 = vmatmul.mubr.f32.vlgmr.msra.gmra.mrb[8].mxu1 %v2626_v33  ;;  %v23543_v33 = vpack.c.bf16 %v26420_v44, %v26419_v53 }
 0x29d   :  { %18614 = vmatpush3.bf16.msra.mxu1 %v23179_v56  ;;  %16259 = vmatprep.mubr.msk.f32.mxu1 %vm21561_vm0, %v26038_v17 }
 0x29e   :  { %18615 = vmatprep.subr.bf16.mxu1 %v26147_v34 }
 0x2a1   :  { %18617 = vmatpush3.bf16.msra.mxu1 %v23189_v25 }
 0x2a2   :  { %18618 = vmatprep.subr.bf16.mxu1 %v26147_v34 }
 0x2a5   :  { %18620 = vmatpush3.bf16.msra.mxu1 %v23199_v20 }
 0x2a6   :  { %18621 = vmatprep.subr.bf16.mxu1 %v26147_v34 }
 0x2a9   :  { %18623 = vmatpush3.bf16.msra.mxu1 %v23224_v21 }
 0x2aa   :  { %18624 = vmatprep.subr.bf16.mxu1 %v26147_v34 }
 0x2ad   :  { %18626 = vmatpush3.bf16.msra.mxu1 %v23234_v63 }
 0x2ae   :  { %18627 = vmatprep.subr.bf16.mxu1 %v26147_v34 }
 0x2b1   :  { %18629 = vmatpush3.bf16.msra.mxu1 %v23254_v57 }
 0x2b2   :  { %18630 = vmatprep.subr.bf16.mxu1 %v26147_v34 }
 0x2b5   :  { %18632 = vmatpush3.bf16.msra.mxu1 %v23274_v37 }
 0x2b6   :  { %18633 = vmatprep.subr.bf16.mxu1 %v26147_v34 }
 0x2b9   :  { %18635 = vmatpush3.bf16.msra.mxu1 %v23288_v43 }
 0x2ba   :  { %18636 = vmatprep.subr.bf16.mxu1 %v26147_v34 }
 0x2bc   :  { %16260 = vmatmul.mubr.f32.vlgmr.msra.gmra.mrb[10].mxu1 %v2627_v23  ;;  %v23551_v23 = vpack.c.bf16 %v26422_v36, %v26421_v22 }
 0x2bd   :  { %18638 = vmatpush3.bf16.msra.mxu1 %v23525_v12  ;;  %16294 = vmatprep.mubr.msk.f32.mxu1 %vm21561_vm0, %v26038_v17 }
 0x2be   :  { %18639 = vmatprep.subr.bf16.mxu1 %v26147_v34 }
 0x2c1   :  { %18641 = vmatpush3.bf16.msra.mxu1 %v23533_v42 }
 0x2c2   :  { %18642 = vmatprep.subr.bf16.mxu1 %v26147_v34 }
 0x2c5   :  { %18644 = vmatpush3.bf16.msra.mxu1 %v23543_v33 }
 0x2c6   :  { %18645 = vmatprep.subr.bf16.mxu1 %v26147_v34 }
 0x2c9   :  { %18647 = vmatpush3.bf16.msra.mxu1 %v23551_v23 }
 0x2ca   :  { %18648 = vmatprep.subr.bf16.mxu1 %v26147_v34 }
 0x2cd   :  { %18650 = vmatpush3.bf16.msra.mxu1 %v23559_v1 }
 0x2ce   :  { %18651 = vmatprep.subr.bf16.mxu1 %v26147_v34 }
 0x2d1   :  { %18653 = vmatpush3.bf16.msra.mxu1 %v23567_v15 }
 0x2d2   :  { %18654 = vmatprep.subr.bf16.mxu1 %v26147_v34 }
 0x2d5   :  { %18656 = vmatpush3.bf16.msra.mxu1 %v23575_v26 }
 0x2d6   :  { %18657 = vmatprep.subr.bf16.mxu1 %v26147_v34 }
 0x2d9   :  { %18659 = vmatpush3.bf16.msra.mxu1 %v23583_v14 }
 0x2da   :  { %18660 = vmatprep.subr.bf16.mxu1 %v26147_v34 }
 0x2dc   :  { %16295 = vmatmul.mubr.f32.vlgmr.msra.gmra.mrb[12].mxu1 %v23464_v4 }
 0x2dd   :  { %18662 = vmatpush3.bf16.msra.mxu1 %v23179_v56  ;;  %16329 = vmatprep.mubr.msk.f32.mxu1 %vm21561_vm0, %v26038_v17 }
 0x2de   :  { %18663 = vmatprep.subr.bf16.mxu1 %v26147_v34 }
 0x2e1   :  { %18665 = vmatpush3.bf16.msra.mxu1 %v23189_v25 }
 0x2e2   :  { %18666 = vmatprep.subr.bf16.mxu1 %v26147_v34 }
 0x2e5   :  { %18668 = vmatpush3.bf16.msra.mxu1 %v23199_v20 }
 0x2e6   :  { %18669 = vmatprep.subr.bf16.mxu1 %v26147_v34 }
 0x2e9   :  { %18671 = vmatpush3.bf16.msra.mxu1 %v23224_v21 }
 0x2ea   :  { %18672 = vmatprep.subr.bf16.mxu1 %v26147_v34 }
 0x2ed   :  { %18674 = vmatpush3.bf16.msra.mxu1 %v23234_v63 }
 0x2ee   :  { %18675 = vmatprep.subr.bf16.mxu1 %v26147_v34 }
 0x2f1   :  { %18677 = vmatpush3.bf16.msra.mxu1 %v23254_v57 }
 0x2f2   :  { %18678 = vmatprep.subr.bf16.mxu1 %v26147_v34 }
 0x2f5   :  { %18680 = vmatpush3.bf16.msra.mxu1 %v23274_v37 }
 0x2f6   :  { %18681 = vmatprep.subr.bf16.mxu1 %v26147_v34 }
 0x2f9   :  { %18683 = vmatpush3.bf16.msra.mxu1 %v23288_v43 }
 0x2fa   :  { %18876 = vmatprep.subr.bf16.mxu1 %v26147_v34 }
 0x2fc   :  { %16330 = vmatmul.mubr.f32.vlgmr.msra.gmra.mrb[14].mxu1 %v23464_v4 }
 0x2fd   :  { %18878 = vmatpush3.bf16.msra.mxu1 %v23179_v56  ;;  %16364 = vmatprep.mubr.msk.f32.mxu1 %vm21561_vm0, %v26038_v17 }
 0x2fe   :  { %18879 = vmatprep.subr.bf16.mxu1 %v26147_v34 }
 0x301   :  { %18881 = vmatpush3.bf16.msra.mxu1 %v23189_v25 }
 0x302   :  { %18882 = vmatprep.subr.bf16.mxu1 %v26147_v34 }
 0x305   :  { %18884 = vmatpush3.bf16.msra.mxu1 %v23199_v20 }
 0x306   :  { %18885 = vmatprep.subr.bf16.mxu1 %v26147_v34 }
 0x309   :  { %18887 = vmatpush3.bf16.msra.mxu1 %v23224_v21 }
 0x30a   :  { %18888 = vmatprep.subr.bf16.mxu1 %v26147_v34 }
 0x30d   :  { %18890 = vmatpush3.bf16.msra.mxu1 %v23234_v63 }
 0x30e   :  { %18891 = vmatprep.subr.bf16.mxu1 %v26147_v34 }
 0x311   :  { %18893 = vmatpush3.bf16.msra.mxu1 %v23254_v57 }
 0x312   :  { %18894 = vmatprep.subr.bf16.mxu1 %v26147_v34 }
 0x315   :  { %18896 = vmatpush3.bf16.msra.mxu1 %v23274_v37 }
 0x316   :  { %18897 = vmatprep.subr.bf16.mxu1 %v26147_v34 }
 0x319   :  { %18899 = vmatpush3.bf16.msra.mxu1 %v23288_v43 }
 0x31a   :  { %18900 = vmatprep.subr.bf16.mxu1 %v26147_v34 }
 0x32f   :  { %v2631_v4 = vpop.f32.mrb[4].mxu1 }
 0x330   :  { %v16156_v60 = vpop.f32.mrb[5].mxu1 }
 0x34f   :  { %v2782_v3 = vpop.f32.mrb[6].mxu1 }
 0x350   :  { %v2783_v35 = vadd.f32 %v2782_v3, %v2631_v4  ;;  %v16191_v45 = vpop.f32.mrb[7].mxu1  ;;  %v21381_v4 = vpop.eup %21380  ;;  %v23631_v3 = vadd.f32 %v23456_v61, %v123_v49  ;;  %v26438_v49 = vld [vmem:[#allocation59_spill] sm:$0xff] }
 0x352   :  { %26433 = vst [vmem:[#allocation60_spill] sm:$0xff] %v23631_v3 }
 0x36f   :  { %v2886_v30 = vpop.f32.mrb[8].mxu1 }
 0x370   :  { %v2887_v53 = vadd.f32 %v2886_v30, %v2783_v35  ;;  %v16226_v44 = vpop.f32.mrb[9].mxu1  ;;  %v2517_v30 = vadd.f32 1.0, %v21381_v4  ;;  %v26439_v4 = vld [vmem:[#allocation61_spill] sm:$0xff] }
 0x38f   :  { %v2975_v22 = vpop.f32.mrb[10].mxu1 }
 0x390   :  { %v2976_v36 = vadd.f32 %v2975_v22, %v2887_v53  ;;  %v16261_v58 = vpop.f32.mrb[11].mxu1 }
 0x3af   :  { %v3094_v18 = vpop.f32.mrb[12].mxu1 }
 0x3b0   :  { %v3095_v52 = vadd.f32 %v3094_v18, %v2976_v36  ;;  %v16296_v50 = vpop.f32.mrb[13].mxu1 }
 0x3cf   :  { %v3181_v60 = vpop.f32.mrb[14].mxu1 }
 0x3d0   :  { %v3182_v35 = vadd.f32 %v3181_v60, %v3095_v52  ;;  %v16331_v45 = vpop.f32.mrb[15].mxu1  ;;  %v26440_v60 = vld [vmem:[#allocation63_spill] sm:$0xff] }
 0x3d1   :  { %v26442_v45 = vld [vmem:[#allocation87_spill] sm:$0xff] }
 0x3d2   :  { %v3185_v53 = vadd.f32 %v23631_v3, %v3182_v35  ;;  %v26441_v35 = vld [vmem:[#allocation64_spill] sm:$0xff]  ;;  %v26483_v3 = vld [vmem:[#allocation46_spill] sm:$0xff] }
 0x3d4   :  { %21382 = vtanh.f32 %v3185_v53  ;;  %v26444_v53 = vld [vmem:[#allocation89_spill] sm:$0xff] }
 0x3d5   :  { %21384 = vrcp.f32 %v2517_v30  ;;  %v26443_v30 = vld [vmem:[#allocation88_spill] sm:$0xff] }
 0x3de   :  { %v21383_v44 = vpop.eup %21382 }
 0x3df   :  { %v3187_v10 = vsub.f32 %v21383_v44, %v23461_v48  ;;  %v21385_v22 = vpop.eup %21384  ;;  %v26445_v44 = vld [vmem:[#allocation25_spill] sm:$0xff] }
 0x3e1   :  { %v3188_v36 = vmul.f32 %v21385_v22, %v3187_v10  ;;  %v26446_v10 = vld [vmem:[#allocation66_spill] sm:$0xff]  ;;  %v26447_v22 = vld [vmem:[#allocation67_spill] sm:$0xff] }
 0x3e3   :  { %v23636_v58 = vadd.f32 %v23461_v48, %v3188_v36  ;;  %v26437_v48 = vld [vmem:[#allocation58_spill] sm:$0xff]  ;;  %v26448_v36 = vld [vmem:[#allocation20_spill] sm:$0xff] }
 0x3e5   :  { %v23639_v2 = vand.u32 4294901760, %v23636_v58 }
 0x3e7   :  { %v3296_v61 = vsub.f32 %v23636_v58, %v23639_v2 }
 0x3e9   :  { %v3297_v18 = vand.u32 4294901760, %v3296_v61 }
 0x3eb   :  { %v3298_v52 = vsub.f32 %v3296_v61, %v3297_v18 }
 0x3ed   :  { %v3299_v50 = vand.u32 4294901760, %v3298_v52  ;;  %v26449_v52 = vld [vmem:[#allocation70_spill] sm:$0xff] }
 0x3ef   :  { %3300 = vmatmul.mubr.f32.vlgmr.msra.gmra.mrb[4].mxu0 %v3299_v50  ;;  %v26450_v50 = vld [vmem:[#allocation71_spill] sm:$0xff] }
 0x3f0   :  { %18719 = vmatpush1.bf16.msra.mxu0 %v26434_v55  ;;  %3530 = vmatprep.mubr.f32.mxu0 %v26038_v17  ;;  %v26482_v55 = vld [vmem:[#allocation45_spill] sm:$0xff] }
 0x3f1   :  { %18721 = vmatprep.subr.bf16.mxu0 %v26435_v11  ;;  %v26481_v11 = vld [vmem:[#allocation38_spill] sm:$0xff] }
 0x3f4   :  { %18723 = vmatpush1.bf16.msra.mxu0 %v26436_v39  ;;  %v26480_v39 = vld [vmem:[#allocation78_spill] sm:$0xff] }
 0x3f5   :  { %18725 = vmatprep.subr.bf16.mxu0 %v26437_v48  ;;  %v26479_v48 = vld [vmem:[#allocation77_spill] sm:$0xff] }
 0x3f8   :  { %18727 = vmatpush1.bf16.msra.mxu0 %v26438_v49  ;;  %v26478_v49 = vld [vmem:[#allocation76_spill] sm:$0xff] }
 0x3f9   :  { %18729 = vmatprep.subr.bf16.mxu0 %v26439_v4  ;;  %v26477_v4 = vld [vmem:[#allocation31_spill] sm:$0xff] }
 0x3fc   :  { %18731 = vmatpush1.bf16.msra.mxu0 %v26440_v60  ;;  %v26476_v60 = vld [vmem:[#allocation22_spill] sm:$0xff] }
 0x3fd   :  { %18733 = vmatprep.subr.bf16.mxu0 %v26441_v35  ;;  %v26475_v35 = vld [vmem:[#allocation27_spill] sm:$0xff] }
 0x400   :  { %18735 = vmatpush1.bf16.msra.mxu0 %v22479_v47  ;;  %v26474_v47 = vld [vmem:[#allocation47_spill] sm:$0xff] }
 0x401   :  { %18737 = vmatprep.subr.bf16.mxu0 %v22506_v7  ;;  %v26473_v7 = vld [vmem:[#allocation44_spill] sm:$0xff] }
 0x404   :  { %18739 = vmatpush1.bf16.msra.mxu0 %v22821_v62  ;;  %v26472_v62 = vld [vmem:[#allocation33_spill] sm:$0xff] }
 0x405   :  { %18741 = vmatprep.subr.bf16.mxu0 %v22823_v40  ;;  %v26471_v40 = vld [vmem:[#allocation40_spill] sm:$0xff] }
 0x408   :  { %18743 = vmatpush1.bf16.msra.mxu0 %v22844_v38  ;;  %v26455_v38 = vld [vmem:[#allocation34_spill] sm:$0xff] }
 0x409   :  { %18745 = vmatprep.subr.bf16.mxu0 %v22847_v51  ;;  %v26453_v51 = vld [vmem:[#allocation41_spill] sm:$0xff] }
 0x40c   :  { %18747 = vmatpush1.bf16.msra.mxu0 %v26442_v45  ;;  %v26451_v45 = vld [vmem:[#allocation74_spill] sm:$0xff] }
 0x40d   :  { %18749 = vmatprep.subr.bf16.mxu0 %v26443_v30  ;;  %v26452_v30 = vld [vmem:[#allocation30_spill] sm:$0xff] }
 0x40f   :  { %3532 = vmatmul.mubr.f32.vlgmr.msra.gmra.mrb[4].mxu0 %v23639_v2 }
 0x410   :  { %18751 = vmatpush1.bf16.msra.mxu0 %v26444_v53  ;;  %3666 = vmatprep.mubr.f32.mxu0 %v26038_v17  ;;  %v26454_v53 = vld [vmem:[#allocation42_spill] sm:$0xff] }
 0x411   :  { %18753 = vmatprep.subr.bf16.mxu0 %v26445_v44  ;;  %v26456_v44 = vld [vmem:[#allocation43_spill] sm:$0xff] }
 0x414   :  { %18755 = vmatpush1.bf16.msra.mxu0 %v26446_v10  ;;  %v26457_v10 = vld [vmem:[#allocation36_spill] sm:$0xff] }
 0x415   :  { %18757 = vmatprep.subr.bf16.mxu0 %v26447_v22  ;;  %v26458_v22 = vld [vmem:[#allocation32_spill] sm:$0xff] }
 0x418   :  { %18759 = vmatpush1.bf16.msra.mxu0 %v26448_v36  ;;  %v26459_v36 = vld [vmem:[#allocation14_spill] sm:$0xff] }
 0x419   :  { %18761 = vmatprep.subr.bf16.mxu0 %v26449_v52  ;;  %v26470_v52 = vld [vmem:[#allocation29_spill] sm:$0xff] }
 0x41c   :  { %18763 = vmatpush1.bf16.msra.mxu0 %v26450_v50  ;;  %v26460_v50 = vld [vmem:[#allocation17_spill] sm:$0xff] }
 0x41d   :  { %18765 = vmatprep.subr.bf16.mxu0 %v26451_v45  ;;  %v26468_v45 = vld [vmem:[#allocation26_spill] sm:$0xff] }
 0x420   :  { %18767 = vmatpush1.bf16.msra.mxu0 %v26452_v30  ;;  %v26461_v30 = vld [vmem:[#allocation19_spill] sm:$0xff] }
 0x421   :  { %18769 = vmatprep.subr.bf16.mxu0 %v26453_v51  ;;  %v26462_v51 = vld [vmem:[#allocation15_spill] sm:$0xff] }
 0x424   :  { %18771 = vmatpush1.bf16.msra.mxu0 %v26454_v53  ;;  %v26463_v53 = vld [vmem:[#allocation16_spill] sm:$0xff] }
 0x425   :  { %18773 = vmatprep.subr.bf16.mxu0 %v26455_v38  ;;  %v26464_v38 = vld [vmem:[#allocation21_spill] sm:$0xff] }
 0x428   :  { %18775 = vmatpush1.bf16.msra.mxu0 %v26456_v44  ;;  %v26465_v44 = vld [vmem:[#allocation23_spill] sm:$0xff] }
 0x429   :  { %18777 = vmatprep.subr.bf16.mxu0 %v26457_v10  ;;  %v26466_v10 = vld [vmem:[#allocation18_spill] sm:$0xff] }
 0x42c   :  { %18779 = vmatpush1.bf16.msra.mxu0 %v26458_v22  ;;  %v26467_v22 = vld [vmem:[#allocation24_spill] sm:$0xff] }
 0x42d   :  { %18781 = vmatprep.subr.bf16.mxu0 %v26459_v36 }
 0x42f   :  { %3669 = vmatmul.mubr.f32.vlgmr.msra.gmra.mrb[4].mxu0 %v3296_v61  ;;  %v26469_v61 = vld [vmem:[#allocation28_spill] sm:$0xff] }
 0x430   :  { %18783 = vmatpush1.bf16.msra.mxu0 %v26460_v50  ;;  %3771 = vmatprep.mubr.f32.mxu0 %v26038_v17 }
 0x431   :  { %18785 = vmatprep.subr.bf16.mxu0 %v26461_v30 }
 0x434   :  { %18787 = vmatpush1.bf16.msra.mxu0 %v26462_v51 }
 0x435   :  { %18789 = vmatprep.subr.bf16.mxu0 %v26463_v53 }
 0x438   :  { %18791 = vmatpush1.bf16.msra.mxu0 %v26464_v38 }
 0x439   :  { %18793 = vmatprep.subr.bf16.mxu0 %v26465_v44 }
 0x43c   :  { %18795 = vmatpush1.bf16.msra.mxu0 %v26466_v10 }
 0x43d   :  { %18797 = vmatprep.subr.bf16.mxu0 %v26467_v22 }
 0x440   :  { %18799 = vmatpush1.bf16.msra.mxu0 %v26468_v45 }
 0x441   :  { %18801 = vmatprep.subr.bf16.mxu0 %v26469_v61 }
 0x444   :  { %18803 = vmatpush1.bf16.msra.mxu0 %v26470_v52 }
 0x445   :  { %18805 = vmatprep.subr.bf16.mxu0 %v26471_v40 }
 0x448   :  { %18807 = vmatpush1.bf16.msra.mxu0 %v26472_v62 }
 0x449   :  { %18809 = vmatprep.subr.bf16.mxu0 %v26473_v7 }
 0x44c   :  { %18811 = vmatpush1.bf16.msra.mxu0 %v26474_v47 }
 0x44d   :  { %18813 = vmatprep.subr.bf16.mxu0 %v26475_v35  ;;  %v26484_v35 = vld [vmem:[#allocation50_spill] sm:$0xff] }
 0x44f   :  { %3775 = vmatmul.mubr.f32.vlgmr.msra.gmra.mrb[4].mxu0 %v3297_v18  ;;  %v26485_v18 = vld [vmem:[#allocation52_spill] sm:$0xff] }
 0x450   :  { %18815 = vmatpush1.bf16.msra.mxu0 %v26476_v60  ;;  %3941 = vmatprep.mubr.f32.mxu0 %v26038_v17  ;;  %v26486_v60 = vld [vmem:[#allocation54_spill] sm:$0xff] }
 0x451   :  { %18817 = vmatprep.subr.bf16.mxu0 %v26477_v4  ;;  %v26488_v4 = vld [vmem:[#allocation80_spill] sm:$0xff] }
 0x454   :  { %18819 = vmatpush1.bf16.msra.mxu0 %v26478_v49  ;;  %v26489_v49 = vld [vmem:[#allocation81_spill] sm:$0xff] }
 0x455   :  { %18821 = vmatprep.subr.bf16.mxu0 %v26479_v48  ;;  %v26490_v48 = vld [vmem:[#allocation82_spill] sm:$0xff] }
 0x458   :  { %18823 = vmatpush1.bf16.msra.mxu0 %v26480_v39 }
 0x459   :  { %18825 = vmatprep.subr.bf16.mxu0 %v26481_v11 }
 0x45c   :  { %18827 = vmatpush1.bf16.msra.mxu0 %v26482_v55  ;;  %v21562_v55 = vmov 1966171168  }
 0x45d   :  { %18829 = vmatprep.subr.bf16.mxu0 %v26483_v3  ;;  %v4075_v11 = vunpack.c.l.s4 %v21562_v55 }
 0x45f   :  { %v4076_v39 = vunpack.c.0.s8 %v4075_v11 }
 0x460   :  { %18831 = vmatpush1.bf16.msra.mxu0 %v26484_v35 }
 0x461   :  { %18833 = vmatprep.subr.bf16.mxu0 %v26485_v18 }
 0x464   :  { %18835 = vmatpush1.bf16.msra.mxu0 %v26486_v60 }
 0x465   :  { %18837 = vmatprep.subr.bf16.mxu0 %v26487_v5  ;;  %v26492_v5 = vld [vmem:[#allocation53_spill] sm:$0xff] }
 0x468   :  { %18839 = vmatpush1.bf16.msra.mxu0 %v26488_v4 }
 0x469   :  { %18841 = vmatprep.subr.bf16.mxu0 %v26489_v49 }
 0x46c   :  { %18843 = vmatpush1.bf16.msra.mxu0 %v26490_v48 }
 0x46d   :  { %18845 = vmatprep.subr.bf16.mxu0 %v26459_v36 }
 0x46f   :  { %3943 = vmatmul.mubr.f32.vlgmr.msra.gmra.mrb[4].mxu0 %v23639_v2 }
 0x470   :  { %18847 = vmatpush1.bf16.msra.mxu0 %v26460_v50  ;;  %4045 = vmatprep.mubr.f32.mxu0 %v26038_v17 }
 0x471   :  { %18849 = vmatprep.subr.bf16.mxu0 %v26461_v30 }
 0x474   :  { %18851 = vmatpush1.bf16.msra.mxu0 %v26462_v51 }
 0x475   :  { %18853 = vmatprep.subr.bf16.mxu0 %v26463_v53 }
 0x478   :  { %18855 = vmatpush1.bf16.msra.mxu0 %v26464_v38 }
 0x479   :  { %18857 = vmatprep.subr.bf16.mxu0 %v26465_v44 }
 0x47c   :  { %18859 = vmatpush1.bf16.msra.mxu0 %v26466_v10 }
 0x47d   :  { %18861 = vmatprep.subr.bf16.mxu0 %v26467_v22 }
 0x480   :  { %18863 = vmatpush1.bf16.msra.mxu0 %v26468_v45 }
 0x481   :  { %18865 = vmatprep.subr.bf16.mxu0 %v26469_v61 }
 0x484   :  { %18867 = vmatpush1.bf16.msra.mxu0 %v26470_v52 }
 0x485   :  { %18869 = vmatprep.subr.bf16.mxu0 %v26471_v40 }
 0x488   :  { %18871 = vmatpush1.bf16.msra.mxu0 %v26472_v62 }
 0x489   :  { %18873 = vmatprep.subr.bf16.mxu0 %v26473_v7 }
 0x48c   :  { %18875 = vmatpush1.bf16.msra.mxu0 %v26474_v47 }
 0x48d   :  { %19021 = vmatprep.subr.bf16.mxu0 %v26459_v36 }
 0x48f   :  { %4047 = vmatmul.mubr.f32.vlgmr.msra.gmra.mrb[4].mxu0 %v23639_v2  ;;  %v26491_v2 = vld [vmem:[#allocation48_spill] sm:$0xff] }
 0x490   :  { %19023 = vmatpush1.bf16.msra.mxu0 %v26460_v50  ;;  %4861 = vmatprep.mubr.f32.mxu0 %v26038_v17 }
 0x491   :  { %19025 = vmatprep.subr.bf16.mxu0 %v26461_v30 }
 0x494   :  { %19027 = vmatpush1.bf16.msra.mxu0 %v26462_v51 }
 0x495   :  { %19029 = vmatprep.subr.bf16.mxu0 %v26463_v53 }
 0x498   :  { %19031 = vmatpush1.bf16.msra.mxu0 %v26464_v38 }
 0x499   :  { %19033 = vmatprep.subr.bf16.mxu0 %v26465_v44 }
 0x49c   :  { %19035 = vmatpush1.bf16.msra.mxu0 %v26466_v10 }
 0x49d   :  { %19037 = vmatprep.subr.bf16.mxu0 %v26467_v22 }
 0x4a0   :  { %19039 = vmatpush1.bf16.msra.mxu0 %v26468_v45 }
 0x4a1   :  { %19041 = vmatprep.subr.bf16.mxu0 %v26469_v61 }
 0x4a4   :  { %19043 = vmatpush1.bf16.msra.mxu0 %v26470_v52 }
 0x4a5   :  { %19045 = vmatprep.subr.bf16.mxu0 %v26471_v40 }
 0x4a8   :  { %19047 = vmatpush1.bf16.msra.mxu0 %v26472_v62 }
 0x4a9   :  { %19049 = vmatprep.subr.bf16.mxu0 %v26473_v7  ;;  %v23752_v7 = vsub.s32 %v4076_v39, %v23143_v19 }
 0x4ac   :  { %19051 = vmatpush1.bf16.msra.mxu0 %v26474_v47 }
 0x4ad   :  { %19053 = vmatprep.subr.bf16.mxu0 %v26491_v2 }
 0x562   :  { %v23748_v48 = vpop.f32.mrb[4].mxu0 }
 0x563   :  { %v4050_v49 = vpop.f32.mrb[5].mxu0 }
 0x564   :  { %v4064_v4 = vrot.slane %v4050_v49, 7 }
 0x566   :  { %v4066_v60 = vadd.f32 %v26492_v5, %v4064_v4 }
 0x568   :  { %v14878_v18 = vmul.f32 -1.442695, %v4066_v60 }
 0x56a   :  { %21386 = vpow2.f32 %v14878_v18 }
 0x574   :  { %v21387_v35 = vpop.eup %21386 }
 0x575   :  { %v4070_v3 = vadd.f32 1.0, %v21387_v35 }
 0x577   :  { %21388 = vrcp.f32 %v4070_v3 }
 0x581   :  { %v21389_v47 = vpop.eup %21388 }
 0x582   :  { %v4080_v2 = vrot.slane %v21389_v47, %v23752_v7  ;;  %v4054_v47 = vrot.slane %v23748_v48, 7 }
 0x584   :  { %v4081_v62 = vcombine.high %v4080_v2, %v4080_v2 }
 0x586   :  { %v4088_v40 = vrot.slane %v4081_v62, %v23752_v7  ;;  %v26493_v62 = vld [vmem:[#allocation35_spill] sm:$0xff] }
 0x588   :  { %v4090_v49 = vmul.f32 %v4088_v40, %v23636_v58  ;;  %v4056_v40 = vadd.f32 %v26493_v62, %v4054_v47  ;;  %v26544_v62 = vld [vmem:[#allocation79_spill] sm:$0xff] }
 0x58a   :  { %v23757_v4 = vand.u32 4294901760, %v4090_v49  ;;  %v14877_v3 = vmul.f32 -1.442695, %v4056_v40 }
 0x58c   :  { %v4173_v60 = vsub.f32 %v4090_v49, %v23757_v4  ;;  %21390 = vpow2.f32 %v14877_v3 }
 0x58e   :  { %v4174_v35 = vand.u32 4294901760, %v4173_v60 }
 0x590   :  { %v4175_v18 = vsub.f32 %v4173_v60, %v4174_v35 }
 0x592   :  { %v4176_v55 = vand.u32 4294901760, %v4175_v18  ;;  %v26495_v18 = vld [vmem:[#allocation39_spill] sm:$0xff] }
 0x594   :  { %16365 = vmatmul.mubr.f32.vlgmr.msra.gmra.mrb[16].mxu1 %v4176_v55  ;;  %v23876_v55 = vrot.slane %v23636_v58, %v26495_v18 }
 0x595   :  { %18902 = vmatpush3.bf16.msra.mxu1 %v23307_v13  ;;  %16399 = vmatprep.mubr.msk.f32.mxu1 %vm21561_vm0, %v26038_v17 }
 0x596   :  { %18903 = vmatprep.subr.bf16.mxu1 %v26147_v34  ;;  %v21391_v11 = vpop.eup %21390  ;;  %26496 = vst [vmem:[#allocation62_spill] sm:$0xff] %v23876_v55 }
 0x599   :  { %18905 = vmatpush3.bf16.msra.mxu1 %v23321_v54 }
 0x59a   :  { %18906 = vmatprep.subr.bf16.mxu1 %v26147_v34 }
 0x59d   :  { %18908 = vmatpush3.bf16.msra.mxu1 %v23335_v28 }
 0x59e   :  { %18909 = vmatprep.subr.bf16.mxu1 %v26147_v34 }
 0x5a1   :  { %18911 = vmatpush3.bf16.msra.mxu1 %v23367_v8 }
 0x5a2   :  { %18912 = vmatprep.subr.bf16.mxu1 %v26147_v34 }
 0x5a5   :  { %18914 = vmatpush3.bf16.msra.mxu1 %v23371_v31 }
 0x5a6   :  { %18915 = vmatprep.subr.bf16.mxu1 %v26147_v34 }
 0x5a9   :  { %18917 = vmatpush3.bf16.msra.mxu1 %v23391_v41 }
 0x5aa   :  { %18918 = vmatprep.subr.bf16.mxu1 %v26147_v34 }
 0x5ad   :  { %18920 = vmatpush3.bf16.msra.mxu1 %v23414_v29 }
 0x5ae   :  { %18921 = vmatprep.subr.bf16.mxu1 %v26147_v34 }
 0x5b1   :  { %18923 = vmatpush3.bf16.msra.mxu1 %v23419_v0 }
 0x5b2   :  { %18924 = vmatprep.subr.bf16.mxu1 %v26147_v34 }
 0x5b4   :  { %16400 = vmatmul.mubr.f32.vlgmr.msra.gmra.mrb[16].mxu1 %v23757_v4 }
 0x5b5   :  { %18926 = vmatpush3.bf16.msra.mxu1 %v23423_v59  ;;  %16434 = vmatprep.mubr.msk.f32.mxu1 %vm21561_vm0, %v26038_v17 }
 0x5b6   :  { %18927 = vmatprep.subr.bf16.mxu1 %v26147_v34 }
 0x5b9   :  { %18929 = vmatpush3.bf16.msra.mxu1 %v23427_v24 }
 0x5ba   :  { %18930 = vmatprep.subr.bf16.mxu1 %v26147_v34 }
 0x5bd   :  { %18932 = vmatpush3.bf16.msra.mxu1 %v23431_v6 }
 0x5be   :  { %18933 = vmatprep.subr.bf16.mxu1 %v26147_v34 }
 0x5c1   :  { %18935 = vmatpush3.bf16.msra.mxu1 %v23435_v32 }
 0x5c2   :  { %18936 = vmatprep.subr.bf16.mxu1 %v26147_v34 }
 0x5c5   :  { %18938 = vmatpush3.bf16.msra.mxu1 %v23439_v27 }
 0x5c6   :  { %18939 = vmatprep.subr.bf16.mxu1 %v26147_v34 }
 0x5c9   :  { %18941 = vmatpush3.bf16.msra.mxu1 %v23443_v46 }
 0x5ca   :  { %18942 = vmatprep.subr.bf16.mxu1 %v26147_v34 }
 0x5cd   :  { %18944 = vmatpush3.bf16.msra.mxu1 %v23447_v16 }
 0x5ce   :  { %18945 = vmatprep.subr.bf16.mxu1 %v26147_v34 }
 0x5d1   :  { %18947 = vmatpush3.bf16.msra.mxu1 %v23451_v9 }
 0x5d2   :  { %18948 = vmatprep.subr.bf16.mxu1 %v26147_v34 }
 0x5d4   :  { %16435 = vmatmul.mubr.f32.vlgmr.msra.gmra.mrb[16].mxu1 %v4173_v60  ;;  %v26494_v60 = vld [vmem:[#allocation60_spill] sm:$0xff] }
 0x5d5   :  { %18950 = vmatpush3.bf16.msra.mxu1 %v23179_v56  ;;  %16469 = vmatprep.mubr.msk.f32.mxu1 %vm21561_vm0, %v26038_v17 }
 0x5d6   :  { %18951 = vmatprep.subr.bf16.mxu1 %v26147_v34 }
 0x5d9   :  { %18953 = vmatpush3.bf16.msra.mxu1 %v23189_v25 }
 0x5da   :  { %18954 = vmatprep.subr.bf16.mxu1 %v26147_v34 }
 0x5dd   :  { %18956 = vmatpush3.bf16.msra.mxu1 %v23199_v20 }
 0x5de   :  { %18957 = vmatprep.subr.bf16.mxu1 %v26147_v34 }
 0x5e1   :  { %18959 = vmatpush3.bf16.msra.mxu1 %v23224_v21 }
 0x5e2   :  { %18960 = vmatprep.subr.bf16.mxu1 %v26147_v34 }
 0x5e5   :  { %18962 = vmatpush3.bf16.msra.mxu1 %v23234_v63 }
 0x5e6   :  { %18963 = vmatprep.subr.bf16.mxu1 %v26147_v34 }
 0x5e9   :  { %18965 = vmatpush3.bf16.msra.mxu1 %v23254_v57 }
 0x5ea   :  { %18966 = vmatprep.subr.bf16.mxu1 %v26147_v34 }
 0x5ed   :  { %18968 = vmatpush3.bf16.msra.mxu1 %v23274_v37 }
 0x5ee   :  { %18969 = vmatprep.subr.bf16.mxu1 %v26147_v34 }
 0x5f1   :  { %18971 = vmatpush3.bf16.msra.mxu1 %v23288_v43 }
 0x5f2   :  { %18972 = vmatprep.subr.bf16.mxu1 %v26147_v34 }
 0x5f4   :  { %16470 = vmatmul.mubr.f32.vlgmr.msra.gmra.mrb[16].mxu1 %v4174_v35 }
 0x5f5   :  { %18974 = vmatpush3.bf16.msra.mxu1 %v23525_v12  ;;  %16504 = vmatprep.mubr.msk.f32.mxu1 %vm21561_vm0, %v26038_v17 }
 0x5f6   :  { %18975 = vmatprep.subr.bf16.mxu1 %v26147_v34 }
 0x5f9   :  { %18977 = vmatpush3.bf16.msra.mxu1 %v23533_v42 }
 0x5fa   :  { %18978 = vmatprep.subr.bf16.mxu1 %v26147_v34 }
 0x5fd   :  { %18980 = vmatpush3.bf16.msra.mxu1 %v23543_v33 }
 0x5fe   :  { %18981 = vmatprep.subr.bf16.mxu1 %v26147_v34 }
 0x601   :  { %18983 = vmatpush3.bf16.msra.mxu1 %v23551_v23 }
 0x602   :  { %18984 = vmatprep.subr.bf16.mxu1 %v26147_v34 }
 0x605   :  { %18986 = vmatpush3.bf16.msra.mxu1 %v23559_v1 }
 0x606   :  { %18987 = vmatprep.subr.bf16.mxu1 %v26147_v34 }
 0x609   :  { %18989 = vmatpush3.bf16.msra.mxu1 %v23567_v15 }
 0x60a   :  { %18990 = vmatprep.subr.bf16.mxu1 %v26147_v34 }
 0x60d   :  { %18992 = vmatpush3.bf16.msra.mxu1 %v23575_v26 }
 0x60e   :  { %18993 = vmatprep.subr.bf16.mxu1 %v26147_v34 }
 0x611   :  { %18995 = vmatpush3.bf16.msra.mxu1 %v23583_v14 }
 0x612   :  { %18996 = vmatprep.subr.bf16.mxu1 %v26147_v34 }
 0x614   :  { %16505 = vmatmul.mubr.f32.vlgmr.msra.gmra.mrb[16].mxu1 %v23757_v4 }
 0x615   :  { %18998 = vmatpush3.bf16.msra.mxu1 %v23179_v56  ;;  %16539 = vmatprep.mubr.msk.f32.mxu1 %vm21561_vm0, %v26038_v17 }
 0x616   :  { %18999 = vmatprep.subr.bf16.mxu1 %v26147_v34 }
 0x619   :  { %19001 = vmatpush3.bf16.msra.mxu1 %v23189_v25 }
 0x61a   :  { %19002 = vmatprep.subr.bf16.mxu1 %v26147_v34 }
 0x61d   :  { %19004 = vmatpush3.bf16.msra.mxu1 %v23199_v20 }
 0x61e   :  { %19005 = vmatprep.subr.bf16.mxu1 %v26147_v34 }
 0x621   :  { %19007 = vmatpush3.bf16.msra.mxu1 %v23224_v21 }
 0x622   :  { %19008 = vmatprep.subr.bf16.mxu1 %v26147_v34 }
 0x625   :  { %19010 = vmatpush3.bf16.msra.mxu1 %v23234_v63 }
 0x626   :  { %19011 = vmatprep.subr.bf16.mxu1 %v26147_v34 }
 0x629   :  { %19013 = vmatpush3.bf16.msra.mxu1 %v23254_v57 }
 0x62a   :  { %19014 = vmatprep.subr.bf16.mxu1 %v26147_v34 }
 0x62d   :  { %19016 = vmatpush3.bf16.msra.mxu1 %v23274_v37 }
 0x62e   :  { %19017 = vmatprep.subr.bf16.mxu1 %v26147_v34 }
 0x631   :  { %19019 = vmatpush3.bf16.msra.mxu1 %v23288_v43 }
 0x632   :  { %19212 = vmatprep.subr.bf16.mxu1 %v26147_v34 }
 0x634   :  { %16540 = vmatmul.mubr.f32.vlgmr.msra.gmra.mrb[16].mxu1 %v23757_v4  ;;  %v4060_v4 = vadd.f32 1.0, %v21391_v11 }
 0x635   :  { %19214 = vmatpush3.bf16.msra.mxu1 %v23179_v56  ;;  %16574 = vmatprep.mubr.msk.f32.mxu1 %vm21561_vm0, %v26038_v17 }
 0x636   :  { %19215 = vmatprep.subr.bf16.mxu1 %v26147_v34 }
 0x639   :  { %19217 = vmatpush3.bf16.msra.mxu1 %v23189_v25 }
 0x63a   :  { %19218 = vmatprep.subr.bf16.mxu1 %v26147_v34 }
 0x63d   :  { %19220 = vmatpush3.bf16.msra.mxu1 %v23199_v20 }
 0x63e   :  { %19221 = vmatprep.subr.bf16.mxu1 %v26147_v34 }
 0x641   :  { %19223 = vmatpush3.bf16.msra.mxu1 %v23224_v21 }
 0x642   :  { %19224 = vmatprep.subr.bf16.mxu1 %v26147_v34 }
 0x645   :  { %19226 = vmatpush3.bf16.msra.mxu1 %v23234_v63 }
 0x646   :  { %19227 = vmatprep.subr.bf16.mxu1 %v26147_v34 }
 0x649   :  { %19229 = vmatpush3.bf16.msra.mxu1 %v23254_v57 }
 0x64a   :  { %19230 = vmatprep.subr.bf16.mxu1 %v26147_v34 }
 0x64d   :  { %19232 = vmatpush3.bf16.msra.mxu1 %v23274_v37 }
 0x64e   :  { %19233 = vmatprep.subr.bf16.mxu1 %v26147_v34 }
 0x651   :  { %19235 = vmatpush3.bf16.msra.mxu1 %v23288_v43 }
 0x652   :  { %19236 = vmatprep.subr.bf16.mxu1 %v26147_v34 }
 0x707   :  { %v4728_v39 = vpop.f32.mrb[16].mxu1 }
 0x708   :  { %v4733_v2 = vrot.slane %v4728_v39, 7  ;;  %v16541_v49 = vpop.f32.mrb[17].mxu1 }
 0x70a   :  { %v4735_v35 = vadd.f32 %v26494_v60, %v4733_v2  ;;  %v26540_v60 = vld [vmem:[#allocation46_spill] sm:$0xff] }
 0x70c   :  { %21392 = vtanh.f32 %v4735_v35 }
 0x70d   :  { %21394 = vrcp.f32 %v4060_v4 }
 0x716   :  { %v21393_v19 = vpop.eup %21392 }
 0x717   :  { %v4737_v48 = vsub.f32 %v21393_v19, %v23876_v55  ;;  %v21395_v14 = vpop.eup %21394  ;;  %v26497_v19 = vld [vmem:[#allocation49_spill] sm:$0xff]  ;;  %v26507_v55 = vld [vmem:[#allocation83_spill] sm:$0xff] }
 0x719   :  { %v4738_v47 = vmul.f32 %v21395_v14, %v4737_v48  ;;  %v26498_v14 = vld [vmem:[#allocation51_spill] sm:$0xff]  ;;  %v26499_v48 = vld [vmem:[#allocation57_spill] sm:$0xff] }
 0x71b   :  { %v4746_v40 = vrot.slane %v4738_v47, %v23752_v7  ;;  %v26501_v47 = vld [vmem:[#allocation59_spill] sm:$0xff] }
 0x71d   :  { %v4747_v3 = vcombine.high %v4746_v40, %v4746_v40  ;;  %v26502_v40 = vld [vmem:[#allocation61_spill] sm:$0xff] }
 0x71f   :  { %v4754_v39 = vrot.slane %v4747_v3, %v23752_v7  ;;  %v26503_v3 = vld [vmem:[#allocation63_spill] sm:$0xff] }
 0x721   :  { %v23882_v11 = vadd.f32 %v4754_v39, %v23636_v58  ;;  %v26500_v58 = vld [vmem:[#allocation58_spill] sm:$0xff]  ;;  %v26504_v39 = vld [vmem:[#allocation64_spill] sm:$0xff] }
 0x723   :  { %v23885_v2 = vand.u32 4294901760, %v23882_v11 }
 0x725   :  { %v4863_v49 = vsub.f32 %v23882_v11, %v23885_v2 }
 0x727   :  { %v4864_v4 = vand.u32 4294901760, %v4863_v49 }
 0x729   :  { %v4865_v35 = vsub.f32 %v4863_v49, %v4864_v4 }
 0x72b   :  { %v4866_v18 = vand.u32 4294901760, %v4865_v35  ;;  %v26505_v35 = vld [vmem:[#allocation65_spill] sm:$0xff] }
 0x72d   :  { %4867 = vmatmul.mubr.f32.vlgmr.msra.gmra.mrb[6].mxu0 %v4866_v18  ;;  %v26506_v18 = vld [vmem:[#allocation69_spill] sm:$0xff] }
 0x72e   :  { %19055 = vmatpush1.bf16.msra.mxu0 %v26497_v19  ;;  %5097 = vmatprep.mubr.f32.mxu0 %v26038_v17  ;;  %v26508_v19 = vld [vmem:[#allocation84_spill] sm:$0xff] }
 0x72f   :  { %19057 = vmatprep.subr.bf16.mxu0 %v26498_v14  ;;  %v26509_v14 = vld [vmem:[#allocation85_spill] sm:$0xff] }
 0x732   :  { %19059 = vmatpush1.bf16.msra.mxu0 %v26499_v48  ;;  %v26510_v48 = vld [vmem:[#allocation86_spill] sm:$0xff] }
 0x733   :  { %19061 = vmatprep.subr.bf16.mxu0 %v26500_v58  ;;  %v26511_v58 = vld [vmem:[#allocation87_spill] sm:$0xff] }
 0x736   :  { %19063 = vmatpush1.bf16.msra.mxu0 %v26501_v47  ;;  %v26512_v47 = vld [vmem:[#allocation88_spill] sm:$0xff] }
 0x737   :  { %19065 = vmatprep.subr.bf16.mxu0 %v26502_v40  ;;  %v26524_v40 = vld [vmem:[#allocation34_spill] sm:$0xff] }
 0x73a   :  { %19067 = vmatpush1.bf16.msra.mxu0 %v26503_v3  ;;  %v26513_v3 = vld [vmem:[#allocation89_spill] sm:$0xff] }
 0x73b   :  { %19069 = vmatprep.subr.bf16.mxu0 %v26504_v39  ;;  %v26522_v39 = vld [vmem:[#allocation41_spill] sm:$0xff] }
 0x73e   :  { %19071 = vmatpush1.bf16.msra.mxu0 %v26505_v35  ;;  %v26514_v35 = vld [vmem:[#allocation25_spill] sm:$0xff] }
 0x73f   :  { %19073 = vmatprep.subr.bf16.mxu0 %v26506_v18  ;;  %v26515_v18 = vld [vmem:[#allocation66_spill] sm:$0xff] }
 0x742   :  { %19075 = vmatpush1.bf16.msra.mxu0 %v26507_v55  ;;  %v26516_v55 = vld [vmem:[#allocation67_spill] sm:$0xff] }
 0x743   :  { %19077 = vmatprep.subr.bf16.mxu0 %v26508_v19  ;;  %v26517_v19 = vld [vmem:[#allocation20_spill] sm:$0xff] }
 0x746   :  { %19079 = vmatpush1.bf16.msra.mxu0 %v26509_v14  ;;  %v26518_v14 = vld [vmem:[#allocation70_spill] sm:$0xff] }
 0x747   :  { %19081 = vmatprep.subr.bf16.mxu0 %v26510_v48  ;;  %v26519_v48 = vld [vmem:[#allocation71_spill] sm:$0xff] }
 0x74a   :  { %19083 = vmatpush1.bf16.msra.mxu0 %v26511_v58  ;;  %v26520_v58 = vld [vmem:[#allocation74_spill] sm:$0xff] }
 0x74b   :  { %19085 = vmatprep.subr.bf16.mxu0 %v26512_v47  ;;  %v26521_v47 = vld [vmem:[#allocation30_spill] sm:$0xff] }
 0x74d   :  { %5099 = vmatmul.mubr.f32.vlgmr.msra.gmra.mrb[6].mxu0 %v23885_v2 }
 0x74e   :  { %19087 = vmatpush1.bf16.msra.mxu0 %v26513_v3  ;;  %5233 = vmatprep.mubr.f32.mxu0 %v26038_v17  ;;  %v26523_v3 = vld [vmem:[#allocation42_spill] sm:$0xff] }
 0x74f   :  { %19089 = vmatprep.subr.bf16.mxu0 %v26514_v35  ;;  %v26525_v35 = vld [vmem:[#allocation43_spill] sm:$0xff] }
 0x752   :  { %19091 = vmatpush1.bf16.msra.mxu0 %v26515_v18  ;;  %v26526_v18 = vld [vmem:[#allocation36_spill] sm:$0xff] }
 0x753   :  { %19093 = vmatprep.subr.bf16.mxu0 %v26516_v55  ;;  %v26527_v55 = vld [vmem:[#allocation32_spill] sm:$0xff] }
 0x756   :  { %19095 = vmatpush1.bf16.msra.mxu0 %v26517_v19  ;;  %v26539_v19 = vld [vmem:[#allocation45_spill] sm:$0xff] }
 0x757   :  { %19097 = vmatprep.subr.bf16.mxu0 %v26518_v14  ;;  %v26538_v14 = vld [vmem:[#allocation38_spill] sm:$0xff] }
 0x75a   :  { %19099 = vmatpush1.bf16.msra.mxu0 %v26519_v48  ;;  %v26537_v48 = vld [vmem:[#allocation78_spill] sm:$0xff] }
 0x75b   :  { %19101 = vmatprep.subr.bf16.mxu0 %v26520_v58  ;;  %v26536_v58 = vld [vmem:[#allocation77_spill] sm:$0xff] }
 0x75e   :  { %19103 = vmatpush1.bf16.msra.mxu0 %v26521_v47  ;;  %v26535_v47 = vld [vmem:[#allocation76_spill] sm:$0xff] }
 0x75f   :  { %19105 = vmatprep.subr.bf16.mxu0 %v26522_v39  ;;  %v26534_v39 = vld [vmem:[#allocation31_spill] sm:$0xff] }
 0x762   :  { %19107 = vmatpush1.bf16.msra.mxu0 %v26523_v3  ;;  %v26533_v3 = vld [vmem:[#allocation22_spill] sm:$0xff] }
 0x763   :  { %19109 = vmatprep.subr.bf16.mxu0 %v26524_v40  ;;  %v26532_v40 = vld [vmem:[#allocation27_spill] sm:$0xff] }
 0x766   :  { %19111 = vmatpush1.bf16.msra.mxu0 %v26525_v35  ;;  %v26531_v35 = vld [vmem:[#allocation47_spill] sm:$0xff] }
 0x767   :  { %19113 = vmatprep.subr.bf16.mxu0 %v26526_v18  ;;  %v26530_v18 = vld [vmem:[#allocation44_spill] sm:$0xff] }
 0x76a   :  { %19115 = vmatpush1.bf16.msra.mxu0 %v26527_v55  ;;  %v26529_v55 = vld [vmem:[#allocation33_spill] sm:$0xff] }
 0x76b   :  { %19117 = vmatprep.subr.bf16.mxu0 %v26459_v36 }
 0x76d   :  { %5236 = vmatmul.mubr.f32.vlgmr.msra.gmra.mrb[6].mxu0 %v4863_v49  ;;  %v26528_v49 = vld [vmem:[#allocation40_spill] sm:$0xff] }
 0x76e   :  { %19119 = vmatpush1.bf16.msra.mxu0 %v26460_v50  ;;  %5338 = vmatprep.mubr.f32.mxu0 %v26038_v17 }
 0x76f   :  { %19121 = vmatprep.subr.bf16.mxu0 %v26461_v30 }
 0x772   :  { %19123 = vmatpush1.bf16.msra.mxu0 %v26462_v51 }
 0x773   :  { %19125 = vmatprep.subr.bf16.mxu0 %v26463_v53 }
 0x776   :  { %19127 = vmatpush1.bf16.msra.mxu0 %v26464_v38 }
 0x777   :  { %19129 = vmatprep.subr.bf16.mxu0 %v26465_v44 }
 0x77a   :  { %19131 = vmatpush1.bf16.msra.mxu0 %v26466_v10 }
 0x77b   :  { %19133 = vmatprep.subr.bf16.mxu0 %v26467_v22 }
 0x77e   :  { %19135 = vmatpush1.bf16.msra.mxu0 %v26468_v45 }
 0x77f   :  { %19137 = vmatprep.subr.bf16.mxu0 %v26469_v61 }
 0x782   :  { %19139 = vmatpush1.bf16.msra.mxu0 %v26470_v52 }
 0x783   :  { %19141 = vmatprep.subr.bf16.mxu0 %v26528_v49 }
 0x786   :  { %19143 = vmatpush1.bf16.msra.mxu0 %v26529_v55 }
 0x787   :  { %19145 = vmatprep.subr.bf16.mxu0 %v26530_v18 }
 0x78a   :  { %19147 = vmatpush1.bf16.msra.mxu0 %v26531_v35 }
 0x78b   :  { %19149 = vmatprep.subr.bf16.mxu0 %v26532_v40  ;;  %v26541_v40 = vld [vmem:[#allocation50_spill] sm:$0xff] }
 0x78d   :  { %5342 = vmatmul.mubr.f32.vlgmr.msra.gmra.mrb[6].mxu0 %v4864_v4  ;;  %v26542_v4 = vld [vmem:[#allocation52_spill] sm:$0xff] }
 0x78e   :  { %19151 = vmatpush1.bf16.msra.mxu0 %v26533_v3  ;;  %5508 = vmatprep.mubr.f32.mxu0 %v26038_v17  ;;  %v26543_v3 = vld [vmem:[#allocation54_spill] sm:$0xff] }
 0x78f   :  { %19153 = vmatprep.subr.bf16.mxu0 %v26534_v39  ;;  %v26545_v39 = vld [vmem:[#allocation80_spill] sm:$0xff] }
 0x792   :  { %19155 = vmatpush1.bf16.msra.mxu0 %v26535_v47  ;;  %v26546_v47 = vld [vmem:[#allocation81_spill] sm:$0xff] }
 0x793   :  { %19157 = vmatprep.subr.bf16.mxu0 %v26536_v58  ;;  %v26547_v58 = vld [vmem:[#allocation82_spill] sm:$0xff] }
 0x796   :  { %19159 = vmatpush1.bf16.msra.mxu0 %v26537_v48 }
 0x797   :  { %19161 = vmatprep.subr.bf16.mxu0 %v26538_v14 }
 0x79a   :  { %19163 = vmatpush1.bf16.msra.mxu0 %v26539_v19 }
 0x79b   :  { %19165 = vmatprep.subr.bf16.mxu0 %v26540_v60 }
 0x79e   :  { %19167 = vmatpush1.bf16.msra.mxu0 %v26541_v40 }
 0x79f   :  { %19169 = vmatprep.subr.bf16.mxu0 %v26542_v4 }
 0x7a2   :  { %19171 = vmatpush1.bf16.msra.mxu0 %v26543_v3 }
 0x7a3   :  { %19173 = vmatprep.subr.bf16.mxu0 %v26544_v62 }
 0x7a6   :  { %19175 = vmatpush1.bf16.msra.mxu0 %v26545_v39 }
 0x7a7   :  { %19177 = vmatprep.subr.bf16.mxu0 %v26546_v47 }
 0x7aa   :  { %19179 = vmatpush1.bf16.msra.mxu0 %v26547_v58 }
 0x7ab   :  { %19181 = vmatprep.subr.bf16.mxu0 %v26459_v36 }
 0x7ad   :  { %5510 = vmatmul.mubr.f32.vlgmr.msra.gmra.mrb[6].mxu0 %v23885_v2 }
 0x7ae   :  { %19183 = vmatpush1.bf16.msra.mxu0 %v26460_v50  ;;  %5612 = vmatprep.mubr.f32.mxu0 %v26038_v17 }
 0x7af   :  { %19185 = vmatprep.subr.bf16.mxu0 %v26461_v30 }
 0x7b2   :  { %19187 = vmatpush1.bf16.msra.mxu0 %v26462_v51 }
 0x7b3   :  { %19189 = vmatprep.subr.bf16.mxu0 %v26463_v53 }
 0x7b6   :  { %19191 = vmatpush1.bf16.msra.mxu0 %v26464_v38 }
 0x7b7   :  { %19193 = vmatprep.subr.bf16.mxu0 %v26465_v44 }
 0x7ba   :  { %19195 = vmatpush1.bf16.msra.mxu0 %v26466_v10 }
 0x7bb   :  { %19197 = vmatprep.subr.bf16.mxu0 %v26467_v22 }
 0x7be   :  { %19199 = vmatpush1.bf16.msra.mxu0 %v26468_v45 }
 0x7bf   :  { %19201 = vmatprep.subr.bf16.mxu0 %v26469_v61 }
 0x7c2   :  { %19203 = vmatpush1.bf16.msra.mxu0 %v26470_v52 }
 0x7c3   :  { %19205 = vmatprep.subr.bf16.mxu0 %v26528_v49 }
 0x7c6   :  { %19207 = vmatpush1.bf16.msra.mxu0 %v26529_v55 }
 0x7c7   :  { %19209 = vmatprep.subr.bf16.mxu0 %v26530_v18 }
 0x7ca   :  { %19211 = vmatpush1.bf16.msra.mxu0 %v26531_v35 }
 0x7cb   :  { %19357 = vmatprep.subr.bf16.mxu0 %v26459_v36 }
 0x7cd   :  { %5614 = vmatmul.mubr.f32.vlgmr.msra.gmra.mrb[6].mxu0 %v23885_v2  ;;  %v26548_v2 = vld [vmem:[#allocation48_spill] sm:$0xff] }
 0x7ce   :  { %19359 = vmatpush1.bf16.msra.mxu0 %v26460_v50  ;;  %6428 = vmatprep.mubr.f32.mxu0 %v26038_v17 }
 0x7cf   :  { %19361 = vmatprep.subr.bf16.mxu0 %v26461_v30 }
 0x7d2   :  { %19363 = vmatpush1.bf16.msra.mxu0 %v26462_v51 }
 0x7d3   :  { %19365 = vmatprep.subr.bf16.mxu0 %v26463_v53 }
 0x7d6   :  { %19367 = vmatpush1.bf16.msra.mxu0 %v26464_v38 }
 0x7d7   :  { %19369 = vmatprep.subr.bf16.mxu0 %v26465_v44 }
 0x7da   :  { %19371 = vmatpush1.bf16.msra.mxu0 %v26466_v10 }
 0x7db   :  { %19373 = vmatprep.subr.bf16.mxu0 %v26467_v22 }
 0x7de   :  { %19375 = vmatpush1.bf16.msra.mxu0 %v26468_v45 }
 0x7df   :  { %19377 = vmatprep.subr.bf16.mxu0 %v26469_v61 }
 0x7e2   :  { %19379 = vmatpush1.bf16.msra.mxu0 %v26470_v52 }
 0x7e3   :  { %19381 = vmatprep.subr.bf16.mxu0 %v26528_v49 }
 0x7e6   :  { %19383 = vmatpush1.bf16.msra.mxu0 %v26529_v55 }
 0x7e7   :  { %19385 = vmatprep.subr.bf16.mxu0 %v26530_v18 }
 0x7ea   :  { %19387 = vmatpush1.bf16.msra.mxu0 %v26531_v35 }
 0x7eb   :  { %19389 = vmatprep.subr.bf16.mxu0 %v26548_v2 }
 0x8a0   :  { %v23994_v58 = vpop.f32.mrb[6].mxu0 }
 0x8a1   :  { %v5617_v47 = vpop.f32.mrb[7].mxu0 }
 0x8a2   :  { %v5631_v39 = vrot.slane %v5617_v47, 6 }
 0x8a4   :  { %v5633_v62 = vadd.f32 %v26492_v5, %v5631_v39 }
 0x8a6   :  { %v14880_v3 = vmul.f32 -1.442695, %v5633_v62  ;;  %v26549_v62 = vld [vmem:[#allocation56_spill] sm:$0xff] }
 0x8a8   :  { %21396 = vpow2.f32 %v14880_v3 }
 0x8b2   :  { %v21397_v4 = vpop.eup %21396 }
 0x8b3   :  { %v5637_v40 = vadd.f32 1.0, %v21397_v4  ;;  %v26551_v4 = vld [vmem:[#allocation60_spill] sm:$0xff] }
 0x8b5   :  { %21398 = vrcp.f32 %v5637_v40 }
 0x8bf   :  { %v21399_v60 = vpop.eup %21398 }
 0x8c0   :  { %v5647_v19 = vrot.slane %v21399_v60, %v23752_v7  ;;  %v5621_v60 = vrot.slane %v23994_v58, 6 }
 0x8c2   :  { %v5654_v14 = vrot.slane %v5647_v19, %v23752_v7 }
 0x8c4   :  { %v5655_v48 = vcombine.high %v5654_v14, %v5654_v14 }
 0x8c6   :  { %v5657_v35 = vmul.f32 %v5655_v48, %v23882_v11 }
 0x8c8   :  { %v24000_v2 = vand.u32 4294901760, %v5657_v35 }
 0x8ca   :  { %v5740_v18 = vsub.f32 %v5657_v35, %v24000_v2 }
 0x8cc   :  { %v5741_v47 = vand.u32 4294901760, %v5740_v18 }
 0x8ce   :  { %v5742_v55 = vsub.f32 %v5740_v18, %v5741_v47 }
 0x8d0   :  { %v5743_v39 = vand.u32 4294901760, %v5742_v55  ;;  %v26550_v55 = vld [vmem:[#allocation35_spill] sm:$0xff] }
 0x8d1   :  { %v5623_v19 = vadd.f32 %v26550_v55, %v5621_v60 }
 0x8d2   :  { %16575 = vmatmul.mubr.f32.vlgmr.msra.gmra.mrb[18].mxu1 %v5743_v39 }
 0x8d3   :  { %19238 = vmatpush3.bf16.msra.mxu1 %v23307_v13  ;;  %16609 = vmatprep.mubr.msk.f32.mxu1 %vm21561_vm0, %v26038_v17  ;;  %v14879_v14 = vmul.f32 -1.442695, %v5623_v19 }
 0x8d4   :  { %19239 = vmatprep.subr.bf16.mxu1 %v26147_v34 }
 0x8d5   :  { %21400 = vpow2.f32 %v14879_v14 }
 0x8d7   :  { %19241 = vmatpush3.bf16.msra.mxu1 %v23321_v54 }
 0x8d8   :  { %19242 = vmatprep.subr.bf16.mxu1 %v26147_v34 }
 0x8db   :  { %19244 = vmatpush3.bf16.msra.mxu1 %v23335_v28 }
 0x8dc   :  { %19245 = vmatprep.subr.bf16.mxu1 %v26147_v34 }
 0x8df   :  { %19247 = vmatpush3.bf16.msra.mxu1 %v23367_v8  ;;  %v21401_v48 = vpop.eup %21400 }
 0x8e0   :  { %19248 = vmatprep.subr.bf16.mxu1 %v26147_v34 }
 0x8e3   :  { %19250 = vmatpush3.bf16.msra.mxu1 %v23371_v31 }
 0x8e4   :  { %19251 = vmatprep.subr.bf16.mxu1 %v26147_v34 }
 0x8e7   :  { %19253 = vmatpush3.bf16.msra.mxu1 %v23391_v41 }
 0x8e8   :  { %19254 = vmatprep.subr.bf16.mxu1 %v26147_v34 }
 0x8eb   :  { %19256 = vmatpush3.bf16.msra.mxu1 %v23414_v29 }
 0x8ec   :  { %19257 = vmatprep.subr.bf16.mxu1 %v26147_v34 }
 0x8ef   :  { %19259 = vmatpush3.bf16.msra.mxu1 %v23419_v0 }
 0x8f0   :  { %19260 = vmatprep.subr.bf16.mxu1 %v26147_v34 }
 0x8f2   :  { %16610 = vmatmul.mubr.f32.vlgmr.msra.gmra.mrb[18].mxu1 %v24000_v2 }
 0x8f3   :  { %19262 = vmatpush3.bf16.msra.mxu1 %v23423_v59  ;;  %16644 = vmatprep.mubr.msk.f32.mxu1 %vm21561_vm0, %v26038_v17 }
 0x8f4   :  { %19263 = vmatprep.subr.bf16.mxu1 %v26147_v34 }
 0x8f7   :  { %19265 = vmatpush3.bf16.msra.mxu1 %v23427_v24 }
 0x8f8   :  { %19266 = vmatprep.subr.bf16.mxu1 %v26147_v34 }
 0x8fb   :  { %19268 = vmatpush3.bf16.msra.mxu1 %v23431_v6 }
 0x8fc   :  { %19269 = vmatprep.subr.bf16.mxu1 %v26147_v34 }
 0x8ff   :  { %19271 = vmatpush3.bf16.msra.mxu1 %v23435_v32 }
 0x900   :  { %19272 = vmatprep.subr.bf16.mxu1 %v26147_v34 }
 0x903   :  { %19274 = vmatpush3.bf16.msra.mxu1 %v23439_v27 }
 0x904   :  { %19275 = vmatprep.subr.bf16.mxu1 %v26147_v34 }
 0x907   :  { %19277 = vmatpush3.bf16.msra.mxu1 %v23443_v46 }
 0x908   :  { %19278 = vmatprep.subr.bf16.mxu1 %v26147_v34 }
 0x90b   :  { %19280 = vmatpush3.bf16.msra.mxu1 %v23447_v16 }
 0x90c   :  { %19281 = vmatprep.subr.bf16.mxu1 %v26147_v34 }
 0x90f   :  { %19283 = vmatpush3.bf16.msra.mxu1 %v23451_v9 }
 0x910   :  { %19284 = vmatprep.subr.bf16.mxu1 %v26147_v34 }
 0x912   :  { %16645 = vmatmul.mubr.f32.vlgmr.msra.gmra.mrb[18].mxu1 %v5740_v18  ;;  %v5627_v18 = vadd.f32 1.0, %v21401_v48 }
 0x913   :  { %19286 = vmatpush3.bf16.msra.mxu1 %v23179_v56  ;;  %16679 = vmatprep.mubr.msk.f32.mxu1 %vm21561_vm0, %v26038_v17 }
 0x914   :  { %19287 = vmatprep.subr.bf16.mxu1 %v26147_v34 }
 0x917   :  { %19289 = vmatpush3.bf16.msra.mxu1 %v23189_v25 }
 0x918   :  { %19290 = vmatprep.subr.bf16.mxu1 %v26147_v34 }
 0x91b   :  { %19292 = vmatpush3.bf16.msra.mxu1 %v23199_v20 }
 0x91c   :  { %19293 = vmatprep.subr.bf16.mxu1 %v26147_v34 }
 0x91f   :  { %19295 = vmatpush3.bf16.msra.mxu1 %v23224_v21 }
 0x920   :  { %19296 = vmatprep.subr.bf16.mxu1 %v26147_v34 }
 0x923   :  { %19298 = vmatpush3.bf16.msra.mxu1 %v23234_v63 }
 0x924   :  { %19299 = vmatprep.subr.bf16.mxu1 %v26147_v34 }
 0x927   :  { %19301 = vmatpush3.bf16.msra.mxu1 %v23254_v57 }
 0x928   :  { %19302 = vmatprep.subr.bf16.mxu1 %v26147_v34 }
 0x92b   :  { %19304 = vmatpush3.bf16.msra.mxu1 %v23274_v37 }
 0x92c   :  { %19305 = vmatprep.subr.bf16.mxu1 %v26147_v34 }
 0x92f   :  { %19307 = vmatpush3.bf16.msra.mxu1 %v23288_v43 }
 0x930   :  { %19308 = vmatprep.subr.bf16.mxu1 %v26147_v34 }
 0x932   :  { %16680 = vmatmul.mubr.f32.vlgmr.msra.gmra.mrb[18].mxu1 %v5741_v47  ;;  %v26552_v47 = vld [vmem:[#allocation39_spill] sm:$0xff] }
 0x933   :  { %19310 = vmatpush3.bf16.msra.mxu1 %v23525_v12  ;;  %16714 = vmatprep.mubr.msk.f32.mxu1 %vm21561_vm0, %v26038_v17  ;;  %v24119_v39 = vrot.slane %v23882_v11, %v26552_v47 }
 0x934   :  { %19311 = vmatprep.subr.bf16.mxu1 %v26147_v34 }
 0x935   :  { %26553 = vst [vmem:[#allocation68_spill] sm:$0xff] %v24119_v39 }
 0x937   :  { %19313 = vmatpush3.bf16.msra.mxu1 %v23533_v42 }
 0x938   :  { %19314 = vmatprep.subr.bf16.mxu1 %v26147_v34 }
 0x93b   :  { %19316 = vmatpush3.bf16.msra.mxu1 %v23543_v33 }
 0x93c   :  { %19317 = vmatprep.subr.bf16.mxu1 %v26147_v34 }
 0x93f   :  { %19319 = vmatpush3.bf16.msra.mxu1 %v23551_v23 }
 0x940   :  { %19320 = vmatprep.subr.bf16.mxu1 %v26147_v34 }
 0x943   :  { %19322 = vmatpush3.bf16.msra.mxu1 %v23559_v1 }
 0x944   :  { %19323 = vmatprep.subr.bf16.mxu1 %v26147_v34 }
 0x947   :  { %19325 = vmatpush3.bf16.msra.mxu1 %v23567_v15 }
 0x948   :  { %19326 = vmatprep.subr.bf16.mxu1 %v26147_v34 }
 0x94b   :  { %19328 = vmatpush3.bf16.msra.mxu1 %v23575_v26 }
 0x94c   :  { %19329 = vmatprep.subr.bf16.mxu1 %v26147_v34 }
 0x94f   :  { %19331 = vmatpush3.bf16.msra.mxu1 %v26549_v62 }
 0x950   :  { %19332 = vmatprep.subr.bf16.mxu1 %v26147_v34 }
 0x952   :  { %16715 = vmatmul.mubr.f32.vlgmr.msra.gmra.mrb[18].mxu1 %v24000_v2 }
 0x953   :  { %19334 = vmatpush3.bf16.msra.mxu1 %v23179_v56  ;;  %16749 = vmatprep.mubr.msk.f32.mxu1 %vm21561_vm0, %v26038_v17 }
 0x954   :  { %19335 = vmatprep.subr.bf16.mxu1 %v26147_v34 }
 0x957   :  { %19337 = vmatpush3.bf16.msra.mxu1 %v23189_v25 }
 0x958   :  { %19338 = vmatprep.subr.bf16.mxu1 %v26147_v34 }
 0x95b   :  { %19340 = vmatpush3.bf16.msra.mxu1 %v23199_v20 }
 0x95c   :  { %19341 = vmatprep.subr.bf16.mxu1 %v26147_v34 }
 0x95f   :  { %19343 = vmatpush3.bf16.msra.mxu1 %v23224_v21 }
 0x960   :  { %19344 = vmatprep.subr.bf16.mxu1 %v26147_v34 }
 0x963   :  { %19346 = vmatpush3.bf16.msra.mxu1 %v23234_v63 }
 0x964   :  { %19347 = vmatprep.subr.bf16.mxu1 %v26147_v34 }
 0x967   :  { %19349 = vmatpush3.bf16.msra.mxu1 %v23254_v57 }
 0x968   :  { %19350 = vmatprep.subr.bf16.mxu1 %v26147_v34 }
 0x96b   :  { %19352 = vmatpush3.bf16.msra.mxu1 %v23274_v37 }
 0x96c   :  { %19353 = vmatprep.subr.bf16.mxu1 %v26147_v34 }
 0x96f   :  { %19355 = vmatpush3.bf16.msra.mxu1 %v23288_v43 }
 0x970   :  { %19548 = vmatprep.subr.bf16.mxu1 %v26147_v34 }
 0x972   :  { %16750 = vmatmul.mubr.f32.vlgmr.msra.gmra.mrb[18].mxu1 %v24000_v2 }
 0x973   :  { %19550 = vmatpush3.bf16.msra.mxu1 %v23179_v56  ;;  %16784 = vmatprep.mubr.msk.f32.mxu1 %vm21561_vm0, %v26038_v17 }
 0x974   :  { %19551 = vmatprep.subr.bf16.mxu1 %v26147_v34 }
 0x977   :  { %19553 = vmatpush3.bf16.msra.mxu1 %v23189_v25 }
 0x978   :  { %19554 = vmatprep.subr.bf16.mxu1 %v26147_v34 }
 0x97b   :  { %19556 = vmatpush3.bf16.msra.mxu1 %v23199_v20 }
 0x97c   :  { %19557 = vmatprep.subr.bf16.mxu1 %v26147_v34 }
 0x97f   :  { %19559 = vmatpush3.bf16.msra.mxu1 %v23224_v21 }
 0x980   :  { %19560 = vmatprep.subr.bf16.mxu1 %v26147_v34 }
 0x983   :  { %19562 = vmatpush3.bf16.msra.mxu1 %v23234_v63 }
 0x984   :  { %19563 = vmatprep.subr.bf16.mxu1 %v26147_v34 }
 0x987   :  { %19565 = vmatpush3.bf16.msra.mxu1 %v23254_v57 }
 0x988   :  { %19566 = vmatprep.subr.bf16.mxu1 %v26147_v34 }
 0x98b   :  { %19568 = vmatpush3.bf16.msra.mxu1 %v23274_v37 }
 0x98c   :  { %19569 = vmatprep.subr.bf16.mxu1 %v26147_v34 }
 0x98f   :  { %19571 = vmatpush3.bf16.msra.mxu1 %v23288_v43 }
 0x990   :  { %19572 = vmatprep.subr.bf16.mxu1 %v26147_v34 }
 0xa45   :  { %v6295_v40 = vpop.f32.mrb[18].mxu1 }
 0xa46   :  { %v6300_v3 = vrot.slane %v6295_v40, 6  ;;  %v16751_v35 = vpop.f32.mrb[19].mxu1 }
 0xa48   :  { %v6302_v2 = vadd.f32 %v26551_v4, %v6300_v3  ;;  %v26600_v4 = vld [vmem:[#allocation79_spill] sm:$0xff] }
 0xa4a   :  { %21402 = vtanh.f32 %v6302_v2 }
 0xa4b   :  { %21404 = vrcp.f32 %v5627_v18 }
 0xa54   :  { %v21403_v62 = vpop.eup %21402 }
 0xa55   :  { %v6304_v58 = vsub.f32 %v21403_v62, %v24119_v39  ;;  %v21405_v26 = vpop.eup %21404  ;;  %v26554_v62 = vld [vmem:[#allocation49_spill] sm:$0xff]  ;;  %v26564_v39 = vld [vmem:[#allocation83_spill] sm:$0xff] }
 0xa57   :  { %v6305_v60 = vmul.f32 %v21405_v26, %v6304_v58  ;;  %v26555_v26 = vld [vmem:[#allocation51_spill] sm:$0xff]  ;;  %v26556_v58 = vld [vmem:[#allocation57_spill] sm:$0xff] }
 0xa59   :  { %v6313_v19 = vrot.slane %v6305_v60, %v23752_v7  ;;  %v26558_v60 = vld [vmem:[#allocation59_spill] sm:$0xff] }
 0xa5b   :  { %v6320_v14 = vrot.slane %v6313_v19, %v23752_v7  ;;  %v26559_v19 = vld [vmem:[#allocation61_spill] sm:$0xff] }
 0xa5d   :  { %v6321_v40 = vcombine.high %v6320_v14, %v6320_v14  ;;  %v26560_v14 = vld [vmem:[#allocation63_spill] sm:$0xff] }
 0xa5f   :  { %v24125_v48 = vadd.f32 %v6321_v40, %v23882_v11  ;;  %v26557_v11 = vld [vmem:[#allocation58_spill] sm:$0xff]  ;;  %v26561_v40 = vld [vmem:[#allocation64_spill] sm:$0xff] }
 0xa61   :  { %v24128_v3 = vand.u32 4294901760, %v24125_v48 }
 0xa63   :  { %v6430_v35 = vsub.f32 %v24125_v48, %v24128_v3 }
 0xa65   :  { %v6431_v18 = vand.u32 4294901760, %v6430_v35 }
 0xa67   :  { %v6432_v2 = vsub.f32 %v6430_v35, %v6431_v18 }
 0xa69   :  { %v6433_v47 = vand.u32 4294901760, %v6432_v2  ;;  %v26562_v2 = vld [vmem:[#allocation65_spill] sm:$0xff] }
 0xa6b   :  { %6434 = vmatmul.mubr.f32.vlgmr.msra.gmra.mrb[8].mxu0 %v6433_v47  ;;  %v26563_v47 = vld [vmem:[#allocation69_spill] sm:$0xff] }
 0xa6c   :  { %19391 = vmatpush1.bf16.msra.mxu0 %v26554_v62  ;;  %6664 = vmatprep.mubr.f32.mxu0 %v26038_v17  ;;  %v26565_v62 = vld [vmem:[#allocation84_spill] sm:$0xff] }
 0xa6d   :  { %19393 = vmatprep.subr.bf16.mxu0 %v26555_v26  ;;  %v26566_v26 = vld [vmem:[#allocation85_spill] sm:$0xff] }
 0xa70   :  { %19395 = vmatpush1.bf16.msra.mxu0 %v26556_v58  ;;  %v26567_v58 = vld [vmem:[#allocation86_spill] sm:$0xff] }
 0xa71   :  { %19397 = vmatprep.subr.bf16.mxu0 %v26557_v11  ;;  %v26568_v11 = vld [vmem:[#allocation87_spill] sm:$0xff] }
 0xa74   :  { %19399 = vmatpush1.bf16.msra.mxu0 %v26558_v60  ;;  %v26569_v60 = vld [vmem:[#allocation88_spill] sm:$0xff] }
 0xa75   :  { %19401 = vmatprep.subr.bf16.mxu0 %v26559_v19  ;;  %v26581_v19 = vld [vmem:[#allocation34_spill] sm:$0xff] }
 0xa78   :  { %19403 = vmatpush1.bf16.msra.mxu0 %v26560_v14  ;;  %v26570_v14 = vld [vmem:[#allocation89_spill] sm:$0xff] }
 0xa79   :  { %19405 = vmatprep.subr.bf16.mxu0 %v26561_v40  ;;  %v26579_v40 = vld [vmem:[#allocation41_spill] sm:$0xff] }
 0xa7c   :  { %19407 = vmatpush1.bf16.msra.mxu0 %v26562_v2  ;;  %v26571_v2 = vld [vmem:[#allocation25_spill] sm:$0xff] }
 0xa7d   :  { %19409 = vmatprep.subr.bf16.mxu0 %v26563_v47  ;;  %v26572_v47 = vld [vmem:[#allocation66_spill] sm:$0xff] }
 0xa80   :  { %19411 = vmatpush1.bf16.msra.mxu0 %v26564_v39  ;;  %v26573_v39 = vld [vmem:[#allocation67_spill] sm:$0xff] }
 0xa81   :  { %19413 = vmatprep.subr.bf16.mxu0 %v26565_v62  ;;  %v26574_v62 = vld [vmem:[#allocation20_spill] sm:$0xff] }
 0xa84   :  { %19415 = vmatpush1.bf16.msra.mxu0 %v26566_v26  ;;  %v26575_v26 = vld [vmem:[#allocation70_spill] sm:$0xff] }
 0xa85   :  { %19417 = vmatprep.subr.bf16.mxu0 %v26567_v58  ;;  %v26576_v58 = vld [vmem:[#allocation71_spill] sm:$0xff] }
 0xa88   :  { %19419 = vmatpush1.bf16.msra.mxu0 %v26568_v11  ;;  %v26577_v11 = vld [vmem:[#allocation74_spill] sm:$0xff] }
 0xa89   :  { %19421 = vmatprep.subr.bf16.mxu0 %v26569_v60  ;;  %v26578_v60 = vld [vmem:[#allocation30_spill] sm:$0xff] }
 0xa8b   :  { %6666 = vmatmul.mubr.f32.vlgmr.msra.gmra.mrb[8].mxu0 %v24128_v3 }
 0xa8c   :  { %19423 = vmatpush1.bf16.msra.mxu0 %v26570_v14  ;;  %6800 = vmatprep.mubr.f32.mxu0 %v26038_v17  ;;  %v26580_v14 = vld [vmem:[#allocation42_spill] sm:$0xff] }
 0xa8d   :  { %19425 = vmatprep.subr.bf16.mxu0 %v26571_v2  ;;  %v26582_v2 = vld [vmem:[#allocation43_spill] sm:$0xff] }
 0xa90   :  { %19427 = vmatpush1.bf16.msra.mxu0 %v26572_v47  ;;  %v26583_v47 = vld [vmem:[#allocation36_spill] sm:$0xff] }
 0xa91   :  { %19429 = vmatprep.subr.bf16.mxu0 %v26573_v39  ;;  %v26584_v39 = vld [vmem:[#allocation32_spill] sm:$0xff] }
 0xa94   :  { %19431 = vmatpush1.bf16.msra.mxu0 %v26574_v62  ;;  %v26596_v62 = vld [vmem:[#allocation46_spill] sm:$0xff] }
 0xa95   :  { %19433 = vmatprep.subr.bf16.mxu0 %v26575_v26  ;;  %v26595_v26 = vld [vmem:[#allocation45_spill] sm:$0xff] }
 0xa98   :  { %19435 = vmatpush1.bf16.msra.mxu0 %v26576_v58  ;;  %v26594_v58 = vld [vmem:[#allocation38_spill] sm:$0xff] }
 0xa99   :  { %19437 = vmatprep.subr.bf16.mxu0 %v26577_v11  ;;  %v26593_v11 = vld [vmem:[#allocation78_spill] sm:$0xff] }
 0xa9c   :  { %19439 = vmatpush1.bf16.msra.mxu0 %v26578_v60  ;;  %v26592_v60 = vld [vmem:[#allocation77_spill] sm:$0xff] }
 0xa9d   :  { %19441 = vmatprep.subr.bf16.mxu0 %v26579_v40  ;;  %v26591_v40 = vld [vmem:[#allocation76_spill] sm:$0xff] }
 0xaa0   :  { %19443 = vmatpush1.bf16.msra.mxu0 %v26580_v14  ;;  %v26590_v14 = vld [vmem:[#allocation31_spill] sm:$0xff] }
 0xaa1   :  { %19445 = vmatprep.subr.bf16.mxu0 %v26581_v19  ;;  %v26589_v19 = vld [vmem:[#allocation22_spill] sm:$0xff] }
 0xaa4   :  { %19447 = vmatpush1.bf16.msra.mxu0 %v26582_v2  ;;  %v26588_v2 = vld [vmem:[#allocation27_spill] sm:$0xff] }
 0xaa5   :  { %19449 = vmatprep.subr.bf16.mxu0 %v26583_v47  ;;  %v26587_v47 = vld [vmem:[#allocation47_spill] sm:$0xff] }
 0xaa8   :  { %19451 = vmatpush1.bf16.msra.mxu0 %v26584_v39  ;;  %v26586_v39 = vld [vmem:[#allocation44_spill] sm:$0xff] }
 0xaa9   :  { %19453 = vmatprep.subr.bf16.mxu0 %v26459_v36 }
 0xaab   :  { %6803 = vmatmul.mubr.f32.vlgmr.msra.gmra.mrb[8].mxu0 %v6430_v35  ;;  %v26585_v35 = vld [vmem:[#allocation33_spill] sm:$0xff] }
 0xaac   :  { %19455 = vmatpush1.bf16.msra.mxu0 %v26460_v50  ;;  %6905 = vmatprep.mubr.f32.mxu0 %v26038_v17 }
 0xaad   :  { %19457 = vmatprep.subr.bf16.mxu0 %v26461_v30 }
 0xab0   :  { %19459 = vmatpush1.bf16.msra.mxu0 %v26462_v51 }
 0xab1   :  { %19461 = vmatprep.subr.bf16.mxu0 %v26463_v53 }
 0xab4   :  { %19463 = vmatpush1.bf16.msra.mxu0 %v26464_v38 }
 0xab5   :  { %19465 = vmatprep.subr.bf16.mxu0 %v26465_v44 }
 0xab8   :  { %19467 = vmatpush1.bf16.msra.mxu0 %v26466_v10 }
 0xab9   :  { %19469 = vmatprep.subr.bf16.mxu0 %v26467_v22 }
 0xabc   :  { %19471 = vmatpush1.bf16.msra.mxu0 %v26468_v45 }
 0xabd   :  { %19473 = vmatprep.subr.bf16.mxu0 %v26469_v61 }
 0xac0   :  { %19475 = vmatpush1.bf16.msra.mxu0 %v26470_v52 }
 0xac1   :  { %19477 = vmatprep.subr.bf16.mxu0 %v26528_v49 }
 0xac4   :  { %19479 = vmatpush1.bf16.msra.mxu0 %v26585_v35 }
 0xac5   :  { %19481 = vmatprep.subr.bf16.mxu0 %v26586_v39 }
 0xac8   :  { %19483 = vmatpush1.bf16.msra.mxu0 %v26587_v47 }
 0xac9   :  { %19485 = vmatprep.subr.bf16.mxu0 %v26588_v2  ;;  %v26597_v2 = vld [vmem:[#allocation50_spill] sm:$0xff] }
 0xacb   :  { %6909 = vmatmul.mubr.f32.vlgmr.msra.gmra.mrb[8].mxu0 %v6431_v18  ;;  %v26598_v18 = vld [vmem:[#allocation52_spill] sm:$0xff] }
 0xacc   :  { %19487 = vmatpush1.bf16.msra.mxu0 %v26589_v19  ;;  %7075 = vmatprep.mubr.f32.mxu0 %v26038_v17  ;;  %v26599_v19 = vld [vmem:[#allocation54_spill] sm:$0xff] }
 0xacd   :  { %19489 = vmatprep.subr.bf16.mxu0 %v26590_v14  ;;  %v26601_v14 = vld [vmem:[#allocation80_spill] sm:$0xff] }
 0xad0   :  { %19491 = vmatpush1.bf16.msra.mxu0 %v26591_v40  ;;  %v26602_v40 = vld [vmem:[#allocation81_spill] sm:$0xff] }
 0xad1   :  { %19493 = vmatprep.subr.bf16.mxu0 %v26592_v60  ;;  %v26603_v60 = vld [vmem:[#allocation82_spill] sm:$0xff] }
 0xad4   :  { %19495 = vmatpush1.bf16.msra.mxu0 %v26593_v11 }
 0xad5   :  { %19497 = vmatprep.subr.bf16.mxu0 %v26594_v58 }
 0xad8   :  { %19499 = vmatpush1.bf16.msra.mxu0 %v26595_v26 }
 0xad9   :  { %19501 = vmatprep.subr.bf16.mxu0 %v26596_v62 }
 0xadc   :  { %19503 = vmatpush1.bf16.msra.mxu0 %v26597_v2 }
 0xadd   :  { %19505 = vmatprep.subr.bf16.mxu0 %v26598_v18 }
 0xae0   :  { %19507 = vmatpush1.bf16.msra.mxu0 %v26599_v19 }
 0xae1   :  { %19509 = vmatprep.subr.bf16.mxu0 %v26600_v4 }
 0xae4   :  { %19511 = vmatpush1.bf16.msra.mxu0 %v26601_v14 }
 0xae5   :  { %19513 = vmatprep.subr.bf16.mxu0 %v26602_v40 }
 0xae8   :  { %19515 = vmatpush1.bf16.msra.mxu0 %v26603_v60 }
 0xae9   :  { %19517 = vmatprep.subr.bf16.mxu0 %v26459_v36 }
 0xaeb   :  { %7077 = vmatmul.mubr.f32.vlgmr.msra.gmra.mrb[8].mxu0 %v24128_v3 }
 0xaec   :  { %19519 = vmatpush1.bf16.msra.mxu0 %v26460_v50  ;;  %7179 = vmatprep.mubr.f32.mxu0 %v26038_v17 }
 0xaed   :  { %19521 = vmatprep.subr.bf16.mxu0 %v26461_v30 }
 0xaf0   :  { %19523 = vmatpush1.bf16.msra.mxu0 %v26462_v51 }
 0xaf1   :  { %19525 = vmatprep.subr.bf16.mxu0 %v26463_v53 }
 0xaf4   :  { %19527 = vmatpush1.bf16.msra.mxu0 %v26464_v38 }
 0xaf5   :  { %19529 = vmatprep.subr.bf16.mxu0 %v26465_v44 }
 0xaf8   :  { %19531 = vmatpush1.bf16.msra.mxu0 %v26466_v10 }
 0xaf9   :  { %19533 = vmatprep.subr.bf16.mxu0 %v26467_v22 }
 0xafc   :  { %19535 = vmatpush1.bf16.msra.mxu0 %v26468_v45 }
 0xafd   :  { %19537 = vmatprep.subr.bf16.mxu0 %v26469_v61 }
 0xb00   :  { %19539 = vmatpush1.bf16.msra.mxu0 %v26470_v52 }
 0xb01   :  { %19541 = vmatprep.subr.bf16.mxu0 %v26528_v49 }
 0xb04   :  { %19543 = vmatpush1.bf16.msra.mxu0 %v26585_v35 }
 0xb05   :  { %19545 = vmatprep.subr.bf16.mxu0 %v26586_v39 }
 0xb08   :  { %19547 = vmatpush1.bf16.msra.mxu0 %v26587_v47 }
 0xb09   :  { %19693 = vmatprep.subr.bf16.mxu0 %v26459_v36 }
 0xb0b   :  { %7181 = vmatmul.mubr.f32.vlgmr.msra.gmra.mrb[8].mxu0 %v24128_v3  ;;  %v26604_v3 = vld [vmem:[#allocation48_spill] sm:$0xff] }
 0xb0c   :  { %19695 = vmatpush1.bf16.msra.mxu0 %v26460_v50  ;;  %7997 = vmatprep.mubr.f32.mxu0 %v26038_v17 }
 0xb0d   :  { %19697 = vmatprep.subr.bf16.mxu0 %v26461_v30 }
 0xb10   :  { %19699 = vmatpush1.bf16.msra.mxu0 %v26462_v51 }
 0xb11   :  { %19701 = vmatprep.subr.bf16.mxu0 %v26463_v53 }
 0xb14   :  { %19703 = vmatpush1.bf16.msra.mxu0 %v26464_v38 }
 0xb15   :  { %19705 = vmatprep.subr.bf16.mxu0 %v26465_v44 }
 0xb18   :  { %19707 = vmatpush1.bf16.msra.mxu0 %v26466_v10 }
 0xb19   :  { %19709 = vmatprep.subr.bf16.mxu0 %v26467_v22 }
 0xb1c   :  { %19711 = vmatpush1.bf16.msra.mxu0 %v26468_v45 }
 0xb1d   :  { %19713 = vmatprep.subr.bf16.mxu0 %v26469_v61 }
 0xb20   :  { %19715 = vmatpush1.bf16.msra.mxu0 %v26470_v52 }
 0xb21   :  { %19717 = vmatprep.subr.bf16.mxu0 %v26528_v49 }
 0xb24   :  { %19719 = vmatpush1.bf16.msra.mxu0 %v26585_v35 }
 0xb25   :  { %19721 = vmatprep.subr.bf16.mxu0 %v26586_v39 }
 0xb28   :  { %19723 = vmatpush1.bf16.msra.mxu0 %v26587_v47 }
 0xb29   :  { %19725 = vmatprep.subr.bf16.mxu0 %v26604_v3 }
 0xbde   :  { %v24237_v60 = vpop.f32.mrb[8].mxu0 }
 0xbdf   :  { %v7184_v40 = vpop.f32.mrb[9].mxu0 }
 0xbe0   :  { %v7198_v14 = vrot.slane %v7184_v40, 5 }
 0xbe2   :  { %v7200_v4 = vadd.f32 %v26492_v5, %v7198_v14 }
 0xbe4   :  { %v14882_v19 = vmul.f32 -1.442695, %v7200_v4 }
 0xbe6   :  { %21406 = vpow2.f32 %v14882_v19 }
 0xbf0   :  { %v21407_v18 = vpop.eup %21406 }
 0xbf1   :  { %v7204_v2 = vadd.f32 1.0, %v21407_v18 }
 0xbf3   :  { %21408 = vrcp.f32 %v7204_v2 }
 0xbfd   :  { %v21409_v62 = vpop.eup %21408 }
 0xbfe   :  { %v7214_v26 = vrot.slane %v21409_v62, %v23752_v7  ;;  %v26605_v62 = vld [vmem:[#allocation55_spill] sm:$0xff] }
 0xc00   :  { %v7215_v58 = vcombine.high %v7214_v26, %v7214_v26  ;;  %v26606_v26 = vld [vmem:[#allocation56_spill] sm:$0xff] }
 0xc02   :  { %v7222_v11 = vrot.slane %v7215_v58, %v23752_v7 }
 0xc04   :  { %v7223_v47 = vcombine.high %v7222_v11, %v7222_v11 }
 0xc06   :  { %v7225_v3 = vmul.f32 %v7223_v47, %v24125_v48 }
 0xc08   :  { %v24243_v39 = vand.u32 4294901760, %v7225_v3 }
 0xc0a   :  { %v7308_v40 = vsub.f32 %v7225_v3, %v24243_v39  ;;  %v26607_v3 = vld [vmem:[#allocation60_spill] sm:$0xff] }
 0xc0c   :  { %v7309_v35 = vand.u32 4294901760, %v7308_v40 }
 0xc0e   :  { %v7310_v14 = vsub.f32 %v7308_v40, %v7309_v35 }
 0xc10   :  { %v7311_v4 = vand.u32 4294901760, %v7310_v14  ;;  %v26608_v14 = vld [vmem:[#allocation39_spill] sm:$0xff] }
 0xc12   :  { %16785 = vmatmul.mubr.f32.vlgmr.msra.gmra.mrb[20].mxu1 %v7311_v4  ;;  %v24362_v4 = vrot.slane %v24125_v48, %v26608_v14 }
 0xc13   :  { %19574 = vmatpush3.bf16.msra.mxu1 %v23307_v13  ;;  %16819 = vmatprep.mubr.msk.f32.mxu1 %vm21561_vm0, %v26038_v17 }
 0xc14   :  { %19575 = vmatprep.subr.bf16.mxu1 %v26147_v34  ;;  %26609 = vst [vmem:[#allocation72_spill] sm:$0xff] %v24362_v4 }
 0xc17   :  { %19577 = vmatpush3.bf16.msra.mxu1 %v23321_v54 }
 0xc18   :  { %19578 = vmatprep.subr.bf16.mxu1 %v26147_v34 }
 0xc1b   :  { %19580 = vmatpush3.bf16.msra.mxu1 %v23335_v28 }
 0xc1c   :  { %19581 = vmatprep.subr.bf16.mxu1 %v26147_v34 }
 0xc1f   :  { %19583 = vmatpush3.bf16.msra.mxu1 %v23367_v8 }
 0xc20   :  { %19584 = vmatprep.subr.bf16.mxu1 %v26147_v34 }
 0xc23   :  { %19586 = vmatpush3.bf16.msra.mxu1 %v23371_v31 }
 0xc24   :  { %19587 = vmatprep.subr.bf16.mxu1 %v26147_v34 }
 0xc27   :  { %19589 = vmatpush3.bf16.msra.mxu1 %v23391_v41 }
 0xc28   :  { %19590 = vmatprep.subr.bf16.mxu1 %v26147_v34 }
 0xc2b   :  { %19592 = vmatpush3.bf16.msra.mxu1 %v23414_v29 }
 0xc2c   :  { %19593 = vmatprep.subr.bf16.mxu1 %v26147_v34 }
 0xc2f   :  { %19595 = vmatpush3.bf16.msra.mxu1 %v23419_v0 }
 0xc30   :  { %19596 = vmatprep.subr.bf16.mxu1 %v26147_v34 }
 0xc32   :  { %16820 = vmatmul.mubr.f32.vlgmr.msra.gmra.mrb[20].mxu1 %v24243_v39 }
 0xc33   :  { %19598 = vmatpush3.bf16.msra.mxu1 %v23423_v59  ;;  %16854 = vmatprep.mubr.msk.f32.mxu1 %vm21561_vm0, %v26038_v17 }
 0xc34   :  { %19599 = vmatprep.subr.bf16.mxu1 %v26147_v34 }
 0xc37   :  { %19601 = vmatpush3.bf16.msra.mxu1 %v23427_v24 }
 0xc38   :  { %19602 = vmatprep.subr.bf16.mxu1 %v26147_v34 }
 0xc3b   :  { %19604 = vmatpush3.bf16.msra.mxu1 %v23431_v6 }
 0xc3c   :  { %19605 = vmatprep.subr.bf16.mxu1 %v26147_v34 }
 0xc3f   :  { %19607 = vmatpush3.bf16.msra.mxu1 %v23435_v32 }
 0xc40   :  { %19608 = vmatprep.subr.bf16.mxu1 %v26147_v34 }
 0xc43   :  { %19610 = vmatpush3.bf16.msra.mxu1 %v23439_v27 }
 0xc44   :  { %19611 = vmatprep.subr.bf16.mxu1 %v26147_v34 }
 0xc47   :  { %19613 = vmatpush3.bf16.msra.mxu1 %v23443_v46 }
 0xc48   :  { %19614 = vmatprep.subr.bf16.mxu1 %v26147_v34 }
 0xc4b   :  { %19616 = vmatpush3.bf16.msra.mxu1 %v23447_v16 }
 0xc4c   :  { %19617 = vmatprep.subr.bf16.mxu1 %v26147_v34 }
 0xc4f   :  { %19619 = vmatpush3.bf16.msra.mxu1 %v23451_v9 }
 0xc50   :  { %19620 = vmatprep.subr.bf16.mxu1 %v26147_v34 }
 0xc52   :  { %16855 = vmatmul.mubr.f32.vlgmr.msra.gmra.mrb[20].mxu1 %v7308_v40 }
 0xc53   :  { %19622 = vmatpush3.bf16.msra.mxu1 %v23179_v56  ;;  %16889 = vmatprep.mubr.msk.f32.mxu1 %vm21561_vm0, %v26038_v17 }
 0xc54   :  { %19623 = vmatprep.subr.bf16.mxu1 %v26147_v34 }
 0xc57   :  { %19625 = vmatpush3.bf16.msra.mxu1 %v23189_v25 }
 0xc58   :  { %19626 = vmatprep.subr.bf16.mxu1 %v26147_v34 }
 0xc5b   :  { %19628 = vmatpush3.bf16.msra.mxu1 %v23199_v20 }
 0xc5c   :  { %19629 = vmatprep.subr.bf16.mxu1 %v26147_v34 }
 0xc5f   :  { %19631 = vmatpush3.bf16.msra.mxu1 %v23224_v21 }
 0xc60   :  { %19632 = vmatprep.subr.bf16.mxu1 %v26147_v34 }
 0xc63   :  { %19634 = vmatpush3.bf16.msra.mxu1 %v23234_v63 }
 0xc64   :  { %19635 = vmatprep.subr.bf16.mxu1 %v26147_v34 }
 0xc67   :  { %19637 = vmatpush3.bf16.msra.mxu1 %v23254_v57 }
 0xc68   :  { %19638 = vmatprep.subr.bf16.mxu1 %v26147_v34 }
 0xc6b   :  { %19640 = vmatpush3.bf16.msra.mxu1 %v23274_v37 }
 0xc6c   :  { %19641 = vmatprep.subr.bf16.mxu1 %v26147_v34 }
 0xc6f   :  { %19643 = vmatpush3.bf16.msra.mxu1 %v23288_v43 }
 0xc70   :  { %19644 = vmatprep.subr.bf16.mxu1 %v26147_v34 }
 0xc72   :  { %16890 = vmatmul.mubr.f32.vlgmr.msra.gmra.mrb[20].mxu1 %v7309_v35 }
 0xc73   :  { %19646 = vmatpush3.bf16.msra.mxu1 %v23525_v12  ;;  %16924 = vmatprep.mubr.msk.f32.mxu1 %vm21561_vm0, %v26038_v17 }
 0xc74   :  { %19647 = vmatprep.subr.bf16.mxu1 %v26147_v34 }
 0xc77   :  { %19649 = vmatpush3.bf16.msra.mxu1 %v23533_v42 }
 0xc78   :  { %19650 = vmatprep.subr.bf16.mxu1 %v26147_v34 }
 0xc7b   :  { %19652 = vmatpush3.bf16.msra.mxu1 %v23543_v33 }
 0xc7c   :  { %19653 = vmatprep.subr.bf16.mxu1 %v26147_v34 }
 0xc7f   :  { %19655 = vmatpush3.bf16.msra.mxu1 %v23551_v23 }
 0xc80   :  { %19656 = vmatprep.subr.bf16.mxu1 %v26147_v34 }
 0xc83   :  { %19658 = vmatpush3.bf16.msra.mxu1 %v23559_v1 }
 0xc84   :  { %19659 = vmatprep.subr.bf16.mxu1 %v26147_v34 }
 0xc87   :  { %19661 = vmatpush3.bf16.msra.mxu1 %v23567_v15 }
 0xc88   :  { %19662 = vmatprep.subr.bf16.mxu1 %v26147_v34 }
 0xc8b   :  { %19664 = vmatpush3.bf16.msra.mxu1 %v26605_v62 }
 0xc8c   :  { %19665 = vmatprep.subr.bf16.mxu1 %v26147_v34 }
 0xc8f   :  { %19667 = vmatpush3.bf16.msra.mxu1 %v26606_v26 }
 0xc90   :  { %19668 = vmatprep.subr.bf16.mxu1 %v26147_v34 }
 0xc92   :  { %16925 = vmatmul.mubr.f32.vlgmr.msra.gmra.mrb[20].mxu1 %v24243_v39 }
 0xc93   :  { %19670 = vmatpush3.bf16.msra.mxu1 %v23179_v56  ;;  %16959 = vmatprep.mubr.msk.f32.mxu1 %vm21561_vm0, %v26038_v17 }
 0xc94   :  { %19671 = vmatprep.subr.bf16.mxu1 %v26147_v34 }
 0xc97   :  { %19673 = vmatpush3.bf16.msra.mxu1 %v23189_v25 }
 0xc98   :  { %19674 = vmatprep.subr.bf16.mxu1 %v26147_v34 }
 0xc9b   :  { %19676 = vmatpush3.bf16.msra.mxu1 %v23199_v20 }
 0xc9c   :  { %19677 = vmatprep.subr.bf16.mxu1 %v26147_v34 }
 0xc9f   :  { %19679 = vmatpush3.bf16.msra.mxu1 %v23224_v21 }
 0xca0   :  { %19680 = vmatprep.subr.bf16.mxu1 %v26147_v34 }
 0xca3   :  { %19682 = vmatpush3.bf16.msra.mxu1 %v23234_v63 }
 0xca4   :  { %19683 = vmatprep.subr.bf16.mxu1 %v26147_v34 }
 0xca7   :  { %19685 = vmatpush3.bf16.msra.mxu1 %v23254_v57 }
 0xca8   :  { %19686 = vmatprep.subr.bf16.mxu1 %v26147_v34 }
 0xcab   :  { %19688 = vmatpush3.bf16.msra.mxu1 %v23274_v37 }
 0xcac   :  { %19689 = vmatprep.subr.bf16.mxu1 %v26147_v34 }
 0xcaf   :  { %19691 = vmatpush3.bf16.msra.mxu1 %v23288_v43 }
 0xcb0   :  { %19884 = vmatprep.subr.bf16.mxu1 %v26147_v34 }
 0xcb2   :  { %16960 = vmatmul.mubr.f32.vlgmr.msra.gmra.mrb[20].mxu1 %v24243_v39  ;;  %v7188_v39 = vrot.slane %v24237_v60, 5 }
 0xcb3   :  { %19886 = vmatpush3.bf16.msra.mxu1 %v23179_v56  ;;  %16994 = vmatprep.mubr.msk.f32.mxu1 %vm21561_vm0, %v26038_v17 }
 0xcb4   :  { %19887 = vmatprep.subr.bf16.mxu1 %v26147_v34  ;;  %v7190_v58 = vadd.f32 %v26550_v55, %v7188_v39 }
 0xcb6   :  { %v14881_v11 = vmul.f32 -1.442695, %v7190_v58 }
 0xcb7   :  { %19889 = vmatpush3.bf16.msra.mxu1 %v23189_v25 }
 0xcb8   :  { %19890 = vmatprep.subr.bf16.mxu1 %v26147_v34  ;;  %21410 = vpow2.f32 %v14881_v11 }
 0xcbb   :  { %19892 = vmatpush3.bf16.msra.mxu1 %v23199_v20 }
 0xcbc   :  { %19893 = vmatprep.subr.bf16.mxu1 %v26147_v34 }
 0xcbf   :  { %19895 = vmatpush3.bf16.msra.mxu1 %v23224_v21 }
 0xcc0   :  { %19896 = vmatprep.subr.bf16.mxu1 %v26147_v34 }
 0xcc2   :  { %v21411_v19 = vpop.eup %21410 }
 0xcc3   :  { %19898 = vmatpush3.bf16.msra.mxu1 %v23234_v63  ;;  %v7194_v18 = vadd.f32 1.0, %v21411_v19 }
 0xcc4   :  { %19899 = vmatprep.subr.bf16.mxu1 %v26147_v34 }
 0xcc7   :  { %19901 = vmatpush3.bf16.msra.mxu1 %v23254_v57 }
 0xcc8   :  { %19902 = vmatprep.subr.bf16.mxu1 %v26147_v34 }
 0xccb   :  { %19904 = vmatpush3.bf16.msra.mxu1 %v23274_v37 }
 0xccc   :  { %19905 = vmatprep.subr.bf16.mxu1 %v26147_v34 }
 0xccf   :  { %19907 = vmatpush3.bf16.msra.mxu1 %v23288_v43 }
 0xcd0   :  { %19908 = vmatprep.subr.bf16.mxu1 %v26147_v34 }
 0xd85   :  { %v7863_v2 = vpop.f32.mrb[20].mxu1 }
 0xd86   :  { %v7868_v47 = vrot.slane %v7863_v2, 5  ;;  %v16961_v35 = vpop.f32.mrb[21].mxu1 }
 0xd88   :  { %v7870_v40 = vadd.f32 %v26607_v3, %v7868_v47  ;;  %v26656_v3 = vld [vmem:[#allocation79_spill] sm:$0xff] }
 0xd8a   :  { %21412 = vtanh.f32 %v7870_v40 }
 0xd8b   :  { %21414 = vrcp.f32 %v7194_v18 }
 0xd94   :  { %v21413_v26 = vpop.eup %21412 }
 0xd95   :  { %v7872_v60 = vsub.f32 %v21413_v26, %v24362_v4  ;;  %v21415_v62 = vpop.eup %21414  ;;  %v26620_v4 = vld [vmem:[#allocation83_spill] sm:$0xff] }
 0xd97   :  { %v7873_v39 = vmul.f32 %v21415_v62, %v7872_v60  ;;  %v26610_v62 = vld [vmem:[#allocation49_spill] sm:$0xff]  ;;  %v26611_v60 = vld [vmem:[#allocation51_spill] sm:$0xff] }
 0xd99   :  { %v7881_v58 = vrot.slane %v7873_v39, %v23752_v7  ;;  %v26612_v39 = vld [vmem:[#allocation57_spill] sm:$0xff] }
 0xd9b   :  { %v7882_v11 = vcombine.high %v7881_v58, %v7881_v58  ;;  %v26614_v58 = vld [vmem:[#allocation59_spill] sm:$0xff] }
 0xd9d   :  { %v7889_v2 = vrot.slane %v7882_v11, %v23752_v7  ;;  %v26615_v11 = vld [vmem:[#allocation61_spill] sm:$0xff] }
 0xd9f   :  { %v7890_v35 = vcombine.high %v7889_v2, %v7889_v2  ;;  %v26616_v2 = vld [vmem:[#allocation63_spill] sm:$0xff] }
 0xda1   :  { %v24368_v19 = vadd.f32 %v7890_v35, %v24125_v48  ;;  %v26613_v48 = vld [vmem:[#allocation58_spill] sm:$0xff]  ;;  %v26617_v35 = vld [vmem:[#allocation64_spill] sm:$0xff] }
 0xda3   :  { %v24371_v47 = vand.u32 4294901760, %v24368_v19 }
 0xda5   :  { %v7999_v18 = vsub.f32 %v24368_v19, %v24371_v47 }
 0xda7   :  { %v8000_v40 = vand.u32 4294901760, %v7999_v18 }
 0xda9   :  { %v8001_v14 = vsub.f32 %v7999_v18, %v8000_v40 }
 0xdab   :  { %v8002_v26 = vand.u32 4294901760, %v8001_v14  ;;  %v26618_v14 = vld [vmem:[#allocation65_spill] sm:$0xff] }
 0xdad   :  { %8003 = vmatmul.mubr.f32.vlgmr.msra.gmra.mrb[10].mxu0 %v8002_v26  ;;  %v26619_v26 = vld [vmem:[#allocation69_spill] sm:$0xff] }
 0xdae   :  { %19727 = vmatpush1.bf16.msra.mxu0 %v26610_v62  ;;  %8233 = vmatprep.mubr.f32.mxu0 %v26038_v17  ;;  %v26621_v62 = vld [vmem:[#allocation84_spill] sm:$0xff] }
 0xdaf   :  { %19729 = vmatprep.subr.bf16.mxu0 %v26611_v60  ;;  %v26622_v60 = vld [vmem:[#allocation85_spill] sm:$0xff] }
 0xdb2   :  { %19731 = vmatpush1.bf16.msra.mxu0 %v26612_v39  ;;  %v26623_v39 = vld [vmem:[#allocation86_spill] sm:$0xff] }
 0xdb3   :  { %19733 = vmatprep.subr.bf16.mxu0 %v26613_v48  ;;  %v26624_v48 = vld [vmem:[#allocation87_spill] sm:$0xff] }
 0xdb6   :  { %19735 = vmatpush1.bf16.msra.mxu0 %v26614_v58  ;;  %v26625_v58 = vld [vmem:[#allocation88_spill] sm:$0xff] }
 0xdb7   :  { %19737 = vmatprep.subr.bf16.mxu0 %v26615_v11  ;;  %v26637_v11 = vld [vmem:[#allocation34_spill] sm:$0xff] }
 0xdba   :  { %19739 = vmatpush1.bf16.msra.mxu0 %v26616_v2  ;;  %v26626_v2 = vld [vmem:[#allocation89_spill] sm:$0xff] }
 0xdbb   :  { %19741 = vmatprep.subr.bf16.mxu0 %v26617_v35  ;;  %v26635_v35 = vld [vmem:[#allocation41_spill] sm:$0xff] }
 0xdbe   :  { %19743 = vmatpush1.bf16.msra.mxu0 %v26618_v14  ;;  %v26627_v14 = vld [vmem:[#allocation25_spill] sm:$0xff] }
 0xdbf   :  { %19745 = vmatprep.subr.bf16.mxu0 %v26619_v26  ;;  %v26628_v26 = vld [vmem:[#allocation66_spill] sm:$0xff] }
 0xdc2   :  { %19747 = vmatpush1.bf16.msra.mxu0 %v26620_v4  ;;  %v26629_v4 = vld [vmem:[#allocation67_spill] sm:$0xff] }
 0xdc3   :  { %19749 = vmatprep.subr.bf16.mxu0 %v26621_v62  ;;  %v26630_v62 = vld [vmem:[#allocation20_spill] sm:$0xff] }
 0xdc6   :  { %19751 = vmatpush1.bf16.msra.mxu0 %v26622_v60  ;;  %v26631_v60 = vld [vmem:[#allocation70_spill] sm:$0xff] }
 0xdc7   :  { %19753 = vmatprep.subr.bf16.mxu0 %v26623_v39  ;;  %v26632_v39 = vld [vmem:[#allocation71_spill] sm:$0xff] }
 0xdca   :  { %19755 = vmatpush1.bf16.msra.mxu0 %v26624_v48  ;;  %v26633_v48 = vld [vmem:[#allocation74_spill] sm:$0xff] }
 0xdcb   :  { %19757 = vmatprep.subr.bf16.mxu0 %v26625_v58  ;;  %v26634_v58 = vld [vmem:[#allocation30_spill] sm:$0xff] }
 0xdcd   :  { %8235 = vmatmul.mubr.f32.vlgmr.msra.gmra.mrb[10].mxu0 %v24371_v47 }
 0xdce   :  { %19759 = vmatpush1.bf16.msra.mxu0 %v26626_v2  ;;  %8369 = vmatprep.mubr.f32.mxu0 %v26038_v17  ;;  %v26636_v2 = vld [vmem:[#allocation42_spill] sm:$0xff] }
 0xdcf   :  { %19761 = vmatprep.subr.bf16.mxu0 %v26627_v14  ;;  %v26638_v14 = vld [vmem:[#allocation43_spill] sm:$0xff] }
 0xdd2   :  { %19763 = vmatpush1.bf16.msra.mxu0 %v26628_v26  ;;  %v26639_v26 = vld [vmem:[#allocation36_spill] sm:$0xff] }
 0xdd3   :  { %19765 = vmatprep.subr.bf16.mxu0 %v26629_v4  ;;  %v26640_v4 = vld [vmem:[#allocation32_spill] sm:$0xff] }
 0xdd6   :  { %19767 = vmatpush1.bf16.msra.mxu0 %v26630_v62  ;;  %v26652_v62 = vld [vmem:[#allocation46_spill] sm:$0xff] }
 0xdd7   :  { %19769 = vmatprep.subr.bf16.mxu0 %v26631_v60  ;;  %v26651_v60 = vld [vmem:[#allocation45_spill] sm:$0xff] }
 0xdda   :  { %19771 = vmatpush1.bf16.msra.mxu0 %v26632_v39  ;;  %v26650_v39 = vld [vmem:[#allocation38_spill] sm:$0xff] }
 0xddb   :  { %19773 = vmatprep.subr.bf16.mxu0 %v26633_v48  ;;  %v26649_v48 = vld [vmem:[#allocation78_spill] sm:$0xff] }
 0xdde   :  { %19775 = vmatpush1.bf16.msra.mxu0 %v26634_v58  ;;  %v26648_v58 = vld [vmem:[#allocation77_spill] sm:$0xff] }
 0xddf   :  { %19777 = vmatprep.subr.bf16.mxu0 %v26635_v35  ;;  %v26647_v35 = vld [vmem:[#allocation76_spill] sm:$0xff] }
 0xde2   :  { %19779 = vmatpush1.bf16.msra.mxu0 %v26636_v2  ;;  %v26646_v2 = vld [vmem:[#allocation31_spill] sm:$0xff] }
 0xde3   :  { %19781 = vmatprep.subr.bf16.mxu0 %v26637_v11  ;;  %v26645_v11 = vld [vmem:[#allocation22_spill] sm:$0xff] }
 0xde6   :  { %19783 = vmatpush1.bf16.msra.mxu0 %v26638_v14  ;;  %v26644_v14 = vld [vmem:[#allocation27_spill] sm:$0xff] }
 0xde7   :  { %19785 = vmatprep.subr.bf16.mxu0 %v26639_v26  ;;  %v26643_v26 = vld [vmem:[#allocation47_spill] sm:$0xff] }
 0xdea   :  { %19787 = vmatpush1.bf16.msra.mxu0 %v26640_v4  ;;  %v26642_v4 = vld [vmem:[#allocation44_spill] sm:$0xff] }
 0xdeb   :  { %19789 = vmatprep.subr.bf16.mxu0 %v26459_v36 }
 0xded   :  { %8372 = vmatmul.mubr.f32.vlgmr.msra.gmra.mrb[10].mxu0 %v7999_v18  ;;  %v26641_v18 = vld [vmem:[#allocation33_spill] sm:$0xff] }
 0xdee   :  { %19791 = vmatpush1.bf16.msra.mxu0 %v26460_v50  ;;  %8474 = vmatprep.mubr.f32.mxu0 %v26038_v17 }
 0xdef   :  { %19793 = vmatprep.subr.bf16.mxu0 %v26461_v30 }
 0xdf2   :  { %19795 = vmatpush1.bf16.msra.mxu0 %v26462_v51 }
 0xdf3   :  { %19797 = vmatprep.subr.bf16.mxu0 %v26463_v53 }
 0xdf6   :  { %19799 = vmatpush1.bf16.msra.mxu0 %v26464_v38 }
 0xdf7   :  { %19801 = vmatprep.subr.bf16.mxu0 %v26465_v44 }
 0xdfa   :  { %19803 = vmatpush1.bf16.msra.mxu0 %v26466_v10 }
 0xdfb   :  { %19805 = vmatprep.subr.bf16.mxu0 %v26467_v22 }
 0xdfe   :  { %19807 = vmatpush1.bf16.msra.mxu0 %v26468_v45 }
 0xdff   :  { %19809 = vmatprep.subr.bf16.mxu0 %v26469_v61 }
 0xe02   :  { %19811 = vmatpush1.bf16.msra.mxu0 %v26470_v52 }
 0xe03   :  { %19813 = vmatprep.subr.bf16.mxu0 %v26528_v49 }
 0xe06   :  { %19815 = vmatpush1.bf16.msra.mxu0 %v26641_v18 }
 0xe07   :  { %19817 = vmatprep.subr.bf16.mxu0 %v26642_v4 }
 0xe0a   :  { %19819 = vmatpush1.bf16.msra.mxu0 %v26643_v26 }
 0xe0b   :  { %19821 = vmatprep.subr.bf16.mxu0 %v26644_v14  ;;  %v26653_v14 = vld [vmem:[#allocation50_spill] sm:$0xff] }
 0xe0d   :  { %8478 = vmatmul.mubr.f32.vlgmr.msra.gmra.mrb[10].mxu0 %v8000_v40  ;;  %v26654_v40 = vld [vmem:[#allocation52_spill] sm:$0xff] }
 0xe0e   :  { %19823 = vmatpush1.bf16.msra.mxu0 %v26645_v11  ;;  %8644 = vmatprep.mubr.f32.mxu0 %v26038_v17  ;;  %v26655_v11 = vld [vmem:[#allocation54_spill] sm:$0xff] }
 0xe0f   :  { %19825 = vmatprep.subr.bf16.mxu0 %v26646_v2  ;;  %v26657_v2 = vld [vmem:[#allocation80_spill] sm:$0xff] }
 0xe12   :  { %19827 = vmatpush1.bf16.msra.mxu0 %v26647_v35  ;;  %v26658_v35 = vld [vmem:[#allocation81_spill] sm:$0xff] }
 0xe13   :  { %19829 = vmatprep.subr.bf16.mxu0 %v26648_v58  ;;  %v26659_v58 = vld [vmem:[#allocation82_spill] sm:$0xff] }
 0xe16   :  { %19831 = vmatpush1.bf16.msra.mxu0 %v26649_v48 }
 0xe17   :  { %19833 = vmatprep.subr.bf16.mxu0 %v26650_v39 }
 0xe1a   :  { %19835 = vmatpush1.bf16.msra.mxu0 %v26651_v60 }
 0xe1b   :  { %19837 = vmatprep.subr.bf16.mxu0 %v26652_v62 }
 0xe1e   :  { %19839 = vmatpush1.bf16.msra.mxu0 %v26653_v14 }
 0xe1f   :  { %19841 = vmatprep.subr.bf16.mxu0 %v26654_v40 }
 0xe22   :  { %19843 = vmatpush1.bf16.msra.mxu0 %v26655_v11 }
 0xe23   :  { %19845 = vmatprep.subr.bf16.mxu0 %v26656_v3 }
 0xe26   :  { %19847 = vmatpush1.bf16.msra.mxu0 %v26657_v2 }
 0xe27   :  { %19849 = vmatprep.subr.bf16.mxu0 %v26658_v35 }
 0xe2a   :  { %19851 = vmatpush1.bf16.msra.mxu0 %v26659_v58 }
 0xe2b   :  { %19853 = vmatprep.subr.bf16.mxu0 %v26459_v36 }
 0xe2d   :  { %8646 = vmatmul.mubr.f32.vlgmr.msra.gmra.mrb[10].mxu0 %v24371_v47 }
 0xe2e   :  { %19855 = vmatpush1.bf16.msra.mxu0 %v26460_v50  ;;  %8748 = vmatprep.mubr.f32.mxu0 %v26038_v17 }
 0xe2f   :  { %19857 = vmatprep.subr.bf16.mxu0 %v26461_v30 }
 0xe32   :  { %19859 = vmatpush1.bf16.msra.mxu0 %v26462_v51 }
 0xe33   :  { %19861 = vmatprep.subr.bf16.mxu0 %v26463_v53 }
 0xe36   :  { %19863 = vmatpush1.bf16.msra.mxu0 %v26464_v38 }
 0xe37   :  { %19865 = vmatprep.subr.bf16.mxu0 %v26465_v44 }
 0xe3a   :  { %19867 = vmatpush1.bf16.msra.mxu0 %v26466_v10 }
 0xe3b   :  { %19869 = vmatprep.subr.bf16.mxu0 %v26467_v22 }
 0xe3e   :  { %19871 = vmatpush1.bf16.msra.mxu0 %v26468_v45 }
 0xe3f   :  { %19873 = vmatprep.subr.bf16.mxu0 %v26469_v61 }
 0xe42   :  { %19875 = vmatpush1.bf16.msra.mxu0 %v26470_v52 }
 0xe43   :  { %19877 = vmatprep.subr.bf16.mxu0 %v26528_v49 }
 0xe46   :  { %19879 = vmatpush1.bf16.msra.mxu0 %v26641_v18 }
 0xe47   :  { %19881 = vmatprep.subr.bf16.mxu0 %v26642_v4 }
 0xe4a   :  { %19883 = vmatpush1.bf16.msra.mxu0 %v26643_v26 }
 0xe4b   :  { %20029 = vmatprep.subr.bf16.mxu0 %v26459_v36 }
 0xe4d   :  { %8750 = vmatmul.mubr.f32.vlgmr.msra.gmra.mrb[10].mxu0 %v24371_v47  ;;  %v26660_v47 = vld [vmem:[#allocation48_spill] sm:$0xff] }
 0xe4e   :  { %20031 = vmatpush1.bf16.msra.mxu0 %v26460_v50  ;;  %9564 = vmatprep.mubr.f32.mxu0 %v26038_v17 }
 0xe4f   :  { %20033 = vmatprep.subr.bf16.mxu0 %v26461_v30 }
 0xe52   :  { %20035 = vmatpush1.bf16.msra.mxu0 %v26462_v51 }
 0xe53   :  { %20037 = vmatprep.subr.bf16.mxu0 %v26463_v53 }
 0xe56   :  { %20039 = vmatpush1.bf16.msra.mxu0 %v26464_v38 }
 0xe57   :  { %20041 = vmatprep.subr.bf16.mxu0 %v26465_v44 }
 0xe5a   :  { %20043 = vmatpush1.bf16.msra.mxu0 %v26466_v10 }
 0xe5b   :  { %20045 = vmatprep.subr.bf16.mxu0 %v26467_v22 }
 0xe5e   :  { %20047 = vmatpush1.bf16.msra.mxu0 %v26468_v45 }
 0xe5f   :  { %20049 = vmatprep.subr.bf16.mxu0 %v26469_v61 }
 0xe62   :  { %20051 = vmatpush1.bf16.msra.mxu0 %v26470_v52 }
 0xe63   :  { %20053 = vmatprep.subr.bf16.mxu0 %v26528_v49 }
 0xe66   :  { %20055 = vmatpush1.bf16.msra.mxu0 %v26641_v18 }
 0xe67   :  { %20057 = vmatprep.subr.bf16.mxu0 %v26642_v4 }
 0xe6a   :  { %20059 = vmatpush1.bf16.msra.mxu0 %v26643_v26 }
 0xe6b   :  { %20061 = vmatprep.subr.bf16.mxu0 %v26660_v47 }
 0xf20   :  { %v24480_v58 = vpop.f32.mrb[10].mxu0 }
 0xf21   :  { %v8753_v35 = vpop.f32.mrb[11].mxu0 }
 0xf22   :  { %v8767_v2 = vrot.slane %v8753_v35, 4 }
 0xf24   :  { %v8769_v3 = vadd.f32 %v26492_v5, %v8767_v2 }
 0xf26   :  { %v14884_v11 = vmul.f32 -1.442695, %v8769_v3  ;;  %v26661_v3 = vld [vmem:[#allocation55_spill] sm:$0xff] }
 0xf28   :  { %21416 = vpow2.f32 %v14884_v11 }
 0xf32   :  { %v21417_v40 = vpop.eup %21416 }
 0xf33   :  { %v8773_v14 = vadd.f32 1.0, %v21417_v40  ;;  %v26663_v40 = vld [vmem:[#allocation60_spill] sm:$0xff] }
 0xf35   :  { %21418 = vrcp.f32 %v8773_v14 }
 0xf3f   :  { %v21419_v62 = vpop.eup %21418 }
 0xf40   :  { %v8777_v60 = vcombine.high %v21419_v62, %v21419_v62  ;;  %v8757_v62 = vrot.slane %v24480_v58, 4 }
 0xf42   :  { %v8784_v39 = vrot.slane %v8777_v60, %v23752_v7  ;;  %v8759_v60 = vadd.f32 %v26550_v55, %v8757_v62 }
 0xf44   :  { %v8791_v48 = vrot.slane %v8784_v39, %v23752_v7  ;;  %v14883_v39 = vmul.f32 -1.442695, %v8759_v60 }
 0xf46   :  { %v8793_v26 = vmul.f32 %v8791_v48, %v24368_v19  ;;  %21420 = vpow2.f32 %v14883_v39 }
 0xf48   :  { %v24486_v47 = vand.u32 4294901760, %v8793_v26 }
 0xf4a   :  { %v8876_v4 = vsub.f32 %v8793_v26, %v24486_v47 }
 0xf4c   :  { %v8877_v35 = vand.u32 4294901760, %v8876_v4 }
 0xf4e   :  { %v8878_v18 = vsub.f32 %v8876_v4, %v8877_v35 }
 0xf50   :  { %v8879_v2 = vand.u32 4294901760, %v8878_v18  ;;  %v21421_v48 = vpop.eup %21420 }
 0xf51   :  { %v8763_v18 = vadd.f32 1.0, %v21421_v48 }
 0xf52   :  { %16995 = vmatmul.mubr.f32.vlgmr.msra.gmra.mrb[22].mxu1 %v8879_v2 }
 0xf53   :  { %19910 = vmatpush3.bf16.msra.mxu1 %v23307_v13  ;;  %17029 = vmatprep.mubr.msk.f32.mxu1 %vm21561_vm0, %v26038_v17 }
 0xf54   :  { %19911 = vmatprep.subr.bf16.mxu1 %v26147_v34 }
 0xf57   :  { %19913 = vmatpush3.bf16.msra.mxu1 %v23321_v54 }
 0xf58   :  { %19914 = vmatprep.subr.bf16.mxu1 %v26147_v34 }
 0xf5b   :  { %19916 = vmatpush3.bf16.msra.mxu1 %v23335_v28 }
 0xf5c   :  { %19917 = vmatprep.subr.bf16.mxu1 %v26147_v34 }
 0xf5f   :  { %19919 = vmatpush3.bf16.msra.mxu1 %v23367_v8 }
 0xf60   :  { %19920 = vmatprep.subr.bf16.mxu1 %v26147_v34 }
 0xf63   :  { %19922 = vmatpush3.bf16.msra.mxu1 %v23371_v31 }
 0xf64   :  { %19923 = vmatprep.subr.bf16.mxu1 %v26147_v34 }
 0xf67   :  { %19925 = vmatpush3.bf16.msra.mxu1 %v23391_v41 }
 0xf68   :  { %19926 = vmatprep.subr.bf16.mxu1 %v26147_v34 }
 0xf6b   :  { %19928 = vmatpush3.bf16.msra.mxu1 %v23414_v29 }
 0xf6c   :  { %19929 = vmatprep.subr.bf16.mxu1 %v26147_v34 }
 0xf6f   :  { %19931 = vmatpush3.bf16.msra.mxu1 %v23419_v0 }
 0xf70   :  { %19932 = vmatprep.subr.bf16.mxu1 %v26147_v34 }
 0xf72   :  { %17030 = vmatmul.mubr.f32.vlgmr.msra.gmra.mrb[22].mxu1 %v24486_v47 }
 0xf73   :  { %19934 = vmatpush3.bf16.msra.mxu1 %v23423_v59  ;;  %17064 = vmatprep.mubr.msk.f32.mxu1 %vm21561_vm0, %v26038_v17 }
 0xf74   :  { %19935 = vmatprep.subr.bf16.mxu1 %v26147_v34 }
 0xf77   :  { %19937 = vmatpush3.bf16.msra.mxu1 %v23427_v24 }
 0xf78   :  { %19938 = vmatprep.subr.bf16.mxu1 %v26147_v34 }
 0xf7b   :  { %19940 = vmatpush3.bf16.msra.mxu1 %v23431_v6 }
 0xf7c   :  { %19941 = vmatprep.subr.bf16.mxu1 %v26147_v34 }
 0xf7f   :  { %19943 = vmatpush3.bf16.msra.mxu1 %v23435_v32 }
 0xf80   :  { %19944 = vmatprep.subr.bf16.mxu1 %v26147_v34 }
 0xf83   :  { %19946 = vmatpush3.bf16.msra.mxu1 %v23439_v27 }
 0xf84   :  { %19947 = vmatprep.subr.bf16.mxu1 %v26147_v34 }
 0xf87   :  { %19949 = vmatpush3.bf16.msra.mxu1 %v23443_v46 }
 0xf88   :  { %19950 = vmatprep.subr.bf16.mxu1 %v26147_v34 }
 0xf8b   :  { %19952 = vmatpush3.bf16.msra.mxu1 %v23447_v16 }
 0xf8c   :  { %19953 = vmatprep.subr.bf16.mxu1 %v26147_v34 }
 0xf8f   :  { %19955 = vmatpush3.bf16.msra.mxu1 %v23451_v9 }
 0xf90   :  { %19956 = vmatprep.subr.bf16.mxu1 %v26147_v34 }
 0xf92   :  { %17065 = vmatmul.mubr.f32.vlgmr.msra.gmra.mrb[22].mxu1 %v8876_v4  ;;  %v26662_v4 = vld [vmem:[#allocation56_spill] sm:$0xff] }
 0xf93   :  { %19958 = vmatpush3.bf16.msra.mxu1 %v23179_v56  ;;  %17099 = vmatprep.mubr.msk.f32.mxu1 %vm21561_vm0, %v26038_v17 }
 0xf94   :  { %19959 = vmatprep.subr.bf16.mxu1 %v26147_v34 }
 0xf97   :  { %19961 = vmatpush3.bf16.msra.mxu1 %v23189_v25 }
 0xf98   :  { %19962 = vmatprep.subr.bf16.mxu1 %v26147_v34 }
 0xf9b   :  { %19964 = vmatpush3.bf16.msra.mxu1 %v23199_v20 }
 0xf9c   :  { %19965 = vmatprep.subr.bf16.mxu1 %v26147_v34 }
 0xf9f   :  { %19967 = vmatpush3.bf16.msra.mxu1 %v23224_v21 }
 0xfa0   :  { %19968 = vmatprep.subr.bf16.mxu1 %v26147_v34 }
 0xfa3   :  { %19970 = vmatpush3.bf16.msra.mxu1 %v23234_v63 }
 0xfa4   :  { %19971 = vmatprep.subr.bf16.mxu1 %v26147_v34 }
 0xfa7   :  { %19973 = vmatpush3.bf16.msra.mxu1 %v23254_v57 }
 0xfa8   :  { %19974 = vmatprep.subr.bf16.mxu1 %v26147_v34 }
 0xfab   :  { %19976 = vmatpush3.bf16.msra.mxu1 %v23274_v37 }
 0xfac   :  { %19977 = vmatprep.subr.bf16.mxu1 %v26147_v34 }
 0xfaf   :  { %19979 = vmatpush3.bf16.msra.mxu1 %v23288_v43 }
 0xfb0   :  { %19980 = vmatprep.subr.bf16.mxu1 %v26147_v34 }
 0xfb2   :  { %17100 = vmatmul.mubr.f32.vlgmr.msra.gmra.mrb[22].mxu1 %v8877_v35  ;;  %v26664_v35 = vld [vmem:[#allocation39_spill] sm:$0xff] }
 0xfb3   :  { %19982 = vmatpush3.bf16.msra.mxu1 %v23525_v12  ;;  %17134 = vmatprep.mubr.msk.f32.mxu1 %vm21561_vm0, %v26038_v17  ;;  %v24605_v2 = vrot.slane %v24368_v19, %v26664_v35 }
 0xfb4   :  { %19983 = vmatprep.subr.bf16.mxu1 %v26147_v34 }
 0xfb5   :  { %26665 = vst [vmem:[#allocation75_spill] sm:$0xff] %v24605_v2 }
 0xfb7   :  { %19985 = vmatpush3.bf16.msra.mxu1 %v23533_v42 }
 0xfb8   :  { %19986 = vmatprep.subr.bf16.mxu1 %v26147_v34 }
 0xfbb   :  { %19988 = vmatpush3.bf16.msra.mxu1 %v23543_v33 }
 0xfbc   :  { %19989 = vmatprep.subr.bf16.mxu1 %v26147_v34 }
 0xfbf   :  { %19991 = vmatpush3.bf16.msra.mxu1 %v23551_v23 }
 0xfc0   :  { %19992 = vmatprep.subr.bf16.mxu1 %v26147_v34 }
 0xfc3   :  { %19994 = vmatpush3.bf16.msra.mxu1 %v23559_v1 }
 0xfc4   :  { %19995 = vmatprep.subr.bf16.mxu1 %v26147_v34 }
 0xfc7   :  { %19997 = vmatpush3.bf16.msra.mxu1 %v23567_v15 }
 0xfc8   :  { %19998 = vmatprep.subr.bf16.mxu1 %v26147_v34 }
 0xfcb   :  { %20000 = vmatpush3.bf16.msra.mxu1 %v26661_v3 }
 0xfcc   :  { %20001 = vmatprep.subr.bf16.mxu1 %v26147_v34 }
 0xfcf   :  { %20003 = vmatpush3.bf16.msra.mxu1 %v26662_v4 }
 0xfd0   :  { %20004 = vmatprep.subr.bf16.mxu1 %v26147_v34 }
 0xfd2   :  { %17135 = vmatmul.mubr.f32.vlgmr.msra.gmra.mrb[22].mxu1 %v24486_v47 }
 0xfd3   :  { %20006 = vmatpush3.bf16.msra.mxu1 %v23179_v56  ;;  %17169 = vmatprep.mubr.msk.f32.mxu1 %vm21561_vm0, %v26038_v17 }
 0xfd4   :  { %20007 = vmatprep.subr.bf16.mxu1 %v26147_v34 }
 0xfd7   :  { %20009 = vmatpush3.bf16.msra.mxu1 %v23189_v25 }
 0xfd8   :  { %20010 = vmatprep.subr.bf16.mxu1 %v26147_v34 }
 0xfdb   :  { %20012 = vmatpush3.bf16.msra.mxu1 %v23199_v20 }
 0xfdc   :  { %20013 = vmatprep.subr.bf16.mxu1 %v26147_v34 }
 0xfdf   :  { %20015 = vmatpush3.bf16.msra.mxu1 %v23224_v21 }
 0xfe0   :  { %20016 = vmatprep.subr.bf16.mxu1 %v26147_v34 }
 0xfe3   :  { %20018 = vmatpush3.bf16.msra.mxu1 %v23234_v63 }
 0xfe4   :  { %20019 = vmatprep.subr.bf16.mxu1 %v26147_v34 }
 0xfe7   :  { %20021 = vmatpush3.bf16.msra.mxu1 %v23254_v57 }
 0xfe8   :  { %20022 = vmatprep.subr.bf16.mxu1 %v26147_v34 }
 0xfeb   :  { %20024 = vmatpush3.bf16.msra.mxu1 %v23274_v37 }
 0xfec   :  { %20025 = vmatprep.subr.bf16.mxu1 %v26147_v34 }
 0xfef   :  { %20027 = vmatpush3.bf16.msra.mxu1 %v23288_v43 }
 0xff0   :  { %20220 = vmatprep.subr.bf16.mxu1 %v26147_v34 }
 0xff2   :  { %17170 = vmatmul.mubr.f32.vlgmr.msra.gmra.mrb[22].mxu1 %v24486_v47 }
 0xff3   :  { %20222 = vmatpush3.bf16.msra.mxu1 %v23179_v56  ;;  %17204 = vmatprep.mubr.msk.f32.mxu1 %vm21561_vm0, %v26038_v17 }
 0xff4   :  { %20223 = vmatprep.subr.bf16.mxu1 %v26147_v34 }
 0xff7   :  { %20225 = vmatpush3.bf16.msra.mxu1 %v23189_v25 }
 0xff8   :  { %20226 = vmatprep.subr.bf16.mxu1 %v26147_v34 }
 0xffb   :  { %20228 = vmatpush3.bf16.msra.mxu1 %v23199_v20 }
 0xffc   :  { %20229 = vmatprep.subr.bf16.mxu1 %v26147_v34 }
 0xfff   :  { %20231 = vmatpush3.bf16.msra.mxu1 %v23224_v21 }
0x1000   :  { %20232 = vmatprep.subr.bf16.mxu1 %v26147_v34 }
0x1003   :  { %20234 = vmatpush3.bf16.msra.mxu1 %v23234_v63 }
0x1004   :  { %20235 = vmatprep.subr.bf16.mxu1 %v26147_v34 }
0x1007   :  { %20237 = vmatpush3.bf16.msra.mxu1 %v23254_v57 }
0x1008   :  { %20238 = vmatprep.subr.bf16.mxu1 %v26147_v34 }
0x100b   :  { %20240 = vmatpush3.bf16.msra.mxu1 %v23274_v37 }
0x100c   :  { %20241 = vmatprep.subr.bf16.mxu1 %v26147_v34 }
0x100f   :  { %20243 = vmatpush3.bf16.msra.mxu1 %v23288_v43 }
0x1010   :  { %20244 = vmatprep.subr.bf16.mxu1 %v26147_v34 }
0x10c5   :  { %v9431_v11 = vpop.f32.mrb[22].mxu1 }
0x10c6   :  { %v9436_v14 = vrot.slane %v9431_v11, 4  ;;  %v17171_v26 = vpop.f32.mrb[23].mxu1 }
0x10c8   :  { %v9438_v47 = vadd.f32 %v26663_v40, %v9436_v14  ;;  %v26712_v40 = vld [vmem:[#allocation79_spill] sm:$0xff] }
0x10ca   :  { %21422 = vtanh.f32 %v9438_v47 }
0x10cb   :  { %21424 = vrcp.f32 %v8763_v18 }
0x10d4   :  { %v21423_v4 = vpop.eup %21422 }
0x10d5   :  { %v9440_v58 = vsub.f32 %v21423_v4, %v24605_v2  ;;  %v21425_v3 = vpop.eup %21424  ;;  %v26666_v4 = vld [vmem:[#allocation49_spill] sm:$0xff]  ;;  %v26676_v2 = vld [vmem:[#allocation83_spill] sm:$0xff] }
0x10d7   :  { %v9441_v62 = vmul.f32 %v21425_v3, %v9440_v58  ;;  %v26667_v3 = vld [vmem:[#allocation51_spill] sm:$0xff]  ;;  %v26668_v58 = vld [vmem:[#allocation57_spill] sm:$0xff] }
0x10d9   :  { %v9443_v60 = vcombine.high %v9441_v62, %v9441_v62  ;;  %v26670_v62 = vld [vmem:[#allocation59_spill] sm:$0xff] }
0x10db   :  { %v9450_v39 = vrot.slane %v9443_v60, %v23752_v7  ;;  %v26671_v60 = vld [vmem:[#allocation61_spill] sm:$0xff] }
0x10dd   :  { %v9457_v11 = vrot.slane %v9450_v39, %v23752_v7  ;;  %v26672_v39 = vld [vmem:[#allocation63_spill] sm:$0xff] }
0x10df   :  { %v24611_v48 = vadd.f32 %v9457_v11, %v24368_v19  ;;  %v26669_v19 = vld [vmem:[#allocation58_spill] sm:$0xff]  ;;  %v26673_v11 = vld [vmem:[#allocation64_spill] sm:$0xff] }
0x10e1   :  { %v24614_v14 = vand.u32 4294901760, %v24611_v48 }
0x10e3   :  { %v9566_v26 = vsub.f32 %v24611_v48, %v24614_v14 }
0x10e5   :  { %v9567_v18 = vand.u32 4294901760, %v9566_v26 }
0x10e7   :  { %v9568_v47 = vsub.f32 %v9566_v26, %v9567_v18 }
0x10e9   :  { %v9569_v35 = vand.u32 4294901760, %v9568_v47  ;;  %v26674_v47 = vld [vmem:[#allocation65_spill] sm:$0xff] }
0x10eb   :  { %9570 = vmatmul.mubr.f32.vlgmr.msra.gmra.mrb[12].mxu0 %v9569_v35  ;;  %v26675_v35 = vld [vmem:[#allocation69_spill] sm:$0xff] }
0x10ec   :  { %20063 = vmatpush1.bf16.msra.mxu0 %v26666_v4  ;;  %9800 = vmatprep.mubr.f32.mxu0 %v26038_v17  ;;  %v26677_v4 = vld [vmem:[#allocation84_spill] sm:$0xff] }
0x10ed   :  { %20065 = vmatprep.subr.bf16.mxu0 %v26667_v3  ;;  %v26678_v3 = vld [vmem:[#allocation85_spill] sm:$0xff] }
0x10f0   :  { %20067 = vmatpush1.bf16.msra.mxu0 %v26668_v58  ;;  %v26679_v58 = vld [vmem:[#allocation86_spill] sm:$0xff] }
0x10f1   :  { %20069 = vmatprep.subr.bf16.mxu0 %v26669_v19  ;;  %v26680_v19 = vld [vmem:[#allocation87_spill] sm:$0xff] }
0x10f4   :  { %20071 = vmatpush1.bf16.msra.mxu0 %v26670_v62  ;;  %v26681_v62 = vld [vmem:[#allocation88_spill] sm:$0xff] }
0x10f5   :  { %20073 = vmatprep.subr.bf16.mxu0 %v26671_v60  ;;  %v26693_v60 = vld [vmem:[#allocation34_spill] sm:$0xff] }
0x10f8   :  { %20075 = vmatpush1.bf16.msra.mxu0 %v26672_v39  ;;  %v26682_v39 = vld [vmem:[#allocation89_spill] sm:$0xff] }
0x10f9   :  { %20077 = vmatprep.subr.bf16.mxu0 %v26673_v11  ;;  %v26691_v11 = vld [vmem:[#allocation41_spill] sm:$0xff] }
0x10fc   :  { %20079 = vmatpush1.bf16.msra.mxu0 %v26674_v47  ;;  %v26683_v47 = vld [vmem:[#allocation25_spill] sm:$0xff] }
0x10fd   :  { %20081 = vmatprep.subr.bf16.mxu0 %v26675_v35  ;;  %v26684_v35 = vld [vmem:[#allocation66_spill] sm:$0xff] }
0x1100   :  { %20083 = vmatpush1.bf16.msra.mxu0 %v26676_v2  ;;  %v26685_v2 = vld [vmem:[#allocation67_spill] sm:$0xff] }
0x1101   :  { %20085 = vmatprep.subr.bf16.mxu0 %v26677_v4  ;;  %v26686_v4 = vld [vmem:[#allocation20_spill] sm:$0xff] }
0x1104   :  { %20087 = vmatpush1.bf16.msra.mxu0 %v26678_v3  ;;  %v26687_v3 = vld [vmem:[#allocation70_spill] sm:$0xff] }
0x1105   :  { %20089 = vmatprep.subr.bf16.mxu0 %v26679_v58  ;;  %v26688_v58 = vld [vmem:[#allocation71_spill] sm:$0xff] }
0x1108   :  { %20091 = vmatpush1.bf16.msra.mxu0 %v26680_v19  ;;  %v26689_v19 = vld [vmem:[#allocation74_spill] sm:$0xff] }
0x1109   :  { %20093 = vmatprep.subr.bf16.mxu0 %v26681_v62  ;;  %v26690_v62 = vld [vmem:[#allocation30_spill] sm:$0xff] }
0x110b   :  { %9802 = vmatmul.mubr.f32.vlgmr.msra.gmra.mrb[12].mxu0 %v24614_v14 }
0x110c   :  { %20095 = vmatpush1.bf16.msra.mxu0 %v26682_v39  ;;  %9936 = vmatprep.mubr.f32.mxu0 %v26038_v17  ;;  %v26692_v39 = vld [vmem:[#allocation42_spill] sm:$0xff] }
0x110d   :  { %20097 = vmatprep.subr.bf16.mxu0 %v26683_v47  ;;  %v26694_v47 = vld [vmem:[#allocation43_spill] sm:$0xff] }
0x1110   :  { %20099 = vmatpush1.bf16.msra.mxu0 %v26684_v35  ;;  %v26695_v35 = vld [vmem:[#allocation36_spill] sm:$0xff] }
0x1111   :  { %20101 = vmatprep.subr.bf16.mxu0 %v26685_v2  ;;  %v26696_v2 = vld [vmem:[#allocation32_spill] sm:$0xff] }
0x1114   :  { %20103 = vmatpush1.bf16.msra.mxu0 %v26686_v4  ;;  %v26708_v4 = vld [vmem:[#allocation46_spill] sm:$0xff] }
0x1115   :  { %20105 = vmatprep.subr.bf16.mxu0 %v26687_v3  ;;  %v26707_v3 = vld [vmem:[#allocation45_spill] sm:$0xff] }
0x1118   :  { %20107 = vmatpush1.bf16.msra.mxu0 %v26688_v58  ;;  %v26706_v58 = vld [vmem:[#allocation38_spill] sm:$0xff] }
0x1119   :  { %20109 = vmatprep.subr.bf16.mxu0 %v26689_v19  ;;  %v26705_v19 = vld [vmem:[#allocation78_spill] sm:$0xff] }
0x111c   :  { %20111 = vmatpush1.bf16.msra.mxu0 %v26690_v62  ;;  %v26704_v62 = vld [vmem:[#allocation77_spill] sm:$0xff] }
0x111d   :  { %20113 = vmatprep.subr.bf16.mxu0 %v26691_v11  ;;  %v26703_v11 = vld [vmem:[#allocation76_spill] sm:$0xff] }
0x1120   :  { %20115 = vmatpush1.bf16.msra.mxu0 %v26692_v39  ;;  %v26702_v39 = vld [vmem:[#allocation31_spill] sm:$0xff] }
0x1121   :  { %20117 = vmatprep.subr.bf16.mxu0 %v26693_v60  ;;  %v26701_v60 = vld [vmem:[#allocation22_spill] sm:$0xff] }
0x1124   :  { %20119 = vmatpush1.bf16.msra.mxu0 %v26694_v47  ;;  %v26700_v47 = vld [vmem:[#allocation27_spill] sm:$0xff] }
0x1125   :  { %20121 = vmatprep.subr.bf16.mxu0 %v26695_v35  ;;  %v26699_v35 = vld [vmem:[#allocation47_spill] sm:$0xff] }
0x1128   :  { %20123 = vmatpush1.bf16.msra.mxu0 %v26696_v2  ;;  %v26698_v2 = vld [vmem:[#allocation44_spill] sm:$0xff] }
0x1129   :  { %20125 = vmatprep.subr.bf16.mxu0 %v26459_v36 }
0x112b   :  { %9939 = vmatmul.mubr.f32.vlgmr.msra.gmra.mrb[12].mxu0 %v9566_v26  ;;  %v26697_v26 = vld [vmem:[#allocation33_spill] sm:$0xff] }
0x112c   :  { %20127 = vmatpush1.bf16.msra.mxu0 %v26460_v50  ;;  %10041 = vmatprep.mubr.f32.mxu0 %v26038_v17 }
0x112d   :  { %20129 = vmatprep.subr.bf16.mxu0 %v26461_v30 }
0x1130   :  { %20131 = vmatpush1.bf16.msra.mxu0 %v26462_v51 }
0x1131   :  { %20133 = vmatprep.subr.bf16.mxu0 %v26463_v53 }
0x1134   :  { %20135 = vmatpush1.bf16.msra.mxu0 %v26464_v38 }
0x1135   :  { %20137 = vmatprep.subr.bf16.mxu0 %v26465_v44 }
0x1138   :  { %20139 = vmatpush1.bf16.msra.mxu0 %v26466_v10 }
0x1139   :  { %20141 = vmatprep.subr.bf16.mxu0 %v26467_v22 }
0x113c   :  { %20143 = vmatpush1.bf16.msra.mxu0 %v26468_v45 }
0x113d   :  { %20145 = vmatprep.subr.bf16.mxu0 %v26469_v61 }
0x1140   :  { %20147 = vmatpush1.bf16.msra.mxu0 %v26470_v52 }
0x1141   :  { %20149 = vmatprep.subr.bf16.mxu0 %v26528_v49 }
0x1144   :  { %20151 = vmatpush1.bf16.msra.mxu0 %v26697_v26 }
0x1145   :  { %20153 = vmatprep.subr.bf16.mxu0 %v26698_v2 }
0x1148   :  { %20155 = vmatpush1.bf16.msra.mxu0 %v26699_v35 }
0x1149   :  { %20157 = vmatprep.subr.bf16.mxu0 %v26700_v47  ;;  %v26709_v47 = vld [vmem:[#allocation50_spill] sm:$0xff] }
0x114b   :  { %10045 = vmatmul.mubr.f32.vlgmr.msra.gmra.mrb[12].mxu0 %v9567_v18  ;;  %v26710_v18 = vld [vmem:[#allocation52_spill] sm:$0xff] }
0x114c   :  { %20159 = vmatpush1.bf16.msra.mxu0 %v26701_v60  ;;  %10211 = vmatprep.mubr.f32.mxu0 %v26038_v17  ;;  %v26711_v60 = vld [vmem:[#allocation54_spill] sm:$0xff] }
0x114d   :  { %20161 = vmatprep.subr.bf16.mxu0 %v26702_v39  ;;  %v26713_v39 = vld [vmem:[#allocation80_spill] sm:$0xff] }
0x1150   :  { %20163 = vmatpush1.bf16.msra.mxu0 %v26703_v11  ;;  %v26714_v11 = vld [vmem:[#allocation81_spill] sm:$0xff] }
0x1151   :  { %20165 = vmatprep.subr.bf16.mxu0 %v26704_v62  ;;  %v26715_v62 = vld [vmem:[#allocation82_spill] sm:$0xff] }
0x1154   :  { %20167 = vmatpush1.bf16.msra.mxu0 %v26705_v19 }
0x1155   :  { %20169 = vmatprep.subr.bf16.mxu0 %v26706_v58 }
0x1158   :  { %20171 = vmatpush1.bf16.msra.mxu0 %v26707_v3 }
0x1159   :  { %20173 = vmatprep.subr.bf16.mxu0 %v26708_v4 }
0x115c   :  { %20175 = vmatpush1.bf16.msra.mxu0 %v26709_v47 }
0x115d   :  { %20177 = vmatprep.subr.bf16.mxu0 %v26710_v18 }
0x1160   :  { %20179 = vmatpush1.bf16.msra.mxu0 %v26711_v60 }
0x1161   :  { %20181 = vmatprep.subr.bf16.mxu0 %v26712_v40 }
0x1164   :  { %20183 = vmatpush1.bf16.msra.mxu0 %v26713_v39 }
0x1165   :  { %20185 = vmatprep.subr.bf16.mxu0 %v26714_v11 }
0x1168   :  { %20187 = vmatpush1.bf16.msra.mxu0 %v26715_v62 }
0x1169   :  { %20189 = vmatprep.subr.bf16.mxu0 %v26459_v36 }
0x116b   :  { %10213 = vmatmul.mubr.f32.vlgmr.msra.gmra.mrb[12].mxu0 %v24614_v14 }
0x116c   :  { %20191 = vmatpush1.bf16.msra.mxu0 %v26460_v50  ;;  %10315 = vmatprep.mubr.f32.mxu0 %v26038_v17 }
0x116d   :  { %20193 = vmatprep.subr.bf16.mxu0 %v26461_v30 }
0x1170   :  { %20195 = vmatpush1.bf16.msra.mxu0 %v26462_v51 }
0x1171   :  { %20197 = vmatprep.subr.bf16.mxu0 %v26463_v53 }
0x1174   :  { %20199 = vmatpush1.bf16.msra.mxu0 %v26464_v38 }
0x1175   :  { %20201 = vmatprep.subr.bf16.mxu0 %v26465_v44 }
0x1178   :  { %20203 = vmatpush1.bf16.msra.mxu0 %v26466_v10 }
0x1179   :  { %20205 = vmatprep.subr.bf16.mxu0 %v26467_v22 }
0x117c   :  { %20207 = vmatpush1.bf16.msra.mxu0 %v26468_v45 }
0x117d   :  { %20209 = vmatprep.subr.bf16.mxu0 %v26469_v61 }
0x1180   :  { %20211 = vmatpush1.bf16.msra.mxu0 %v26470_v52 }
0x1181   :  { %20213 = vmatprep.subr.bf16.mxu0 %v26528_v49 }
0x1184   :  { %20215 = vmatpush1.bf16.msra.mxu0 %v26697_v26 }
0x1185   :  { %20217 = vmatprep.subr.bf16.mxu0 %v26698_v2 }
0x1188   :  { %20219 = vmatpush1.bf16.msra.mxu0 %v26699_v35 }
0x1189   :  { %20365 = vmatprep.subr.bf16.mxu0 %v26459_v36 }
0x118b   :  { %10317 = vmatmul.mubr.f32.vlgmr.msra.gmra.mrb[12].mxu0 %v24614_v14  ;;  %v26716_v14 = vld [vmem:[#allocation48_spill] sm:$0xff] }
0x118c   :  { %20367 = vmatpush1.bf16.msra.mxu0 %v26460_v50  ;;  %11133 = vmatprep.mubr.f32.mxu0 %v26038_v17 }
0x118d   :  { %20369 = vmatprep.subr.bf16.mxu0 %v26461_v30 }
0x1190   :  { %20371 = vmatpush1.bf16.msra.mxu0 %v26462_v51 }
0x1191   :  { %20373 = vmatprep.subr.bf16.mxu0 %v26463_v53 }
0x1194   :  { %20375 = vmatpush1.bf16.msra.mxu0 %v26464_v38 }
0x1195   :  { %20377 = vmatprep.subr.bf16.mxu0 %v26465_v44 }
0x1198   :  { %20379 = vmatpush1.bf16.msra.mxu0 %v26466_v10 }
0x1199   :  { %20381 = vmatprep.subr.bf16.mxu0 %v26467_v22 }
0x119c   :  { %20383 = vmatpush1.bf16.msra.mxu0 %v26468_v45 }
0x119d   :  { %20385 = vmatprep.subr.bf16.mxu0 %v26469_v61 }
0x11a0   :  { %20387 = vmatpush1.bf16.msra.mxu0 %v26470_v52 }
0x11a1   :  { %20389 = vmatprep.subr.bf16.mxu0 %v26528_v49 }
0x11a4   :  { %20391 = vmatpush1.bf16.msra.mxu0 %v26697_v26 }
0x11a5   :  { %20393 = vmatprep.subr.bf16.mxu0 %v26698_v2 }
0x11a8   :  { %20395 = vmatpush1.bf16.msra.mxu0 %v26699_v35 }
0x11a9   :  { %20397 = vmatprep.subr.bf16.mxu0 %v26716_v14 }
0x125e   :  { %v24723_v62 = vpop.f32.mrb[12].mxu0 }
0x125f   :  { %v10320_v11 = vpop.f32.mrb[13].mxu0 }
0x1260   :  { %v10334_v39 = vrot.slane %v10320_v11, 3 }
0x1262   :  { %v10336_v40 = vadd.f32 %v26492_v5, %v10334_v39 }
0x1264   :  { %v14886_v60 = vmul.f32 -1.442695, %v10336_v40 }
0x1266   :  { %21426 = vpow2.f32 %v14886_v60 }
0x1270   :  { %v21427_v18 = vpop.eup %21426 }
0x1271   :  { %v10340_v47 = vadd.f32 1.0, %v21427_v18 }
0x1273   :  { %21428 = vrcp.f32 %v10340_v47 }
0x127d   :  { %v21429_v4 = vpop.eup %21428 }
0x127e   :  { %v10344_v3 = vcombine.high %v21429_v4, %v21429_v4  ;;  %v26717_v4 = vld [vmem:[#allocation55_spill] sm:$0xff] }
0x1280   :  { %v10351_v58 = vrot.slane %v10344_v3, %v23752_v7  ;;  %v26718_v3 = vld [vmem:[#allocation56_spill] sm:$0xff] }
0x1282   :  { %v10352_v19 = vcombine.high %v10351_v58, %v10351_v58 }
0x1284   :  { %v10359_v35 = vrot.slane %v10352_v19, %v23752_v7 }
0x1286   :  { %v10361_v14 = vmul.f32 %v10359_v35, %v24611_v48 }
0x1288   :  { %v24729_v2 = vand.u32 4294901760, %v10361_v14 }
0x128a   :  { %v10444_v11 = vsub.f32 %v10361_v14, %v24729_v2  ;;  %v26719_v14 = vld [vmem:[#allocation60_spill] sm:$0xff] }
0x128c   :  { %v10445_v26 = vand.u32 4294901760, %v10444_v11 }
0x128e   :  { %v10446_v39 = vsub.f32 %v10444_v11, %v10445_v26 }
0x1290   :  { %v10447_v40 = vand.u32 4294901760, %v10446_v39  ;;  %v26720_v39 = vld [vmem:[#allocation39_spill] sm:$0xff] }
0x1292   :  { %17205 = vmatmul.mubr.f32.vlgmr.msra.gmra.mrb[24].mxu1 %v10447_v40  ;;  %v24848_v40 = vrot.slane %v24611_v48, %v26720_v39  ;;  %v26768_v39 = vld [vmem:[#allocation79_spill] sm:$0xff] }
0x1293   :  { %20246 = vmatpush3.bf16.msra.mxu1 %v23307_v13  ;;  %17239 = vmatprep.mubr.msk.f32.mxu1 %vm21561_vm0, %v26038_v17 }
0x1294   :  { %20247 = vmatprep.subr.bf16.mxu1 %v26147_v34  ;;  %26721 = vst [vmem:[#allocation37_spill] sm:$0xff] %v24848_v40 }
0x1297   :  { %20249 = vmatpush3.bf16.msra.mxu1 %v23321_v54 }
0x1298   :  { %20250 = vmatprep.subr.bf16.mxu1 %v26147_v34 }
0x129b   :  { %20252 = vmatpush3.bf16.msra.mxu1 %v23335_v28 }
0x129c   :  { %20253 = vmatprep.subr.bf16.mxu1 %v26147_v34 }
0x129f   :  { %20255 = vmatpush3.bf16.msra.mxu1 %v23367_v8 }
0x12a0   :  { %20256 = vmatprep.subr.bf16.mxu1 %v26147_v34 }
0x12a3   :  { %20258 = vmatpush3.bf16.msra.mxu1 %v23371_v31 }
0x12a4   :  { %20259 = vmatprep.subr.bf16.mxu1 %v26147_v34 }
0x12a7   :  { %20261 = vmatpush3.bf16.msra.mxu1 %v23391_v41 }
0x12a8   :  { %20262 = vmatprep.subr.bf16.mxu1 %v26147_v34 }
0x12ab   :  { %20264 = vmatpush3.bf16.msra.mxu1 %v23414_v29 }
0x12ac   :  { %20265 = vmatprep.subr.bf16.mxu1 %v26147_v34 }
0x12af   :  { %20267 = vmatpush3.bf16.msra.mxu1 %v23419_v0 }
0x12b0   :  { %20268 = vmatprep.subr.bf16.mxu1 %v26147_v34 }
0x12b2   :  { %17240 = vmatmul.mubr.f32.vlgmr.msra.gmra.mrb[24].mxu1 %v24729_v2 }
0x12b3   :  { %20270 = vmatpush3.bf16.msra.mxu1 %v23423_v59  ;;  %17274 = vmatprep.mubr.msk.f32.mxu1 %vm21561_vm0, %v26038_v17 }
0x12b4   :  { %20271 = vmatprep.subr.bf16.mxu1 %v26147_v34 }
0x12b7   :  { %20273 = vmatpush3.bf16.msra.mxu1 %v23427_v24 }
0x12b8   :  { %20274 = vmatprep.subr.bf16.mxu1 %v26147_v34 }
0x12bb   :  { %20276 = vmatpush3.bf16.msra.mxu1 %v23431_v6 }
0x12bc   :  { %20277 = vmatprep.subr.bf16.mxu1 %v26147_v34 }
0x12bf   :  { %20279 = vmatpush3.bf16.msra.mxu1 %v23435_v32 }
0x12c0   :  { %20280 = vmatprep.subr.bf16.mxu1 %v26147_v34 }
0x12c3   :  { %20282 = vmatpush3.bf16.msra.mxu1 %v23439_v27 }
0x12c4   :  { %20283 = vmatprep.subr.bf16.mxu1 %v26147_v34 }
0x12c7   :  { %20285 = vmatpush3.bf16.msra.mxu1 %v23443_v46 }
0x12c8   :  { %20286 = vmatprep.subr.bf16.mxu1 %v26147_v34 }
0x12cb   :  { %20288 = vmatpush3.bf16.msra.mxu1 %v23447_v16 }
0x12cc   :  { %20289 = vmatprep.subr.bf16.mxu1 %v26147_v34 }
0x12cf   :  { %20291 = vmatpush3.bf16.msra.mxu1 %v23451_v9 }
0x12d0   :  { %20292 = vmatprep.subr.bf16.mxu1 %v26147_v34 }
0x12d2   :  { %17275 = vmatmul.mubr.f32.vlgmr.msra.gmra.mrb[24].mxu1 %v10444_v11 }
0x12d3   :  { %20294 = vmatpush3.bf16.msra.mxu1 %v23179_v56  ;;  %17309 = vmatprep.mubr.msk.f32.mxu1 %vm21561_vm0, %v26038_v17 }
0x12d4   :  { %20295 = vmatprep.subr.bf16.mxu1 %v26147_v34 }
0x12d7   :  { %20297 = vmatpush3.bf16.msra.mxu1 %v23189_v25 }
0x12d8   :  { %20298 = vmatprep.subr.bf16.mxu1 %v26147_v34 }
0x12db   :  { %20300 = vmatpush3.bf16.msra.mxu1 %v23199_v20 }
0x12dc   :  { %20301 = vmatprep.subr.bf16.mxu1 %v26147_v34 }
0x12df   :  { %20303 = vmatpush3.bf16.msra.mxu1 %v23224_v21 }
0x12e0   :  { %20304 = vmatprep.subr.bf16.mxu1 %v26147_v34 }
0x12e3   :  { %20306 = vmatpush3.bf16.msra.mxu1 %v23234_v63 }
0x12e4   :  { %20307 = vmatprep.subr.bf16.mxu1 %v26147_v34 }
0x12e7   :  { %20309 = vmatpush3.bf16.msra.mxu1 %v23254_v57 }
0x12e8   :  { %20310 = vmatprep.subr.bf16.mxu1 %v26147_v34 }
0x12eb   :  { %20312 = vmatpush3.bf16.msra.mxu1 %v23274_v37 }
0x12ec   :  { %20313 = vmatprep.subr.bf16.mxu1 %v26147_v34 }
0x12ef   :  { %20315 = vmatpush3.bf16.msra.mxu1 %v23288_v43 }
0x12f0   :  { %20316 = vmatprep.subr.bf16.mxu1 %v26147_v34 }
0x12f2   :  { %17310 = vmatmul.mubr.f32.vlgmr.msra.gmra.mrb[24].mxu1 %v10445_v26 }
0x12f3   :  { %20318 = vmatpush3.bf16.msra.mxu1 %v23525_v12  ;;  %17344 = vmatprep.mubr.msk.f32.mxu1 %vm21561_vm0, %v26038_v17 }
0x12f4   :  { %20319 = vmatprep.subr.bf16.mxu1 %v26147_v34 }
0x12f7   :  { %20321 = vmatpush3.bf16.msra.mxu1 %v23533_v42 }
0x12f8   :  { %20322 = vmatprep.subr.bf16.mxu1 %v26147_v34 }
0x12fb   :  { %20324 = vmatpush3.bf16.msra.mxu1 %v23543_v33 }
0x12fc   :  { %20325 = vmatprep.subr.bf16.mxu1 %v26147_v34 }
0x12ff   :  { %20327 = vmatpush3.bf16.msra.mxu1 %v23551_v23 }
0x1300   :  { %20328 = vmatprep.subr.bf16.mxu1 %v26147_v34 }
0x1303   :  { %20330 = vmatpush3.bf16.msra.mxu1 %v23559_v1 }
0x1304   :  { %20331 = vmatprep.subr.bf16.mxu1 %v26147_v34 }
0x1307   :  { %20333 = vmatpush3.bf16.msra.mxu1 %v23567_v15 }
0x1308   :  { %20334 = vmatprep.subr.bf16.mxu1 %v26147_v34 }
0x130b   :  { %20336 = vmatpush3.bf16.msra.mxu1 %v26717_v4 }
0x130c   :  { %20337 = vmatprep.subr.bf16.mxu1 %v26147_v34 }
0x130f   :  { %20339 = vmatpush3.bf16.msra.mxu1 %v26718_v3 }
0x1310   :  { %20340 = vmatprep.subr.bf16.mxu1 %v26147_v34 }
0x1312   :  { %17345 = vmatmul.mubr.f32.vlgmr.msra.gmra.mrb[24].mxu1 %v24729_v2 }
0x1313   :  { %20342 = vmatpush3.bf16.msra.mxu1 %v23179_v56  ;;  %17379 = vmatprep.mubr.msk.f32.mxu1 %vm21561_vm0, %v26038_v17 }
0x1314   :  { %20343 = vmatprep.subr.bf16.mxu1 %v26147_v34 }
0x1317   :  { %20345 = vmatpush3.bf16.msra.mxu1 %v23189_v25 }
0x1318   :  { %20346 = vmatprep.subr.bf16.mxu1 %v26147_v34 }
0x131b   :  { %20348 = vmatpush3.bf16.msra.mxu1 %v23199_v20 }
0x131c   :  { %20349 = vmatprep.subr.bf16.mxu1 %v26147_v34 }
0x131f   :  { %20351 = vmatpush3.bf16.msra.mxu1 %v23224_v21 }
0x1320   :  { %20352 = vmatprep.subr.bf16.mxu1 %v26147_v34 }
0x1323   :  { %20354 = vmatpush3.bf16.msra.mxu1 %v23234_v63 }
0x1324   :  { %20355 = vmatprep.subr.bf16.mxu1 %v26147_v34 }
0x1327   :  { %20357 = vmatpush3.bf16.msra.mxu1 %v23254_v57 }
0x1328   :  { %20358 = vmatprep.subr.bf16.mxu1 %v26147_v34 }
0x132b   :  { %20360 = vmatpush3.bf16.msra.mxu1 %v23274_v37 }
0x132c   :  { %20361 = vmatprep.subr.bf16.mxu1 %v26147_v34 }
0x132f   :  { %20363 = vmatpush3.bf16.msra.mxu1 %v23288_v43 }
0x1330   :  { %20556 = vmatprep.subr.bf16.mxu1 %v26147_v34 }
0x1332   :  { %17380 = vmatmul.mubr.f32.vlgmr.msra.gmra.mrb[24].mxu1 %v24729_v2  ;;  %v10324_v2 = vrot.slane %v24723_v62, 3 }
0x1333   :  { %20558 = vmatpush3.bf16.msra.mxu1 %v23179_v56  ;;  %17414 = vmatprep.mubr.msk.f32.mxu1 %vm21561_vm0, %v26038_v17 }
0x1334   :  { %20559 = vmatprep.subr.bf16.mxu1 %v26147_v34  ;;  %v10326_v58 = vadd.f32 %v26550_v55, %v10324_v2 }
0x1336   :  { %v14885_v19 = vmul.f32 -1.442695, %v10326_v58 }
0x1337   :  { %20561 = vmatpush3.bf16.msra.mxu1 %v23189_v25 }
0x1338   :  { %20562 = vmatprep.subr.bf16.mxu1 %v26147_v34  ;;  %21430 = vpow2.f32 %v14885_v19 }
0x133b   :  { %20564 = vmatpush3.bf16.msra.mxu1 %v23199_v20 }
0x133c   :  { %20565 = vmatprep.subr.bf16.mxu1 %v26147_v34 }
0x133f   :  { %20567 = vmatpush3.bf16.msra.mxu1 %v23224_v21 }
0x1340   :  { %20568 = vmatprep.subr.bf16.mxu1 %v26147_v34 }
0x1342   :  { %v21431_v60 = vpop.eup %21430 }
0x1343   :  { %20570 = vmatpush3.bf16.msra.mxu1 %v23234_v63  ;;  %v10330_v18 = vadd.f32 1.0, %v21431_v60 }
0x1344   :  { %20571 = vmatprep.subr.bf16.mxu1 %v26147_v34 }
0x1347   :  { %20573 = vmatpush3.bf16.msra.mxu1 %v23254_v57 }
0x1348   :  { %20574 = vmatprep.subr.bf16.mxu1 %v26147_v34 }
0x134b   :  { %20576 = vmatpush3.bf16.msra.mxu1 %v23274_v37 }
0x134c   :  { %20577 = vmatprep.subr.bf16.mxu1 %v26147_v34 }
0x134f   :  { %20579 = vmatpush3.bf16.msra.mxu1 %v23288_v43 }
0x1350   :  { %20580 = vmatprep.subr.bf16.mxu1 %v26147_v34 }
0x1405   :  { %v10999_v47 = vpop.f32.mrb[24].mxu1 }
0x1406   :  { %v11004_v35 = vrot.slane %v10999_v47, 3  ;;  %v17381_v26 = vpop.f32.mrb[25].mxu1 }
0x1408   :  { %v11006_v11 = vadd.f32 %v26719_v14, %v11004_v35 }
0x140a   :  { %21432 = vtanh.f32 %v11006_v11 }
0x140b   :  { %21434 = vrcp.f32 %v10330_v18 }
0x1414   :  { %v21433_v3 = vpop.eup %21432 }
0x1415   :  { %v11008_v62 = vsub.f32 %v21433_v3, %v24848_v40  ;;  %v21435_v4 = vpop.eup %21434  ;;  %v26732_v40 = vld [vmem:[#allocation83_spill] sm:$0xff] }
0x1417   :  { %v11009_v2 = vmul.f32 %v21435_v4, %v11008_v62  ;;  %v26722_v4 = vld [vmem:[#allocation49_spill] sm:$0xff]  ;;  %v26723_v62 = vld [vmem:[#allocation51_spill] sm:$0xff] }
0x1419   :  { %v11011_v58 = vcombine.high %v11009_v2, %v11009_v2  ;;  %v26726_v2 = vld [vmem:[#allocation59_spill] sm:$0xff] }
0x141b   :  { %v11018_v19 = vrot.slane %v11011_v58, %v23752_v7  ;;  %v26727_v58 = vld [vmem:[#allocation61_spill] sm:$0xff] }
0x141d   :  { %v11019_v55 = vcombine.high %v11018_v19, %v11018_v19  ;;  %v26728_v19 = vld [vmem:[#allocation63_spill] sm:$0xff] }
0x141f   :  { %v11026_v47 = vrot.slane %v11019_v55, %v23752_v7  ;;  %v26724_v55 = vld [vmem:[#allocation57_spill] sm:$0xff] }
0x1421   :  { %v24854_v60 = vadd.f32 %v11026_v47, %v24611_v48  ;;  %v26725_v48 = vld [vmem:[#allocation58_spill] sm:$0xff]  ;;  %v26729_v47 = vld [vmem:[#allocation64_spill] sm:$0xff] }
0x1423   :  { %v24857_v35 = vand.u32 4294901760, %v24854_v60 }
0x1425   :  { %v11135_v26 = vsub.f32 %v24854_v60, %v24857_v35 }
0x1427   :  { %v11136_v18 = vand.u32 4294901760, %v11135_v26 }
0x1429   :  { %v11137_v11 = vsub.f32 %v11135_v26, %v11136_v18 }
0x142b   :  { %v11138_v3 = vand.u32 4294901760, %v11137_v11  ;;  %v26730_v11 = vld [vmem:[#allocation65_spill] sm:$0xff] }
0x142d   :  { %11139 = vmatmul.mubr.f32.vlgmr.msra.gmra.mrb[14].mxu0 %v11138_v3  ;;  %v26731_v3 = vld [vmem:[#allocation69_spill] sm:$0xff] }
0x142e   :  { %20399 = vmatpush1.bf16.msra.mxu0 %v26722_v4  ;;  %11369 = vmatprep.mubr.f32.mxu0 %v26038_v17  ;;  %v26733_v4 = vld [vmem:[#allocation84_spill] sm:$0xff] }
0x142f   :  { %20401 = vmatprep.subr.bf16.mxu0 %v26723_v62  ;;  %v26734_v62 = vld [vmem:[#allocation85_spill] sm:$0xff] }
0x1432   :  { %20403 = vmatpush1.bf16.msra.mxu0 %v26724_v55  ;;  %v26735_v55 = vld [vmem:[#allocation86_spill] sm:$0xff] }
0x1433   :  { %20405 = vmatprep.subr.bf16.mxu0 %v26725_v48  ;;  %v26736_v48 = vld [vmem:[#allocation87_spill] sm:$0xff] }
0x1436   :  { %20407 = vmatpush1.bf16.msra.mxu0 %v26726_v2  ;;  %v26737_v2 = vld [vmem:[#allocation88_spill] sm:$0xff] }
0x1437   :  { %20409 = vmatprep.subr.bf16.mxu0 %v26727_v58  ;;  %v26749_v58 = vld [vmem:[#allocation34_spill] sm:$0xff] }
0x143a   :  { %20411 = vmatpush1.bf16.msra.mxu0 %v26728_v19  ;;  %v26738_v19 = vld [vmem:[#allocation89_spill] sm:$0xff] }
0x143b   :  { %20413 = vmatprep.subr.bf16.mxu0 %v26729_v47  ;;  %v26747_v47 = vld [vmem:[#allocation41_spill] sm:$0xff] }
0x143e   :  { %20415 = vmatpush1.bf16.msra.mxu0 %v26730_v11  ;;  %v26739_v11 = vld [vmem:[#allocation25_spill] sm:$0xff] }
0x143f   :  { %20417 = vmatprep.subr.bf16.mxu0 %v26731_v3  ;;  %v26740_v3 = vld [vmem:[#allocation66_spill] sm:$0xff] }
0x1442   :  { %20419 = vmatpush1.bf16.msra.mxu0 %v26732_v40  ;;  %v26741_v40 = vld [vmem:[#allocation67_spill] sm:$0xff] }
0x1443   :  { %20421 = vmatprep.subr.bf16.mxu0 %v26733_v4  ;;  %v26742_v4 = vld [vmem:[#allocation20_spill] sm:$0xff] }
0x1446   :  { %20423 = vmatpush1.bf16.msra.mxu0 %v26734_v62  ;;  %v26743_v62 = vld [vmem:[#allocation70_spill] sm:$0xff] }
0x1447   :  { %20425 = vmatprep.subr.bf16.mxu0 %v26735_v55  ;;  %v26744_v55 = vld [vmem:[#allocation71_spill] sm:$0xff] }
0x144a   :  { %20427 = vmatpush1.bf16.msra.mxu0 %v26736_v48  ;;  %v26745_v48 = vld [vmem:[#allocation74_spill] sm:$0xff] }
0x144b   :  { %20429 = vmatprep.subr.bf16.mxu0 %v26737_v2  ;;  %v26746_v2 = vld [vmem:[#allocation30_spill] sm:$0xff] }
0x144d   :  { %11371 = vmatmul.mubr.f32.vlgmr.msra.gmra.mrb[14].mxu0 %v24857_v35 }
0x144e   :  { %20431 = vmatpush1.bf16.msra.mxu0 %v26738_v19  ;;  %11505 = vmatprep.mubr.f32.mxu0 %v26038_v17  ;;  %v26748_v19 = vld [vmem:[#allocation42_spill] sm:$0xff] }
0x144f   :  { %20433 = vmatprep.subr.bf16.mxu0 %v26739_v11  ;;  %v26750_v11 = vld [vmem:[#allocation43_spill] sm:$0xff] }
0x1452   :  { %20435 = vmatpush1.bf16.msra.mxu0 %v26740_v3  ;;  %v26751_v3 = vld [vmem:[#allocation36_spill] sm:$0xff] }
0x1453   :  { %20437 = vmatprep.subr.bf16.mxu0 %v26741_v40  ;;  %v26752_v40 = vld [vmem:[#allocation32_spill] sm:$0xff] }
0x1456   :  { %20439 = vmatpush1.bf16.msra.mxu0 %v26742_v4  ;;  %v26764_v4 = vld [vmem:[#allocation46_spill] sm:$0xff] }
0x1457   :  { %20441 = vmatprep.subr.bf16.mxu0 %v26743_v62  ;;  %v26763_v62 = vld [vmem:[#allocation45_spill] sm:$0xff] }
0x145a   :  { %20443 = vmatpush1.bf16.msra.mxu0 %v26744_v55  ;;  %v26762_v55 = vld [vmem:[#allocation38_spill] sm:$0xff] }
0x145b   :  { %20445 = vmatprep.subr.bf16.mxu0 %v26745_v48  ;;  %v26761_v48 = vld [vmem:[#allocation78_spill] sm:$0xff] }
0x145e   :  { %20447 = vmatpush1.bf16.msra.mxu0 %v26746_v2  ;;  %v26760_v2 = vld [vmem:[#allocation77_spill] sm:$0xff] }
0x145f   :  { %20449 = vmatprep.subr.bf16.mxu0 %v26747_v47  ;;  %v26759_v47 = vld [vmem:[#allocation76_spill] sm:$0xff] }
0x1462   :  { %20451 = vmatpush1.bf16.msra.mxu0 %v26748_v19  ;;  %v26758_v19 = vld [vmem:[#allocation31_spill] sm:$0xff] }
0x1463   :  { %20453 = vmatprep.subr.bf16.mxu0 %v26749_v58  ;;  %v26757_v58 = vld [vmem:[#allocation22_spill] sm:$0xff] }
0x1466   :  { %20455 = vmatpush1.bf16.msra.mxu0 %v26750_v11  ;;  %v26756_v11 = vld [vmem:[#allocation27_spill] sm:$0xff] }
0x1467   :  { %20457 = vmatprep.subr.bf16.mxu0 %v26751_v3  ;;  %v26755_v3 = vld [vmem:[#allocation47_spill] sm:$0xff] }
0x146a   :  { %20459 = vmatpush1.bf16.msra.mxu0 %v26752_v40  ;;  %v26754_v40 = vld [vmem:[#allocation44_spill] sm:$0xff] }
0x146b   :  { %20461 = vmatprep.subr.bf16.mxu0 %v26459_v36 }
0x146d   :  { %11508 = vmatmul.mubr.f32.vlgmr.msra.gmra.mrb[14].mxu0 %v11135_v26  ;;  %v26753_v26 = vld [vmem:[#allocation33_spill] sm:$0xff] }
0x146e   :  { %20463 = vmatpush1.bf16.msra.mxu0 %v26460_v50  ;;  %11610 = vmatprep.mubr.f32.mxu0 %v26038_v17 }
0x146f   :  { %20465 = vmatprep.subr.bf16.mxu0 %v26461_v30 }
0x1472   :  { %20467 = vmatpush1.bf16.msra.mxu0 %v26462_v51 }
0x1473   :  { %20469 = vmatprep.subr.bf16.mxu0 %v26463_v53 }
0x1476   :  { %20471 = vmatpush1.bf16.msra.mxu0 %v26464_v38 }
0x1477   :  { %20473 = vmatprep.subr.bf16.mxu0 %v26465_v44 }
0x147a   :  { %20475 = vmatpush1.bf16.msra.mxu0 %v26466_v10 }
0x147b   :  { %20477 = vmatprep.subr.bf16.mxu0 %v26467_v22 }
0x147e   :  { %20479 = vmatpush1.bf16.msra.mxu0 %v26468_v45 }
0x147f   :  { %20481 = vmatprep.subr.bf16.mxu0 %v26469_v61 }
0x1482   :  { %20483 = vmatpush1.bf16.msra.mxu0 %v26470_v52 }
0x1483   :  { %20485 = vmatprep.subr.bf16.mxu0 %v26528_v49 }
0x1486   :  { %20487 = vmatpush1.bf16.msra.mxu0 %v26753_v26 }
0x1487   :  { %20489 = vmatprep.subr.bf16.mxu0 %v26754_v40 }
0x148a   :  { %20491 = vmatpush1.bf16.msra.mxu0 %v26755_v3 }
0x148b   :  { %20493 = vmatprep.subr.bf16.mxu0 %v26756_v11  ;;  %v26765_v11 = vld [vmem:[#allocation50_spill] sm:$0xff] }
0x148d   :  { %11614 = vmatmul.mubr.f32.vlgmr.msra.gmra.mrb[14].mxu0 %v11136_v18  ;;  %v26766_v18 = vld [vmem:[#allocation52_spill] sm:$0xff] }
0x148e   :  { %20495 = vmatpush1.bf16.msra.mxu0 %v26757_v58  ;;  %11780 = vmatprep.mubr.f32.mxu0 %v26038_v17  ;;  %v26767_v58 = vld [vmem:[#allocation54_spill] sm:$0xff] }
0x148f   :  { %20497 = vmatprep.subr.bf16.mxu0 %v26758_v19  ;;  %v26769_v19 = vld [vmem:[#allocation80_spill] sm:$0xff] }
0x1492   :  { %20499 = vmatpush1.bf16.msra.mxu0 %v26759_v47  ;;  %v26770_v47 = vld [vmem:[#allocation81_spill] sm:$0xff] }
0x1493   :  { %20501 = vmatprep.subr.bf16.mxu0 %v26760_v2  ;;  %v26771_v2 = vld [vmem:[#allocation82_spill] sm:$0xff] }
0x1496   :  { %20503 = vmatpush1.bf16.msra.mxu0 %v26761_v48 }
0x1497   :  { %20505 = vmatprep.subr.bf16.mxu0 %v26762_v55 }
0x149a   :  { %20507 = vmatpush1.bf16.msra.mxu0 %v26763_v62 }
0x149b   :  { %20509 = vmatprep.subr.bf16.mxu0 %v26764_v4 }
0x149e   :  { %20511 = vmatpush1.bf16.msra.mxu0 %v26765_v11 }
0x149f   :  { %20513 = vmatprep.subr.bf16.mxu0 %v26766_v18 }
0x14a2   :  { %20515 = vmatpush1.bf16.msra.mxu0 %v26767_v58 }
0x14a3   :  { %20517 = vmatprep.subr.bf16.mxu0 %v26768_v39 }
0x14a6   :  { %20519 = vmatpush1.bf16.msra.mxu0 %v26769_v19 }
0x14a7   :  { %20521 = vmatprep.subr.bf16.mxu0 %v26770_v47 }
0x14aa   :  { %20523 = vmatpush1.bf16.msra.mxu0 %v26771_v2 }
0x14ab   :  { %20525 = vmatprep.subr.bf16.mxu0 %v26459_v36 }
0x14ad   :  { %11782 = vmatmul.mubr.f32.vlgmr.msra.gmra.mrb[14].mxu0 %v24857_v35 }
0x14ae   :  { %20527 = vmatpush1.bf16.msra.mxu0 %v26460_v50  ;;  %11884 = vmatprep.mubr.f32.mxu0 %v26038_v17 }
0x14af   :  { %20529 = vmatprep.subr.bf16.mxu0 %v26461_v30 }
0x14b2   :  { %20531 = vmatpush1.bf16.msra.mxu0 %v26462_v51 }
0x14b3   :  { %20533 = vmatprep.subr.bf16.mxu0 %v26463_v53 }
0x14b6   :  { %20535 = vmatpush1.bf16.msra.mxu0 %v26464_v38 }
0x14b7   :  { %20537 = vmatprep.subr.bf16.mxu0 %v26465_v44 }
0x14ba   :  { %20539 = vmatpush1.bf16.msra.mxu0 %v26466_v10 }
0x14bb   :  { %20541 = vmatprep.subr.bf16.mxu0 %v26467_v22 }
0x14be   :  { %20543 = vmatpush1.bf16.msra.mxu0 %v26468_v45 }
0x14bf   :  { %20545 = vmatprep.subr.bf16.mxu0 %v26469_v61 }
0x14c2   :  { %20547 = vmatpush1.bf16.msra.mxu0 %v26470_v52 }
0x14c3   :  { %20549 = vmatprep.subr.bf16.mxu0 %v26528_v49 }
0x14c6   :  { %20551 = vmatpush1.bf16.msra.mxu0 %v26753_v26 }
0x14c7   :  { %20553 = vmatprep.subr.bf16.mxu0 %v26754_v40 }
0x14ca   :  { %20555 = vmatpush1.bf16.msra.mxu0 %v26755_v3 }
0x14cb   :  { %20701 = vmatprep.subr.bf16.mxu0 %v26459_v36 }
0x14cd   :  { %11886 = vmatmul.mubr.f32.vlgmr.msra.gmra.mrb[14].mxu0 %v24857_v35  ;;  %v26772_v35 = vld [vmem:[#allocation48_spill] sm:$0xff] }
0x14ce   :  { %20703 = vmatpush1.bf16.msra.mxu0 %v26460_v50  ;;  %12702 = vmatprep.mubr.f32.mxu0 %v26038_v17 }
0x14cf   :  { %20705 = vmatprep.subr.bf16.mxu0 %v26461_v30 }
0x14d2   :  { %20707 = vmatpush1.bf16.msra.mxu0 %v26462_v51 }
0x14d3   :  { %20709 = vmatprep.subr.bf16.mxu0 %v26463_v53 }
0x14d6   :  { %20711 = vmatpush1.bf16.msra.mxu0 %v26464_v38 }
0x14d7   :  { %20713 = vmatprep.subr.bf16.mxu0 %v26465_v44 }
0x14da   :  { %20715 = vmatpush1.bf16.msra.mxu0 %v26466_v10 }
0x14db   :  { %20717 = vmatprep.subr.bf16.mxu0 %v26467_v22 }
0x14de   :  { %20719 = vmatpush1.bf16.msra.mxu0 %v26468_v45 }
0x14df   :  { %20721 = vmatprep.subr.bf16.mxu0 %v26469_v61 }
0x14e2   :  { %20723 = vmatpush1.bf16.msra.mxu0 %v26470_v52 }
0x14e3   :  { %20725 = vmatprep.subr.bf16.mxu0 %v26528_v49 }
0x14e6   :  { %20727 = vmatpush1.bf16.msra.mxu0 %v26753_v26 }
0x14e7   :  { %20729 = vmatprep.subr.bf16.mxu0 %v26754_v40 }
0x14ea   :  { %20731 = vmatpush1.bf16.msra.mxu0 %v26755_v3 }
0x14eb   :  { %20733 = vmatprep.subr.bf16.mxu0 %v26772_v35 }
0x15a0   :  { %v24966_v2 = vpop.f32.mrb[14].mxu0 }
0x15a1   :  { %v11889_v47 = vpop.f32.mrb[15].mxu0 }
0x15a2   :  { %v11903_v19 = vrot.slane %v11889_v47, 2 }
0x15a4   :  { %v11905_v39 = vadd.f32 %v26492_v5, %v11903_v19 }
0x15a6   :  { %v14888_v58 = vmul.f32 -1.442695, %v11905_v39 }
0x15a8   :  { %21436 = vpow2.f32 %v14888_v58 }
0x15b2   :  { %v21437_v18 = vpop.eup %21436 }
0x15b3   :  { %v11909_v11 = vadd.f32 1.0, %v21437_v18 }
0x15b5   :  { %21438 = vrcp.f32 %v11909_v11 }
0x15bf   :  { %v21439_v4 = vpop.eup %21438 }
0x15c0   :  { %v11913_v62 = vcombine.high %v21439_v4, %v21439_v4  ;;  %v26773_v4 = vld [vmem:[#allocation55_spill] sm:$0xff] }
0x15c2   :  { %v11920_v55 = vrot.slane %v11913_v62, %v23752_v7  ;;  %v26774_v62 = vld [vmem:[#allocation56_spill] sm:$0xff] }
0x15c4   :  { %v11927_v48 = vrot.slane %v11920_v55, %v23752_v7  ;;  %v26775_v55 = vld [vmem:[#allocation35_spill] sm:$0xff] }
0x15c6   :  { %v11928_v3 = vcombine.high %v11927_v48, %v11927_v48 }
0x15c8   :  { %v11930_v35 = vmul.f32 %v11928_v3, %v24854_v60 }
0x15ca   :  { %v24972_v40 = vand.u32 4294901760, %v11930_v35 }
0x15cc   :  { %v12013_v47 = vsub.f32 %v11930_v35, %v24972_v40 }
0x15ce   :  { %v12014_v26 = vand.u32 4294901760, %v12013_v47 }
0x15d0   :  { %v12015_v19 = vsub.f32 %v12013_v47, %v12014_v26 }
0x15d2   :  { %v12016_v39 = vand.u32 4294901760, %v12015_v19  ;;  %v26776_v19 = vld [vmem:[#allocation39_spill] sm:$0xff] }
0x15d4   :  { %17415 = vmatmul.mubr.f32.vlgmr.msra.gmra.mrb[26].mxu1 %v12016_v39  ;;  %v25091_v39 = vrot.slane %v24854_v60, %v26776_v19 }
0x15d5   :  { %20582 = vmatpush3.bf16.msra.mxu1 %v23307_v13  ;;  %17449 = vmatprep.mubr.msk.f32.mxu1 %vm21561_vm0, %v26038_v17 }
0x15d6   :  { %20583 = vmatprep.subr.bf16.mxu1 %v26147_v34  ;;  %26777 = vst [vmem:[#allocation14_spill] sm:$0xff] %v25091_v39 }
0x15d9   :  { %20585 = vmatpush3.bf16.msra.mxu1 %v23321_v54 }
0x15da   :  { %20586 = vmatprep.subr.bf16.mxu1 %v26147_v34 }
0x15dd   :  { %20588 = vmatpush3.bf16.msra.mxu1 %v23335_v28 }
0x15de   :  { %20589 = vmatprep.subr.bf16.mxu1 %v26147_v34 }
0x15e1   :  { %20591 = vmatpush3.bf16.msra.mxu1 %v23367_v8 }
0x15e2   :  { %20592 = vmatprep.subr.bf16.mxu1 %v26147_v34 }
0x15e5   :  { %20594 = vmatpush3.bf16.msra.mxu1 %v23371_v31 }
0x15e6   :  { %20595 = vmatprep.subr.bf16.mxu1 %v26147_v34 }
0x15e9   :  { %20597 = vmatpush3.bf16.msra.mxu1 %v23391_v41 }
0x15ea   :  { %20598 = vmatprep.subr.bf16.mxu1 %v26147_v34 }
0x15ed   :  { %20600 = vmatpush3.bf16.msra.mxu1 %v23414_v29 }
0x15ee   :  { %20601 = vmatprep.subr.bf16.mxu1 %v26147_v34 }
0x15f1   :  { %20603 = vmatpush3.bf16.msra.mxu1 %v23419_v0 }
0x15f2   :  { %20604 = vmatprep.subr.bf16.mxu1 %v26147_v34 }
0x15f4   :  { %17450 = vmatmul.mubr.f32.vlgmr.msra.gmra.mrb[26].mxu1 %v24972_v40 }
0x15f5   :  { %20606 = vmatpush3.bf16.msra.mxu1 %v23423_v59  ;;  %17484 = vmatprep.mubr.msk.f32.mxu1 %vm21561_vm0, %v26038_v17 }
0x15f6   :  { %20607 = vmatprep.subr.bf16.mxu1 %v26147_v34 }
0x15f9   :  { %20609 = vmatpush3.bf16.msra.mxu1 %v23427_v24 }
0x15fa   :  { %20610 = vmatprep.subr.bf16.mxu1 %v26147_v34 }
0x15fd   :  { %20612 = vmatpush3.bf16.msra.mxu1 %v23431_v6 }
0x15fe   :  { %20613 = vmatprep.subr.bf16.mxu1 %v26147_v34 }
0x1601   :  { %20615 = vmatpush3.bf16.msra.mxu1 %v23435_v32 }
0x1602   :  { %20616 = vmatprep.subr.bf16.mxu1 %v26147_v34 }
0x1605   :  { %20618 = vmatpush3.bf16.msra.mxu1 %v23439_v27 }
0x1606   :  { %20619 = vmatprep.subr.bf16.mxu1 %v26147_v34 }
0x1609   :  { %20621 = vmatpush3.bf16.msra.mxu1 %v23443_v46 }
0x160a   :  { %20622 = vmatprep.subr.bf16.mxu1 %v26147_v34 }
0x160d   :  { %20624 = vmatpush3.bf16.msra.mxu1 %v23447_v16 }
0x160e   :  { %20625 = vmatprep.subr.bf16.mxu1 %v26147_v34 }
0x1611   :  { %20627 = vmatpush3.bf16.msra.mxu1 %v23451_v9 }
0x1612   :  { %20628 = vmatprep.subr.bf16.mxu1 %v26147_v34 }
0x1614   :  { %17485 = vmatmul.mubr.f32.vlgmr.msra.gmra.mrb[26].mxu1 %v12013_v47 }
0x1615   :  { %20630 = vmatpush3.bf16.msra.mxu1 %v23179_v56  ;;  %17519 = vmatprep.mubr.msk.f32.mxu1 %vm21561_vm0, %v26038_v17 }
0x1616   :  { %20631 = vmatprep.subr.bf16.mxu1 %v26147_v34 }
0x1619   :  { %20633 = vmatpush3.bf16.msra.mxu1 %v23189_v25 }
0x161a   :  { %20634 = vmatprep.subr.bf16.mxu1 %v26147_v34 }
0x161d   :  { %20636 = vmatpush3.bf16.msra.mxu1 %v23199_v20 }
0x161e   :  { %20637 = vmatprep.subr.bf16.mxu1 %v26147_v34 }
0x1621   :  { %20639 = vmatpush3.bf16.msra.mxu1 %v23224_v21 }
0x1622   :  { %20640 = vmatprep.subr.bf16.mxu1 %v26147_v34 }
0x1625   :  { %20642 = vmatpush3.bf16.msra.mxu1 %v23234_v63 }
0x1626   :  { %20643 = vmatprep.subr.bf16.mxu1 %v26147_v34 }
0x1629   :  { %20645 = vmatpush3.bf16.msra.mxu1 %v23254_v57 }
0x162a   :  { %20646 = vmatprep.subr.bf16.mxu1 %v26147_v34 }
0x162d   :  { %20648 = vmatpush3.bf16.msra.mxu1 %v23274_v37 }
0x162e   :  { %20649 = vmatprep.subr.bf16.mxu1 %v26147_v34 }
0x1631   :  { %20651 = vmatpush3.bf16.msra.mxu1 %v23288_v43 }
0x1632   :  { %20652 = vmatprep.subr.bf16.mxu1 %v26147_v34 }
0x1634   :  { %17520 = vmatmul.mubr.f32.vlgmr.msra.gmra.mrb[26].mxu1 %v12014_v26 }
0x1635   :  { %20654 = vmatpush3.bf16.msra.mxu1 %v23525_v12  ;;  %17554 = vmatprep.mubr.msk.f32.mxu1 %vm21561_vm0, %v26038_v17 }
0x1636   :  { %20655 = vmatprep.subr.bf16.mxu1 %v26147_v34 }
0x1639   :  { %20657 = vmatpush3.bf16.msra.mxu1 %v23533_v42 }
0x163a   :  { %20658 = vmatprep.subr.bf16.mxu1 %v26147_v34 }
0x163d   :  { %20660 = vmatpush3.bf16.msra.mxu1 %v23543_v33 }
0x163e   :  { %20661 = vmatprep.subr.bf16.mxu1 %v26147_v34 }
0x1641   :  { %20663 = vmatpush3.bf16.msra.mxu1 %v23551_v23 }
0x1642   :  { %20664 = vmatprep.subr.bf16.mxu1 %v26147_v34 }
0x1645   :  { %20666 = vmatpush3.bf16.msra.mxu1 %v23559_v1 }
0x1646   :  { %20667 = vmatprep.subr.bf16.mxu1 %v26147_v34 }
0x1649   :  { %20669 = vmatpush3.bf16.msra.mxu1 %v23567_v15 }
0x164a   :  { %20670 = vmatprep.subr.bf16.mxu1 %v26147_v34 }
0x164d   :  { %20672 = vmatpush3.bf16.msra.mxu1 %v26773_v4 }
0x164e   :  { %20673 = vmatprep.subr.bf16.mxu1 %v26147_v34 }
0x1651   :  { %20675 = vmatpush3.bf16.msra.mxu1 %v26774_v62 }
0x1652   :  { %20676 = vmatprep.subr.bf16.mxu1 %v26147_v34 }
0x1654   :  { %17555 = vmatmul.mubr.f32.vlgmr.msra.gmra.mrb[26].mxu1 %v24972_v40 }
0x1655   :  { %20678 = vmatpush3.bf16.msra.mxu1 %v23179_v56  ;;  %17589 = vmatprep.mubr.msk.f32.mxu1 %vm21561_vm0, %v26038_v17 }
0x1656   :  { %20679 = vmatprep.subr.bf16.mxu1 %v26147_v34 }
0x1659   :  { %20681 = vmatpush3.bf16.msra.mxu1 %v23189_v25 }
0x165a   :  { %20682 = vmatprep.subr.bf16.mxu1 %v26147_v34 }
0x165d   :  { %20684 = vmatpush3.bf16.msra.mxu1 %v23199_v20 }
0x165e   :  { %20685 = vmatprep.subr.bf16.mxu1 %v26147_v34 }
0x1661   :  { %20687 = vmatpush3.bf16.msra.mxu1 %v23224_v21 }
0x1662   :  { %20688 = vmatprep.subr.bf16.mxu1 %v26147_v34 }
0x1665   :  { %20690 = vmatpush3.bf16.msra.mxu1 %v23234_v63 }
0x1666   :  { %20691 = vmatprep.subr.bf16.mxu1 %v26147_v34 }
0x1669   :  { %20693 = vmatpush3.bf16.msra.mxu1 %v23254_v57 }
0x166a   :  { %20694 = vmatprep.subr.bf16.mxu1 %v26147_v34 }
0x166d   :  { %20696 = vmatpush3.bf16.msra.mxu1 %v23274_v37 }
0x166e   :  { %20697 = vmatprep.subr.bf16.mxu1 %v26147_v34 }
0x1671   :  { %20699 = vmatpush3.bf16.msra.mxu1 %v23288_v43 }
0x1672   :  { %20892 = vmatprep.subr.bf16.mxu1 %v26147_v34 }
0x1674   :  { %17590 = vmatmul.mubr.f32.vlgmr.msra.gmra.mrb[26].mxu1 %v24972_v40  ;;  %v11893_v40 = vrot.slane %v24966_v2, 2 }
0x1675   :  { %20894 = vmatpush3.bf16.msra.mxu1 %v23179_v56  ;;  %17624 = vmatprep.mubr.msk.f32.mxu1 %vm21561_vm0, %v26038_v17 }
0x1676   :  { %20895 = vmatprep.subr.bf16.mxu1 %v26147_v34  ;;  %v11895_v48 = vadd.f32 %v26775_v55, %v11893_v40 }
0x1678   :  { %v14887_v58 = vmul.f32 -1.442695, %v11895_v48 }
0x1679   :  { %20897 = vmatpush3.bf16.msra.mxu1 %v23189_v25 }
0x167a   :  { %20898 = vmatprep.subr.bf16.mxu1 %v26147_v34  ;;  %21440 = vpow2.f32 %v14887_v58 }
0x167d   :  { %20900 = vmatpush3.bf16.msra.mxu1 %v23199_v20 }
0x167e   :  { %20901 = vmatprep.subr.bf16.mxu1 %v26147_v34 }
0x1681   :  { %20903 = vmatpush3.bf16.msra.mxu1 %v23224_v21 }
0x1682   :  { %20904 = vmatprep.subr.bf16.mxu1 %v26147_v34 }
0x1684   :  { %v21441_v11 = vpop.eup %21440 }
0x1685   :  { %20906 = vmatpush3.bf16.msra.mxu1 %v23234_v63  ;;  %v11899_v35 = vadd.f32 1.0, %v21441_v11 }
0x1686   :  { %20907 = vmatprep.subr.bf16.mxu1 %v26147_v34 }
0x1689   :  { %20909 = vmatpush3.bf16.msra.mxu1 %v23254_v57 }
0x168a   :  { %20910 = vmatprep.subr.bf16.mxu1 %v26147_v34 }
0x168d   :  { %20912 = vmatpush3.bf16.msra.mxu1 %v23274_v37 }
0x168e   :  { %20913 = vmatprep.subr.bf16.mxu1 %v26147_v34 }
0x1691   :  { %20915 = vmatpush3.bf16.msra.mxu1 %v23288_v43 }
0x1692   :  { %20916 = vmatprep.subr.bf16.mxu1 %v26147_v34 }
0x1747   :  { %v12568_v3 = vpop.f32.mrb[26].mxu1 }
0x1748   :  { %v12573_v26 = vrot.slane %v12568_v3, 2  ;;  %v17591_v18 = vpop.f32.mrb[27].mxu1 }
0x174a   :  { %v12575_v47 = vadd.f32 %v26719_v14, %v12573_v26  ;;  %v26824_v14 = vld [vmem:[#allocation79_spill] sm:$0xff] }
0x174c   :  { %21442 = vtanh.f32 %v12575_v47 }
0x174d   :  { %21444 = vrcp.f32 %v11899_v35 }
0x1756   :  { %v21443_v62 = vpop.eup %21442 }
0x1757   :  { %v12577_v2 = vsub.f32 %v21443_v62, %v25091_v39  ;;  %v21445_v4 = vpop.eup %21444  ;;  %v26789_v39 = vld [vmem:[#allocation84_spill] sm:$0xff] }
0x1759   :  { %v12578_v40 = vmul.f32 %v21445_v4, %v12577_v2  ;;  %v26778_v4 = vld [vmem:[#allocation49_spill] sm:$0xff]  ;;  %v26779_v2 = vld [vmem:[#allocation51_spill] sm:$0xff] }
0x175b   :  { %v12580_v48 = vcombine.high %v12578_v40, %v12578_v40  ;;  %v26780_v40 = vld [vmem:[#allocation57_spill] sm:$0xff] }
0x175d   :  { %v12587_v58 = vrot.slane %v12580_v48, %v23752_v7  ;;  %v26782_v48 = vld [vmem:[#allocation59_spill] sm:$0xff] }
0x175f   :  { %v12594_v3 = vrot.slane %v12587_v58, %v23752_v7  ;;  %v26783_v58 = vld [vmem:[#allocation61_spill] sm:$0xff] }
0x1761   :  { %v12595_v18 = vcombine.high %v12594_v3, %v12594_v3  ;;  %v26784_v3 = vld [vmem:[#allocation63_spill] sm:$0xff] }
0x1763   :  { %v25097_v11 = vadd.f32 %v12595_v18, %v24854_v60  ;;  %v26781_v60 = vld [vmem:[#allocation58_spill] sm:$0xff]  ;;  %v26785_v18 = vld [vmem:[#allocation64_spill] sm:$0xff] }
0x1765   :  { %v25100_v26 = vand.u32 4294901760, %v25097_v11 }
0x1767   :  { %v12704_v35 = vsub.f32 %v25097_v11, %v25100_v26 }
0x1769   :  { %v12705_v47 = vand.u32 4294901760, %v12704_v35 }
0x176b   :  { %v12706_v19 = vsub.f32 %v12704_v35, %v12705_v47 }
0x176d   :  { %v12707_v62 = vand.u32 4294901760, %v12706_v19  ;;  %v26786_v19 = vld [vmem:[#allocation65_spill] sm:$0xff] }
0x176f   :  { %12708 = vmatmul.mubr.f32.vlgmr.msra.gmra.mrb[16].mxu0 %v12707_v62  ;;  %v26787_v62 = vld [vmem:[#allocation69_spill] sm:$0xff] }
0x1770   :  { %20735 = vmatpush1.bf16.msra.mxu0 %v26778_v4  ;;  %12938 = vmatprep.mubr.f32.mxu0 %v26038_v17  ;;  %v26788_v4 = vld [vmem:[#allocation83_spill] sm:$0xff] }
0x1771   :  { %20737 = vmatprep.subr.bf16.mxu0 %v26779_v2  ;;  %v26790_v2 = vld [vmem:[#allocation85_spill] sm:$0xff] }
0x1774   :  { %20739 = vmatpush1.bf16.msra.mxu0 %v26780_v40  ;;  %v26791_v40 = vld [vmem:[#allocation86_spill] sm:$0xff] }
0x1775   :  { %20741 = vmatprep.subr.bf16.mxu0 %v26781_v60  ;;  %v26792_v60 = vld [vmem:[#allocation87_spill] sm:$0xff] }
0x1778   :  { %20743 = vmatpush1.bf16.msra.mxu0 %v26782_v48  ;;  %v26793_v48 = vld [vmem:[#allocation88_spill] sm:$0xff] }
0x1779   :  { %20745 = vmatprep.subr.bf16.mxu0 %v26783_v58  ;;  %v26794_v58 = vld [vmem:[#allocation89_spill] sm:$0xff] }
0x177c   :  { %20747 = vmatpush1.bf16.msra.mxu0 %v26784_v3  ;;  %v26795_v3 = vld [vmem:[#allocation25_spill] sm:$0xff] }
0x177d   :  { %20749 = vmatprep.subr.bf16.mxu0 %v26785_v18  ;;  %v26796_v18 = vld [vmem:[#allocation66_spill] sm:$0xff] }
0x1780   :  { %20751 = vmatpush1.bf16.msra.mxu0 %v26786_v19  ;;  %v26797_v19 = vld [vmem:[#allocation67_spill] sm:$0xff] }
0x1781   :  { %20753 = vmatprep.subr.bf16.mxu0 %v26787_v62  ;;  %v26799_v62 = vld [vmem:[#allocation70_spill] sm:$0xff] }
0x1784   :  { %20755 = vmatpush1.bf16.msra.mxu0 %v26788_v4  ;;  %v26800_v4 = vld [vmem:[#allocation71_spill] sm:$0xff] }
0x1785   :  { %20757 = vmatprep.subr.bf16.mxu0 %v26789_v39  ;;  %v26798_v39 = vld [vmem:[#allocation20_spill] sm:$0xff] }
0x1788   :  { %20759 = vmatpush1.bf16.msra.mxu0 %v26790_v2  ;;  %v26801_v2 = vld [vmem:[#allocation74_spill] sm:$0xff] }
0x1789   :  { %20761 = vmatprep.subr.bf16.mxu0 %v26791_v40  ;;  %v26802_v40 = vld [vmem:[#allocation30_spill] sm:$0xff] }
0x178c   :  { %20763 = vmatpush1.bf16.msra.mxu0 %v26792_v60  ;;  %v26803_v60 = vld [vmem:[#allocation41_spill] sm:$0xff] }
0x178d   :  { %20765 = vmatprep.subr.bf16.mxu0 %v26793_v48  ;;  %v26804_v48 = vld [vmem:[#allocation42_spill] sm:$0xff] }
0x178f   :  { %12940 = vmatmul.mubr.f32.vlgmr.msra.gmra.mrb[16].mxu0 %v25100_v26 }
0x1790   :  { %20767 = vmatpush1.bf16.msra.mxu0 %v26794_v58  ;;  %13074 = vmatprep.mubr.f32.mxu0 %v26038_v17  ;;  %v26805_v58 = vld [vmem:[#allocation34_spill] sm:$0xff] }
0x1791   :  { %20769 = vmatprep.subr.bf16.mxu0 %v26795_v3  ;;  %v26806_v3 = vld [vmem:[#allocation43_spill] sm:$0xff] }
0x1794   :  { %20771 = vmatpush1.bf16.msra.mxu0 %v26796_v18  ;;  %v26807_v18 = vld [vmem:[#allocation36_spill] sm:$0xff] }
0x1795   :  { %20773 = vmatprep.subr.bf16.mxu0 %v26797_v19  ;;  %v26808_v19 = vld [vmem:[#allocation32_spill] sm:$0xff] }
0x1798   :  { %20775 = vmatpush1.bf16.msra.mxu0 %v26798_v39  ;;  %v26810_v39 = vld [vmem:[#allocation44_spill] sm:$0xff] }
0x1799   :  { %20777 = vmatprep.subr.bf16.mxu0 %v26799_v62  ;;  %v26811_v62 = vld [vmem:[#allocation47_spill] sm:$0xff] }
0x179c   :  { %20779 = vmatpush1.bf16.msra.mxu0 %v26800_v4  ;;  %v26812_v4 = vld [vmem:[#allocation27_spill] sm:$0xff] }
0x179d   :  { %20781 = vmatprep.subr.bf16.mxu0 %v26801_v2  ;;  %v26813_v2 = vld [vmem:[#allocation22_spill] sm:$0xff] }
0x17a0   :  { %20783 = vmatpush1.bf16.msra.mxu0 %v26802_v40  ;;  %v26814_v40 = vld [vmem:[#allocation31_spill] sm:$0xff] }
0x17a1   :  { %20785 = vmatprep.subr.bf16.mxu0 %v26803_v60  ;;  %v26815_v60 = vld [vmem:[#allocation76_spill] sm:$0xff] }
0x17a4   :  { %20787 = vmatpush1.bf16.msra.mxu0 %v26804_v48  ;;  %v26816_v48 = vld [vmem:[#allocation77_spill] sm:$0xff] }
0x17a5   :  { %20789 = vmatprep.subr.bf16.mxu0 %v26805_v58  ;;  %v26817_v58 = vld [vmem:[#allocation78_spill] sm:$0xff] }
0x17a8   :  { %20791 = vmatpush1.bf16.msra.mxu0 %v26806_v3  ;;  %v26818_v3 = vld [vmem:[#allocation38_spill] sm:$0xff] }
0x17a9   :  { %20793 = vmatprep.subr.bf16.mxu0 %v26807_v18  ;;  %v26819_v18 = vld [vmem:[#allocation45_spill] sm:$0xff] }
0x17ac   :  { %20795 = vmatpush1.bf16.msra.mxu0 %v26808_v19  ;;  %v26820_v19 = vld [vmem:[#allocation46_spill] sm:$0xff] }
0x17ad   :  { %20797 = vmatprep.subr.bf16.mxu0 %v26459_v36 }
0x17af   :  { %13077 = vmatmul.mubr.f32.vlgmr.msra.gmra.mrb[16].mxu0 %v12704_v35  ;;  %v26809_v35 = vld [vmem:[#allocation33_spill] sm:$0xff] }
0x17b0   :  { %20799 = vmatpush1.bf16.msra.mxu0 %v26460_v50  ;;  %13179 = vmatprep.mubr.f32.mxu0 %v26038_v17 }
0x17b1   :  { %20801 = vmatprep.subr.bf16.mxu0 %v26461_v30 }
0x17b4   :  { %20803 = vmatpush1.bf16.msra.mxu0 %v26462_v51 }
0x17b5   :  { %20805 = vmatprep.subr.bf16.mxu0 %v26463_v53 }
0x17b8   :  { %20807 = vmatpush1.bf16.msra.mxu0 %v26464_v38 }
0x17b9   :  { %20809 = vmatprep.subr.bf16.mxu0 %v26465_v44 }
0x17bc   :  { %20811 = vmatpush1.bf16.msra.mxu0 %v26466_v10 }
0x17bd   :  { %20813 = vmatprep.subr.bf16.mxu0 %v26467_v22 }
0x17c0   :  { %20815 = vmatpush1.bf16.msra.mxu0 %v26468_v45 }
0x17c1   :  { %20817 = vmatprep.subr.bf16.mxu0 %v26469_v61 }
0x17c4   :  { %20819 = vmatpush1.bf16.msra.mxu0 %v26470_v52 }
0x17c5   :  { %20821 = vmatprep.subr.bf16.mxu0 %v26528_v49 }
0x17c8   :  { %20823 = vmatpush1.bf16.msra.mxu0 %v26809_v35 }
0x17c9   :  { %20825 = vmatprep.subr.bf16.mxu0 %v26810_v39 }
0x17cc   :  { %20827 = vmatpush1.bf16.msra.mxu0 %v26811_v62 }
0x17cd   :  { %20829 = vmatprep.subr.bf16.mxu0 %v26812_v4  ;;  %v26821_v4 = vld [vmem:[#allocation50_spill] sm:$0xff] }
0x17cf   :  { %13183 = vmatmul.mubr.f32.vlgmr.msra.gmra.mrb[16].mxu0 %v12705_v47  ;;  %v26822_v47 = vld [vmem:[#allocation52_spill] sm:$0xff] }
0x17d0   :  { %20831 = vmatpush1.bf16.msra.mxu0 %v26813_v2  ;;  %13349 = vmatprep.mubr.f32.mxu0 %v26038_v17  ;;  %v26823_v2 = vld [vmem:[#allocation54_spill] sm:$0xff] }
0x17d1   :  { %20833 = vmatprep.subr.bf16.mxu0 %v26814_v40  ;;  %v26825_v40 = vld [vmem:[#allocation80_spill] sm:$0xff] }
0x17d4   :  { %20835 = vmatpush1.bf16.msra.mxu0 %v26815_v60  ;;  %v26826_v60 = vld [vmem:[#allocation81_spill] sm:$0xff] }
0x17d5   :  { %20837 = vmatprep.subr.bf16.mxu0 %v26816_v48  ;;  %v26827_v48 = vld [vmem:[#allocation82_spill] sm:$0xff] }
0x17d8   :  { %20839 = vmatpush1.bf16.msra.mxu0 %v26817_v58 }
0x17d9   :  { %20841 = vmatprep.subr.bf16.mxu0 %v26818_v3  ;;  %v14189_v3 = vld [vmem:[%s25694_s6 + $0x50] sm:$0xff] }
0x17dc   :  { %20843 = vmatpush1.bf16.msra.mxu0 %v26819_v18  ;;  %v14190_v18 = vld [vmem:[%s25694_s6 + $0x58] sm:$0xff] }
0x17dd   :  { %20845 = vmatprep.subr.bf16.mxu0 %v26820_v19  ;;  %v14191_v19 = vld [vmem:[%s25694_s6 + $0x60] sm:$0xff] }
0x17e0   :  { %20847 = vmatpush1.bf16.msra.mxu0 %v26821_v4 }
0x17e1   :  { %20849 = vmatprep.subr.bf16.mxu0 %v26822_v47 }
0x17e4   :  { %20851 = vmatpush1.bf16.msra.mxu0 %v26823_v2 }
0x17e5   :  { %20853 = vmatprep.subr.bf16.mxu0 %v26824_v14 }
0x17e8   :  { %20855 = vmatpush1.bf16.msra.mxu0 %v26825_v40 }
0x17e9   :  { %20857 = vmatprep.subr.bf16.mxu0 %v26826_v60  ;;  %v14192_v60 = vld [vmem:[%s25694_s6 + $0x68] sm:$0xff] }
0x17ec   :  { %20859 = vmatpush1.bf16.msra.mxu0 %v26827_v48  ;;  %v14193_v48 = vld [vmem:[%s25694_s6 + $0x70] sm:$0xff] }
0x17ed   :  { %20861 = vmatprep.subr.bf16.mxu0 %v26459_v36 }
0x17ef   :  { %13351 = vmatmul.mubr.f32.vlgmr.msra.gmra.mrb[16].mxu0 %v25100_v26 }
0x17f0   :  { %20863 = vmatpush1.bf16.msra.mxu0 %v26460_v50  ;;  %13453 = vmatprep.mubr.f32.mxu0 %v26038_v17 }
0x17f1   :  { %20865 = vmatprep.subr.bf16.mxu0 %v26461_v30 }
0x17f4   :  { %20867 = vmatpush1.bf16.msra.mxu0 %v26462_v51 }
0x17f5   :  { %20869 = vmatprep.subr.bf16.mxu0 %v26463_v53 }
0x17f8   :  { %20871 = vmatpush1.bf16.msra.mxu0 %v26464_v38 }
0x17f9   :  { %20873 = vmatprep.subr.bf16.mxu0 %v26465_v44 }
0x17fc   :  { %20875 = vmatpush1.bf16.msra.mxu0 %v26466_v10 }
0x17fd   :  { %20877 = vmatprep.subr.bf16.mxu0 %v26467_v22 }
0x1800   :  { %20879 = vmatpush1.bf16.msra.mxu0 %v26468_v45 }
0x1801   :  { %20881 = vmatprep.subr.bf16.mxu0 %v26469_v61 }
0x1804   :  { %20883 = vmatpush1.bf16.msra.mxu0 %v26470_v52 }
0x1805   :  { %20885 = vmatprep.subr.bf16.mxu0 %v26528_v49 }
0x1808   :  { %20887 = vmatpush1.bf16.msra.mxu0 %v26809_v35 }
0x1809   :  { %20889 = vmatprep.subr.bf16.mxu0 %v26810_v39 }
0x180c   :  { %20891 = vmatpush1.bf16.msra.mxu0 %v26811_v62 }
0x180d   :  { %21036 = vmatprep.subr.bf16.mxu0 %v26147_v34 }
0x180f   :  { %13455 = vmatmul.mubr.f32.vlgmr.msra.gmra.mrb[16].mxu0 %v25100_v26 }
0x1810   :  { %17834 = vmatprep.mubr.msk.f32.mxu0 %vm21561_vm0, %v26038_v17 }
0x18e2   :  { %v25194_v51 = vpop.f32.mrb[16].mxu0 }
0x18e3   :  { %v13458_v38 = vpop.f32.mrb[17].mxu0 }
0x18e4   :  { %v13472_v45 = vrot.slane %v13458_v38, 1  ;;  %v14194_v38 = vld [vmem:[%s25694_s6 + $0x78] sm:$0xff] }
0x18e6   :  { %v13474_v30 = vadd.f32 %v26492_v5, %v13472_v45 }
0x18e8   :  { %v14890_v53 = vmul.f32 -1.442695, %v13474_v30 }
0x18ea   :  { %21446 = vpow2.f32 %v14890_v53  ;;  %v14233_v53 = vand.u32 4294901760, %v14189_v3 }
0x18f4   :  { %v21447_v44 = vpop.eup %21446 }
0x18f5   :  { %v13478_v10 = vadd.f32 1.0, %v21447_v44  ;;  %v14236_v44 = vand.u32 4294901760, %v14190_v18 }
0x18f7   :  { %21448 = vrcp.f32 %v13478_v10  ;;  %v14239_v10 = vand.u32 4294901760, %v14191_v19 }
0x1901   :  { %v21449_v22 = vpop.eup %21448 }
0x1902   :  { %v13482_v36 = vcombine.high %v21449_v22, %v21449_v22  ;;  %v14242_v22 = vand.u32 4294901760, %v14192_v60 }
0x1904   :  { %v13489_v52 = vrot.slane %v13482_v36, %v23752_v7  ;;  %v14245_v36 = vand.u32 4294901760, %v14193_v48 }
0x1906   :  { %v13490_v50 = vcombine.high %v13489_v52, %v13489_v52  ;;  %v25383_v52 = vpack.c.bf16 %v14236_v44, %v14233_v53 }
0x1908   :  { %v13497_v61 = vrot.slane %v13490_v50, %v23752_v7  ;;  %v25385_v50 = vsub.f32 %v14189_v3, %v14233_v53 }
0x190a   :  { %v13498_v49 = vcombine.high %v13497_v61, %v13497_v61  ;;  %v25387_v61 = vsub.f32 %v14190_v18, %v14236_v44 }
0x190c   :  { %v13500_v14 = vmul.f32 %v13498_v49, %v25097_v11  ;;  %v14248_v49 = vand.u32 4294901760, %v14194_v38 }
0x190e   :  { %v25200_v26 = vand.u32 4294901760, %v13500_v14 }
0x1910   :  { %v13583_v35 = vsub.f32 %v13500_v14, %v25200_v26  ;;  %v25389_v14 = vsub.f32 %v14191_v19, %v14239_v10 }
0x1912   :  { %v13584_v5 = vand.u32 4294901760, %v13583_v35 }
0x1914   :  { %v13585_v39 = vsub.f32 %v13583_v35, %v13584_v5 }
0x1916   :  { %v13586_v62 = vand.u32 4294901760, %v13585_v39  ;;  %v25398_v39 = vsub.f32 %v14194_v38, %v14248_v49 }
0x1918   :  { %17625 = vmatmul.mubr.f32.vlgmr.msra.gmra.mrb[28].mxu1 %v13586_v62 }
0x1919   :  { %20918 = vmatpush3.bf16.msra.mxu1 %v23307_v13  ;;  %17659 = vmatprep.mubr.msk.f32.mxu1 %vm21561_vm0, %v26038_v17  ;;  %v26828_v13 = vld [vmem:[#allocation55_spill] sm:$0xff] }
0x191a   :  { %20919 = vmatprep.subr.bf16.mxu1 %v26147_v34 }
0x191d   :  { %20921 = vmatpush3.bf16.msra.mxu1 %v23321_v54 }
0x191e   :  { %20922 = vmatprep.subr.bf16.mxu1 %v26147_v34 }
0x1921   :  { %20924 = vmatpush3.bf16.msra.mxu1 %v23335_v28 }
0x1922   :  { %20925 = vmatprep.subr.bf16.mxu1 %v26147_v34 }
0x1925   :  { %20927 = vmatpush3.bf16.msra.mxu1 %v23367_v8  ;;  %v14184_v8 = vld [vmem:[%s25694_s6 + $0x28] sm:$0xff] }
0x1926   :  { %20928 = vmatprep.subr.bf16.mxu1 %v26147_v34 }
0x1929   :  { %20930 = vmatpush3.bf16.msra.mxu1 %v23371_v31  ;;  %v26829_v31 = vld [vmem:[#allocation56_spill] sm:$0xff] }
0x192a   :  { %20931 = vmatprep.subr.bf16.mxu1 %v26147_v34 }
0x192d   :  { %20933 = vmatpush3.bf16.msra.mxu1 %v23391_v41  ;;  %v14183_v41 = vld [vmem:[%s25694_s6 + $0x20] sm:$0xff] }
0x192e   :  { %20934 = vmatprep.subr.bf16.mxu1 %v26147_v34 }
0x1931   :  { %20936 = vmatpush3.bf16.msra.mxu1 %v23414_v29  ;;  %v14215_v29 = vand.u32 4294901760, %v14183_v41 }
0x1932   :  { %20937 = vmatprep.subr.bf16.mxu1 %v26147_v34 }
0x1933   :  { %v25360_v4 = vsub.f32 %v14183_v41, %v14215_v29 }
0x1935   :  { %20939 = vmatpush3.bf16.msra.mxu1 %v23419_v0  ;;  %v14218_v0 = vand.u32 4294901760, %v14184_v8 }
0x1936   :  { %20940 = vmatprep.subr.bf16.mxu1 %v26147_v34 }
0x1937   :  { %v25362_v47 = vsub.f32 %v14184_v8, %v14218_v0 }
0x1938   :  { %17660 = vmatmul.mubr.f32.vlgmr.msra.gmra.mrb[28].mxu1 %v25200_v26 }
0x1939   :  { %20942 = vmatpush3.bf16.msra.mxu1 %v23423_v59  ;;  %17694 = vmatprep.mubr.msk.f32.mxu1 %vm21561_vm0, %v26038_v17  ;;  %v25321_v59 = vpack.c.bf16 %v14218_v0, %v14215_v29  ;;  %v26010_v0 = vand.u32 4294901760, %v25360_v4 }
0x193a   :  { %20943 = vmatprep.subr.bf16.mxu1 %v26147_v34 }
0x193d   :  { %20945 = vmatpush3.bf16.msra.mxu1 %v23427_v24  ;;  %v14185_v24 = vld [vmem:[%s25694_s6 + $0x30] sm:$0xff] }
0x193e   :  { %20946 = vmatprep.subr.bf16.mxu1 %v26147_v34 }
0x1941   :  { %20948 = vmatpush3.bf16.msra.mxu1 %v23431_v6  ;;  %v14186_v6 = vld [vmem:[%s25694_s6 + $0x38] sm:$0xff] }
0x1942   :  { %20949 = vmatprep.subr.bf16.mxu1 %v26147_v34 }
0x1945   :  { %20951 = vmatpush3.bf16.msra.mxu1 %v23435_v32  ;;  %v14221_v32 = vand.u32 4294901760, %v14185_v24 }
0x1946   :  { %20952 = vmatprep.subr.bf16.mxu1 %v26147_v34 }
0x1947   :  { %v25364_v2 = vsub.f32 %v14185_v24, %v14221_v32  ;;  %v26009_v24 = vand.u32 4294901760, %v25362_v47 }
0x1949   :  { %20954 = vmatpush3.bf16.msra.mxu1 %v23439_v27  ;;  %v14224_v27 = vand.u32 4294901760, %v14186_v6 }
0x194a   :  { %20955 = vmatprep.subr.bf16.mxu1 %v26147_v34 }
0x194b   :  { %v25366_v40 = vsub.f32 %v14186_v6, %v14224_v27 }
0x194d   :  { %20957 = vmatpush3.bf16.msra.mxu1 %v23443_v46  ;;  %v25331_v46 = vpack.c.bf16 %v14224_v27, %v14221_v32  ;;  %v14325_v32 = vsub.f32 %v25360_v4, %v26010_v0  ;;  %v14332_v27 = vsub.f32 %v25362_v47, %v26009_v24 }
0x194e   :  { %20958 = vmatprep.subr.bf16.mxu1 %v26147_v34 }
0x1951   :  { %20960 = vmatpush3.bf16.msra.mxu1 %v23447_v16  ;;  %v14187_v16 = vld [vmem:[%s25694_s6 + $0x40] sm:$0xff] }
0x1952   :  { %20961 = vmatprep.subr.bf16.mxu1 %v26147_v34 }
0x1955   :  { %20963 = vmatpush3.bf16.msra.mxu1 %v23451_v9  ;;  %v14188_v9 = vld [vmem:[%s25694_s6 + $0x48] sm:$0xff] }
0x1956   :  { %20964 = vmatprep.subr.bf16.mxu1 %v26147_v34 }
0x1958   :  { %17695 = vmatmul.mubr.f32.vlgmr.msra.gmra.mrb[28].mxu1 %v13583_v35  ;;  %v25394_v35 = vpack.c.bf16 %v14242_v22, %v14239_v10 }
0x1959   :  { %20966 = vmatpush3.bf16.msra.mxu1 %v23179_v56  ;;  %17729 = vmatprep.mubr.msk.f32.mxu1 %vm21561_vm0, %v26038_v17 }
0x195a   :  { %20967 = vmatprep.subr.bf16.mxu1 %v26147_v34 }
0x195d   :  { %20969 = vmatpush3.bf16.msra.mxu1 %v23189_v25 }
0x195e   :  { %20970 = vmatprep.subr.bf16.mxu1 %v26147_v34 }
0x1961   :  { %20972 = vmatpush3.bf16.msra.mxu1 %v23199_v20 }
0x1962   :  { %20973 = vmatprep.subr.bf16.mxu1 %v26147_v34 }
0x1965   :  { %20975 = vmatpush3.bf16.msra.mxu1 %v23224_v21 }
0x1966   :  { %20976 = vmatprep.subr.bf16.mxu1 %v26147_v34 }
0x1969   :  { %20978 = vmatpush3.bf16.msra.mxu1 %v23234_v63 }
0x196a   :  { %20979 = vmatprep.subr.bf16.mxu1 %v26147_v34 }
0x196d   :  { %20981 = vmatpush3.bf16.msra.mxu1 %v23254_v57 }
0x196e   :  { %20982 = vmatprep.subr.bf16.mxu1 %v26147_v34 }
0x1971   :  { %20984 = vmatpush3.bf16.msra.mxu1 %v23274_v37 }
0x1972   :  { %20985 = vmatprep.subr.bf16.mxu1 %v26147_v34 }
0x1975   :  { %20987 = vmatpush3.bf16.msra.mxu1 %v23288_v43 }
0x1976   :  { %20988 = vmatprep.subr.bf16.mxu1 %v26147_v34 }
0x1978   :  { %17730 = vmatmul.mubr.f32.vlgmr.msra.gmra.mrb[28].mxu1 %v13584_v5  ;;  %v25396_v5 = vsub.f32 %v14193_v48, %v14245_v36 }
0x1979   :  { %20990 = vmatpush3.bf16.msra.mxu1 %v23525_v12  ;;  %17764 = vmatprep.mubr.msk.f32.mxu1 %vm21561_vm0, %v26038_v17  ;;  %v14227_v12 = vand.u32 4294901760, %v14187_v16 }
0x197a   :  { %20991 = vmatprep.subr.bf16.mxu1 %v26147_v34 }
0x197b   :  { %v25378_v45 = vsub.f32 %v14187_v16, %v14227_v12  ;;  %v14326_v16 = vand.u32 4294901760, %v14325_v32 }
0x197d   :  { %20993 = vmatpush3.bf16.msra.mxu1 %v23533_v42  ;;  %v14230_v42 = vand.u32 4294901760, %v14188_v9  ;;  %v26006_v38 = vand.u32 4294901760, %v25378_v45 }
0x197e   :  { %20994 = vmatprep.subr.bf16.mxu1 %v26147_v34 }
0x197f   :  { %v25380_v30 = vsub.f32 %v14188_v9, %v14230_v42  ;;  %v14333_v9 = vand.u32 4294901760, %v14332_v27  ;;  %v14353_v10 = vsub.f32 %v25378_v45, %v26006_v38 }
0x1981   :  { %20996 = vmatpush3.bf16.msra.mxu1 %v23543_v33  ;;  %v25341_v33 = vpack.c.bf16 %v14230_v42, %v14227_v12  ;;  %v26008_v12 = vand.u32 4294901760, %v25364_v2  ;;  %v26007_v42 = vand.u32 4294901760, %v25366_v40  ;;  %v25437_v3 = vpack.c.bf16 %v14333_v9, %v14326_v16 }
0x1982   :  { %20997 = vmatprep.subr.bf16.mxu1 %v26147_v34  ;;  %v26005_v53 = vand.u32 4294901760, %v25380_v30 }
0x1983   :  { %v14339_v18 = vsub.f32 %v25364_v2, %v26008_v12  ;;  %v14346_v19 = vsub.f32 %v25366_v40, %v26007_v42  ;;  %v26831_v42 = vld [vmem:[#allocation39_spill] sm:$0xff] }
0x1984   :  { %v12603_v12 = vrot.slane %v25097_v11, %v26831_v42 }
0x1985   :  { %20999 = vmatpush3.bf16.msra.mxu1 %v23551_v23  ;;  %v14347_v48 = vand.u32 4294901760, %v14346_v19 }
0x1986   :  { %21000 = vmatprep.subr.bf16.mxu1 %v26147_v34 }
0x1989   :  { %21002 = vmatpush3.bf16.msra.mxu1 %v23559_v1 }
0x198a   :  { %21003 = vmatprep.subr.bf16.mxu1 %v26147_v34 }
0x198d   :  { %21005 = vmatpush3.bf16.msra.mxu1 %v23567_v15 }
0x198e   :  { %21006 = vmatprep.subr.bf16.mxu1 %v26147_v34 }
0x1991   :  { %21008 = vmatpush3.bf16.msra.mxu1 %v26828_v13 }
0x1992   :  { %21009 = vmatprep.subr.bf16.mxu1 %v26147_v34 }
0x1995   :  { %21011 = vmatpush3.bf16.msra.mxu1 %v26829_v31  ;;  %v25404_v31 = vpack.c.bf16 %v14248_v49, %v14245_v36  ;;  %v14354_v36 = vand.u32 4294901760, %v14353_v10 }
0x1996   :  { %21012 = vmatprep.subr.bf16.mxu1 %v26147_v34 }
0x1998   :  { %17765 = vmatmul.mubr.f32.vlgmr.msra.gmra.mrb[28].mxu1 %v25200_v26 }
0x1999   :  { %21014 = vmatpush3.bf16.msra.mxu1 %v23179_v56  ;;  %17799 = vmatprep.mubr.msk.f32.mxu1 %vm21561_vm0, %v26038_v17 }
0x199a   :  { %21015 = vmatprep.subr.bf16.mxu1 %v26147_v34 }
0x199d   :  { %21017 = vmatpush3.bf16.msra.mxu1 %v23189_v25 }
0x199e   :  { %21018 = vmatprep.subr.bf16.mxu1 %v26147_v34 }
0x19a1   :  { %21020 = vmatpush3.bf16.msra.mxu1 %v23199_v20 }
0x19a2   :  { %21021 = vmatprep.subr.bf16.mxu1 %v26147_v34 }
0x19a5   :  { %21023 = vmatpush3.bf16.msra.mxu1 %v23224_v21  ;;  %v14179_v21 = vld [vmem:[%s25694_s6] sm:$0xff] }
0x19a6   :  { %21024 = vmatprep.subr.bf16.mxu1 %v26147_v34  ;;  %v14203_v20 = vand.u32 4294901760, %v14179_v21 }
0x19a8   :  { %v25343_v23 = vsub.f32 %v14179_v21, %v14203_v20 }
0x19a9   :  { %21026 = vmatpush3.bf16.msra.mxu1 %v23234_v63  ;;  %v14180_v63 = vld [vmem:[%s25694_s6 + $0x8] sm:$0xff] }
0x19aa   :  { %21027 = vmatprep.subr.bf16.mxu1 %v26147_v34  ;;  %v14296_v62 = vand.u32 4294901760, %v25343_v23 }
0x19ac   :  { %v14297_v21 = vsub.f32 %v25343_v23, %v14296_v62 }
0x19ad   :  { %21029 = vmatpush3.bf16.msra.mxu1 %v23254_v57  ;;  %v14206_v57 = vand.u32 4294901760, %v14180_v63 }
0x19ae   :  { %21030 = vmatprep.subr.bf16.mxu1 %v26147_v34 }
0x19af   :  { %v25301_v25 = vpack.c.bf16 %v14206_v57, %v14203_v20  ;;  %v25345_v1 = vsub.f32 %v14180_v63, %v14206_v57  ;;  %v14298_v20 = vand.u32 4294901760, %v14297_v21  ;;  %v26004_v21 = vand.u32 4294901760, %v25385_v50 }
0x19b1   :  { %21032 = vmatpush3.bf16.msra.mxu1 %v23274_v37  ;;  %v14181_v37 = vld [vmem:[%s25694_s6 + $0x10] sm:$0xff]  ;;  %21038 = vmatpush3.bf16.msra.mxu0 %v25301_v25  ;;  %v14303_v13 = vand.u32 4294901760, %v25345_v1 }
0x19b2   :  { %21033 = vmatprep.subr.bf16.mxu1 %v26147_v34  ;;  %v14209_v56 = vand.u32 4294901760, %v14181_v37  ;;  %21039 = vmatprep.subr.bf16.mxu0 %v26147_v34 }
0x19b3   :  { %v14304_v63 = vsub.f32 %v25345_v1, %v14303_v13 }
0x19b4   :  { %v25347_v15 = vsub.f32 %v14181_v37, %v14209_v56 }
0x19b5   :  { %21035 = vmatpush3.bf16.msra.mxu1 %v23288_v43  ;;  %v14182_v43 = vld [vmem:[%s25694_s6 + $0x18] sm:$0xff]  ;;  %v14305_v57 = vand.u32 4294901760, %v14304_v63  ;;  %v26003_v63 = vand.u32 4294901760, %v25387_v61  ;;  %s21563_s6 = smov [#allocation8]  }
0x19b6   :  { %v14212_v54 = vand.u32 4294901760, %v14182_v43  ;;  %v26012_v37 = vand.u32 4294901760, %v25347_v15  ;;  %s14861_s30 = sshll.u32 %s21563_s6, 4  ;;  %s14862_s30 = int_to_ptr.vmem [resolvable:$true] %s14861_s30 }
0x19b7   :  { %s21501_s11 = scalar_lea.vmem %s14862_s30, 16  ;;  %s21505_s12 = scalar_lea.vmem %s14862_s30, 32 }
0x19b8   :  { %17800 = vmatmul.mubr.f32.vlgmr.msra.gmra.mrb[28].mxu1 %v25200_v26  ;;  %v25311_v28 = vpack.c.bf16 %v14212_v54, %v14209_v56  ;;  %v25349_v58 = vsub.f32 %v14182_v43, %v14212_v54  ;;  %v25391_v26 = vsub.f32 %v14192_v60, %v14242_v22  ;;  %v25417_v56 = vpack.c.bf16 %v14305_v57, %v14298_v20  ;;  %p21502_p2 = scmp.ne.s32.totalorder %s14862_s30, %s21501_s11  ;;  %p21506_p3 = scmp.lt.s32.totalorder %s14862_s30, %s14862_s30 }
0x19b9   :  { %v14311_v54 = vsub.f32 %v25347_v15, %v26012_v37  ;;  %v14340_v60 = vand.u32 4294901760, %v14339_v18  ;;  %v14360_v22 = vsub.f32 %v25380_v30, %v26005_v53  ;;  %v14367_v57 = vsub.f32 %v25385_v50, %v26004_v21  ;;  %v26830_v53 = vld [vmem:[#allocation60_spill] sm:$0xff]  ;;  %p21507_p4 = scmp.lt.s32.totalorder %s21505_s12, %s21501_s11 }
0x19ba   :  { %21041 = vmatpush3.bf16.msra.mxu0 %v25311_v28  ;;  %v26011_v43 = vand.u32 4294901760, %v25349_v58  ;;  %v26001_v32 = vand.u32 4294901760, %v25391_v26 }
0x19bb   :  { %21042 = vmatprep.subr.bf16.mxu0 %v26147_v34  ;;  %v14312_v8 = vand.u32 4294901760, %v14311_v54  ;;  %v25447_v44 = vpack.c.bf16 %v14347_v48, %v14340_v60  ;;  %v14361_v49 = vand.u32 4294901760, %v14360_v22  ;;  %v14374_v54 = vsub.f32 %v25387_v61, %v26003_v63  ;;  %p21508_p5 = por %p21507_p4, %p21506_p3 }
0x19bc   :  { %v14318_v41 = vsub.f32 %v25349_v58, %v26011_v43  ;;  %v14388_v9 = vsub.f32 %v25391_v26, %v26001_v32  ;;  %v26000_v60 = vand.u32 4294901760, %v25396_v5  ;;  %v25999_v48 = vand.u32 4294901760, %v25398_v39 }
0x19bd   :  { %v25457_v20 = vpack.c.bf16 %v14361_v49, %v14354_v36  ;;  %p21509_p6 = pnand %p21508_p5, %p21502_p2 }
0x19be   :  { %21044 = vmatpush3.bf16.msra.mxu0 %v25321_v59  ;;  %v14319_v29 = vand.u32 4294901760, %v14318_v41  ;;  %v14368_v41 = vand.u32 4294901760, %v14367_v57  ;;  %v14389_v19 = vand.u32 4294901760, %v14388_v9  ;;  %v14395_v22 = vsub.f32 %v25396_v5, %v26000_v60 }
0x19bf   :  { %21045 = vmatprep.subr.bf16.mxu0 %v26147_v34  ;;  %v14402_v36 = vsub.f32 %v25398_v39, %v25999_v48  ;;  %v21094_v9 = vpack.c.bf16 %v25366_v40, %v25364_v2 }
0x19c0   :  { %v25427_v6 = vpack.c.bf16 %v14319_v29, %v14312_v8  ;;  %v14375_v8 = vand.u32 4294901760, %v14374_v54  ;;  %v26002_v29 = vand.u32 4294901760, %v25389_v14  ;;  %v14396_v49 = vand.u32 4294901760, %v14395_v22 }
0x19c1   :  { %v14403_v57 = vand.u32 4294901760, %v14402_v36  ;;  %v21103_v22 = vpack.c.bf16 %v25391_v26, %v25389_v14  ;;  %v21106_v36 = vpack.c.bf16 %v25398_v39, %v25396_v5 }
0x19c2   :  { %21047 = vmatpush3.bf16.msra.mxu0 %v25331_v46  ;;  %v25467_v27 = vpack.c.bf16 %v14375_v8, %v14368_v41  ;;  %v14381_v16 = vsub.f32 %v25389_v14, %v26002_v29  ;;  %v21085_v41 = vpack.c.bf16 %v25345_v1, %v25343_v23  ;;  %v21088_v8 = vpack.c.bf16 %v25349_v58, %v25347_v15 }
0x19c3   :  { %21048 = vmatprep.subr.bf16.mxu0 %v26147_v34  ;;  %v25485_v54 = vpack.c.bf16 %v14403_v57, %v14396_v49  ;;  %v13462_v49 = vrot.slane %v25194_v51, 1  ;;  %v26841_v23 = vand.u32 4294901760, %v25360_v4  ;;  %v26842_v1 = vand.u32 4294901760, %v25362_v47 }
0x19c4   :  { %v14382_v18 = vand.u32 4294901760, %v14381_v16  ;;  %v21091_v16 = vpack.c.bf16 %v25362_v47, %v25360_v4  ;;  %v26847_v4 = vand.u32 4294901760, %v25385_v50  ;;  %v26848_v47 = vand.u32 4294901760, %v25387_v61 }
0x19c5   :  { %v13464_v57 = vadd.f32 %v26775_v55, %v13462_v49 }
0x19c6   :  { %21050 = vmatpush3.bf16.msra.mxu0 %v25341_v33  ;;  %v25477_v10 = vpack.c.bf16 %v14389_v19, %v14382_v18  ;;  %v21097_v18 = vpack.c.bf16 %v25380_v30, %v25378_v45  ;;  %v21100_v19 = vpack.c.bf16 %v25387_v61, %v25385_v50 }
0x19c7   :  { %21051 = vmatprep.subr.bf16.mxu0 %v26147_v34  ;;  %v14889_v48 = vmul.f32 -1.442695, %v13464_v57 }
0x19c9   :  { %21450 = vpow2.f32 %v14889_v48  ;;  %v26832_v48 = vld [vmem:[#allocation73_spill] sm:$0xff] }
0x19ca   :  { %21053 = vmatpush3.bf16.msra.mxu0 %v25383_v52  ;;  %vm3190_vm1 = vcmp.eq.s32.totalorder %v26832_v48, 0  ;;  %vm4757_vm2 = vcmp.eq.s32.totalorder %v26832_v48, 1  ;;  %vm6324_vm3 = vcmp.eq.s32.totalorder %v26832_v48, 2  ;;  %vm7893_vm4 = vcmp.eq.s32.totalorder %v26832_v48, 3 }
0x19cb   :  { %21054 = vmatprep.subr.bf16.mxu0 %v26147_v34  ;;  %vm9460_vm5 = vcmp.eq.s32.totalorder %v26832_v48, 4  ;;  %vm11029_vm6 = vcmp.eq.s32.totalorder %v26832_v48, 5  ;;  %vm12598_vm8 = vcmp.eq.s32.totalorder %v26832_v48, 6  ;;  %vm14169_vm9 = vcmp.eq.s32.totalorder %v26832_v48, 7 }
0x19ce   :  { %21056 = vmatpush3.bf16.msra.mxu0 %v25394_v35 }
0x19cf   :  { %21057 = vmatprep.subr.bf16.mxu0 %v26147_v34 }
0x19d2   :  { %21059 = vmatpush3.bf16.msra.mxu0 %v25404_v31 }
0x19d3   :  { %21060 = vmatprep.subr.bf16.mxu0 %v26147_v34  ;;  %v21451_v60 = vpop.eup %21450 }
0x19d4   :  { %v13468_v21 = vadd.f32 1.0, %v21451_v60  ;;  %v26837_v60 = vld [vmem:[#allocation37_spill] sm:$0xff] }
0x1a8b   :  { %v14138_v32 = vpop.f32.mrb[28].mxu1 }
0x1a8c   :  { %v14143_v29 = vrot.slane %v14138_v32, 1  ;;  %v17801_v63 = vpop.f32.mrb[29].mxu1 }
0x1a8d   :  { %v26834_v63 = vld [vmem:[#allocation68_spill] sm:$0xff] }
0x1a8e   :  { %v14145_v38 = vadd.f32 %v26830_v53, %v14143_v29  ;;  %v26833_v53 = vld [vmem:[#allocation62_spill] sm:$0xff] }
0x1a90   :  { %21452 = vtanh.f32 %v14145_v38 }
0x1a91   :  { %21454 = vrcp.f32 %v13468_v21  ;;  %v3197_v21 = vsel %vm3190_vm1, %v26833_v53, 0.0 }
0x1a9a   :  { %v21453_v24 = vpop.eup %21452 }
0x1a9b   :  { %v14147_v0 = vsub.f32 %v21453_v24, %v12603_v12  ;;  %v21455_v43 = vpop.eup %21454  ;;  %v4764_v24 = vsel %vm4757_vm2, %v26834_v63, %v3197_v21 }
0x1a9d   :  { %v14148_v51 = vmul.f32 %v21455_v43, %v14147_v0  ;;  %v26835_v43 = vld [vmem:[#allocation72_spill] sm:$0xff]  ;;  %v26836_v0 = vld [vmem:[#allocation75_spill] sm:$0xff] }
0x1a9f   :  { %v14150_v37 = vcombine.high %v14148_v51, %v14148_v51  ;;  %v26838_v51 = vld [vmem:[#allocation14_spill] sm:$0xff] }
0x1aa1   :  { %v14157_v55 = vrot.slane %v14150_v37, %v23752_v7  ;;  %v6331_v37 = vsel %vm6324_vm3, %v26835_v43, %v4764_v24 }
0x1aa2   :  { %v7900_v32 = vsel %vm7893_vm4, %v26836_v0, %v6331_v37 }
0x1aa3   :  { %v14158_v49 = vcombine.high %v14157_v55, %v14157_v55  ;;  %v9467_v57 = vsel %vm9460_vm5, %v26837_v60, %v7900_v32 }
0x1aa4   :  { %v11036_v55 = vsel %vm11029_vm6, %v26838_v51, %v9467_v57 }
0x1aa5   :  { %v14165_v38 = vrot.slane %v14158_v49, %v23752_v7 }
0x1aa7   :  { %v14166_v29 = vcombine.high %v14165_v38, %v14165_v38  ;;  %v12605_v38 = vsel %vm12598_vm8, %v12603_v12, %v11036_v55 }
0x1aa9   :  { %v14168_v7 = vadd.f32 %v14166_v29, %v25097_v11  ;;  %v21133_v11 = vpack.c.bf16 %v14303_v13, %v14296_v62  ;;  %v21139_v62 = vpack.c.bf16 %v26842_v1, %v26841_v23  ;;  %v26843_v13 = vand.u32 4294901760, %v25364_v2 }
0x1aaa   :  { %v26849_v2 = vand.u32 4294901760, %v25389_v14 }
0x1aab   :  { %v14174_v49 = vrot.slane %v14168_v7, %v26831_v42  ;;  %14178 = vst.msk [vmem:[#allocation8] sm:$0x1] %vm14177_vm7, %v14168_v7  ;;  %v26845_v42 = vand.u32 4294901760, %v25378_v45  ;;  %v26851_v45 = vand.u32 4294901760, %v25396_v5 }
0x1aad   :  { %v14176_v53 = vsel %vm14169_vm9, %v14174_v49, %v12605_v38 }
0x1aae   :  { %v25526_v21 = vand.u32 4294901760, %v14176_v53 }
0x1ab0   :  { %v14284_v63 = vsub.f32 %v14176_v53, %v25526_v21 }
0x1ab2   :  { %v14285_v24 = vand.u32 4294901760, %v14284_v63 }
0x1ab4   :  { %v14286_v43 = vsub.f32 %v14284_v63, %v14285_v24 }
0x1ab6   :  { %v14287_v37 = vand.u32 4294901760, %v14286_v43 }
0x1ab8   :  { %17835 = vmatmul.mubr.f32.vlgmr.msra.gmra.mrb[18].mxu0 %v14287_v37 }
0x1ab9   :  { %21062 = vmatpush3.bf16.msra.mxu0 %v25417_v56  ;;  %17869 = vmatprep.mubr.msk.f32.mxu0 %vm21561_vm0, %v26038_v17  ;;  %v26839_v56 = vand.u32 4294901760, %v25347_v15  ;;  %v26844_v15 = vand.u32 4294901760, %v25366_v40  ;;  %v26850_v40 = vand.u32 4294901760, %v25391_v26 }
0x1aba   :  { %21063 = vmatprep.subr.bf16.mxu0 %v26147_v34 }
0x1abd   :  { %21065 = vmatpush3.bf16.msra.mxu0 %v25427_v6  ;;  %v26840_v6 = vand.u32 4294901760, %v25349_v58  ;;  %v21142_v58 = vpack.c.bf16 %v26844_v15, %v26843_v13 }
0x1abe   :  { %21066 = vmatprep.subr.bf16.mxu0 %v26147_v34 }
0x1abf   :  { %v21136_v12 = vpack.c.bf16 %v26840_v6, %v26839_v56 }
0x1ac1   :  { %21068 = vmatpush3.bf16.msra.mxu0 %v25437_v3  ;;  %v26846_v3 = vand.u32 4294901760, %v25380_v30  ;;  %v26852_v30 = vand.u32 4294901760, %v25398_v39 }
0x1ac2   :  { %21069 = vmatprep.subr.bf16.mxu0 %v26147_v34 }
0x1ac5   :  { %21071 = vmatpush3.bf16.msra.mxu0 %v25447_v44  ;;  %v21145_v44 = vpack.c.bf16 %v26846_v3, %v26845_v42 }
0x1ac6   :  { %21072 = vmatprep.subr.bf16.mxu0 %v26147_v34 }
0x1ac9   :  { %21074 = vmatpush3.bf16.msra.mxu0 %v25457_v20  ;;  %v21148_v20 = vpack.c.bf16 %v26848_v47, %v26847_v4 }
0x1aca   :  { %21075 = vmatprep.subr.bf16.mxu0 %v26147_v34 }
0x1acd   :  { %21077 = vmatpush3.bf16.msra.mxu0 %v25467_v27  ;;  %v21151_v27 = vpack.c.bf16 %v26850_v40, %v26849_v2 }
0x1ace   :  { %21078 = vmatprep.subr.bf16.mxu0 %v26147_v34 }
0x1ad1   :  { %21080 = vmatpush3.bf16.msra.mxu0 %v25477_v10  ;;  %v21154_v10 = vpack.c.bf16 %v26852_v30, %v26851_v45 }
0x1ad2   :  { %21081 = vmatprep.subr.bf16.mxu0 %v26147_v34 }
0x1ad5   :  { %21083 = vmatpush3.bf16.msra.mxu0 %v25485_v54 }
0x1ad6   :  { %21084 = vmatprep.subr.bf16.mxu0 %v26147_v34 }
0x1ad8   :  { %17870 = vmatmul.mubr.f32.vlgmr.msra.gmra.mrb[18].mxu0 %v25526_v21 }
0x1ad9   :  { %21086 = vmatpush3.bf16.msra.mxu0 %v21085_v41  ;;  %17904 = vmatprep.mubr.msk.f32.mxu0 %vm21561_vm0, %v26038_v17 }
0x1ada   :  { %21087 = vmatprep.subr.bf16.mxu0 %v26147_v34 }
0x1add   :  { %21089 = vmatpush3.bf16.msra.mxu0 %v21088_v8 }
0x1ade   :  { %21090 = vmatprep.subr.bf16.mxu0 %v26147_v34 }
0x1ae1   :  { %21092 = vmatpush3.bf16.msra.mxu0 %v21091_v16 }
0x1ae2   :  { %21093 = vmatprep.subr.bf16.mxu0 %v26147_v34 }
0x1ae5   :  { %21095 = vmatpush3.bf16.msra.mxu0 %v21094_v9 }
0x1ae6   :  { %21096 = vmatprep.subr.bf16.mxu0 %v26147_v34 }
0x1ae9   :  { %21098 = vmatpush3.bf16.msra.mxu0 %v21097_v18 }
0x1aea   :  { %21099 = vmatprep.subr.bf16.mxu0 %v26147_v34 }
0x1aed   :  { %21101 = vmatpush3.bf16.msra.mxu0 %v21100_v19 }
0x1aee   :  { %21102 = vmatprep.subr.bf16.mxu0 %v26147_v34 }
0x1af1   :  { %21104 = vmatpush3.bf16.msra.mxu0 %v21103_v22 }
0x1af2   :  { %21105 = vmatprep.subr.bf16.mxu0 %v26147_v34 }
0x1af5   :  { %21107 = vmatpush3.bf16.msra.mxu0 %v21106_v36 }
0x1af6   :  { %21108 = vmatprep.subr.bf16.mxu0 %v26147_v34 }
0x1af8   :  { %17905 = vmatmul.mubr.f32.vlgmr.msra.gmra.mrb[18].mxu0 %v14284_v63 }
0x1af9   :  { %21110 = vmatpush3.bf16.msra.mxu0 %v25301_v25  ;;  %17939 = vmatprep.mubr.msk.f32.mxu0 %vm21561_vm0, %v26038_v17 }
0x1afa   :  { %21111 = vmatprep.subr.bf16.mxu0 %v26147_v34 }
0x1afd   :  { %21113 = vmatpush3.bf16.msra.mxu0 %v25311_v28 }
0x1afe   :  { %21114 = vmatprep.subr.bf16.mxu0 %v26147_v34 }
0x1b01   :  { %21116 = vmatpush3.bf16.msra.mxu0 %v25321_v59 }
0x1b02   :  { %21117 = vmatprep.subr.bf16.mxu0 %v26147_v34 }
0x1b05   :  { %21119 = vmatpush3.bf16.msra.mxu0 %v25331_v46 }
0x1b06   :  { %21120 = vmatprep.subr.bf16.mxu0 %v26147_v34 }
0x1b09   :  { %21122 = vmatpush3.bf16.msra.mxu0 %v25341_v33 }
0x1b0a   :  { %21123 = vmatprep.subr.bf16.mxu0 %v26147_v34 }
0x1b0d   :  { %21125 = vmatpush3.bf16.msra.mxu0 %v25383_v52 }
0x1b0e   :  { %21126 = vmatprep.subr.bf16.mxu0 %v26147_v34 }
0x1b11   :  { %21128 = vmatpush3.bf16.msra.mxu0 %v25394_v35 }
0x1b12   :  { %21129 = vmatprep.subr.bf16.mxu0 %v26147_v34 }
0x1b15   :  { %21131 = vmatpush3.bf16.msra.mxu0 %v25404_v31 }
0x1b16   :  { %21132 = vmatprep.subr.bf16.mxu0 %v26147_v34 }
0x1b18   :  { %17940 = vmatmul.mubr.f32.vlgmr.msra.gmra.mrb[18].mxu0 %v14285_v24 }
0x1b19   :  { %21134 = vmatpush3.bf16.msra.mxu0 %v21133_v11  ;;  %17974 = vmatprep.mubr.msk.f32.mxu0 %vm21561_vm0, %v26038_v17 }
0x1b1a   :  { %21135 = vmatprep.subr.bf16.mxu0 %v26147_v34 }
0x1b1d   :  { %21137 = vmatpush3.bf16.msra.mxu0 %v21136_v12 }
0x1b1e   :  { %21138 = vmatprep.subr.bf16.mxu0 %v26147_v34 }
0x1b21   :  { %21140 = vmatpush3.bf16.msra.mxu0 %v21139_v62 }
0x1b22   :  { %21141 = vmatprep.subr.bf16.mxu0 %v26147_v34 }
0x1b25   :  { %21143 = vmatpush3.bf16.msra.mxu0 %v21142_v58 }
0x1b26   :  { %21144 = vmatprep.subr.bf16.mxu0 %v26147_v34 }
0x1b29   :  { %21146 = vmatpush3.bf16.msra.mxu0 %v21145_v44 }
0x1b2a   :  { %21147 = vmatprep.subr.bf16.mxu0 %v26147_v34 }
0x1b2d   :  { %21149 = vmatpush3.bf16.msra.mxu0 %v21148_v20 }
0x1b2e   :  { %21150 = vmatprep.subr.bf16.mxu0 %v26147_v34 }
0x1b31   :  { %21152 = vmatpush3.bf16.msra.mxu0 %v21151_v27 }
0x1b32   :  { %21153 = vmatprep.subr.bf16.mxu0 %v26147_v34 }
0x1b35   :  { %21155 = vmatpush3.bf16.msra.mxu0 %v21154_v10 }
0x1b36   :  { %21156 = vmatprep.subr.bf16.mxu0 %v26147_v34 }
0x1b38   :  { %17975 = vmatmul.mubr.f32.vlgmr.msra.gmra.mrb[18].mxu0 %v25526_v21 }
0x1b39   :  { %21158 = vmatpush3.bf16.msra.mxu0 %v25301_v25  ;;  %18009 = vmatprep.mubr.msk.f32.mxu0 %vm21561_vm0, %v26038_v17 }
0x1b3a   :  { %21159 = vmatprep.subr.bf16.mxu0 %v26147_v34 }
0x1b3d   :  { %21161 = vmatpush3.bf16.msra.mxu0 %v25311_v28 }
0x1b3e   :  { %21162 = vmatprep.subr.bf16.mxu0 %v26147_v34 }
0x1b41   :  { %21164 = vmatpush3.bf16.msra.mxu0 %v25321_v59 }
0x1b42   :  { %21165 = vmatprep.subr.bf16.mxu0 %v26147_v34 }
0x1b45   :  { %21167 = vmatpush3.bf16.msra.mxu0 %v25331_v46 }
0x1b46   :  { %21168 = vmatprep.subr.bf16.mxu0 %v26147_v34 }
0x1b49   :  { %21170 = vmatpush3.bf16.msra.mxu0 %v25341_v33 }
0x1b4a   :  { %21171 = vmatprep.subr.bf16.mxu0 %v26147_v34 }
0x1b4d   :  { %21173 = vmatpush3.bf16.msra.mxu0 %v25383_v52 }
0x1b4e   :  { %21174 = vmatprep.subr.bf16.mxu0 %v26147_v34 }
0x1b51   :  { %21176 = vmatpush3.bf16.msra.mxu0 %v25394_v35 }
0x1b52   :  { %21177 = vmatprep.subr.bf16.mxu0 %v26147_v34 }
0x1b55   :  { %21179 = vmatpush3.bf16.msra.mxu0 %v25404_v31 }
0x1b58   :  { %18010 = vmatmul.mubr.f32.vlgmr.msra.gmra.mrb[18].mxu0 %v25526_v21 }
0x1b59   :  { %21512 = shalt.err (!%p21509_p6)
}
0x1b5a   :  { %s21513_s13 = scalar_lea.hbm %s25697_s9, 16 }
0x1b5b   :  { %p21514_p7 = scmp.ne.s32.totalorder %s25697_s9, %s21513_s13  ;;  %p21517_p8 = scmp.lt.u32.totalorder %s21513_s13, %s25697_s9 }
0x1b5d   :  { %p21519_p9 = pnand %p21517_p8, %p21514_p7 }
0x1b5f   :  { %21522 = shalt.err (!%p21519_p9)
}
0x1b60   :  { %14864 = dma.vmem_to_hbm [thread:$0]  %s14862_s30, 16, %s25697_s9, [#allocation9]   ;;  %v14891_v17 = vld [vmem:[%s25695_s7] ss:$0 sm:$0xff]  ;;  %vm14843_vm10 = vcmask 64512  }
0x1b61   :  { %s21564_s19 = smov [#allocation7]  }
0x1b62   :  { %s14851_s20 = sshll.u32 %s21564_s19, 4  ;;  %s14852_s20 = int_to_ptr.vmem [resolvable:$true] %s14851_s20 }
0x1b63   :  { %s21523_s21 = scalar_lea.vmem %s14852_s20, 128  ;;  %p21528_p11 = scmp.lt.s32.totalorder %s14852_s20, %s14852_s20 }
0x1b64   :  { %p21524_p10 = scmp.ne.s32.totalorder %s14852_s20, %s21523_s21  ;;  %p21529_p12 = scmp.lt.s32.totalorder %s21523_s21, %s21523_s21 }
0x1b66   :  { %p21530_p13 = por %p21529_p12, %p21528_p11 }
0x1b68   :  { %p21531_p0 = pnand %p21530_p13, %p21524_p10 }
0x1c2b   :  { %v14839_v34 = vpop.f32.mrb[18].mxu0 }
0x1c2c   :  { %v21185_v25 = vadd.f32 %v14891_v17, %v14839_v34  ;;  %v18011_v28 = vpop.f32.mrb[19].mxu0 }
0x1c2e   :  { %14844 = vst.msk [vmem:[#allocation7] sm:$0xff] %vm14843_vm10, %v21185_v25 }
0x1c2f   :  { %21534 = shalt.err (!%p21531_p0)
}
0x1c30   :  { %s21535_s23 = scalar_lea.hbm %s25696_s8, 128 }
0x1c31   :  { %p21536_p1 = scmp.ne.s32.totalorder %s25696_s8, %s21535_s23  ;;  %p21539_p2 = scmp.lt.u32.totalorder %s21535_s23, %s25696_s8 }
0x1c33   :  { %p21541_p3 = pnand %p21539_p2, %p21536_p1 }
0x1c35   :  { %21544 = shalt.err (!%p21541_p3)
}
0x1c36   :  { %14854 = dma.vmem_to_hbm [thread:$0]  %s14852_s20, 128, %s25696_s8, [#allocation4]  }
0x1c37   :  { %21549 = dma.done.wait [#allocation4], 128  }
0x1c38   :  { %21550 = vsyncadd [#allocation4], 4294967168 }
0x1c39   :  { %21551 = dma.done.wait [#allocation9], 16  }
0x1c3a   :  { %21552 = vsyncadd [#allocation9], 4294967280 }
0x1c3b   :  { %14871 = vsyncpa [#allocation3], 1 }
0x1c3c   :  { %14872 = vsyncpa [#allocation6], 1 }
0x1c3d   :  { %14873 = vsyncpa [#allocation4], 1 }
0x1c3e   :  { %14874 = vsyncpa [#allocation9], 1 }

</bundles_post_ra>
